<compile_context>
chip_gen: v7x
topology: tpu7x:2x2x1
jax: 0.10.0
libtpu: 0.0.40
codegen_flags: <defaults>
</compile_context>

<pallas_src>
import functools
import math

import numpy as np

import jax
import jax.numpy as jnp
from jax.experimental import pallas as pl
from jax.experimental.pallas import tpu as pltpu

_PREC = jax.lax.Precision.HIGHEST


# --------------------------------- fused kernel --------------------------------- #

def _fno_fused_kernel(xin_ref, cs_ref, m1_ref, m2_ref, msel2_ref, msel2s_ref,
                      foldb_ref, fc0w_ref, fc0b_ref,
                      wlr_ref, wli_ref, wsw_ref, wsb_ref,
                      w1h_ref, w1x_ref, b1_ref, w2_ref, b2_ref,
                      h_out_ref, y_out_ref, h_scr,
                      *, npts, width, bp, eps):
    """One grid step = one FNO block; fc0 on step 0, fc1/ReLU/fc2 on the last step.

    Layout: activations are [width, B*N] (lane dense).  Spectral intermediates stack
    real | imag along the lane axis (2*B*P lanes).
    """
    b = pl.program_id(0)
    nb = pl.num_programs(0)

    # ---- fc0 (only on the first block) -> carried VMEM scratch ----
    @pl.when(b == 0)
    def _():
        h_scr[...] = (jnp.dot(fc0w_ref[...], xin_ref[...], precision=_PREC,
                              preferred_element_type=jnp.float32) + fc0b_ref[...])

    h = h_scr[...]                                                   # [C, L]

    # ---- pointwise Conv1d(width, width, 1) ----
    h2 = (jnp.dot(wsw_ref[...], h, precision=_PREC,
                  preferred_element_type=jnp.float32) + wsb_ref[...])

    # ---- forward V-transform: one matmul against the precomputed, block-diagonal
    #      [cos | -sin] matrix -> xt = [xt_r | xt_i], 2*B*P lanes ----
    xt = jnp.dot(h, cs_ref[...], precision=_PREC,
                 preferred_element_type=jnp.float32)                 # [C, 2BP]

    # ---- per-mode complex channel mixing as block-structured real matmuls.
    #      imag cross term via a lane roll (swap real/imag halves) + sign-folded mask:
    #      y_r = wlr@xt_r - wli@xt_i ; y_i = wlr@xt_i + wli@xt_r ----
    mix_a = jnp.dot(wlr_ref[...], xt, precision=_PREC,
                    preferred_element_type=jnp.float32)              # [P*C, 2BP]
    mix_b = jnp.dot(wli_ref[...], xt, precision=_PREC,
                    preferred_element_type=jnp.float32)
    mix_b_sw = pltpu.roll(mix_b, shift=bp, axis=1)                   # swap lane halves
    y = mix_a * msel2_ref[...] + mix_b_sw * msel2s_ref[...]

    # ---- fold modes back per output channel; rows [0:C] plain, rows [C:2C] already
    #      channel-flipped (fold_flip = rmat @ fold, compile-time constant) ----
    o = jnp.dot(foldb_ref[...], y, precision=_PREC,
                preferred_element_type=jnp.float32)                  # [2C, 2BP]

    # ---- inverse V-transform: direct part + conjugate-symmetric reconstructed part,
    #      each one K = 2*B*P matmul against a stacked [cos; +/-sin] matrix ----
    part1 = jnp.dot(o[:width, :], m1_ref[...], precision=_PREC,
                    preferred_element_type=jnp.float32)              # [C, L]
    part2 = jnp.dot(o[width:, :], m2_ref[...], precision=_PREC,
                    preferred_element_type=jnp.float32)
    h1 = (2.0 / npts) * (part1 + part2)

    # ---- residual add + BatchNorm1d (training batch stats) + exact GELU ----
    s = h1 + h2
    mean = jnp.mean(s, axis=1, keepdims=True)
    var = jnp.mean((s - mean) ** 2, axis=1, keepdims=True)
    xn = (s - mean) * jax.lax.rsqrt(var + eps)
    h_new = 0.5 * xn * (1.0 + jax.lax.erf(xn * (1.0 / math.sqrt(2.0))))
    h_scr[...] = h_new

    # ---- head fused into the last grid step ----
    @pl.when(b == nb - 1)
    def _():
        h_out_ref[...] = h_new
        f1 = (jnp.dot(w1h_ref[...], h_new, precision=_PREC,
                      preferred_element_type=jnp.float32)
              + jnp.dot(w1x_ref[...], xin_ref[...], precision=_PREC,
                        preferred_element_type=jnp.float32)
              + b1_ref[...])
        f1 = jnp.maximum(f1, 0.0)
        y_out_ref[...] = (jnp.dot(w2_ref[...], f1, precision=_PREC,
                                  preferred_element_type=jnp.float32) + b2_ref[...])


# ------------------------------ tables / wrappers ------------------------------- #

def _norm_positions(p):
    p = p - jnp.min(p)
    return p * 6.28 / jnp.max(p)


def _frequencies(m):
    Xvals = jnp.concatenate([jnp.arange(m), jnp.arange(-m, 0)]).astype(jnp.float32)
    Yvals = jnp.concatenate([jnp.arange(m), jnp.arange(-(m - 1), 0)]).astype(jnp.float32)
    fX = jnp.tile(Xvals, 2 * m - 1)
    fY = jnp.repeat(Yvals, 2 * m)
    return fX, fY


def _static_tables(m, width, batch):
    """Compile-time (numpy) frequency tables, mode-select masks and fold matrices."""
    two_m = 2 * m
    P = 2 * m * m
    Xv = np.concatenate([np.arange(m), np.arange(-m, 0)]).astype(np.float32)
    Yv = np.concatenate([np.arange(m), np.arange(-(m - 1), 0)]).astype(np.float32)

    # forward: weight-order mode p -> flat row of the [2m, 2m-1]-reshaped spectrum.
    p = np.arange(P)
    a = np.where(p < m * m, p // m, m + (p - m * m) // m)
    c = np.where(p < m * m, p % m, (p - m * m) % m)
    r_sel = a * (two_m - 1) + c
    fxf = Xv[r_sel % two_m]
    fyf = Yv[r_sel // two_m]

    # inverse, direct half: out_ft flat row q sits at full-spectrum row q.
    q = np.arange(P)
    fx1 = Xv[q % two_m]
    fy1 = Yv[q // two_m]

    # inverse, conjugate-symmetric half: out_ft row q (q >= 2m) also contributes at
    # full-spectrum row 2P-1-q, conjugated and channel-flipped.
    valid = (q >= two_m).astype(np.float32)
    r2 = np.where(q >= two_m, 2 * P - 1 - q, 0)
    fx2 = Xv[r2 % two_m]
    fy2 = Yv[r2 // two_m]

    # mode-select mask for the block-structured mixing, tiled over [real|imag] x batch;
    # the (-1 / +1) sign of the rolled imaginary cross term is folded into a 2nd copy.
    rows = np.arange(P * width)
    base = (rows[:, None] // width == np.arange(P)[None, :]).astype(np.float32)
    msel2 = np.tile(base, (1, 2 * batch))                            # [P*C, 2*B*P]
    sign = np.concatenate([-np.ones(batch * P), np.ones(batch * P)]).astype(np.float32)
    msel2s = msel2 * sign[None, :]

    # fold matrices: plain channel pick-out and channel-flipped pick-out, stacked.
    och = rows % width
    fold = (np.arange(width)[:, None] == och[None, :]).astype(np.float32)
    fold_flip = (np.arange(width)[:, None] == (width - 1 - och)[None, :]).astype(np.float32)
    fold_big = np.concatenate([fold, fold_flip], axis=0)             # [2C, P*C]

    return fxf, fyf, fx1, fy1, fx2, fy2, valid, msel2, msel2s, fold_big


def _transform_mats(xp, yp, fxf, fyf, fx1, fy1, fx2, fy2, valid, batch, npts):
    """Position-dependent VFT matrices (block-diagonal over batch), computed ONCE."""
    eyeB = jnp.eye(batch, dtype=jnp.float32)

    # forward: [B, N, P] -> block-diag [B*N, B*P]; stacked as [cos | -sin] over lanes.
    ph_f = xp[:, :, None] * fxf[None, None, :] + yp[:, :, None] * fyf[None, None, :]
    cf = (eyeB[:, None, :, None] * jnp.cos(ph_f)[:, :, None, :]).reshape(batch * npts, -1)
    sf = (eyeB[:, None, :, None] * jnp.sin(ph_f)[:, :, None, :]).reshape(batch * npts, -1)
    cs = jnp.concatenate([cf, -sf], axis=1)                          # [L, 2*B*P]

    # inverse direct part: [B, P, N] -> block-diag [B*P, B*N]; stacked [c1; -s1].
    ph1 = fx1[None, :, None] * xp[:, None, :] + fy1[None, :, None] * yp[:, None, :]
    c1 = (eyeB[:, None, :, None] * jnp.cos(ph1)[:, :, None, :]).reshape(-1, batch * npts)
    s1 = (eyeB[:, None, :, None] * jnp.sin(ph1)[:, :, None, :]).reshape(-1, batch * npts)
    m1 = jnp.concatenate([c1, -s1], axis=0)                          # [2*B*P, L]

    # inverse conjugate-symmetric part: masked to rows q >= 2m; stacked [c2; s2].
    ph2 = fx2[None, :, None] * xp[:, None, :] + fy2[None, :, None] * yp[:, None, :]
    vm = valid[None, :, None]
    c2 = (eyeB[:, None, :, None] * (jnp.cos(ph2) * vm)[:, :, None, :]).reshape(-1, batch * npts)
    s2 = (eyeB[:, None, :, None] * (jnp.sin(ph2) * vm)[:, :, None, :]).reshape(-1, batch * npts)
    m2 = jnp.concatenate([c2, s2], axis=0)                           # [2*B*P, L]
    return cs, m1, m2


def _prep_block_weights(params, width, m, num_blocks):
    """[in, out, m, m] complex weights -> stacked [nb, P*width, width] real / imag."""
    P = 2 * m * m

    def pack(wa, wb):
        w3 = jnp.concatenate([wa.reshape(width, width, m * m),
                              wb.reshape(width, width, m * m)], axis=-1)   # [i, o, p]
        return jnp.transpose(w3, (2, 1, 0)).reshape(P * width, width)      # [(p,o), i]

    wlr = jnp.stack([pack(params["w1_re"][i], params["w2_re"][i]) for i in range(num_blocks)])
    wli = jnp.stack([pack(params["w1_im"][i], params["w2_im"][i]) for i in range(num_blocks)])
    wsw = jnp.stack([params["ws_w"][i][:, :, 0] for i in range(num_blocks)])
    wsb = jnp.stack([params["ws_b"][i].reshape(width, 1) for i in range(num_blocks)])
    return wlr, wli, wsw, wsb


@functools.partial(jax.jit, static_argnames=("m", "width", "num_blocks"))
def pallas_forward(x, params, m, width, num_blocks):
    """x: [B, N, 3] -> (out [B, N, 1], lane-dense pre-head features [width, B*N])."""
    assert num_blocks >= 1
    B, N, _ = x.shape
    L = B * N
    P = 2 * m * m
    BP = B * P
    PC = P * width
    nh = params["fc1_w"].shape[0]

    xp = _norm_positions(x[:, :, 0])                                  # [B, N]
    yp = _norm_positions(x[:, :, 1])

    (fxf, fyf, fx1, fy1, fx2, fy2, valid,
     msel2_np, msel2s_np, foldb_np) = _static_tables(m, width, B)
    cs, m1, m2 = _transform_mats(xp, yp, fxf, fyf, fx1, fy1, fx2, fy2, valid, B, N)

    msel2 = jnp.asarray(msel2_np)
    msel2s = jnp.asarray(msel2s_np)
    foldb = jnp.asarray(foldb_np)

    xin = x.reshape(L, 3).T                                           # [3, L] lane-dense
    wlr, wli, wsw, wsb = _prep_block_weights(params, width, m, num_blocks)

    fc0w = params["fc0_w"]
    fc0b = params["fc0_b"].reshape(width, 1)
    w1h = params["fc1_w"][:, :width]
    w1x = params["fc1_w"][:, width:]
    b1 = params["fc1_b"].reshape(nh, 1)
    w2 = params["fc2_w"]
    b2 = params["fc2_b"].reshape(1, 1)

    kern = functools.partial(_fno_fused_kernel, npts=N, width=width, bp=BP, eps=1e-5)
    inv2 = lambda b: (0, 0)                      # resident constants: no re-DMA after step 0
    blk3 = lambda b: (b, 0, 0)                   # per-block weights

    h_lane, y_row = pl.pallas_call(
        kern,
        out_shape=(jax.ShapeDtypeStruct((width, L), jnp.float32),
                   jax.ShapeDtypeStruct((1, L), jnp.float32)),
        grid=(num_blocks,),
        in_specs=[
            pl.BlockSpec((3, L), inv2),                  # xin
            pl.BlockSpec((L, 2 * BP), inv2),             # forward [cos | -sin]
            pl.BlockSpec((2 * BP, L), inv2),             # inverse direct [c1; -s1]
            pl.BlockSpec((2 * BP, L), inv2),             # inverse conj-sym [c2; s2]
            pl.BlockSpec((PC, 2 * BP), inv2),            # mode-select mask
            pl.BlockSpec((PC, 2 * BP), inv2),            # sign-folded mode-select mask
            pl.BlockSpec((2 * width, PC), inv2),         # [fold; fold_flip]
            pl.BlockSpec((width, 3), inv2),              # fc0 weight
            pl.BlockSpec((width, 1), inv2),              # fc0 bias
            pl.BlockSpec((None, PC, width), blk3),       # spectral weights (real)
            pl.BlockSpec((None, PC, width), blk3),       # spectral weights (imag)
            pl.BlockSpec((None, width, width), blk3),    # 1x1 conv weight
            pl.BlockSpec((None, width, 1), blk3),        # 1x1 conv bias
            pl.BlockSpec((nh, width), inv2),             # fc1 weight (h part)
            pl.BlockSpec((nh, 3), inv2),                 # fc1 weight (x part)
            pl.BlockSpec((nh, 1), inv2),                 # fc1 bias
            pl.BlockSpec((1, nh), inv2),                 # fc2 weight
            pl.BlockSpec((1, 1), inv2),                  # fc2 bias
        ],
        out_specs=(pl.BlockSpec((width, L), inv2),
                   pl.BlockSpec((1, L), inv2)),
        scratch_shapes=[pltpu.VMEM((width, L), jnp.float32)],
        compiler_params=pltpu.CompilerParams(
            dimension_semantics=("arbitrary",),
            vmem_limit_bytes=48 * 1024 * 1024),
    )(xin, cs, m1, m2, msel2, msel2s, foldb, fc0w, fc0b,
      wlr, wli, wsw, wsb, w1h, w1x, b1, w2, b2)

    return y_row.reshape(B, N, 1), h_lane


# ------------------------------ pure-JAX reference ------------------------------ #

def reference_forward(x, params, m, width, num_blocks):
    B, N, _ = x.shape
    xp = _norm_positions(x[:, :, 0])
    yp = _norm_positions(x[:, :, 1])
    fX, fY = _frequencies(m)
    phase = fX[None, :, None] * xp[:, None, :] + fY[None, :, None] * yp[:, None, :]
    Vf = jnp.exp(-1j * phase.astype(jnp.complex64))
    Vi = jnp.conj(jnp.transpose(Vf, (0, 2, 1)))

    h = x @ params["fc0_w"].T + params["fc0_b"]
    h = jnp.transpose(h, (0, 2, 1))                                   # [B, C, N]
    for i in range(num_blocks):
        w1 = params["w1_re"][i] + 1j * params["w1_im"][i]
        w2 = params["w2_re"][i] + 1j * params["w2_im"][i]
        xc = jnp.transpose(h, (0, 2, 1)).astype(jnp.complex64)
        xft = jnp.einsum("brn,bnc->brc", Vf, xc, precision=_PREC)
        xft = jnp.transpose(xft, (0, 2, 1)).reshape(B, width, 2 * m, 2 * m - 1)
        top = jnp.einsum("bixy,ioxy->boxy", xft[:, :, :m, :m], w1, precision=_PREC)
        bot = jnp.einsum("bixy,ioxy->boxy", xft[:, :, -m:, :m], w2, precision=_PREC)
        out_ft = jnp.concatenate([top, bot], axis=2).reshape(B, width, 2 * m * m)
        xf2 = jnp.conj(jnp.flip(out_ft[:, :, 2 * m:], axis=(-1, -2)))
        xf = jnp.concatenate([out_ft, xf2], axis=-1)
        xf = jnp.transpose(xf, (0, 2, 1))
        xi = jnp.einsum("bnr,brc->bnc", Vi, xf, precision=_PREC)
        h1 = jnp.real(jnp.transpose(xi, (0, 2, 1))) / N * 2
        h2 = jnp.einsum("oi,bin->bon", params["ws_w"][i][:, :, 0], h,
                        precision=_PREC) + params["ws_b"][i][None, :, None]
        s = h1 + h2
        mean = jnp.mean(s, axis=(0, 2), keepdims=True)
        var = jnp.mean((s - mean) ** 2, axis=(0, 2), keepdims=True)
        s = (s - mean) / jnp.sqrt(var + 1e-5)
        h = jax.nn.gelu(s, approximate=False)
    feat_h = h                                                        # [B, C, N]
    hout = jnp.transpose(h, (0, 2, 1))
    feat = jnp.concatenate([hout, x], axis=-1)
    f1 = jnp.maximum(feat @ params["fc1_w"].T + params["fc1_b"], 0.0)
    out = f1 @ params["fc2_w"].T + params["fc2_b"]
    return out, feat_h


# -------------------------------- params / main --------------------------------- #

def init_params(key, width, m, num_blocks):
    scale = 1.0 / (width * width)
    ks = jax.random.split(key, 4 + 6 * num_blocks)
    p = {
        "fc0_w": jax.random.normal(ks[0], (width, 3), jnp.float32) * 0.3,
        "fc0_b": jax.random.normal(ks[1], (width,), jnp.float32) * 0.1,
        "fc1_w": jax.random.normal(ks[2], (128, width + 3), jnp.float32) * 0.1,
        "fc1_b": jax.random.normal(ks[3], (128,), jnp.float32) * 0.1,
        "fc2_w": jnp.zeros((1, 128), jnp.float32),            # matches .fill_(0.0)
        "fc2_b": jnp.full((1,), 1.31, jnp.float32),            # matches .fill_(1.31)
        "w1_re": [], "w1_im": [], "w2_re": [], "w2_im": [], "ws_w": [], "ws_b": [],
    }
    for i in range(num_blocks):
        k = ks[4 + 6 * i: 4 + 6 * (i + 1)]
        p["w1_re"].append(scale * jax.random.uniform(k[0], (width, width, m, m), jnp.float32))
        p["w1_im"].append(scale * jax.random.uniform(k[1], (width, width, m, m), jnp.float32))
        p["w2_re"].append(scale * jax.random.uniform(k[2], (width, width, m, m), jnp.float32))
        p["w2_im"].append(scale * jax.random.uniform(k[3], (width, width, m, m), jnp.float32))
        p["ws_w"].append(jax.random.normal(k[4], (width, width, 1), jnp.float32) * (1.0 / width) ** 0.5)
        p["ws_b"].append(jax.random.normal(k[5], (width,), jnp.float32) * 0.05)
    return p


if __name__ == "__main__":
    B, N = 2, 64
    modes, width, num_blocks = 4, 8, 2

    key = jax.random.PRNGKey(0)
    kx, kp = jax.random.split(key)
    x = jax.random.uniform(kx, (B, N, 3), jnp.float32)
    params = init_params(kp, width, modes, num_blocks)

    out, h_lane = pallas_forward(x, params, m=modes, width=width, num_blocks=num_blocks)
    out = jax.block_until_ready(out)
    h_lane = jax.block_until_ready(h_lane)

    ref_out, ref_h = reference_forward(x, params, modes, width, num_blocks)
    ref_h_lane = jnp.transpose(ref_h, (1, 0, 2)).reshape(width, B * N)

    assert out.shape == (B, N, 1)
    assert bool(jnp.all(jnp.isfinite(out))), "non-finite output"
    assert bool(jnp.allclose(out, 1.31, atol=1e-5)), "fc2 (zero-weight) output mismatch"
    err = float(jnp.max(jnp.abs(h_lane - ref_h_lane)))
    assert err < 1e-2, f"pre-head feature mismatch vs reference: {err}"

    print("KERNEL_OK")
</pallas_src>

<mosaic_0001>
module attributes {stable_mosaic.version = 11 : i64} {
  func.func @_fno_fused_kernel(%arg0: i32, %arg1: memref<3x128xf32, #tpu.memory_space<vmem>>, %arg2: memref<128x128xf32, #tpu.memory_space<vmem>>, %arg3: memref<128x128xf32, #tpu.memory_space<vmem>>, %arg4: memref<128x128xf32, #tpu.memory_space<vmem>>, %arg5: memref<256x128xf32, #tpu.memory_space<vmem>>, %arg6: memref<256x128xf32, #tpu.memory_space<vmem>>, %arg7: memref<16x256xf32, #tpu.memory_space<vmem>>, %arg8: memref<8x3xf32, #tpu.memory_space<vmem>>, %arg9: memref<8x1xf32, #tpu.memory_space<vmem>>, %arg10: memref<1x256x8xf32, #tpu.memory_space<vmem>>, %arg11: memref<1x256x8xf32, #tpu.memory_space<vmem>>, %arg12: memref<1x8x8xf32, #tpu.memory_space<vmem>>, %arg13: memref<1x8x1xf32, #tpu.memory_space<vmem>>, %arg14: memref<128x8xf32, #tpu.memory_space<vmem>>, %arg15: memref<128x3xf32, #tpu.memory_space<vmem>>, %arg16: memref<128x1xf32, #tpu.memory_space<vmem>>, %arg17: memref<1x128xf32, #tpu.memory_space<vmem>>, %arg18: memref<1x1xf32, #tpu.memory_space<vmem>>, %arg19: memref<8x128xf32, #tpu.memory_space<vmem>>, %arg20: memref<1x128xf32, #tpu.memory_space<vmem>>, %arg21: memref<8x128xf32, #tpu.memory_space<vmem>>) attributes {dimension_semantics = [#tpu.dimension_semantics<arbitrary>], iteration_bounds = array<i64: 2>, scalar_prefetch = 0 : i64, scratch_operands = 1 : i64, tpu.core_type = #tpu.core_type<tc>, window_params = [{pipeline_mode = #tpu.pipeline_mode<synchronous>, transform_indices = @transform_0, window_bounds = array<i64: 3, 128>}, {pipeline_mode = #tpu.pipeline_mode<synchronous>, transform_indices = @transform_1, window_bounds = array<i64: 128, 128>}, {pipeline_mode = #tpu.pipeline_mode<synchronous>, transform_indices = @transform_2, window_bounds = array<i64: 128, 128>}, {pipeline_mode = #tpu.pipeline_mode<synchronous>, transform_indices = @transform_3, window_bounds = array<i64: 128, 128>}, {pipeline_mode = #tpu.pipeline_mode<synchronous>, transform_indices = @transform_4, window_bounds = array<i64: 256, 128>}, {pipeline_mode = #tpu.pipeline_mode<synchronous>, transform_indices = @transform_5, window_bounds = array<i64: 256, 128>}, {pipeline_mode = #tpu.pipeline_mode<synchronous>, transform_indices = @transform_6, window_bounds = array<i64: 16, 256>}, {pipeline_mode = #tpu.pipeline_mode<synchronous>, transform_indices = @transform_7, window_bounds = array<i64: 8, 3>}, {pipeline_mode = #tpu.pipeline_mode<synchronous>, transform_indices = @transform_8, window_bounds = array<i64: 8, 1>}, {transform_indices = @transform_9, window_bounds = array<i64: 1, 256, 8>}, {transform_indices = @transform_10, window_bounds = array<i64: 1, 256, 8>}, {transform_indices = @transform_11, window_bounds = array<i64: 1, 8, 8>}, {transform_indices = @transform_12, window_bounds = array<i64: 1, 8, 1>}, {pipeline_mode = #tpu.pipeline_mode<synchronous>, transform_indices = @transform_13, window_bounds = array<i64: 128, 8>}, {pipeline_mode = #tpu.pipeline_mode<synchronous>, transform_indices = @transform_14, window_bounds = array<i64: 128, 3>}, {pipeline_mode = #tpu.pipeline_mode<synchronous>, transform_indices = @transform_15, window_bounds = array<i64: 128, 1>}, {pipeline_mode = #tpu.pipeline_mode<synchronous>, transform_indices = @transform_16, window_bounds = array<i64: 1, 128>}, {pipeline_mode = #tpu.pipeline_mode<synchronous>, transform_indices = @transform_17, window_bounds = array<i64: 1, 1>}, {pipeline_mode = #tpu.pipeline_mode<synchronous>, transform_indices = @transform_18, window_bounds = array<i64: 8, 128>}, {pipeline_mode = #tpu.pipeline_mode<synchronous>, transform_indices = @transform_19, window_bounds = array<i64: 1, 128>}]} {
    %c0_i32 = arith.constant 0 : i32
    %0 = arith.cmpi eq, %arg0, %c0_i32 : i32
    %1 = arith.extui %0 : i1 to i32
    %c0_i32_0 = arith.constant 0 : i32
    %2 = arith.cmpi ne, %1, %c0_i32_0 : i32
    scf.if %2 {
      %c0_44 = arith.constant 0 : index
      %c0_45 = arith.constant 0 : index
      %67 = vector.load %arg8[%c0_44, %c0_45] : memref<8x3xf32, #tpu.memory_space<vmem>>, vector<8x3xf32>
      %c0_46 = arith.constant 0 : index
      %c0_47 = arith.constant 0 : index
      %68 = vector.load %arg1[%c0_46, %c0_47] : memref<3x128xf32, #tpu.memory_space<vmem>>, vector<3x128xf32>
      %cst_48 = arith.constant dense<0.000000e+00> : vector<8x128xf32>
      %69 = tpu.matmul %67, %68, %cst_48 {dimension_numbers = #tpu.dot_dimension_numbers<[1], [0], [0], [1], [0, 0, 1, 1], [], []>, precision = #tpu.contract_precision<fp32>} : vector<8x3xf32>, vector<3x128xf32>, vector<8x128xf32> -> vector<8x128xf32>
      %c0_49 = arith.constant 0 : index
      %c0_50 = arith.constant 0 : index
      %70 = vector.load %arg9[%c0_49, %c0_50] : memref<8x1xf32, #tpu.memory_space<vmem>>, vector<8x1xf32>
      %71 = vector.broadcast %70 : vector<8x1xf32> to vector<8x128xf32>
      %72 = arith.addf %69, %71 : vector<8x128xf32>
      %c0_51 = arith.constant 0 : index
      %c0_52 = arith.constant 0 : index
      %73 = vector.load %arg21[%c0_51, %c0_52] : memref<8x128xf32, #tpu.memory_space<vmem>>, vector<8x128xf32>
      tpu.vector_store %arg21[%c0_51, %c0_52], %72 {strides = array<i32>} : memref<8x128xf32, #tpu.memory_space<vmem>>, vector<8x128xf32>,
    } else {
    }
    %c0 = arith.constant 0 : index
    %c0_1 = arith.constant 0 : index
    %3 = vector.load %arg21[%c0, %c0_1] : memref<8x128xf32, #tpu.memory_space<vmem>>, vector<8x128xf32>
    %c0_2 = arith.constant 0 : index
    %c0_3 = arith.constant 0 : index
    %c0_4 = arith.constant 0 : index
    %4 = vector.load %arg12[%c0_2, %c0_3, %c0_4] : memref<1x8x8xf32, #tpu.memory_space<vmem>>, vector<1x8x8xf32>
    %5 = vector.shape_cast %4 : vector<1x8x8xf32> to vector<8x8xf32>
    %cst = arith.constant dense<0.000000e+00> : vector<8x128xf32>
    %6 = tpu.matmul %5, %3, %cst {dimension_numbers = #tpu.dot_dimension_numbers<[1], [0], [0], [1], [0, 0, 1, 1], [], []>, precision = #tpu.contract_precision<fp32>} : vector<8x8xf32>, vector<8x128xf32>, vector<8x128xf32> -> vector<8x128xf32>
    %c0_5 = arith.constant 0 : index
    %c0_6 = arith.constant 0 : index
    %c0_7 = arith.constant 0 : index
    %7 = vector.load %arg13[%c0_5, %c0_6, %c0_7] : memref<1x8x1xf32, #tpu.memory_space<vmem>>, vector<1x8x1xf32>
    %8 = vector.shape_cast %7 : vector<1x8x1xf32> to vector<8x1xf32>
    %9 = vector.broadcast %8 : vector<8x1xf32> to vector<8x128xf32>
    %10 = arith.addf %6, %9 : vector<8x128xf32>
    %c0_8 = arith.constant 0 : index
    %c0_9 = arith.constant 0 : index
    %11 = vector.load %arg2[%c0_8, %c0_9] : memref<128x128xf32, #tpu.memory_space<vmem>>, vector<128x128xf32>
    %cst_10 = arith.constant dense<0.000000e+00> : vector<8x128xf32>
    %12 = tpu.matmul %3, %11, %cst_10 {dimension_numbers = #tpu.dot_dimension_numbers<[1], [0], [0], [1], [0, 0, 1, 1], [], []>, precision = #tpu.contract_precision<fp32>} : vector<8x128xf32>, vector<128x128xf32>, vector<8x128xf32> -> vector<8x128xf32>
    %c0_11 = arith.constant 0 : index
    %c0_12 = arith.constant 0 : index
    %c0_13 = arith.constant 0 : index
    %13 = vector.load %arg10[%c0_11, %c0_12, %c0_13] : memref<1x256x8xf32, #tpu.memory_space<vmem>>, vector<1x256x8xf32>
    %14 = vector.shape_cast %13 : vector<1x256x8xf32> to vector<256x8xf32>
    %cst_14 = arith.constant dense<0.000000e+00> : vector<256x128xf32>
    %15 = tpu.matmul %14, %12, %cst_14 {dimension_numbers = #tpu.dot_dimension_numbers<[1], [0], [0], [1], [0, 0, 1, 1], [], []>, precision = #tpu.contract_precision<fp32>} : vector<256x8xf32>, vector<8x128xf32>, vector<256x128xf32> -> vector<256x128xf32>
    %c0_15 = arith.constant 0 : index
    %c0_16 = arith.constant 0 : index
    %c0_17 = arith.constant 0 : index
    %16 = vector.load %arg11[%c0_15, %c0_16, %c0_17] : memref<1x256x8xf32, #tpu.memory_space<vmem>>, vector<1x256x8xf32>
    %17 = vector.shape_cast %16 : vector<1x256x8xf32> to vector<256x8xf32>
    %cst_18 = arith.constant dense<0.000000e+00> : vector<256x128xf32>
    %18 = tpu.matmul %17, %12, %cst_18 {dimension_numbers = #tpu.dot_dimension_numbers<[1], [0], [0], [1], [0, 0, 1, 1], [], []>, precision = #tpu.contract_precision<fp32>} : vector<256x8xf32>, vector<8x128xf32>, vector<256x128xf32> -> vector<256x128xf32>
    %c64_i32 = arith.constant 64 : i32
    %19 = tpu.dynamic_rotate %18 by %c64_i32 dim 1 : vector<256x128xf32>, i32 -> vector<256x128xf32>
    %c0_19 = arith.constant 0 : index
    %c0_20 = arith.constant 0 : index
    %20 = vector.load %arg5[%c0_19, %c0_20] : memref<256x128xf32, #tpu.memory_space<vmem>>, vector<256x128xf32>
    %21 = arith.mulf %15, %20 : vector<256x128xf32>
    %c0_21 = arith.constant 0 : index
    %c0_22 = arith.constant 0 : index
    %22 = vector.load %arg6[%c0_21, %c0_22] : memref<256x128xf32, #tpu.memory_space<vmem>>, vector<256x128xf32>
    %23 = arith.mulf %19, %22 : vector<256x128xf32>
    %24 = arith.addf %21, %23 : vector<256x128xf32>
    %c0_23 = arith.constant 0 : index
    %c0_24 = arith.constant 0 : index
    %25 = vector.load %arg7[%c0_23, %c0_24] : memref<16x256xf32, #tpu.memory_space<vmem>>, vector<16x256xf32>
    %cst_25 = arith.constant dense<0.000000e+00> : vector<16x128xf32>
    %26 = tpu.matmul %25, %24, %cst_25 {dimension_numbers = #tpu.dot_dimension_numbers<[1], [0], [0], [1], [0, 0, 1, 1], [], []>, precision = #tpu.contract_precision<fp32>} : vector<16x256xf32>, vector<256x128xf32>, vector<16x128xf32> -> vector<16x128xf32>
    %27 = vector.extract_strided_slice %26 {offsets = [0, 0], sizes = [8, 128], strides = [1, 1]} : vector<16x128xf32> to vector<8x128xf32>
    %c0_26 = arith.constant 0 : index
    %c0_27 = arith.constant 0 : index
    %28 = vector.load %arg3[%c0_26, %c0_27] : memref<128x128xf32, #tpu.memory_space<vmem>>, vector<128x128xf32>
    %cst_28 = arith.constant dense<0.000000e+00> : vector<8x128xf32>
    %29 = tpu.matmul %27, %28, %cst_28 {dimension_numbers = #tpu.dot_dimension_numbers<[1], [0], [0], [1], [0, 0, 1, 1], [], []>, precision = #tpu.contract_precision<fp32>} : vector<8x128xf32>, vector<128x128xf32>, vector<8x128xf32> -> vector<8x128xf32>
    %30 = vector.extract_strided_slice %26 {offsets = [8, 0], sizes = [8, 128], strides = [1, 1]} : vector<16x128xf32> to vector<8x128xf32>
    %c0_29 = arith.constant 0 : index
    %c0_30 = arith.constant 0 : index
    %31 = vector.load %arg4[%c0_29, %c0_30] : memref<128x128xf32, #tpu.memory_space<vmem>>, vector<128x128xf32>
    %cst_31 = arith.constant dense<0.000000e+00> : vector<8x128xf32>
    %32 = tpu.matmul %30, %31, %cst_31 {dimension_numbers = #tpu.dot_dimension_numbers<[1], [0], [0], [1], [0, 0, 1, 1], [], []>, precision = #tpu.contract_precision<fp32>} : vector<8x128xf32>, vector<128x128xf32>, vector<8x128xf32> -> vector<8x128xf32>
    %33 = arith.addf %29, %32 : vector<8x128xf32>
    %cst_32 = arith.constant 3.125000e-02 : f32
    %34 = vector.broadcast %cst_32 : f32 to vector<8x128xf32>
    %35 = arith.mulf %34, %33 : vector<8x128xf32>
    %36 = arith.addf %35, %10 : vector<8x128xf32>
    %cst_33 = arith.constant dense<0.000000e+00> : vector<8xf32>
    %37 = vector.multi_reduction <add>, %36, %cst_33 [1] : vector<8x128xf32> to vector<8xf32>
    %38 = vector.shape_cast %37 : vector<8xf32> to vector<8x1xf32>
    %cst_34 = arith.constant 1.280000e+02 : f32
    %39 = vector.broadcast %cst_34 : f32 to vector<8x1xf32>
    %40 = arith.divf %38, %39 : vector<8x1xf32>
    %41 = vector.broadcast %40 : vector<8x1xf32> to vector<8x128xf32>
    %42 = arith.subf %36, %41 : vector<8x128xf32>
    %43 = arith.mulf %42, %42 : vector<8x128xf32>
    %cst_35 = arith.constant dense<0.000000e+00> : vector<8xf32>
    %44 = vector.multi_reduction <add>, %43, %cst_35 [1] : vector<8x128xf32> to vector<8xf32>
    %45 = vector.shape_cast %44 : vector<8xf32> to vector<8x1xf32>
    %cst_36 = arith.constant 1.280000e+02 : f32
    %46 = vector.broadcast %cst_36 : f32 to vector<8x1xf32>
    %47 = arith.divf %45, %46 : vector<8x1xf32>
    %48 = vector.broadcast %40 : vector<8x1xf32> to vector<8x128xf32>
    %49 = arith.subf %36, %48 : vector<8x128xf32>
    %cst_37 = arith.constant 9.99999974E-6 : f32
    %50 = vector.broadcast %cst_37 : f32 to vector<8x1xf32>
    %51 = arith.addf %47, %50 : vector<8x1xf32>
    %52 = math.rsqrt %51 : vector<8x1xf32>
    %53 = vector.broadcast %52 : vector<8x1xf32> to vector<8x128xf32>
    %54 = arith.mulf %49, %53 : vector<8x128xf32>
    %cst_38 = arith.constant 5.000000e-01 : f32
    %55 = vector.broadcast %cst_38 : f32 to vector<8x128xf32>
    %56 = arith.mulf %55, %54 : vector<8x128xf32>
    %cst_39 = arith.constant 0.707106769 : f32
    %57 = vector.broadcast %cst_39 : f32 to vector<8x128xf32>
    %58 = arith.mulf %54, %57 : vector<8x128xf32>
    %59 = math.erf %58 : vector<8x128xf32>
    %cst_40 = arith.constant 1.000000e+00 : f32
    %60 = vector.broadcast %cst_40 : f32 to vector<8x128xf32>
    %61 = arith.addf %60, %59 : vector<8x128xf32>
    %62 = arith.mulf %56, %61 : vector<8x128xf32>
    %c0_41 = arith.constant 0 : index
    %c0_42 = arith.constant 0 : index
    %63 = vector.load %arg21[%c0_41, %c0_42] : memref<8x128xf32, #tpu.memory_space<vmem>>, vector<8x128xf32>
    tpu.vector_store %arg21[%c0_41, %c0_42], %62 {strides = array<i32>} : memref<8x128xf32, #tpu.memory_space<vmem>>, vector<8x128xf32>,
    %c1_i32 = arith.constant 1 : i32
    %64 = arith.cmpi eq, %arg0, %c1_i32 : i32
    %65 = arith.extui %64 : i1 to i32
    %c0_i32_43 = arith.constant 0 : i32
    %66 = arith.cmpi ne, %65, %c0_i32_43 : i32
    scf.if %66 {
      %c0_44 = arith.constant 0 : index
      %c0_45 = arith.constant 0 : index
      %67 = vector.load %arg19[%c0_44, %c0_45] : memref<8x128xf32, #tpu.memory_space<vmem>>, vector<8x128xf32>
      tpu.vector_store %arg19[%c0_44, %c0_45], %62 {strides = array<i32>} : memref<8x128xf32, #tpu.memory_space<vmem>>, vector<8x128xf32>,
      %c0_46 = arith.constant 0 : index
      %c0_47 = arith.constant 0 : index
      %68 = vector.load %arg14[%c0_46, %c0_47] : memref<128x8xf32, #tpu.memory_space<vmem>>, vector<128x8xf32>
      %cst_48 = arith.constant dense<0.000000e+00> : vector<128x128xf32>
      %69 = tpu.matmul %68, %62, %cst_48 {dimension_numbers = #tpu.dot_dimension_numbers<[1], [0], [0], [1], [0, 0, 1, 1], [], []>, precision = #tpu.contract_precision<fp32>} : vector<128x8xf32>, vector<8x128xf32>, vector<128x128xf32> -> vector<128x128xf32>
      %c0_49 = arith.constant 0 : index
      %c0_50 = arith.constant 0 : index
      %70 = vector.load %arg15[%c0_49, %c0_50] : memref<128x3xf32, #tpu.memory_space<vmem>>, vector<128x3xf32>
      %c0_51 = arith.constant 0 : index
      %c0_52 = arith.constant 0 : index
      %71 = vector.load %arg1[%c0_51, %c0_52] : memref<3x128xf32, #tpu.memory_space<vmem>>, vector<3x128xf32>
      %cst_53 = arith.constant dense<0.000000e+00> : vector<128x128xf32>
      %72 = tpu.matmul %70, %71, %cst_53 {dimension_numbers = #tpu.dot_dimension_numbers<[1], [0], [0], [1], [0, 0, 1, 1], [], []>, precision = #tpu.contract_precision<fp32>} : vector<128x3xf32>, vector<3x128xf32>, vector<128x128xf32> -> vector<128x128xf32>
      %73 = arith.addf %69, %72 : vector<128x128xf32>
      %c0_54 = arith.constant 0 : index
      %c0_55 = arith.constant 0 : index
      %74 = vector.load %arg16[%c0_54, %c0_55] : memref<128x1xf32, #tpu.memory_space<vmem>>, vector<128x1xf32>
      %75 = vector.broadcast %74 : vector<128x1xf32> to vector<128x128xf32>
      %76 = arith.addf %73, %75 : vector<128x128xf32>
      %cst_56 = arith.constant 0.000000e+00 : f32
      %77 = vector.broadcast %cst_56 : f32 to vector<128x128xf32>
      %78 = arith.maximumf %76, %77 : vector<128x128xf32>
      %c0_57 = arith.constant 0 : index
      %c0_58 = arith.constant 0 : index
      %79 = vector.load %arg17[%c0_57, %c0_58] : memref<1x128xf32, #tpu.memory_space<vmem>>, vector<1x128xf32>
      %cst_59 = arith.constant dense<0.000000e+00> : vector<1x128xf32>
      %80 = tpu.matmul %79, %78, %cst_59 {dimension_numbers = #tpu.dot_dimension_numbers<[1], [0], [0], [1], [0, 0, 1, 1], [], []>, precision = #tpu.contract_precision<fp32>} : vector<1x128xf32>, vector<128x128xf32>, vector<1x128xf32> -> vector<1x128xf32>
      %c0_60 = arith.constant 0 : index
      %c0_61 = arith.constant 0 : index
      %81 = vector.load %arg18[%c0_60, %c0_61] : memref<1x1xf32, #tpu.memory_space<vmem>>, vector<1x1xf32>
      %82 = vector.broadcast %81 : vector<1x1xf32> to vector<1x128xf32>
      %83 = arith.addf %80, %82 : vector<1x128xf32>
      %c0_62 = arith.constant 0 : index
      %c0_63 = arith.constant 0 : index
      %84 = vector.load %arg20[%c0_62, %c0_63] : memref<1x128xf32, #tpu.memory_space<vmem>>, vector<1x128xf32>
      tpu.vector_store %arg20[%c0_62, %c0_63], %83 {strides = array<i32>} : memref<1x128xf32, #tpu.memory_space<vmem>>, vector<1x128xf32>,
    } else {
    }
    return
  }
  func.func @transform_0(%arg0: i32) -> (i32, i32) {
    %c0_i32 = arith.constant 0 : i32
    %c0_i32_0 = arith.constant 0 : i32
    %c0_i32_1 = arith.constant 0 : i32
    return %c0_i32, %c0_i32_0 : i32, i32
  }
  func.func @transform_1(%arg0: i32) -> (i32, i32) {
    %c0_i32 = arith.constant 0 : i32
    %c0_i32_0 = arith.constant 0 : i32
    %c0_i32_1 = arith.constant 0 : i32
    return %c0_i32, %c0_i32_0 : i32, i32
  }
  func.func @transform_2(%arg0: i32) -> (i32, i32) {
    %c0_i32 = arith.constant 0 : i32
    %c0_i32_0 = arith.constant 0 : i32
    %c0_i32_1 = arith.constant 0 : i32
    return %c0_i32, %c0_i32_0 : i32, i32
  }
  func.func @transform_3(%arg0: i32) -> (i32, i32) {
    %c0_i32 = arith.constant 0 : i32
    %c0_i32_0 = arith.constant 0 : i32
    %c0_i32_1 = arith.constant 0 : i32
    return %c0_i32, %c0_i32_0 : i32, i32
  }
  func.func @transform_4(%arg0: i32) -> (i32, i32) {
    %c0_i32 = arith.constant 0 : i32
    %c0_i32_0 = arith.constant 0 : i32
    %c0_i32_1 = arith.constant 0 : i32
    return %c0_i32, %c0_i32_0 : i32, i32
  }
  func.func @transform_5(%arg0: i32) -> (i32, i32) {
    %c0_i32 = arith.constant 0 : i32
    %c0_i32_0 = arith.constant 0 : i32
    %c0_i32_1 = arith.constant 0 : i32
    return %c0_i32, %c0_i32_0 : i32, i32
  }
  func.func @transform_6(%arg0: i32) -> (i32, i32) {
    %c0_i32 = arith.constant 0 : i32
    %c0_i32_0 = arith.constant 0 : i32
    %c0_i32_1 = arith.constant 0 : i32
    return %c0_i32, %c0_i32_0 : i32, i32
  }
  func.func @transform_7(%arg0: i32) -> (i32, i32) {
    %c0_i32 = arith.constant 0 : i32
    %c0_i32_0 = arith.constant 0 : i32
    %c0_i32_1 = arith.constant 0 : i32
    return %c0_i32, %c0_i32_0 : i32, i32
  }
  func.func @transform_8(%arg0: i32) -> (i32, i32) {
    %c0_i32 = arith.constant 0 : i32
    %c0_i32_0 = arith.constant 0 : i32
    %c0_i32_1 = arith.constant 0 : i32
    return %c0_i32, %c0_i32_0 : i32, i32
  }
  func.func @transform_9(%arg0: i32) -> (i32, i32, i32) {
    %c0_i32 = arith.constant 0 : i32
    %c0_i32_0 = arith.constant 0 : i32
    %c0_i32_1 = arith.constant 0 : i32
    return %arg0, %c0_i32, %c0_i32_0 : i32, i32, i32
  }
  func.func @transform_10(%arg0: i32) -> (i32, i32, i32) {
    %c0_i32 = arith.constant 0 : i32
    %c0_i32_0 = arith.constant 0 : i32
    %c0_i32_1 = arith.constant 0 : i32
    return %arg0, %c0_i32, %c0_i32_0 : i32, i32, i32
  }
  func.func @transform_11(%arg0: i32) -> (i32, i32, i32) {
    %c0_i32 = arith.constant 0 : i32
    %c0_i32_0 = arith.constant 0 : i32
    %c0_i32_1 = arith.constant 0 : i32
    return %arg0, %c0_i32, %c0_i32_0 : i32, i32, i32
  }
  func.func @transform_12(%arg0: i32) -> (i32, i32, i32) {
    %c0_i32 = arith.constant 0 : i32
    %c0_i32_0 = arith.constant 0 : i32
    %c0_i32_1 = arith.constant 0 : i32
    return %arg0, %c0_i32, %c0_i32_0 : i32, i32, i32
  }
  func.func @transform_13(%arg0: i32) -> (i32, i32) {
    %c0_i32 = arith.constant 0 : i32
    %c0_i32_0 = arith.constant 0 : i32
    %c0_i32_1 = arith.constant 0 : i32
    return %c0_i32, %c0_i32_0 : i32, i32
  }
  func.func @transform_14(%arg0: i32) -> (i32, i32) {
    %c0_i32 = arith.constant 0 : i32
    %c0_i32_0 = arith.constant 0 : i32
    %c0_i32_1 = arith.constant 0 : i32
    return %c0_i32, %c0_i32_0 : i32, i32
  }
  func.func @transform_15(%arg0: i32) -> (i32, i32) {
    %c0_i32 = arith.constant 0 : i32
    %c0_i32_0 = arith.constant 0 : i32
    %c0_i32_1 = arith.constant 0 : i32
    return %c0_i32, %c0_i32_0 : i32, i32
  }
  func.func @transform_16(%arg0: i32) -> (i32, i32) {
    %c0_i32 = arith.constant 0 : i32
    %c0_i32_0 = arith.constant 0 : i32
    %c0_i32_1 = arith.constant 0 : i32
    return %c0_i32, %c0_i32_0 : i32, i32
  }
  func.func @transform_17(%arg0: i32) -> (i32, i32) {
    %c0_i32 = arith.constant 0 : i32
    %c0_i32_0 = arith.constant 0 : i32
    %c0_i32_1 = arith.constant 0 : i32
    return %c0_i32, %c0_i32_0 : i32, i32
  }
  func.func @transform_18(%arg0: i32) -> (i32, i32) {
    %c0_i32 = arith.constant 0 : i32
    %c0_i32_0 = arith.constant 0 : i32
    %c0_i32_1 = arith.constant 0 : i32
    return %c0_i32, %c0_i32_0 : i32, i32
  }
  func.func @transform_19(%arg0: i32) -> (i32, i32) {
    %c0_i32 = arith.constant 0 : i32
    %c0_i32_0 = arith.constant 0 : i32
    %c0_i32_1 = arith.constant 0 : i32
    return %c0_i32, %c0_i32_0 : i32, i32
  }
}

</mosaic_0001>

<bundles_post_ra>
// kernel: pallas_forward.1
= control target key start
LH: loop header
LB: loop body
LE: loop exit
PB: predicated region body
PF: predicated region fallthrough
CT: control target
= control target key end

     0   :  { %s20575_s0 = inlined_call_operand.vmem [shape: f32[3,128], index: 0, kind: input, shape index: {}]   ;;  %s20576_s1 = inlined_call_operand.vmem [shape: f32[128,128], index: 1, kind: input, shape index: {}]   ;;  %s20577_s2 = inlined_call_operand.vmem [shape: f32[128,128], index: 2, kind: input, shape index: {}]   ;;  %s20578_s3 = inlined_call_operand.vmem [shape: f32[128,128], index: 3, kind: input, shape index: {}]   ;;  %s20579_s4 = inlined_call_operand.vmem [shape: f32[256,128], index: 4, kind: input, shape index: {}]   ;;  %s20580_s5 = inlined_call_operand.vmem [shape: f32[256,128], index: 5, kind: input, shape index: {}]   ;;  %s20581_s6 = inlined_call_operand.vmem [shape: f32[16,256], index: 6, kind: input, shape index: {}]   ;;  %s20582_s7 = inlined_call_operand.vmem [shape: f32[8,3], index: 7, kind: input, shape index: {}]   ;;  %s20583_s8 = inlined_call_operand.vmem [shape: f32[8,1], index: 8, kind: input, shape index: {}]   ;;  %s20584_s9 = inlined_call_operand.vmem [shape: f32[2,256,8], index: 9, kind: input, shape index: {}]   ;;  %s20585_s10 = inlined_call_operand.vmem [shape: f32[2,256,8], index: 10, kind: input, shape index: {}]   ;;  %s20586_s11 = inlined_call_operand.vmem [shape: f32[2,8,8], index: 11, kind: input, shape index: {}]   ;;  %s20587_s12 = inlined_call_operand.vmem [shape: f32[2,8,1], index: 12, kind: input, shape index: {}]   ;;  %s20588_s13 = inlined_call_operand.vmem [shape: f32[128,8], index: 13, kind: input, shape index: {}]   ;;  %s20589_s14 = inlined_call_operand.vmem [shape: f32[128,3], index: 14, kind: input, shape index: {}]   ;;  %s20590_s15 = inlined_call_operand.vmem [shape: f32[128,1], index: 15, kind: input, shape index: {}]   ;;  %s20591_s16 = inlined_call_operand.vmem [shape: f32[1,128], index: 16, kind: input, shape index: {}]   ;;  %s20592_s17 = inlined_call_operand.<no memory space> [shape: f32[1,1], index: 17, kind: input, shape index: {}]   ;;  %s20593_s18 = inlined_call_operand.hbm [shape: f32[8,128], index: 18, kind: output, shape index: {0}]   ;;  %s20594_s19 = inlined_call_operand.vmem [shape: f32[1,128], index: 19, kind: output, shape index: {1}]  }
   0x1   :  { %20913 = sst [smem:[#allocation124_spill]] %s20575_s0  ;;  %v25_v0 = vstv %s20592_s17 }
   0x2   :  { %20914 = sst [smem:[#allocation125_spill]] %s20576_s1  ;;  %26 = vst [vmem:[#allocation3] sm:$0x1] %v25_v0 }
   0x3   :  { %20915 = sst [smem:[#allocation126_spill]] %s20577_s2 }
   0x4   :  { %20916 = sst [smem:[#allocation127_spill]] %s20578_s3 }
   0x5   :  { %27 = vsyncpa [#allocation5], 0  ;;  %s16305_s20 = smov 0  }
   0x6 LB: > { %20917 = sst [smem:[#allocation7_spill]] %s16187_s20  ;;  %s16311_s21 = sadd.s32 4294967295, %s16187_s20   ;;  %s16187_s20 = sphi %s16305_s20, %s33_s20  }
   0x7   : > { %p11712_p0 = scmp.ge.s32.totalorder %s16187_s20, 1  ;;  %p561_p1 = scmp.lt.s32.totalorder %s16187_s20, 3 }
   0x9   : > { %p562_p2 = pnand %p11712_p0, %p561_p1 }
   0xb   : > { %565 = sbr.rel (%p562_p2) target bundleno = 3800 (0xed8), region = 92 }
  0x12   : > { %p625_p3 = scmp.lt.s32.totalorder %s16311_s21, 1  ;;  %p11719_p4 = scmp.ne.s32.totalorder %s16311_s21, 0 }
  0x13   : > { %s20918_s23 = sld [smem:[#allocation124_spill]] (!%p11719_p4)  ;;  %vm659_vm0 = vcmask (!%p11719_p4), 1042432   ;;  %v647_v2 = vld [vmem:[%s20582_s7] sm:$0xff] (!%p11719_p4)  ;;  %v16189_v3 = vmov (!%p11719_p4), 0.0   ;;  %vm16190_vm1 = vmmov (!%p11719_p4), 0   ;;  %vm655_vm2 = vcmask (!%p11719_p4), 23552  }
  0x14   : > { %s626_s17 = scalar_select %p625_p3, %s16311_s21, 1 }
  0x15   : > { %646 = sbr.rel (%p11719_p4) target bundleno = 266 (0x10a), region = 96  ;;  %13002 = vmatprep.subr.mxu0 (!%p11719_p4), %v16189_v3  ;;  %13004 = vmatprep.mubr.msk.f32.mxu0 (!%p11719_p4), %vm16190_vm1, %v16189_v3  ;;  %v657_v6 = vsel (!%p11719_p4), %vm655_vm2, %v647_v2, 0  ;;  %v16191_v8 = vmov (!%p11719_p4), 0   ;;  %v649_v9 = vld [vmem:[%s20583_s8] sm:$0xff] (!%p11719_p4) }
  0x16   : > { %s11725_s1 = sshll.u32 %s626_s17, 8  ;;  %s11717_s22 = sshll.u32 %s626_s17, 3  ;;  %12987 = vmatprep.subr.mxu1 (!%p11719_p4), %v16189_v3  ;;  %12989 = vmatprep.mubr.msk.f32.mxu1 (!%p11719_p4), %vm16190_vm1, %v16189_v3  ;;  %v729_v7 = vand.u32 (!%p11719_p4), 4294901760, %v657_v6 }
  0x17   : > { %s16320_s24 = scalar_lea.vmem %s20584_s9, %s11725_s1  ;;  %s16325_s26 = scalar_lea.vmem %s20585_s10, %s11725_s1  ;;  %16143 = vset.pattern.permute.xlu0 (!%p11719_p4), %v16191_v8 }
  0x18   : > { %s16330_s29 = scalar_lea.vmem %s20586_s11, %s11717_s22  ;;  %s16335_s20 = scalar_lea.vmem %s20587_s12, %s11717_s22  ;;  %v730_v11 = vsub.f32 (!%p11719_p4), %v657_v6, %v729_v7  ;;  %652 = vperm.xlu0 (!%p11719_p4), %16143, %v649_v9  }
  0x19   : > { %v648_v1 = vld [vmem:[%s20918_s23] sm:$0x7] (!%p11719_p4) }
  0x1a   : > { %v661_v4 = vsel (!%p11719_p4), %vm659_vm0, %v648_v1, 0  ;;  %v731_v13 = vand.u32 (!%p11719_p4), 4294901760, %v730_v11 }
  0x1b   : > { %v664_v5 = vand.u32 (!%p11719_p4), 4294901760, %v661_v4 }
  0x1c   : > { %v732_v15 = vsub.f32 %v730_v11, %v731_v13 }
  0x1d   : > { %v741_v10 = vsub.f32 %v661_v4, %v664_v5  ;;  %13003 = vmatpush3.msra.mxu0 %v664_v5  ;;  %12988 = vmatpush3.msra.mxu1 %v664_v5 }
  0x1e   : > { %12992 = vmatprep.subr.mxu1 %v16189_v3  ;;  %13007 = vmatprep.subr.mxu0 %v16189_v3  ;;  %v733_v17 = vand.u32 4294901760, %v732_v15 }
  0x1f   : > { %v742_v12 = vand.u32 4294901760, %v741_v10  ;;  %13005 = vmatmul.mubr.f32.vlgmr.msra.gmra.mrb[0].mxu0 %v731_v13 }
  0x20   : > { %13009 = vmatprep.mubr.msk.f32.mxu0 %vm16190_vm1, %v16189_v3  ;;  %12990 = vmatmul.mubr.f32.vlgmr.msra.gmra.mrb[0].mxu1 %v733_v17 }
  0x21   : > { %v743_v14 = vsub.f32 %v741_v10, %v742_v12  ;;  %13008 = vmatpush3.msra.mxu0 %v742_v12  ;;  %12994 = vmatprep.mubr.msk.f32.mxu1 %vm16190_vm1, %v16189_v3 }
  0x22   : > { %13012 = vmatprep.subr.mxu0 %v16189_v3 }
  0x23   : > { %v744_v16 = vand.u32 4294901760, %v743_v14 }
  0x25   : > { %12993 = vmatpush3.msra.mxu1 %v744_v16 }
  0x26   : > { %12997 = vmatprep.subr.mxu1 %v16189_v3 }
  0x27   : > { %13010 = vmatmul.mubr.f32.vlgmr.msra.gmra.mrb[0].mxu0 %v729_v7 }
  0x28   : > { %13013 = vmatpush3.msra.mxu0 %v664_v5  ;;  %13014 = vmatprep.mubr.msk.f32.mxu0 %vm16190_vm1, %v16189_v3 }
  0x29   : > { %12995 = vmatmul.mubr.f32.vlgmr.msra.gmra.mrb[0].mxu1 %v729_v7 }
  0x2a   : > { %12998 = vmatpush3.msra.mxu1 %v741_v10  ;;  %12999 = vmatprep.mubr.msk.f32.mxu1 %vm16190_vm1, %v16189_v3 }
  0x2f   : > { %13015 = vmatmul.mubr.f32.vlgmr.msra.gmra.mrb[0].mxu0 %v729_v7 }
  0x31   : > { %13000 = vmatmul.mubr.f32.vlgmr.msra.gmra.mrb[0].mxu1 %v730_v11 }
  0x97   : > { %v653_v20 = vpop.permute.xlu0 %652 }
 0x102   : > { %v1105_v18 = vpop.f32.mrb[0].mxu0 }
 0x103   : > { %v13016_v19 = vpop.f32.mrb[1].mxu0 }
 0x104   : > { %v885_v21 = vpop.f32.mrb[0].mxu1 }
 0x105   : > { %v15567_v22 = vadd.f32 %v885_v21, %v653_v20  ;;  %v13001_v23 = vpop.f32.mrb[1].mxu1 }
 0x107   : > { %v15568_v24 = vadd.f32 %v15567_v22, %v1105_v18 }
 0x109   : > { %1109 = vst [vmem:[#allocation2] sm:$0xff] %v15568_v24 }
 0x10a PF: > { %v1111_v26 = vld [vmem:[%s16330_s29] sm:$0xff]  ;;  %vm1118_vm3 = vcmask 64512   ;;  %v20603_v27 = vmov 0.0   ;;  %vm16193_vm4 = vmmov 0   ;;  %s20919_s29 = sld [smem:[#allocation125_spill]]  ;;  %v20607_v48 = vmov 0.0|0.0  }
 0x10b   : > { %13017 = vmatprep.subr.mxu0 %v20603_v27  ;;  %13019 = vmatprep.mubr.msk.f32.mxu0 %vm16193_vm4, %v20603_v27  ;;  %v1120_v29 = vsel %vm1118_vm3, %v1111_v26, 0  ;;  %s21459_s17 = sld [smem:[#allocation126_spill]]  ;;  %p11720_p5 = scmp.ne.s32.totalorder %s16311_s21, 1 }
 0x10c   : > { %v16360_v30 = vand.u32 4294901760, %v1120_v29  ;;  %13022 = vmatprep.subr.mxu1 %v20603_v27  ;;  %13024 = vmatprep.mubr.msk.f32.mxu1 %vm16193_vm4, %v20603_v27  ;;  %s21460_s27 = sld [smem:[#allocation124_spill]] (!%p11720_p5)  ;;  %vm8606_vm5 = vcmask (!%p11720_p5), 1042432   ;;  %vm8557_vm6 = vcmask (!%p11720_p5), 23552   ;;  %vm16199_vm7 = vmmov (!%p11720_p5), 0  }
 0x10e   : > { %v1189_v31 = vsub.f32 %v1120_v29, %v16360_v30 }
 0x110   : > { %v1110_v25 = vld [vmem:[#allocation2] sm:$0xff]  ;;  %v1190_v32 = vand.u32 4294901760, %v1189_v31  ;;  %v1569_v38 = vld [vmem:[%s20919_s29 + $0x8] sm:$0xff]  ;;  %v1570_v42 = vld [vmem:[%s20919_s29 + $0x10] sm:$0xff] }
 0x111   : > { %v16355_v28 = vand.u32 4294901760, %v1110_v25  ;;  %v1568_v37 = vld [vmem:[%s20919_s29] sm:$0xff]  ;;  %v1588_v41 = vand.u32 4294901760, %v1569_v38  ;;  %v1571_v43 = vld [vmem:[%s20919_s29 + $0x18] sm:$0xff]  ;;  %v1591_v46 = vand.u32 4294901760, %v1570_v42  ;;  %v1573_v50 = vld [vmem:[%s20919_s29 + $0x28] sm:$0xff] }
 0x112   : > { %v1191_v34 = vsub.f32 %v1189_v31, %v1190_v32  ;;  %v1585_v40 = vand.u32 4294901760, %v1568_v37  ;;  %v1594_v47 = vand.u32 4294901760, %v1571_v43  ;;  %v1572_v49 = vld [vmem:[%s20919_s29 + $0x20] sm:$0xff]  ;;  %v1574_v51 = vld [vmem:[%s20919_s29 + $0x30] sm:$0xff]  ;;  %v1575_v52 = vld [vmem:[%s20919_s29 + $0x38] sm:$0xff]  ;;  %v1600_v55 = vand.u32 4294901760, %v1573_v50 }
 0x113   : > { %13018 = vmatpush3.msra.mxu0 %v16355_v28  ;;  %v16369_v33 = vsub.f32 %v1110_v25, %v16355_v28  ;;  %v1597_v54 = vand.u32 4294901760, %v1572_v49  ;;  %v1576_v56 = vld [vmem:[%s20919_s29 + $0x40] sm:$0xff]  ;;  %v1577_v57 = vld [vmem:[%s20919_s29 + $0x48] sm:$0xff]  ;;  %v16433_v59 = vsub.f32 %v1569_v38, %v1588_v41  ;;  %v16435_v60 = vsub.f32 %v1570_v42, %v1591_v46  ;;  %v1578_v10 = vld [vmem:[%s20919_s29 + $0x50] sm:$0xff] }
 0x114   : > { %13027 = vmatprep.subr.mxu0 %v20603_v27  ;;  %v1192_v35 = vand.u32 4294901760, %v1191_v34  ;;  %v16398_v45 = vpack.c.bf16 %v1588_v41, %v1585_v40  ;;  %v16418_v53 = vpack.c.bf16 %v1594_v47, %v1591_v46  ;;  %v16428_v58 = vsub.f32 %v1568_v37, %v1585_v40  ;;  %v1579_v11 = vld [vmem:[%s20919_s29 + $0x58] sm:$0xff]  ;;  %v1580_v24 = vld [vmem:[%s20919_s29 + $0x60] sm:$0xff]  ;;  %v1581_v25 = vld [vmem:[%s20919_s29 + $0x68] sm:$0xff] }
 0x115   : > { %v16372_v36 = vand.u32 4294901760, %v16369_v33  ;;  %v1603_v61 = vand.u32 4294901760, %v1574_v51  ;;  %v1606_v62 = vand.u32 4294901760, %v1575_v52  ;;  %v16438_v63 = vsub.f32 %v1571_v43, %v1594_v47  ;;  %v1582_v40 = vld [vmem:[%s20919_s29 + $0x70] sm:$0xff]  ;;  %v1583_v41 = vld [vmem:[%s20919_s29 + $0x78] sm:$0xff] }
 0x116   : > { %13020 = vmatmul.mubr.f32.vlgmr.msra.gmra.mrb[0].mxu0 %v1192_v35  ;;  %v16440_v0 = vsub.f32 %v1572_v49, %v1597_v54  ;;  %v1609_v1 = vand.u32 4294901760, %v1576_v56  ;;  %v1612_v2 = vand.u32 4294901760, %v1577_v57  ;;  %v16446_v3 = vpack.c.bf16 %v1600_v55, %v1597_v54 }
 0x117   : > { %v1202_v39 = vsub.f32 %v16369_v33, %v16372_v36  ;;  %13028 = vmatpush3.msra.mxu0 %v16369_v33  ;;  %13029 = vmatprep.mubr.msk.f32.mxu0 %vm16193_vm4, %v20603_v27  ;;  %v16448_v4 = vsub.f32 %v1573_v50, %v1600_v55  ;;  %v16450_v5 = vsub.f32 %v1574_v51, %v1603_v61  ;;  %v1678_v12 = vand.u32 4294901760, %v16428_v58 }
 0x118   : > { %13037 = vmatprep.subr.mxu0 %v20603_v27  ;;  %v16452_v6 = vsub.f32 %v1575_v52, %v1606_v62  ;;  %v16455_v7 = vpack.c.bf16 %v1606_v62, %v1603_v61  ;;  %v16457_v8 = vsub.f32 %v1576_v56, %v1609_v1  ;;  %v16459_v9 = vsub.f32 %v1577_v57, %v1612_v2 }
 0x119   : > { %v16392_v44 = vand.u32 4294901760, %v1202_v39  ;;  %v1685_v13 = vand.u32 4294901760, %v16433_v59  ;;  %v1692_v14 = vand.u32 4294901760, %v16435_v60  ;;  %v1699_v15 = vand.u32 4294901760, %v16438_v63 }
 0x11a   : > { %13030 = vmatmul.mubr.f32.vlgmr.msra.gmra.mrb[2].mxu0 %v1189_v31  ;;  %v1706_v16 = vand.u32 4294901760, %v16440_v0  ;;  %v1713_v17 = vand.u32 4294901760, %v16448_v4  ;;  %v1720_v18 = vand.u32 4294901760, %v16450_v5  ;;  %v1727_v19 = vand.u32 4294901760, %v16452_v6 }
 0x11b   : > { %13023 = vmatpush3.msra.mxu1 %v16392_v44  ;;  %13038 = vmatpush3.msra.mxu0 %v16372_v36  ;;  %v1615_v20 = vand.u32 4294901760, %v1578_v10  ;;  %v1618_v21 = vand.u32 4294901760, %v1579_v11  ;;  %v16478_v22 = vpack.c.bf16 %v1685_v13, %v1678_v12  ;;  %v16480_v23 = vpack.c.bf16 %v1699_v15, %v1692_v14 }
 0x11c   : > { %13039 = vmatprep.mubr.msk.f32.mxu0 %vm16193_vm4, %v20603_v27  ;;  %14799 = vmatprep.subr.bf16.mxu0 %v20607_v48  ;;  %v16488_v26 = vpack.c.bf16 %v1713_v17, %v1706_v16  ;;  %v16490_v29 = vpack.c.bf16 %v1727_v19, %v1720_v18  ;;  %v1741_v34 = vand.u32 4294901760, %v16459_v9  ;;  %v16499_v35 = vpack.c.bf16 %v1612_v2, %v1609_v1 }
 0x11d   : > { %13025 = vmatmul.mubr.f32.vlgmr.msra.gmra.mrb[0].mxu1 %v16360_v30  ;;  %13032 = vmatprep.subr.mxu1 %v20603_v27  ;;  %v16494_v31 = vsub.f32 %v1579_v11, %v1618_v21  ;;  %v1621_v37 = vand.u32 4294901760, %v1580_v24  ;;  %v1624_v38 = vand.u32 4294901760, %v1581_v25  ;;  %v16517_v49 = vpack.c.bf16 %v1618_v21, %v1615_v20 }
 0x11e   : > { %13040 = vmatmul.mubr.f32.vlgmr.msra.gmra.mrb[4].mxu0 %v16360_v30  ;;  %13033 = vmatpush3.msra.mxu1 %v16355_v28  ;;  %v1627_v50 = vand.u32 4294901760, %v1582_v40  ;;  %v1630_v51 = vand.u32 4294901760, %v1583_v41  ;;  %v1679_v62 = vsub.f32 %v16428_v58, %v1678_v12  ;;  %v1686_v1 = vsub.f32 %v16433_v59, %v1685_v13 }
 0x11f   : > { %14801 = vmatpush3.bf16.msra.mxu0 %v16398_v45  ;;  %13079 = vmatprep.mubr.msk.f32.mxu0 %vm16193_vm4, %v20603_v27  ;;  %v16510_v42 = vsub.f32 %v1580_v24, %v1621_v37  ;;  %v16512_v43 = vsub.f32 %v1581_v25, %v1624_v38  ;;  %v1755_v47 = vand.u32 4294901760, %v16494_v31  ;;  %v16529_v61 = vpack.c.bf16 %v1624_v38, %v1621_v37 }
 0x120   : > { %14802 = vmatprep.subr.bf16.mxu0 %v20607_v48  ;;  %13034 = vmatprep.mubr.msk.f32.mxu1 %vm16193_vm4, %v20603_v27  ;;  %v16522_v54 = vsub.f32 %v1582_v40, %v1627_v50  ;;  %v16524_v55 = vsub.f32 %v1583_v41, %v1630_v51  ;;  %v1680_v21 = vand.u32 4294901760, %v1679_v62  ;;  %v1687_v24 = vand.u32 4294901760, %v1686_v1 }
 0x121   : > { %13035 = vmatmul.mubr.f32.vlgmr.msra.gmra.mrb[2].mxu1 %v1190_v32  ;;  %13042 = vmatprep.subr.mxu1 %v20603_v27  ;;  %v1734_v32 = vand.u32 4294901760, %v16457_v8  ;;  %v1762_v56 = vand.u32 4294901760, %v16510_v42  ;;  %v1769_v57 = vand.u32 4294901760, %v16512_v43  ;;  %v1693_v25 = vsub.f32 %v16435_v60, %v1692_v14 }
 0x122   : > { %13043 = vmatpush3.msra.mxu1 %v16355_v28  ;;  %13044 = vmatprep.mubr.msk.f32.mxu1 %vm16193_vm4, %v20603_v27  ;;  %v1776_v11 = vand.u32 4294901760, %v16522_v54  ;;  %v1700_v12 = vsub.f32 %v16438_v63, %v1699_v15  ;;  %v1707_v37 = vsub.f32 %v16440_v0, %v1706_v16  ;;  %v14824_v38 = vpack.c.bf16 %v1687_v24, %v1680_v21 }
 0x123   : > { %14804 = vmatpush3.bf16.msra.mxu0 %v16418_v53  ;;  %v16502_v39 = vpack.c.bf16 %v1741_v34, %v1734_v32  ;;  %v16534_v2 = vpack.c.bf16 %v1769_v57, %v1762_v56  ;;  %v1694_v40 = vand.u32 4294901760, %v1693_v25  ;;  %v1721_v14 = vsub.f32 %v16450_v5, %v1720_v18 }
 0x124   : > { %14805 = vmatprep.subr.bf16.mxu0 %v20607_v48  ;;  %v1701_v41 = vand.u32 4294901760, %v1700_v12  ;;  %v1728_v15 = vsub.f32 %v16452_v6, %v1727_v19  ;;  %v1708_v62 = vand.u32 4294901760, %v1707_v37  ;;  %v1735_v24 = vsub.f32 %v16457_v8, %v1734_v32 }
 0x125   : > { %13045 = vmatmul.mubr.f32.vlgmr.msra.gmra.mrb[4].mxu1 %v16360_v30  ;;  %v16492_v30 = vsub.f32 %v1578_v10, %v1615_v20  ;;  %v16536_v10 = vpack.c.bf16 %v1630_v51, %v1627_v50  ;;  %v1783_v20 = vand.u32 4294901760, %v16524_v55  ;;  %v1714_v50 = vsub.f32 %v16448_v4, %v1713_v17 }
 0x126   : > { %v14827_v51 = vpack.c.bf16 %v1701_v41, %v1694_v40  ;;  %v1722_v16 = vand.u32 4294901760, %v1721_v14  ;;  %v1729_v21 = vand.u32 4294901760, %v1728_v15  ;;  %v1736_v19 = vand.u32 4294901760, %v1735_v24  ;;  %v2230_v24 = vld [vmem:[%s16320_s24 + $0x28] sm:$0xff] }
 0x127   : > { %14807 = vmatpush3.bf16.msra.mxu0 %v16446_v3  ;;  %v1748_v46 = vand.u32 4294901760, %v16492_v30  ;;  %v16544_v13 = vpack.c.bf16 %v1783_v20, %v1776_v11  ;;  %v1715_v1 = vand.u32 4294901760, %v1714_v50  ;;  %v1756_v37 = vsub.f32 %v16494_v31, %v1755_v47 }
 0x128   : > { %14808 = vmatprep.subr.bf16.mxu0 %v20607_v48  ;;  %v14833_v18 = vpack.c.bf16 %v1729_v21, %v1722_v16  ;;  %v2229_v16 = vld [vmem:[%s16320_s24 + $0x20] sm:$0xff] }
 0x129   : > { %v16520_v52 = vpack.c.bf16 %v1755_v47, %v1748_v46  ;;  %v14830_v17 = vpack.c.bf16 %v1715_v1, %v1708_v62  ;;  %v1749_v12 = vsub.f32 %v16492_v30, %v1748_v46  ;;  %v1757_v32 = vand.u32 4294901760, %v1756_v37 }
 0x12a   : > { %v1777_v46 = vsub.f32 %v16522_v54, %v1776_v11  ;;  %v1784_v47 = vsub.f32 %v16524_v55, %v1783_v20  ;;  %v14848_v1 = vpack.c.bf16 %v16433_v59, %v16428_v58  ;;  %v14851_v11 = vpack.c.bf16 %v16438_v63, %v16435_v60 }
 0x12b   : > { %14810 = vmatpush3.bf16.msra.mxu0 %v16455_v7  ;;  %v1750_v41 = vand.u32 4294901760, %v1749_v12  ;;  %v14854_v20 = vpack.c.bf16 %v16448_v4, %v16440_v0  ;;  %v14857_v58 = vpack.c.bf16 %v16452_v6, %v16450_v5  ;;  %v14860_v59 = vpack.c.bf16 %v16459_v9, %v16457_v8  ;;  %v2225_v5 = vld [vmem:[%s16320_s24] sm:$0xff] }
 0x12c   : > { %14811 = vmatprep.subr.bf16.mxu0 %v20607_v48  ;;  %v1785_v62 = vand.u32 4294901760, %v1784_v47  ;;  %v14863_v60 = vpack.c.bf16 %v16494_v31, %v16492_v30  ;;  %v14866_v63 = vpack.c.bf16 %v16512_v43, %v16510_v42  ;;  %v14869_v0 = vpack.c.bf16 %v16524_v55, %v16522_v54 }
 0x12d   : > { %v14839_v14 = vpack.c.bf16 %v1757_v32, %v1750_v41  ;;  %v2258_v6 = vsel %vm1118_vm3, %v2225_v5, 0 }
 0x12f   : > { %14813 = vmatpush3.bf16.msra.mxu0 %v16499_v35 }
 0x130   : > { %14814 = vmatprep.subr.bf16.mxu0 %v20607_v48 }
 0x133   : > { %14816 = vmatpush3.bf16.msra.mxu0 %v16517_v49 }
 0x134   : > { %14817 = vmatprep.subr.bf16.mxu0 %v20607_v48 }
 0x137   : > { %14819 = vmatpush3.bf16.msra.mxu0 %v16529_v61 }
 0x138   : > { %14820 = vmatprep.subr.bf16.mxu0 %v20607_v48 }
 0x13b   : > { %14822 = vmatpush3.bf16.msra.mxu0 %v16536_v10 }
 0x13c   : > { %14823 = vmatprep.subr.bf16.mxu0 %v20607_v48 }
 0x13e   : > { %13080 = vmatmul.mubr.f32.vlgmr.msra.gmra.mrb[6].mxu0 %v16392_v44  ;;  %v1742_v44 = vsub.f32 %v16459_v9, %v1741_v34  ;;  %v1770_v34 = vsub.f32 %v16512_v43, %v1769_v57 }
 0x13f   : > { %14825 = vmatpush3.bf16.msra.mxu0 %v14824_v38  ;;  %13114 = vmatprep.mubr.msk.f32.mxu0 %vm16193_vm4, %v20603_v27  ;;  %v1763_v38 = vsub.f32 %v16510_v42, %v1762_v56 }
 0x140   : > { %14826 = vmatprep.subr.bf16.mxu0 %v20607_v48  ;;  %v1743_v25 = vand.u32 4294901760, %v1742_v44  ;;  %v1771_v15 = vand.u32 4294901760, %v1770_v34 }
 0x141   : > { %v1764_v50 = vand.u32 4294901760, %v1763_v38  ;;  %v2273_v38 = vsel %vm1118_vm3, %v2230_v24, 0 }
 0x142   : > { %v14836_v40 = vpack.c.bf16 %v1743_v25, %v1736_v19  ;;  %v2270_v19 = vsel %vm1118_vm3, %v2229_v16, 0  ;;  %v16726_v47 = vand.u32 4294901760, %v2273_v38 }
 0x143   : > { %14828 = vmatpush3.bf16.msra.mxu0 %v14827_v51  ;;  %v14842_v56 = vpack.c.bf16 %v1771_v15, %v1764_v50  ;;  %v1778_v51 = vand.u32 4294901760, %v1777_v46  ;;  %v16719_v34 = vand.u32 4294901760, %v2270_v19  ;;  %v2231_v50 = vld [vmem:[%s16320_s24 + $0x30] sm:$0xff]  ;;  %v4136_v46 = vld [vmem:[%s16325_s26 + $0x20] sm:$0xff] }
 0x144   : > { %14829 = vmatprep.subr.bf16.mxu0 %v20607_v48 }
 0x145   : > { %v14845_v57 = vpack.c.bf16 %v1785_v62, %v1778_v51 }
 0x147   : > { %14831 = vmatpush3.bf16.msra.mxu0 %v14830_v17  ;;  %v4135_v17 = vld [vmem:[%s16325_s26 + $0x18] sm:$0xff] }
 0x148   : > { %14832 = vmatprep.subr.bf16.mxu0 %v20607_v48  ;;  %v4174_v37 = vsel %vm1118_vm3, %v4135_v17, 0  ;;  %v4140_v17 = vld [vmem:[%s16325_s26 + $0x40] sm:$0xff] }
 0x149   : > { %v16723_v15 = vand.u32 4294901760, %v4174_v37 }
 0x14b   : > { %14834 = vmatpush3.bf16.msra.mxu0 %v14833_v18  ;;  %20931 = vst [vmem:[#allocation19_spill] sm:$0xff] %v16723_v15 }
 0x14c   : > { %14835 = vmatprep.subr.bf16.mxu0 %v20607_v48 }
 0x14f   : > { %14837 = vmatpush3.bf16.msra.mxu0 %v14836_v40 }
 0x150   : > { %14838 = vmatprep.subr.bf16.mxu0 %v20607_v48 }
 0x153   : > { %14840 = vmatpush3.bf16.msra.mxu0 %v14839_v14  ;;  %v2232_v14 = vld [vmem:[%s16320_s24 + $0x38] sm:$0xff] }
 0x154   : > { %14841 = vmatprep.subr.bf16.mxu0 %v20607_v48 }
 0x157   : > { %14843 = vmatpush3.bf16.msra.mxu0 %v14842_v56  ;;  %v2233_v56 = vld [vmem:[%s16320_s24 + $0x40] sm:$0xff] }
 0x158   : > { %14844 = vmatprep.subr.bf16.mxu0 %v20607_v48 }
 0x15b   : > { %14846 = vmatpush3.bf16.msra.mxu0 %v14845_v57  ;;  %v4137_v57 = vld [vmem:[%s16325_s26 + $0x28] sm:$0xff] }
 0x15c   : > { %14847 = vmatprep.subr.bf16.mxu0 %v20607_v48  ;;  %v4180_v5 = vsel %vm1118_vm3, %v4137_v57, 0  ;;  %v2236_v57 = vld [vmem:[%s16320_s24 + $0x58] sm:$0xff] }
 0x15e   : > { %13115 = vmatmul.mubr.f32.vlgmr.msra.gmra.mrb[6].mxu0 %v16355_v28 }
 0x15f   : > { %14849 = vmatpush3.bf16.msra.mxu0 %v14848_v1  ;;  %13149 = vmatprep.mubr.msk.f32.mxu0 %vm16193_vm4, %v20603_v27  ;;  %v4138_v1 = vld [vmem:[%s16325_s26 + $0x30] sm:$0xff] }
 0x160   : > { %14850 = vmatprep.subr.bf16.mxu0 %v20607_v48 }
 0x163   : > { %14852 = vmatpush3.bf16.msra.mxu0 %v14851_v11 }
 0x164   : > { %14853 = vmatprep.subr.bf16.mxu0 %v20607_v48 }
 0x167   : > { %14855 = vmatpush3.bf16.msra.mxu0 %v14854_v20 }
 0x168   : > { %14856 = vmatprep.subr.bf16.mxu0 %v20607_v48 }
 0x16b   : > { %14858 = vmatpush3.bf16.msra.mxu0 %v14857_v58  ;;  %v2276_v58 = vsel %vm1118_vm3, %v2231_v50, 0 }
 0x16c   : > { %14859 = vmatprep.subr.bf16.mxu0 %v20607_v48 }
 0x16f   : > { %14861 = vmatpush3.bf16.msra.mxu0 %v14860_v59  ;;  %v2279_v59 = vsel %vm1118_vm3, %v2232_v14, 0 }
 0x170   : > { %14862 = vmatprep.subr.bf16.mxu0 %v20607_v48 }
 0x173   : > { %14864 = vmatpush3.bf16.msra.mxu0 %v14863_v60 }
 0x174   : > { %14865 = vmatprep.subr.bf16.mxu0 %v20607_v48 }
 0x177   : > { %14867 = vmatpush3.bf16.msra.mxu0 %v14866_v63  ;;  %v16751_v63 = vsub.f32 %v2270_v19, %v16719_v34 }
 0x178   : > { %14868 = vmatprep.subr.bf16.mxu0 %v20607_v48 }
 0x179   : > { %20934 = vst [vmem:[#allocation22_spill] sm:$0xff] %v16751_v63 }
 0x17b   : > { %14870 = vmatpush3.bf16.msra.mxu0 %v14869_v0  ;;  %v4177_v0 = vsel %vm1118_vm3, %v4136_v46, 0 }
 0x17c   : > { %14871 = vmatprep.subr.bf16.mxu0 %v20607_v48 }
 0x17e   : > { %13150 = vmatmul.mubr.f32.vlgmr.msra.gmra.mrb[6].mxu0 %v16369_v33 }
 0x17f   : > { %14873 = vmatpush3.bf16.msra.mxu0 %v16398_v45  ;;  %13184 = vmatprep.mubr.msk.f32.mxu0 %vm16193_vm4, %v20603_v27 }
 0x180   : > { %14874 = vmatprep.subr.bf16.mxu0 %v20607_v48 }
 0x183   : > { %14876 = vmatpush3.bf16.msra.mxu0 %v16418_v53 }
 0x184   : > { %14877 = vmatprep.subr.bf16.mxu0 %v20607_v48 }
 0x187   : > { %14879 = vmatpush3.bf16.msra.mxu0 %v16446_v3 }
 0x188   : > { %14880 = vmatprep.subr.bf16.mxu0 %v20607_v48 }
 0x18b   : > { %14882 = vmatpush3.bf16.msra.mxu0 %v16455_v7 }
 0x18c   : > { %14883 = vmatprep.subr.bf16.mxu0 %v20607_v48 }
 0x18f   : > { %14885 = vmatpush3.bf16.msra.mxu0 %v16499_v35 }
 0x190   : > { %14886 = vmatprep.subr.bf16.mxu0 %v20607_v48 }
 0x193   : > { %14888 = vmatpush3.bf16.msra.mxu0 %v16517_v49 }
 0x194   : > { %14889 = vmatprep.subr.bf16.mxu0 %v20607_v48 }
 0x197   : > { %14891 = vmatpush3.bf16.msra.mxu0 %v16529_v61 }
 0x198   : > { %14892 = vmatprep.subr.bf16.mxu0 %v20607_v48 }
 0x19b   : > { %14894 = vmatpush3.bf16.msra.mxu0 %v16536_v10 }
 0x19c   : > { %14895 = vmatprep.subr.bf16.mxu0 %v20607_v48 }
 0x19e   : > { %13185 = vmatmul.mubr.f32.vlgmr.msra.gmra.mrb[6].mxu0 %v16372_v36 }
 0x19f   : > { %14897 = vmatpush3.bf16.msra.mxu0 %v16478_v22  ;;  %13219 = vmatprep.mubr.msk.f32.mxu0 %vm16193_vm4, %v20603_v27 }
 0x1a0   : > { %14898 = vmatprep.subr.bf16.mxu0 %v20607_v48 }
 0x1a3   : > { %14900 = vmatpush3.bf16.msra.mxu0 %v16480_v23 }
 0x1a4   : > { %14901 = vmatprep.subr.bf16.mxu0 %v20607_v48 }
 0x1a7   : > { %14903 = vmatpush3.bf16.msra.mxu0 %v16488_v26 }
 0x1a8   : > { %14904 = vmatprep.subr.bf16.mxu0 %v20607_v48 }
 0x1ab   : > { %14906 = vmatpush3.bf16.msra.mxu0 %v16490_v29 }
 0x1ac   : > { %14907 = vmatprep.subr.bf16.mxu0 %v20607_v48 }
 0x1af   : > { %14909 = vmatpush3.bf16.msra.mxu0 %v16502_v39  ;;  %v2227_v39 = vld [vmem:[%s16320_s24 + $0x10] sm:$0xff] }
 0x1b0   : > { %14910 = vmatprep.subr.bf16.mxu0 %v20607_v48  ;;  %v2264_v43 = vsel %vm1118_vm3, %v2227_v39, 0 }
 0x1b1   : > { %v16689_v54 = vand.u32 4294901760, %v2264_v43 }
 0x1b3   : > { %14912 = vmatpush3.bf16.msra.mxu0 %v16520_v52  ;;  %v16701_v21 = vsub.f32 %v2264_v43, %v16689_v54 }
 0x1b4   : > { %14913 = vmatprep.subr.bf16.mxu0 %v20607_v48 }
 0x1b5   : > { %20927 = vst [vmem:[#allocation15_spill] sm:$0xff] %v16701_v21  ;;  %v20601_v41 = vand.u32 4294901760, %v16701_v21 }
 0x1b7   : > { %14915 = vmatpush3.bf16.msra.mxu0 %v16534_v2  ;;  %v16743_v20 = vsub.f32 %v16701_v21, %v20601_v41  ;;  %v4142_v41 = vld [vmem:[%s16325_s26 + $0x50] sm:$0xff]  ;;  %v2241_v21 = vld [vmem:[%s16320_s24 + $0x80] sm:$0xff] }
 0x1b8   : > { %14916 = vmatprep.subr.bf16.mxu0 %v20607_v48 }
 0x1bb   : > { %14918 = vmatpush3.bf16.msra.mxu0 %v16544_v13 }
 0x1bc   : > { %14919 = vmatprep.subr.bf16.mxu0 %v20607_v48 }
 0x1be   : > { %13220 = vmatmul.mubr.f32.vlgmr.msra.gmra.mrb[6].mxu0 %v16355_v28 }
 0x1bf   : > { %14921 = vmatpush3.bf16.msra.mxu0 %v16398_v45  ;;  %13254 = vmatprep.mubr.msk.f32.mxu0 %vm16193_vm4, %v20603_v27 }
 0x1c0   : > { %14922 = vmatprep.subr.bf16.mxu0 %v20607_v48 }
 0x1c3   : > { %14924 = vmatpush3.bf16.msra.mxu0 %v16418_v53 }
 0x1c4   : > { %14925 = vmatprep.subr.bf16.mxu0 %v20607_v48 }
 0x1c7   : > { %14927 = vmatpush3.bf16.msra.mxu0 %v16446_v3 }
 0x1c8   : > { %14928 = vmatprep.subr.bf16.mxu0 %v20607_v48 }
 0x1cb   : > { %14930 = vmatpush3.bf16.msra.mxu0 %v16455_v7  ;;  %v16663_v7 = vand.u32 4294901760, %v2258_v6 }
 0x1cc   : > { %14931 = vmatprep.subr.bf16.mxu0 %v20607_v48 }
 0x1cd   : > { %v16666_v8 = vsub.f32 %v2258_v6, %v16663_v7  ;;  %v4183_v6 = vsel %vm1118_vm3, %v4138_v1, 0 }
 0x1cf   : > { %14933 = vmatpush3.bf16.msra.mxu0 %v16499_v35  ;;  %20923 = vst [vmem:[#allocation11_spill] sm:$0xff] %v16666_v8  ;;  %v20606_v22 = vand.u32 4294901760, %v16666_v8  ;;  %v2226_v35 = vld [vmem:[%s16320_s24 + $0x8] sm:$0xff] }
 0x1d0   : > { %14934 = vmatprep.subr.bf16.mxu0 %v20607_v48  ;;  %v2261_v42 = vsel %vm1118_vm3, %v2226_v35, 0 }
 0x1d1   : > { %v2422_v26 = vsub.f32 %v16666_v8, %v20606_v22  ;;  %v16687_v52 = vand.u32 4294901760, %v2261_v42 }
 0x1d3   : > { %14936 = vmatpush3.bf16.msra.mxu0 %v16517_v49  ;;  %v2423_v30 = vand.u32 4294901760, %v2422_v26  ;;  %v2228_v49 = vld [vmem:[%s16320_s24 + $0x18] sm:$0xff]  ;;  %v16694_v2 = vsub.f32 %v2261_v42, %v16687_v52  ;;  %v16769_v26 = vand.u32 4294901760, %v2276_v58  ;;  %v16775_v42 = vand.u32 4294901760, %v4177_v0 }
 0x1d4   : > { %14937 = vmatprep.subr.bf16.mxu0 %v20607_v48  ;;  %v2267_v55 = vsel %vm1118_vm3, %v2228_v49, 0  ;;  %v2234_v49 = vld [vmem:[%s16320_s24 + $0x48] sm:$0xff] }
 0x1d5   : > { %13259 = vmatprep.mubr.f32.mxu1 %v2423_v30  ;;  %20926 = vst [vmem:[#allocation14_spill] sm:$0xff] %v16694_v2  ;;  %v16697_v13 = vand.u32 4294901760, %v2267_v55  ;;  %v20602_v25 = vand.u32 4294901760, %v16694_v2  ;;  %v16771_v30 = vand.u32 4294901760, %v2279_v59  ;;  %20937 = vst [vmem:[#allocation25_spill] sm:$0xff] %v16775_v42  ;;  %v16794_v50 = vsub.f32 %v2276_v58, %v16769_v26 }
 0x1d6   : > { %v2285_v46 = vsel %vm1118_vm3, %v2234_v49, 0  ;;  %v16803_v1 = vsub.f32 %v4177_v0, %v16775_v42 }
 0x1d7   : > { %14939 = vmatpush3.bf16.msra.mxu0 %v16529_v61  ;;  %v4133_v61 = vld [vmem:[%s16325_s26 + $0x8] sm:$0xff]  ;;  %v16710_v12 = vsub.f32 %v2267_v55, %v16697_v13  ;;  %v16732_v51 = vsub.f32 %v16694_v2, %v20602_v25  ;;  %v20605_v55 = vand.u32 4294901760, %v16751_v63  ;;  %20940 = vst [vmem:[#allocation28_spill] sm:$0xff] %v16794_v50  ;;  %v16797_v14 = vsub.f32 %v2279_v59, %v16771_v30  ;;  %v2237_v25 = vld [vmem:[%s16320_s24 + $0x60] sm:$0xff] }
 0x1d8   : > { %14940 = vmatprep.subr.bf16.mxu0 %v20607_v48  ;;  %v4168_v44 = vsel %vm1118_vm3, %v4133_v61, 0  ;;  %v16781_v61 = vand.u32 4294901760, %v4180_v5  ;;  %20942 = vst [vmem:[#allocation30_spill] sm:$0xff] %v16803_v1 }
 0x1d9   : > { %20928 = vst [vmem:[#allocation16_spill] sm:$0xff] %v16710_v12  ;;  %v16714_v40 = vand.u32 4294901760, %v4168_v44  ;;  %v20600_v62 = vand.u32 4294901760, %v16710_v12  ;;  %20941 = vst [vmem:[#allocation29_spill] sm:$0xff] %v16797_v14  ;;  %v16815_v58 = vsub.f32 %v16751_v63, %v20605_v55  ;;  %v2291_v55 = vsel %vm1118_vm3, %v2236_v57, 0 }
 0x1da   : > { %20938 = vst [vmem:[#allocation26_spill] sm:$0xff] %v16781_v61  ;;  %v16818_v59 = vsub.f32 %v4180_v5, %v16781_v61  ;;  %v20610_v5 = vand.u32 4294901760, %v16794_v50  ;;  %v16850_v24 = vand.u32 4294901760, %v2291_v55  ;;  %v20965_v2 = vand.u32 4294901760, %v16732_v51 }
 0x1db   : > { %14942 = vmatpush3.bf16.msra.mxu0 %v16536_v10  ;;  %v4134_v10 = vld [vmem:[%s16325_s26 + $0x10] sm:$0xff]  ;;  %20929 = vst [vmem:[#allocation17_spill] sm:$0xff] %v16714_v40  ;;  %v16738_v11 = vsub.f32 %v4168_v44, %v16714_v40  ;;  %v20969_v51 = vand.u32 4294901760, %v16743_v20 }
 0x1dc   : > { %v4171_v18 = vsel %vm1118_vm3, %v4134_v10, 0  ;;  %v16783_v10 = vand.u32 4294901760, %v4183_v6  ;;  %20945 = vst [vmem:[#allocation33_spill] sm:$0xff] %v16818_v59  ;;  %20950 = vst [vmem:[#allocation38_spill] sm:$0xff] %v16850_v24 }
 0x1dd   : > { %v16717_v32 = vand.u32 4294901760, %v4171_v18  ;;  %20932 = vst [vmem:[#allocation20_spill] sm:$0xff] %v16738_v11 }
 0x1de   : > { %13255 = vmatmul.mubr.f32.vlgmr.msra.gmra.mrb[6].mxu0 %v16355_v28  ;;  %v4132_v28 = vld [vmem:[%s16325_s26] sm:$0xff]  ;;  %20939 = vst [vmem:[#allocation27_spill] sm:$0xff] %v16783_v10  ;;  %v16821_v49 = vsub.f32 %v4183_v6, %v16783_v10  ;;  %v20613_v6 = vand.u32 4294901760, %v16797_v14 }
 0x1df   : > { %v4165_v9 = vsel %vm1118_vm3, %v4132_v28, 0  ;;  %20930 = vst [vmem:[#allocation18_spill] sm:$0xff] %v16717_v32  ;;  %v16748_v60 = vsub.f32 %v4171_v18, %v16717_v32  ;;  %v4139_v28 = vld [vmem:[%s16325_s26 + $0x38] sm:$0xff] }
 0x1e0   : > { %v16671_v23 = vand.u32 4294901760, %v4165_v9  ;;  %v4186_v16 = vsel %vm1118_vm3, %v4139_v28, 0  ;;  %20946 = vst [vmem:[#allocation34_spill] sm:$0xff] %v16821_v49  ;;  %v16869_v57 = vsub.f32 %v16797_v14, %v20613_v6 }
 0x1e1   : > { %20933 = vst [vmem:[#allocation21_spill] sm:$0xff] %v16748_v60  ;;  %v16805_v28 = vand.u32 4294901760, %v4186_v16 }
 0x1e2   : > { %20924 = vst [vmem:[#allocation12_spill] sm:$0xff] %v16671_v23  ;;  %v16677_v29 = vsub.f32 %v4165_v9, %v16671_v23  ;;  %v16767_v9 = vsub.f32 %v16710_v12, %v20600_v62  ;;  %v4189_v62 = vsel %vm1118_vm3, %v4140_v17, 0  ;;  %v16830_v17 = vand.u32 4294901760, %v2285_v46 }
 0x1e3   : > { %20943 = vst [vmem:[#allocation31_spill] sm:$0xff] %v16805_v28  ;;  %v16836_v22 = vand.u32 4294901760, %v4189_v62  ;;  %v16840_v48 = vsub.f32 %v4186_v16, %v16805_v28 }
 0x1e4   : > { %20925 = vst [vmem:[#allocation13_spill] sm:$0xff] %v16677_v29  ;;  %v20599_v31 = vand.u32 4294901760, %v16677_v29  ;;  %v16855_v39 = vsub.f32 %v2285_v46, %v16830_v17 }
 0x1e5   : > { %20947 = vst [vmem:[#allocation35_spill] sm:$0xff] %v16836_v22  ;;  %20948 = vst [vmem:[#allocation36_spill] sm:$0xff] %v16840_v48  ;;  %v16872_v16 = vsub.f32 %v4189_v62, %v16836_v22  ;;  %v16891_v62 = vsub.f32 %v2291_v55, %v16850_v24  ;;  %v4146_v24 = vld [vmem:[%s16325_s26 + $0x70] sm:$0xff]  ;;  %v2306_v55 = vsel %vm1118_vm3, %v2241_v21, 0  ;;  %v20977_v21 = vand.u32 4294901760, %v16767_v9 }
 0x1e6   : > { %13709 = vmatprep.mubr.f32.mxu0 %v20599_v31  ;;  %20951 = vst [vmem:[#allocation39_spill] sm:$0xff] %v16855_v39 }
 0x1e7   : > { %20953 = vst [vmem:[#allocation41_spill] sm:$0xff] %v16872_v16  ;;  %20958 = vst [vmem:[#allocation45_spill] sm:$0xff] %v16891_v62 }
 0x1e9   : > { %v16655_v33 = vpop.f32.mrb[0].mxu0 }
 0x1ea   : > { %20920 = vst [vmem:[#allocation8_spill] sm:$0xff] %v16655_v33  ;;  %v13021_v36 = vpop.f32.mrb[1].mxu0 }
 0x1eb   : > { %v2282_v36 = vsel %vm1118_vm3, %v2233_v56, 0  ;;  %v2235_v56 = vld [vmem:[%s16320_s24 + $0x50] sm:$0xff] }
 0x1ec   : > { %v16777_v43 = vand.u32 4294901760, %v2282_v36  ;;  %v2288_v27 = vsel %vm1118_vm3, %v2235_v56, 0  ;;  %v2294_v56 = vsel %vm1118_vm3, %v2237_v25, 0  ;;  %v2238_v25 = vld [vmem:[%s16320_s24 + $0x68] sm:$0xff] }
 0x1ed   : > { %v16657_v45 = vpop.f32.mrb[2].mxu0  ;;  %v16848_v44 = vand.u32 4294901760, %v2288_v27  ;;  %v16874_v46 = vand.u32 4294901760, %v2294_v56 }
 0x1ee   : > { %20921 = vst [vmem:[#allocation9_spill] sm:$0xff] %v16657_v45  ;;  %v13031_v53 = vpop.f32.mrb[3].mxu0  ;;  %v16808_v31 = vsub.f32 %v2282_v36, %v16777_v43  ;;  %v2239_v45 = vld [vmem:[%s16320_s24 + $0x70] sm:$0xff] }
 0x1ef   : > { %v16756_v53 = vsub.f32 %v4174_v37, %v16723_v15  ;;  %v4141_v37 = vld [vmem:[%s16325_s26 + $0x48] sm:$0xff]  ;;  %20954 = vst [vmem:[#allocation42_spill] sm:$0xff] %v16874_v46  ;;  %v16888_v14 = vsub.f32 %v2288_v27, %v16848_v44  ;;  %v2300_v63 = vsel %vm1118_vm3, %v2239_v45, 0  ;;  %v20966_v45 = vand.u32 4294901760, %v16738_v11 }
 0x1f0   : > { %20944 = vst [vmem:[#allocation32_spill] sm:$0xff] %v16808_v31  ;;  %v4192_v0 = vsel %vm1118_vm3, %v4141_v37, 0  ;;  %v4195_v37 = vsel %vm1118_vm3, %v4142_v41, 0  ;;  %v4144_v41 = vld [vmem:[%s16325_s26 + $0x60] sm:$0xff]  ;;  %v20955_v33 = vand.u32 4294901760, %v16808_v31 }
 0x1f1   : > { %v16659_v3 = vpop.f32.mrb[4].mxu0  ;;  %20935 = vst [vmem:[#allocation23_spill] sm:$0xff] %v16756_v53  ;;  %v16843_v18 = vand.u32 4294901760, %v4192_v0  ;;  %v16857_v35 = vand.u32 4294901760, %v4195_v37  ;;  %20957 = vst [vmem:[#allocation44_spill] sm:$0xff] %v16888_v14  ;;  %v4201_v27 = vsel %vm1118_vm3, %v4144_v41, 0 }
 0x1f2   : > { %20922 = vst [vmem:[#allocation10_spill] sm:$0xff] %v16659_v3  ;;  %v13041_v4 = vpop.f32.mrb[5].mxu0  ;;  %v2297_v3 = vsel %vm1118_vm3, %v2238_v25, 0  ;;  %v16907_v25 = vsub.f32 %v2294_v56, %v16874_v46  ;;  %v20968_v46 = vand.u32 4294901760, %v16855_v39 }
 0x1f3   : > { %v16759_v4 = vsub.f32 %v2273_v38, %v16726_v47  ;;  %20949 = vst [vmem:[#allocation37_spill] sm:$0xff] %v16843_v18  ;;  %20952 = vst [vmem:[#allocation40_spill] sm:$0xff] %v16857_v35  ;;  %v16864_v38 = vsub.f32 %v16794_v50, %v20610_v5  ;;  %v16882_v5 = vsub.f32 %v16808_v31, %v20955_v33  ;;  %v16916_v41 = vand.u32 4294901760, %v2297_v3 }
 0x1f4   : > { %v16885_v29 = vsub.f32 %v4192_v0, %v16843_v18  ;;  %v16900_v31 = vsub.f32 %v4195_v37, %v16857_v35  ;;  %20960 = vst [vmem:[#allocation47_spill] sm:$0xff] %v16907_v25  ;;  %v16926_v0 = vand.u32 4294901760, %v4201_v27  ;;  %v16950_v35 = vand.u32 4294901760, %v2300_v63 }
 0x1f5   : > { %20936 = vst [vmem:[#allocation24_spill] sm:$0xff] %v16759_v4  ;;  %v20609_v19 = vand.u32 4294901760, %v16759_v4  ;;  %20963 = vst [vmem:[#allocation50_spill] sm:$0xff] %v16916_v41  ;;  %v20983_v9 = vand.u32 4294901760, %v16907_v25 }
 0x1f6   : > { %20956 = vst [vmem:[#allocation43_spill] sm:$0xff] %v16885_v29  ;;  %20959 = vst [vmem:[#allocation46_spill] sm:$0xff] %v16900_v31 }
 0x1f7   : > { %v16828_v36 = vsub.f32 %v16759_v4, %v20609_v19  ;;  %v4143_v19 = vld [vmem:[%s16325_s26 + $0x58] sm:$0xff]  ;;  %20964 = vst [vmem:[#allocation51_spill] sm:$0xff] %v16926_v0  ;;  %20971 = vst [vmem:[#allocation53_spill] sm:$0xff] %v16950_v35 }
 0x1f8   : > { %v4198_v50 = vsel %vm1118_vm3, %v4143_v19, 0  ;;  %v2240_v19 = vld [vmem:[%s16320_s24 + $0x78] sm:$0xff] }
 0x1f9   : > { %v16914_v37 = vand.u32 4294901760, %v4198_v50 }
 0x1fb   : > { %20962 = vst [vmem:[#allocation49_spill] sm:$0xff] %v16914_v37  ;;  %v16958_v20 = vsub.f32 %v4198_v50, %v16914_v37  ;;  %v16977_v50 = vsub.f32 %v4201_v27, %v16926_v0  ;;  %v20982_v27 = vand.u32 4294901760, %v16815_v58  ;;  %v20986_v58 = vand.u32 4294901760, %v16803_v1  ;;  %v4150_v0 = vld [vmem:[%s16325_s26 + $0x90] sm:$0xff] }
 0x1fc   : > { %v20993_v37 = vand.u32 4294901760, %v16818_v59  ;;  %v2247_v59 = vld [vmem:[%s16320_s24 + $0xb0] sm:$0xff] }
 0x1fd   : > { %20972 = vst [vmem:[#allocation54_spill] sm:$0xff] %v16958_v20  ;;  %20976 = vst [vmem:[#allocation56_spill] sm:$0xff] %v16977_v50 }
 0x2b1   : > { %v2221_v6 = vpop.f32.mrb[6].mxu0 }
 0x2b2   : > { %v16896_v4 = vand.u32 4294901760, %v2221_v6  ;;  %v13256_v33 = vpop.f32.mrb[7].mxu0 }
 0x2b3   : > { %v4145_v33 = vld [vmem:[%s16325_s26 + $0x68] sm:$0xff] }
 0x2b4   : > { %v16910_v12 = vsub.f32 %v2221_v6, %v16896_v4  ;;  %13257 = vmatprep.subr.mxu1 %v16896_v4  ;;  %13707 = vmatprep.subr.mxu0 %v16896_v4  ;;  %v16939_v6 = vsub.f32 %v16855_v39, %v20968_v46  ;;  %v4204_v11 = vsel %vm1118_vm3, %v4145_v33, 0  ;;  %v2303_v46 = vsel %vm1118_vm3, %v2240_v19, 0  ;;  %v2242_v39 = vld [vmem:[%s16320_s24 + $0x88] sm:$0xff] }
 0x2b5   : > { %13258 = vmatpush3.msra.mxu1 %v16896_v4  ;;  %13708 = vmatpush3.msra.mxu0 %v16896_v4  ;;  %v20974_v33 = vand.u32 4294901760, %v16888_v14 }
 0x2b6   : > { %20961 = vst [vmem:[#allocation48_spill] sm:$0xff] %v16910_v12  ;;  %13260 = vmatmul.mubr.f32.vlgmr.msra.gmra.mrb[6].mxu1 %v20965_v2  ;;  %13710 = vmatmul.mubr.f32.vlgmr.msra.gmra.mrb[8].mxu0 %v20966_v45  ;;  %v16934_v8 = vand.u32 4294901760, %v16910_v12  ;;  %v20970_v2 = vand.u32 4294901760, %v16748_v60  ;;  %v20975_v45 = vand.u32 4294901760, %v16891_v62 }
 0x2b7   : > { %13262 = vmatprep.mubr.f32.mxu1 %v20969_v51  ;;  %v16961_v51 = vsub.f32 %v2297_v3, %v16916_v41  ;;  %v16969_v19 = vsub.f32 %v16888_v14, %v20974_v33  ;;  %v4207_v3 = vsel %vm1118_vm3, %v4146_v24, 0  ;;  %v16986_v33 = vand.u32 4294901760, %v4204_v11 }
 0x2b8   : > { %20967 = vst [vmem:[#allocation52_spill] sm:$0xff] %v16934_v8  ;;  %13712 = vmatprep.mubr.f32.mxu0 %v20970_v2  ;;  %13757 = vmatprep.subr.mxu0 %v16934_v8  ;;  %v2743_v56 = vsub.f32 %v16910_v12, %v16934_v8  ;;  %v4147_v2 = vld [vmem:[%s16325_s26 + $0x78] sm:$0xff]  ;;  %v16974_v60 = vsub.f32 %v16891_v62, %v20975_v45  ;;  %v16988_v14 = vand.u32 4294901760, %v2303_v46  ;;  %v2309_v45 = vsel %vm1118_vm3, %v2242_v39, 0  ;;  %v2243_v39 = vld [vmem:[%s16320_s24 + $0x90] sm:$0xff]  ;;  %v4149_v62 = vld [vmem:[%s16325_s26 + $0x88] sm:$0xff] }
 0x2b9   : > { %20973 = vst [vmem:[#allocation55_spill] sm:$0xff] %v16961_v51  ;;  %13758 = vmatpush3.msra.mxu0 %v16934_v8  ;;  %v20978_v8 = vand.u32 4294901760, %v16756_v53  ;;  %20980 = vst [vmem:[#allocation58_spill] sm:$0xff] %v16986_v33  ;;  %v16997_v24 = vsub.f32 %v16907_v25, %v20983_v9  ;;  %v2523_v25 = vand.u32 4294901760, %v16969_v19  ;;  %v20989_v9 = vand.u32 4294901760, %v16828_v36 }
 0x2ba   : > { %13263 = vmatmul.mubr.f32.gmra.mrb[8].mxu1 %v20977_v21  ;;  %v16984_v41 = vand.u32 4294901760, %v2743_v56  ;;  %20981 = vst [vmem:[#allocation59_spill] sm:$0xff] %v16988_v14  ;;  %13807 = vmatprep.subr.mxu0 %v16896_v4  ;;  %v4210_v56 = vsel %vm1118_vm3, %v4147_v2, 0  ;;  %v17003_v21 = vand.u32 4294901760, %v2306_v55  ;;  %v2244_v2 = vld [vmem:[%s16320_s24 + $0x98] sm:$0xff]  ;;  %v17027_v53 = vsub.f32 %v4204_v11, %v16986_v33 }
 0x2bb   : > { %13713 = vmatmul.mubr.f32.gmra.mrb[10].mxu0 %v20978_v8  ;;  %13265 = vmatprep.mubr.f32.mxu1 %v20982_v27  ;;  %v17000_v8 = vsub.f32 %v2300_v63, %v16950_v35  ;;  %v2513_v27 = vand.u32 4294901760, %v16939_v6  ;;  %v17012_v63 = vand.u32 4294901760, %v4207_v3  ;;  %v17020_v35 = vand.u32 4294901760, %v2309_v45  ;;  %v2245_v6 = vld [vmem:[%s16320_s24 + $0xa0] sm:$0xff] }
 0x2bc   : > { %20979 = vst [vmem:[#allocation57_spill] sm:$0xff] %v16984_v41  ;;  %20985 = vst [vmem:[#allocation61_spill] sm:$0xff] %v17003_v21  ;;  %13307 = vmatprep.subr.mxu1 %v16984_v41  ;;  %13715 = vmatprep.mubr.f32.mxu0 %v20986_v58  ;;  %v4148_v58 = vld [vmem:[%s16325_s26 + $0x80] sm:$0xff]  ;;  %v17032_v19 = vand.u32 4294901760, %v4210_v56  ;;  %v2312_v1 = vsel %vm1118_vm3, %v2243_v39, 0  ;;  %v20994_v36 = vand.u32 4294901760, %v16864_v38  ;;  %v17044_v33 = vsub.f32 %v2306_v55, %v17003_v21 }
 0x2bd   : > { %20984 = vst [vmem:[#allocation60_spill] sm:$0xff] %v17000_v8  ;;  %20987 = vst [vmem:[#allocation62_spill] sm:$0xff] %v17012_v63  ;;  %13308 = vmatpush3.msra.mxu1 %v16984_v41  ;;  %v17030_v41 = vsub.f32 %v2303_v46, %v16988_v14  ;;  %v2315_v46 = vsel %vm1118_vm3, %v2244_v2, 0  ;;  %v20996_v14 = vand.u32 4294901760, %v16821_v49  ;;  %v20997_v39 = vand.u32 4294901760, %v16961_v51  ;;  %v4151_v49 = vld [vmem:[%s16325_s26 + $0x98] sm:$0xff] }
 0x2be   : > { %20988 = vst [vmem:[#allocation63_spill] sm:$0xff] %v17020_v35  ;;  %13266 = vmatmul.mubr.f32.gmra.mrb[10].mxu1 %v20989_v9  ;;  %13357 = vmatprep.subr.mxu1 %v16910_v12  ;;  %20990 = vst [vmem:[#allocation64_spill] sm:$0xff] %v17027_v53  ;;  %v17055_v38 = vsub.f32 %v4207_v3, %v17012_v63  ;;  %v2318_v55 = vsel %vm1118_vm3, %v2245_v6, 0  ;;  %v17060_v9 = vsub.f32 %v2309_v45, %v17020_v35  ;;  %v2246_v45 = vld [vmem:[%s16320_s24 + $0xa8] sm:$0xff] }
 0x2bf   : > { %20991 = vst [vmem:[#allocation65_spill] sm:$0xff] %v17030_v41  ;;  %20992 = vst [vmem:[#allocation66_spill] sm:$0xff] %v17032_v19  ;;  %13716 = vmatmul.mubr.f32.gmra.mrb[12].mxu0 %v20993_v37  ;;  %13268 = vmatprep.mubr.f32.mxu1 %v20994_v36  ;;  %v17052_v37 = vsub.f32 %v16961_v51, %v20997_v39  ;;  %v4213_v36 = vsel %vm1118_vm3, %v4148_v58, 0  ;;  %v4216_v2 = vsel %vm1118_vm3, %v4149_v62, 0  ;;  %v17063_v11 = vand.u32 4294901760, %v2312_v1 }
 0x2c0   : > { %20995 = vst [vmem:[#allocation67_spill] sm:$0xff] %v17044_v33  ;;  %13718 = vmatprep.mubr.f32.mxu0 %v20996_v14  ;;  %20998 = vst [vmem:[#allocation68_spill] sm:$0xff] %v17055_v38  ;;  %v4219_v14 = vsel %vm1118_vm3, %v4150_v0, 0  ;;  %v21001_v39 = vand.u32 4294901760, %v16869_v57  ;;  %v17071_v58 = vsub.f32 %v4210_v56, %v17032_v19  ;;  %v17073_v6 = vand.u32 4294901760, %v2315_v46 }
 0x2c1   : > { %20999 = vst [vmem:[#allocation69_spill] sm:$0xff] %v17060_v9  ;;  %21000 = vst [vmem:[#allocation70_spill] sm:$0xff] %v17063_v11  ;;  %v21004_v62 = vand.u32 4294901760, %v16840_v48  ;;  %v21005_v0 = vand.u32 4294901760, %v16882_v5  ;;  %v21006_v57 = vand.u32 4294901760, %v17000_v8  ;;  %v17087_v56 = vand.u32 4294901760, %v4213_v36 }
 0x2c2   : > { %13269 = vmatmul.mubr.f32.gmra.mrb[12].mxu1 %v21001_v39  ;;  %21002 = vst [vmem:[#allocation71_spill] sm:$0xff] %v17071_v58  ;;  %21003 = vst [vmem:[#allocation72_spill] sm:$0xff] %v17073_v6  ;;  %v17090_v51 = vand.u32 4294901760, %v2318_v55  ;;  %v21009_v35 = vand.u32 4294901760, %v16872_v16  ;;  %v17098_v48 = vand.u32 4294901760, %v4219_v14  ;;  %v17102_v3 = vsub.f32 %v2312_v1, %v17063_v11 }
 0x2c3   : > { %13719 = vmatmul.mubr.f32.gmra.mrb[14].mxu0 %v21004_v62  ;;  %13271 = vmatprep.mubr.f32.mxu1 %v21005_v0  ;;  %v17084_v39 = vsub.f32 %v17000_v8, %v21006_v57  ;;  %21007 = vst [vmem:[#allocation73_spill] sm:$0xff] %v17087_v56  ;;  %v2553_v62 = vand.u32 4294901760, %v17052_v37  ;;  %v17096_v0 = vand.u32 4294901760, %v4216_v2  ;;  %v4152_v8 = vld [vmem:[%s16325_s26 + $0xa0] sm:$0xff]  ;;  %v2321_v16 = vsel %vm1118_vm3, %v2246_v45, 0 }
 0x2c4   : > { %21008 = vst [vmem:[#allocation74_spill] sm:$0xff] %v17090_v51  ;;  %13721 = vmatprep.mubr.f32.mxu0 %v21009_v35  ;;  %21011 = vst [vmem:[#allocation76_spill] sm:$0xff] %v17098_v48  ;;  %v2324_v35 = vsel %vm1118_vm3, %v2247_v59, 0  ;;  %v21013_v37 = vand.u32 4294901760, %v17030_v41  ;;  %v17114_v57 = vsub.f32 %v2315_v46, %v17073_v6  ;;  %v4222_v1 = vsel %vm1118_vm3, %v4151_v49, 0  ;;  %v4153_v46 = vld [vmem:[%s16325_s26 + $0xa8] sm:$0xff] }
 0x2c5   : > { %21010 = vst [vmem:[#allocation75_spill] sm:$0xff] %v17096_v0  ;;  %21012 = vst [vmem:[#allocation77_spill] sm:$0xff] %v17102_v3  ;;  %v21015_v11 = vand.u32 4294901760, %v16885_v29  ;;  %v2563_v45 = vand.u32 4294901760, %v17084_v39  ;;  %v21016_v59 = vand.u32 4294901760, %v17044_v33  ;;  %v17129_v19 = vsub.f32 %v2318_v55, %v17090_v51  ;;  %v2249_v49 = vld [vmem:[%s16320_s24 + $0xc0] sm:$0xff] }
 0x2c6   : > { %13272 = vmatmul.mubr.f32.gmra.mrb[14].mxu1 %v2513_v27  ;;  %v17110_v5 = vsub.f32 %v17030_v41, %v21013_v37  ;;  %21014 = vst [vmem:[#allocation78_spill] sm:$0xff] %v17114_v57  ;;  %v17126_v37 = vsub.f32 %v4213_v36, %v17087_v56  ;;  %v2248_v41 = vld [vmem:[%s16320_s24 + $0xb8] sm:$0xff]  ;;  %v21019_v29 = vand.u32 4294901760, %v16900_v31  ;;  %v17140_v39 = vand.u32 4294901760, %v2321_v16 }
 0x2c7   : > { %13722 = vmatmul.mubr.f32.gmra.mrb[16].mxu0 %v21015_v11  ;;  %13274 = vmatprep.mubr.f32.mxu1 %v2523_v25  ;;  %v17123_v27 = vsub.f32 %v17044_v33, %v21016_v59  ;;  %21018 = vst [vmem:[#allocation80_spill] sm:$0xff] %v17129_v19  ;;  %v17137_v25 = vsub.f32 %v4216_v2, %v17096_v0  ;;  %v4225_v11 = vsel %vm1118_vm3, %v4152_v8, 0  ;;  %v17142_v59 = vand.u32 4294901760, %v2324_v35 }
 0x2c8   : > { %21017 = vst [vmem:[#allocation79_spill] sm:$0xff] %v17126_v37  ;;  %13724 = vmatprep.mubr.f32.mxu0 %v21019_v29  ;;  %21021 = vst [vmem:[#allocation82_spill] sm:$0xff] %v17140_v39  ;;  %v21023_v36 = vand.u32 4294901760, %v17060_v9  ;;  %v17151_v51 = vsub.f32 %v4219_v14, %v17098_v48  ;;  %v17153_v29 = vand.u32 4294901760, %v4222_v1  ;;  %v21026_v2 = vand.u32 4294901760, %v16974_v60 }
 0x2c9   : > { %21020 = vst [vmem:[#allocation81_spill] sm:$0xff] %v17137_v25  ;;  %21022 = vst [vmem:[#allocation83_spill] sm:$0xff] %v17142_v59  ;;  %v4228_v31 = vsel %vm1118_vm3, %v4153_v46, 0  ;;  %v2327_v6 = vsel %vm1118_vm3, %v2248_v41, 0  ;;  %v21027_v33 = vand.u32 4294901760, %v16958_v20  ;;  %v21028_v14 = vand.u32 4294901760, %v16997_v24 }
 0x2ca   : > { %v17147_v55 = vsub.f32 %v17060_v9, %v21023_v36  ;;  %21024 = vst [vmem:[#allocation84_spill] sm:$0xff] %v17151_v51  ;;  %21025 = vst [vmem:[#allocation85_spill] sm:$0xff] %v17153_v29  ;;  %13275 = vmatmul.mubr.f32.gmra.mrb[16].mxu1 %v21026_v2  ;;  %v2330_v36 = vsel %vm1118_vm3, %v2249_v49, 0  ;;  %v2573_v60 = vand.u32 4294901760, %v17110_v5  ;;  %v17168_v9 = vand.u32 4294901760, %v4225_v11  ;;  %v4154_v5 = vld [vmem:[%s16325_s26 + $0xb0] sm:$0xff] }
 0x2cb   : > { %13725 = vmatmul.mubr.f32.gmra.mrb[18].mxu0 %v21027_v33  ;;  %13277 = vmatprep.mubr.f32.mxu1 %v21028_v14  ;;  %v21029_v41 = vand.u32 4294901760, %v16977_v50  ;;  %v2583_v46 = vand.u32 4294901760, %v17123_v27  ;;  %v17175_v24 = vsub.f32 %v2321_v16, %v17140_v39  ;;  %v17178_v49 = vsub.f32 %v2324_v35, %v17142_v59  ;;  %v2250_v14 = vld [vmem:[%s16320_s24 + $0xc8] sm:$0xff]  ;;  %v2251_v27 = vld [vmem:[%s16320_s24 + $0xd0] sm:$0xff] }
 0x2cc   : > { %v17183_v2 = vsub.f32 %v4222_v1, %v17153_v29  ;;  %v17185_v8 = vand.u32 4294901760, %v4228_v31  ;;  %v17187_v20 = vand.u32 4294901760, %v2327_v6  ;;  %v17190_v50 = vand.u32 4294901760, %v2330_v36 }
 0x2cd   : > { %13727 = vmatprep.mubr.f32.mxu0 %v21029_v41  ;;  %21030 = vst [vmem:[#allocation86_spill] sm:$0xff] %v17175_v24  ;;  %21031 = vst [vmem:[#allocation87_spill] sm:$0xff] %v17178_v49  ;;  %v4155_v41 = vld [vmem:[%s16325_s26 + $0xb8] sm:$0xff]  ;;  %v2593_v16 = vand.u32 4294901760, %v17147_v55  ;;  %v21036_v35 = vand.u32 4294901760, %v17102_v3  ;;  %v21037_v1 = vand.u32 4294901760, %v17114_v57  ;;  %v17211_v48 = vsub.f32 %v4225_v11, %v17168_v9 }
 0x2ce   : > { %21032 = vst [vmem:[#allocation88_spill] sm:$0xff] %v17183_v2  ;;  %21033 = vst [vmem:[#allocation89_spill] sm:$0xff] %v17185_v8  ;;  %13278 = vmatmul.mubr.f32.gmra.mrb[18].mxu1 %v2553_v62  ;;  %v21038_v29 = vand.u32 4294901760, %v17027_v53  ;;  %v21039_v62 = vand.u32 4294901760, %v17129_v19  ;;  %v2333_v59 = vsel %vm1118_vm3, %v2250_v14, 0  ;;  %v4234_v53 = vsel %vm1118_vm3, %v4155_v41, 0 }
 0x2cf   : > { %21034 = vst [vmem:[#allocation90_spill] sm:$0xff] %v17187_v20  ;;  %21035 = vst [vmem:[#allocation91_spill] sm:$0xff] %v17190_v50  ;;  %v2602_v33 = vsub.f32 %v17102_v3, %v21036_v35  ;;  %v17201_v39 = vsub.f32 %v17114_v57, %v21037_v1  ;;  %13280 = vmatprep.mubr.f32.mxu1 %v2563_v45  ;;  %v4231_v35 = vsel %vm1118_vm3, %v4154_v5, 0  ;;  %v21041_v1 = vand.u32 4294901760, %v17055_v38  ;;  %v4156_v38 = vld [vmem:[%s16325_s26 + $0xc0] sm:$0xff]  ;;  %v4157_v11 = vld [vmem:[%s16325_s26 + $0xc8] sm:$0xff] }
 0x2d0   : > { %13728 = vmatmul.mubr.f32.gmra.mrb[20].mxu0 %v21038_v29  ;;  %v17208_v55 = vsub.f32 %v17129_v19, %v21039_v62  ;;  %21040 = vst [vmem:[#allocation92_spill] sm:$0xff] %v17211_v48  ;;  %v2336_v62 = vsel %vm1118_vm3, %v2251_v27, 0  ;;  %v2252_v19 = vld [vmem:[%s16320_s24 + $0xd8] sm:$0xff]  ;;  %v17224_v5 = vsub.f32 %v4228_v31, %v17185_v8  ;;  %v17227_v14 = vsub.f32 %v2327_v6, %v17187_v20  ;;  %v2253_v29 = vld [vmem:[%s16320_s24 + $0xe0] sm:$0xff]  ;;  %v2254_v20 = vld [vmem:[%s16320_s24 + $0xe8] sm:$0xff] }
 0x2d1   : > { %13730 = vmatprep.mubr.f32.mxu0 %v21041_v1  ;;  %v17230_v1 = vsub.f32 %v2330_v36, %v17190_v50  ;;  %v2603_v45 = vand.u32 4294901760, %v2602_v33  ;;  %v2613_v41 = vand.u32 4294901760, %v17201_v39  ;;  %v17234_v27 = vand.u32 4294901760, %v4231_v35  ;;  %v2255_v8 = vld [vmem:[%s16320_s24 + $0xf0] sm:$0xff] }
 0x2d2   : > { %21042 = vst [vmem:[#allocation93_spill] sm:$0xff] %v17224_v5  ;;  %21043 = vst [vmem:[#allocation94_spill] sm:$0xff] %v17227_v14  ;;  %13281 = vmatmul.mubr.f32.gmra.mrb[20].mxu1 %v2573_v60  ;;  %v17237_v57 = vand.u32 4294901760, %v2333_v59  ;;  %v21047_v31 = vand.u32 4294901760, %v17071_v58  ;;  %v17242_v36 = vand.u32 4294901760, %v4234_v53  ;;  %v17245_v60 = vand.u32 4294901760, %v2336_v62 }
 0x2d3   : > { %21044 = vst [vmem:[#allocation95_spill] sm:$0xff] %v17230_v1  ;;  %21045 = vst [vmem:[#allocation96_spill] sm:$0xff] %v17234_v27  ;;  %13283 = vmatprep.mubr.f32.mxu1 %v2583_v46  ;;  %v2339_v39 = vsel %vm1118_vm3, %v2252_v19, 0  ;;  %v21050_v33 = vand.u32 4294901760, %v17126_v37  ;;  %v2623_v3 = vand.u32 4294901760, %v17208_v55  ;;  %v21051_v58 = vand.u32 4294901760, %v17175_v24 }
 0x2d4   : > { %21046 = vst [vmem:[#allocation97_spill] sm:$0xff] %v17237_v57  ;;  %13731 = vmatmul.mubr.f32.gmra.mrb[22].mxu0 %v21047_v31  ;;  %21048 = vst [vmem:[#allocation98_spill] sm:$0xff] %v17242_v36  ;;  %v21052_v31 = vand.u32 4294901760, %v17178_v49  ;;  %v2342_v50 = vsel %vm1118_vm3, %v2253_v29, 0  ;;  %v4237_v55 = vsel %vm1118_vm3, %v4156_v38, 0  ;;  %v4240_v29 = vsel %vm1118_vm3, %v4157_v11, 0 }
 0x2d5   : > { %21049 = vst [vmem:[#allocation99_spill] sm:$0xff] %v17245_v60  ;;  %13733 = vmatprep.mubr.f32.mxu0 %v21050_v33  ;;  %v2632_v46 = vsub.f32 %v17175_v24, %v21051_v58  ;;  %v17265_v58 = vsub.f32 %v4231_v35, %v17234_v27  ;;  %v17268_v24 = vsub.f32 %v2333_v59, %v17237_v57  ;;  %v21056_v19 = vand.u32 4294901760, %v17137_v25  ;;  %v4159_v35 = vld [vmem:[%s16325_s26 + $0xd8] sm:$0xff] }
 0x2d6   : > { %v2642_v6 = vsub.f32 %v17178_v49, %v21052_v31  ;;  %13284 = vmatmul.mubr.f32.gmra.mrb[22].mxu1 %v2593_v16  ;;  %v4158_v31 = vld [vmem:[%s16325_s26 + $0xd0] sm:$0xff]  ;;  %v17272_v49 = vand.u32 4294901760, %v2339_v39  ;;  %v17277_v38 = vsub.f32 %v4234_v53, %v17242_v36  ;;  %v17280_v16 = vsub.f32 %v2336_v62, %v17245_v60  ;;  %v2256_v53 = vld [vmem:[%s16320_s24 + $0xf8] sm:$0xff]  ;;  %s16196_s24 = smov 64  }
 0x2d7   : > { %21053 = vst [vmem:[#allocation100_spill] sm:$0xff] %v17265_v58  ;;  %21054 = vst [vmem:[#allocation101_spill] sm:$0xff] %v17268_v24  ;;  %13286 = vmatprep.mubr.f32.mxu1 %v2603_v45  ;;  %v17283_v33 = vand.u32 4294901760, %v2342_v50  ;;  %v2345_v59 = vsel %vm1118_vm3, %v2254_v20, 0  ;;  %v21059_v11 = vand.u32 4294901760, %v17151_v51  ;;  %v2633_v37 = vand.u32 4294901760, %v2632_v46 }
 0x2d8   : > { %21055 = vst [vmem:[#allocation102_spill] sm:$0xff] %v17272_v49  ;;  %13734 = vmatmul.mubr.f32.gmra.mrb[24].mxu0 %v21056_v19  ;;  %21057 = vst [vmem:[#allocation103_spill] sm:$0xff] %v17277_v38  ;;  %v2643_v57 = vand.u32 4294901760, %v2642_v6  ;;  %v17288_v25 = vand.u32 4294901760, %v4237_v55  ;;  %v2348_v45 = vsel %vm1118_vm3, %v2255_v8, 0  ;;  %v21060_v19 = vand.u32 4294901760, %v17227_v14 }
 0x2d9   : > { %21058 = vst [vmem:[#allocation104_spill] sm:$0xff] %v17283_v33  ;;  %13736 = vmatprep.mubr.f32.mxu0 %v21059_v11  ;;  %v21061_v60 = vand.u32 4294901760, %v17230_v1  ;;  %v17298_v27 = vand.u32 4294901760, %v4240_v29  ;;  %v4243_v20 = vsel %vm1118_vm3, %v4158_v31, 0  ;;  %v17303_v46 = vsub.f32 %v2339_v39, %v17272_v49  ;;  %v4160_v11 = vld [vmem:[%s16325_s26 + $0xe0] sm:$0xff] }
 0x2da   : > { %v2652_v62 = vsub.f32 %v17227_v14, %v21060_v19  ;;  %13287 = vmatmul.mubr.f32.gmra.mrb[24].mxu1 %v2613_v41  ;;  %v4246_v8 = vsel %vm1118_vm3, %v4159_v35, 0  ;;  %v17307_v51 = vand.u32 4294901760, %v2345_v59  ;;  %v21064_v19 = vand.u32 4294901760, %v17183_v2  ;;  %v4161_v14 = vld [vmem:[%s16325_s26 + $0xe8] sm:$0xff] }
 0x2db   : > { %v2662_v36 = vsub.f32 %v17230_v1, %v21061_v60  ;;  %21062 = vst [vmem:[#allocation105_spill] sm:$0xff] %v17298_v27  ;;  %13289 = vmatprep.mubr.f32.mxu1 %v2623_v3  ;;  %v17313_v31 = vsub.f32 %v2342_v50, %v17283_v33  ;;  %v17315_v41 = vand.u32 4294901760, %v2348_v45  ;;  %v2351_v39 = vsel %vm1118_vm3, %v2256_v53, 0 }
 0x2dc   : > { %21063 = vst [vmem:[#allocation106_spill] sm:$0xff] %v17307_v51  ;;  %13737 = vmatmul.mubr.f32.gmra.mrb[26].mxu0 %v21064_v19  ;;  %v21066_v35 = vand.u32 4294901760, %v17211_v48  ;;  %v17323_v19 = vsub.f32 %v4237_v55, %v17288_v25  ;;  %v17325_v3 = vand.u32 4294901760, %v4243_v20  ;;  %v2653_v60 = vand.u32 4294901760, %v2652_v62  ;;  %v4162_v48 = vld [vmem:[%s16325_s26 + $0xf0] sm:$0xff] }
 0x2dd   : > { %21065 = vst [vmem:[#allocation107_spill] sm:$0xff] %v17315_v41  ;;  %v17328_v50 = vsub.f32 %v4240_v29, %v17298_v27  ;;  %v17330_v1 = vand.u32 4294901760, %v4246_v8  ;;  %v4249_v53 = vsel %vm1118_vm3, %v4160_v11, 0  ;;  %v17339_v55 = vsub.f32 %v2345_v59, %v17307_v51 }
 0x2de   : > { %13739 = vmatprep.mubr.f32.mxu0 %v21066_v35  ;;  %21067 = vst [vmem:[#allocation108_spill] sm:$0xff] %v17323_v19  ;;  %21068 = vst [vmem:[#allocation109_spill] sm:$0xff] %v17325_v3  ;;  %13290 = vmatmul.mubr.f32.gmra.mrb[26].mxu1 %v2633_v37  ;;  %v21071_v35 = vand.u32 4294901760, %v17268_v24  ;;  %v17342_v62 = vand.u32 4294901760, %v2351_v39  ;;  %v21073_v29 = vand.u32 4294901760, %v17224_v5  ;;  %v2663_v11 = vand.u32 4294901760, %v2662_v36 }
 0x2df   : > { %21069 = vst [vmem:[#allocation110_spill] sm:$0xff] %v17328_v50  ;;  %21070 = vst [vmem:[#allocation111_spill] sm:$0xff] %v17330_v1  ;;  %13292 = vmatprep.mubr.f32.mxu1 %v2643_v57  ;;  %v21074_v37 = vand.u32 4294901760, %v17280_v16  ;;  %v17351_v2 = vsub.f32 %v2348_v45, %v17315_v41  ;;  %v21075_v59 = vand.u32 4294901760, %v17265_v58  ;;  %v17357_v51 = vsub.f32 %v4243_v20, %v17325_v3 }
 0x2e0   : > { %v2672_v6 = vsub.f32 %v17268_v24, %v21071_v35  ;;  %21072 = vst [vmem:[#allocation112_spill] sm:$0xff] %v17342_v62  ;;  %13740 = vmatmul.mubr.f32.gmra.mrb[28].mxu0 %v21073_v29  ;;  %v17359_v29 = vand.u32 4294901760, %v4249_v53  ;;  %v4252_v57 = vsel %vm1118_vm3, %v4161_v14, 0  ;;  %v4255_v45 = vsel %vm1118_vm3, %v4162_v48, 0  ;;  %v4163_v35 = vld [vmem:[%s16325_s26 + $0xf8] sm:$0xff] }
 0x2e1   : > { %v2682_v33 = vsub.f32 %v17280_v16, %v21074_v37  ;;  %13742 = vmatprep.mubr.f32.mxu0 %v21075_v59  ;;  %21076 = vst [vmem:[#allocation113_spill] sm:$0xff] %v17357_v51  ;;  %v17364_v37 = vsub.f32 %v4246_v8, %v17330_v1  ;;  %v21079_v59 = vand.u32 4294901760, %v17303_v46  ;;  %v17373_v5 = vsub.f32 %v2351_v39, %v17342_v62 }
 0x2e2   : > { %21077 = vst [vmem:[#allocation114_spill] sm:$0xff] %v17359_v29  ;;  %13293 = vmatmul.mubr.f32.gmra.mrb[28].mxu1 %v2653_v60  ;;  %v2673_v58 = vand.u32 4294901760, %v2672_v6  ;;  %v21080_v14 = vand.u32 4294901760, %v17277_v38  ;;  %v21081_v36 = vand.u32 4294901760, %v17313_v31  ;;  %v17380_v60 = vand.u32 4294901760, %v4252_v57 }
 0x2e3   : > { %21078 = vst [vmem:[#allocation115_spill] sm:$0xff] %v17364_v37  ;;  %v2692_v24 = vsub.f32 %v17303_v46, %v21079_v59  ;;  %13295 = vmatprep.mubr.f32.mxu1 %v2663_v11  ;;  %v2683_v8 = vand.u32 4294901760, %v2682_v33  ;;  %v21082_v59 = vand.u32 4294901760, %v17323_v19  ;;  %v17387_v39 = vsub.f32 %v4249_v53, %v17359_v29 }
 0x2e4   : > { %13743 = vmatmul.mubr.f32.gmra.mrb[30].mxu0 %v21080_v14  ;;  %v2702_v48 = vsub.f32 %v17313_v31, %v21081_v36  ;;  %v17389_v38 = vand.u32 4294901760, %v4255_v45  ;;  %v4258_v33 = vsel %vm1118_vm3, %v4163_v35, 0  ;;  %v21085_v14 = vand.u32 4294901760, %v17339_v55 }
 0x2e5   : > { %13745 = vmatprep.mubr.f32.mxu0 %v21082_v59  ;;  %21083 = vst [vmem:[#allocation116_spill] sm:$0xff] %v17387_v39  ;;  %v2693_v11 = vand.u32 4294901760, %v2692_v24  ;;  %v21086_v59 = vand.u32 4294901760, %v17328_v50  ;;  %v17400_v20 = vsub.f32 %v4252_v57, %v17380_v60  ;;  %v21088_v35 = vand.u32 4294901760, %v17351_v2 }
 0x2e6   : > { %21084 = vst [vmem:[#allocation117_spill] sm:$0xff] %v17389_v38  ;;  %13296 = vmatmul.mubr.f32.gmra.mrb[30].mxu1 %v2673_v58  ;;  %v2712_v6 = vsub.f32 %v17339_v55, %v21085_v14  ;;  %v2703_v53 = vand.u32 4294901760, %v2702_v48  ;;  %v17405_v58 = vand.u32 4294901760, %v4258_v33  ;;  %v21089_v36 = vand.u32 4294901760, %v17357_v51  ;;  %v21116_v51 = vld [vmem:[#allocation89_spill] sm:$0xff] }
 0x2e7   : > { %13298 = vmatprep.mubr.f32.mxu1 %v2683_v8  ;;  %21087 = vst [vmem:[#allocation118_spill] sm:$0xff] %v17400_v20  ;;  %v2722_v24 = vsub.f32 %v17351_v2, %v21088_v35  ;;  %v20777_v14 = vand.u32 4294901760, %v17387_v39  ;;  %v17411_v19 = vsub.f32 %v4255_v45, %v17389_v38  ;;  %v21091_v48 = vand.u32 4294901760, %v17373_v5  ;;  %v21114_v39 = vld [vmem:[#allocation82_spill] sm:$0xff] }
 0x2e8   : > { %13746 = vmatmul.mubr.f32.gmra.mrb[32].mxu0 %v21086_v59  ;;  %v2713_v8 = vand.u32 4294901760, %v2712_v6  ;;  %v21092_v59 = vand.u32 4294901760, %v17364_v37  ;;  %v20776_v35 = vand.u32 4294901760, %v17400_v20  ;;  %v21113_v20 = vld [vmem:[#allocation85_spill] sm:$0xff]  ;;  %v21115_v37 = vld [vmem:[#allocation83_spill] sm:$0xff] }
 0x2e9   : > { %13748 = vmatprep.mubr.f32.mxu0 %v21089_v36  ;;  %21090 = vst [vmem:[#allocation119_spill] sm:$0xff] %v17411_v19  ;;  %v2732_v57 = vsub.f32 %v17373_v5, %v21091_v48  ;;  %v2723_v50 = vand.u32 4294901760, %v2722_v24  ;;  %v17420_v36 = vsub.f32 %v4258_v33, %v17405_v58  ;;  %v20775_v45 = vand.u32 4294901760, %v17411_v19  ;;  %v21112_v19 = vld [vmem:[#allocation74_spill] sm:$0xff] }
 0x2ea   : > { %13299 = vmatmul.mubr.f32.gmra.mrb[32].mxu1 %v2693_v11  ;;  %v21095_v33 = vmov 0.0|0.0  }
 0x2eb   : > { %13301 = vmatprep.mubr.f32.mxu1 %v2703_v53  ;;  %21093 = vst [vmem:[#allocation120_spill] sm:$0xff] %v17420_v36  ;;  %v2733_v6 = vand.u32 4294901760, %v2732_v57  ;;  %v20774_v11 = vand.u32 4294901760, %v17420_v36  ;;  %v21111_v36 = vld [vmem:[#allocation72_spill] sm:$0xff] }
 0x2ec   : > { %13749 = vmatmul.mubr.f32.gmra.mrb[34].mxu0 %v21092_v59  ;;  %v21098_v59 = vld [vmem:[#allocation40_spill] sm:$0xff] }
 0x2ed   : > { %13751 = vmatprep.mubr.f32.mxu0 %v20777_v14  ;;  %v21106_v14 = vld [vmem:[#allocation59_spill] sm:$0xff] }
 0x2ee   : > { %13302 = vmatmul.mubr.f32.gmra.mrb[34].mxu1 %v2713_v8 }
 0x2ef   : > { %13304 = vmatprep.mubr.f32.mxu1 %v2723_v50  ;;  %v17442_v50 = vpop.f32.mrb[0].mxu1 }
 0x2f0   : > { %13752 = vmatmul.mubr.f32.gmra.mrb[36].mxu0 %v20776_v35  ;;  %21094 = vst [vmem:[#allocation121_spill] sm:$0xff] %v17442_v50  ;;  %v13026_v53 = vpop.f32.mrb[1].mxu1  ;;  %v21105_v35 = vld [vmem:[#allocation58_spill] sm:$0xff]  ;;  %v21110_v50 = vld [vmem:[#allocation76_spill] sm:$0xff] }
 0x2f1   : > { %13754 = vmatprep.mubr.f32.mxu0 %v20775_v45  ;;  %v17449_v24 = vpop.f32.mrb[2].mxu1  ;;  %v21100_v53 = vld [vmem:[#allocation42_spill] sm:$0xff]  ;;  %v21104_v45 = vld [vmem:[#allocation53_spill] sm:$0xff] }
 0x2f2   : > { %13305 = vmatmul.mubr.f32.gmra.mrb[36].mxu1 %v2733_v6  ;;  %21096 = vst [vmem:[#allocation122_spill] sm:$0xff] %v17449_v24  ;;  %v13036_v8 = vpop.f32.mrb[3].mxu1  ;;  %v21099_v6 = vld [vmem:[#allocation38_spill] sm:$0xff] }
 0x2f3   : > { %13309 = vmatprep.mubr.f32.mxu1 %v16663_v7  ;;  %v17455_v48 = vpop.f32.mrb[4].mxu1  ;;  %v21101_v8 = vld [vmem:[#allocation49_spill] sm:$0xff]  ;;  %v21109_v24 = vld [vmem:[#allocation70_spill] sm:$0xff] }
 0x2f4   : > { %13755 = vmatmul.mubr.f32.gmra.mrb[38].mxu0 %v20774_v11  ;;  %21097 = vst [vmem:[#allocation123_spill] sm:$0xff] %v17455_v48  ;;  %v13046_v57 = vpop.f32.mrb[5].mxu1  ;;  %v21102_v11 = vld [vmem:[#allocation51_spill] sm:$0xff] }
 0x2f5   : > { %13759 = vmatprep.mubr.f32.mxu0 %v16671_v23  ;;  %v21103_v57 = vld [vmem:[#allocation50_spill] sm:$0xff]  ;;  %v21108_v48 = vld [vmem:[#allocation63_spill] sm:$0xff] }
 0x2f6   : > { %13310 = vmatmul.mubr.f32.vlgmr.msra.gmra.mrb[6].mxu1 %v16687_v52 }
 0x2f7   : > { %13358 = vmatpush3.msra.mxu1 %v16910_v12  ;;  %13312 = vmatprep.mubr.f32.mxu1 %v16689_v54  ;;  %v21117_v12 = vld [vmem:[#allocation96_spill] sm:$0xff] }
 0x2f8   : > { %13760 = vmatmul.mubr.f32.vlgmr.msra.gmra.mrb[8].mxu0 %v16714_v40  ;;  %13407 = vmatprep.subr.mxu1 %v16896_v4 }
 0x2f9   : > { %13808 = vmatpush3.msra.mxu0 %v16896_v4  ;;  %13762 = vmatprep.mubr.f32.mxu0 %v16717_v32 }
 0x2fa   : > { %13313 = vmatmul.mubr.f32.gmra.mrb[8].mxu1 %v16697_v13  ;;  %15135 = vmatprep.subr.bf16.mxu0 %v21095_v33  ;;  %v21107_v33 = vld [vmem:[#allocation66_spill] sm:$0xff] }
 0x2fb   : > { %13315 = vmatprep.mubr.f32.mxu1 %v16719_v34 }
 0x2fc   : > { %13763 = vmatmul.mubr.f32.gmra.mrb[10].mxu0 %v16723_v15 }
 0x2fd   : > { %13765 = vmatprep.mubr.f32.mxu0 %v16775_v42 }
 0x2fe   : > { %13316 = vmatmul.mubr.f32.gmra.mrb[10].mxu1 %v16726_v47 }
 0x2ff   : > { %13318 = vmatprep.mubr.f32.mxu1 %v16769_v26 }
 0x300   : > { %13766 = vmatmul.mubr.f32.gmra.mrb[12].mxu0 %v16781_v61 }
 0x301   : > { %13768 = vmatprep.mubr.f32.mxu0 %v16783_v10 }
 0x302   : > { %13319 = vmatmul.mubr.f32.gmra.mrb[12].mxu1 %v16771_v30 }
 0x303   : > { %13321 = vmatprep.mubr.f32.mxu1 %v16777_v43 }
 0x304   : > { %13769 = vmatmul.mubr.f32.gmra.mrb[14].mxu0 %v16805_v28 }
 0x305   : > { %13771 = vmatprep.mubr.f32.mxu0 %v16836_v22 }
 0x306   : > { %13322 = vmatmul.mubr.f32.gmra.mrb[14].mxu1 %v16830_v17 }
 0x307   : > { %13324 = vmatprep.mubr.f32.mxu1 %v16848_v44 }
 0x308   : > { %13772 = vmatmul.mubr.f32.gmra.mrb[16].mxu0 %v16843_v18 }
 0x309   : > { %13774 = vmatprep.mubr.f32.mxu0 %v21098_v59 }
 0x30a   : > { %13325 = vmatmul.mubr.f32.gmra.mrb[16].mxu1 %v21099_v6 }
 0x30b   : > { %13327 = vmatprep.mubr.f32.mxu1 %v21100_v53 }
 0x30c   : > { %13775 = vmatmul.mubr.f32.gmra.mrb[18].mxu0 %v21101_v8 }
 0x30d   : > { %13777 = vmatprep.mubr.f32.mxu0 %v21102_v11 }
 0x30e   : > { %13328 = vmatmul.mubr.f32.gmra.mrb[18].mxu1 %v21103_v57 }
 0x30f   : > { %13330 = vmatprep.mubr.f32.mxu1 %v21104_v45 }
 0x310   : > { %13778 = vmatmul.mubr.f32.gmra.mrb[20].mxu0 %v21105_v35 }
 0x311   : > { %13780 = vmatprep.mubr.f32.mxu0 %v17012_v63 }
 0x312   : > { %13331 = vmatmul.mubr.f32.gmra.mrb[20].mxu1 %v21106_v14 }
 0x313   : > { %13333 = vmatprep.mubr.f32.mxu1 %v17003_v21  ;;  %v21120_v21 = vld [vmem:[#allocation98_spill] sm:$0xff] }
 0x314   : > { %13781 = vmatmul.mubr.f32.gmra.mrb[22].mxu0 %v21107_v33 }
 0x315   : > { %13783 = vmatprep.mubr.f32.mxu0 %v17087_v56 }
 0x316   : > { %13334 = vmatmul.mubr.f32.gmra.mrb[22].mxu1 %v21108_v48  ;;  %v21119_v48 = vld [vmem:[#allocation91_spill] sm:$0xff] }
 0x317   : > { %13336 = vmatprep.mubr.f32.mxu1 %v21109_v24  ;;  %v21118_v24 = vld [vmem:[#allocation90_spill] sm:$0xff] }
 0x318   : > { %13784 = vmatmul.mubr.f32.gmra.mrb[24].mxu0 %v17096_v0 }
 0x319   : > { %13786 = vmatprep.mubr.f32.mxu0 %v21110_v50 }
 0x31a   : > { %13337 = vmatmul.mubr.f32.gmra.mrb[24].mxu1 %v21111_v36  ;;  %v21122_v36 = vld [vmem:[#allocation99_spill] sm:$0xff] }
 0x31b   : > { %13339 = vmatprep.mubr.f32.mxu1 %v21112_v19  ;;  %v21121_v19 = vld [vmem:[#allocation97_spill] sm:$0xff] }
 0x31c   : > { %13787 = vmatmul.mubr.f32.gmra.mrb[26].mxu0 %v21113_v20 }
 0x31d   : > { %13789 = vmatprep.mubr.f32.mxu0 %v17168_v9 }
 0x31e   : > { %13340 = vmatmul.mubr.f32.gmra.mrb[26].mxu1 %v21114_v39 }
 0x31f   : > { %13342 = vmatprep.mubr.f32.mxu1 %v21115_v37  ;;  %v21123_v37 = vld [vmem:[#allocation104_spill] sm:$0xff] }
 0x320   : > { %13790 = vmatmul.mubr.f32.gmra.mrb[28].mxu0 %v21116_v51 }
 0x321   : > { %13792 = vmatprep.mubr.f32.mxu0 %v21117_v12 }
 0x322   : > { %13343 = vmatmul.mubr.f32.gmra.mrb[28].mxu1 %v21118_v24  ;;  %v21133_v24 = vld [vmem:[#allocation29_spill] sm:$0xff] }
 0x323   : > { %13345 = vmatprep.mubr.f32.mxu1 %v21119_v48  ;;  %v21124_v48 = vld [vmem:[#allocation106_spill] sm:$0xff] }
 0x324   : > { %13793 = vmatmul.mubr.f32.gmra.mrb[30].mxu0 %v21120_v21 }
 0x325   : > { %13795 = vmatprep.mubr.f32.mxu0 %v17288_v25 }
 0x326   : > { %13346 = vmatmul.mubr.f32.gmra.mrb[30].mxu1 %v21121_v19  ;;  %v21132_v19 = vld [vmem:[#allocation28_spill] sm:$0xff] }
 0x327   : > { %13348 = vmatprep.mubr.f32.mxu1 %v21122_v36  ;;  %v21125_v36 = vld [vmem:[#allocation11_spill] sm:$0xff] }
 0x328   : > { %13796 = vmatmul.mubr.f32.gmra.mrb[32].mxu0 %v17298_v27 }
 0x329   : > { %13798 = vmatprep.mubr.f32.mxu0 %v17325_v3 }
 0x32a   : > { %13349 = vmatmul.mubr.f32.gmra.mrb[32].mxu1 %v17272_v49  ;;  %v21127_v49 = vld [vmem:[#allocation15_spill] sm:$0xff] }
 0x32b   : > { %13351 = vmatprep.mubr.f32.mxu1 %v21123_v37  ;;  %v21126_v37 = vld [vmem:[#allocation14_spill] sm:$0xff] }
 0x32c   : > { %13799 = vmatmul.mubr.f32.gmra.mrb[34].mxu0 %v17330_v1 }
 0x32d   : > { %13801 = vmatprep.mubr.f32.mxu0 %v17359_v29 }
 0x32e   : > { %13352 = vmatmul.mubr.f32.gmra.mrb[34].mxu1 %v21124_v48  ;;  %v21128_v48 = vld [vmem:[#allocation52_spill] sm:$0xff] }
 0x32f   : > { %13354 = vmatprep.mubr.f32.mxu1 %v17315_v41  ;;  %v21129_v41 = vld [vmem:[#allocation16_spill] sm:$0xff] }
 0x330   : > { %13802 = vmatmul.mubr.f32.gmra.mrb[36].mxu0 %v17380_v60 }
 0x331   : > { %13804 = vmatprep.mubr.f32.mxu0 %v17389_v38 }
 0x332   : > { %13355 = vmatmul.mubr.f32.gmra.mrb[36].mxu1 %v17342_v62  ;;  %v21130_v62 = vld [vmem:[#allocation22_spill] sm:$0xff] }
 0x333   : > { %13359 = vmatprep.mubr.f32.mxu1 %v21125_v36 }
 0x334   : > { %13805 = vmatmul.mubr.f32.gmra.mrb[38].mxu0 %v17405_v58 }
 0x335   : > { %13809 = vmatprep.mubr.f32.mxu0 %v16671_v23  ;;  %v21131_v23 = vld [vmem:[#allocation24_spill] sm:$0xff] }
 0x336   : > { %13360 = vmatmul.mubr.f32.vlgmr.msra.gmra.mrb[6].mxu1 %v21126_v37 }
 0x337   : > { %13408 = vmatpush3.msra.mxu1 %v16896_v4  ;;  %13362 = vmatprep.mubr.f32.mxu1 %v21127_v49 }
 0x338   : > { %13457 = vmatprep.subr.mxu1 %v21128_v48  ;;  %13810 = vmatmul.mubr.f32.vlgmr.msra.gmra.mrb[8].mxu0 %v16714_v40  ;;  %v21134_v40 = vld [vmem:[#allocation32_spill] sm:$0xff] }
 0x339   : > { %13812 = vmatprep.mubr.f32.mxu0 %v16717_v32  ;;  %v21135_v32 = vld [vmem:[#allocation39_spill] sm:$0xff] }
 0x33a   : > { %13363 = vmatmul.mubr.f32.gmra.mrb[8].mxu1 %v21129_v41 }
 0x33b   : > { %13365 = vmatprep.mubr.f32.mxu1 %v21130_v62 }
 0x33c   : > { %13813 = vmatmul.mubr.f32.gmra.mrb[10].mxu0 %v16723_v15  ;;  %v21136_v15 = vld [vmem:[#allocation44_spill] sm:$0xff] }
 0x33d   : > { %13815 = vmatprep.mubr.f32.mxu0 %v16775_v42  ;;  %v21137_v42 = vld [vmem:[#allocation45_spill] sm:$0xff] }
 0x33e   : > { %13366 = vmatmul.mubr.f32.gmra.mrb[10].mxu1 %v21131_v23 }
 0x33f   : > { %13368 = vmatprep.mubr.f32.mxu1 %v21132_v19 }
 0x340   : > { %13816 = vmatmul.mubr.f32.gmra.mrb[12].mxu0 %v16781_v61  ;;  %v21138_v61 = vld [vmem:[#allocation47_spill] sm:$0xff] }
 0x341   : > { %13818 = vmatprep.mubr.f32.mxu0 %v16783_v10  ;;  %v21139_v10 = vld [vmem:[#allocation55_spill] sm:$0xff] }
 0x342   : > { %13369 = vmatmul.mubr.f32.gmra.mrb[12].mxu1 %v21133_v24 }
 0x343   : > { %13371 = vmatprep.mubr.f32.mxu1 %v21134_v40 }
 0x344   : > { %13819 = vmatmul.mubr.f32.gmra.mrb[14].mxu0 %v16805_v28  ;;  %v21140_v28 = vld [vmem:[#allocation60_spill] sm:$0xff] }
 0x345   : > { %13821 = vmatprep.mubr.f32.mxu0 %v16836_v22  ;;  %v21141_v22 = vld [vmem:[#allocation65_spill] sm:$0xff] }
 0x346   : > { %13372 = vmatmul.mubr.f32.gmra.mrb[14].mxu1 %v21135_v32 }
 0x347   : > { %13374 = vmatprep.mubr.f32.mxu1 %v21136_v15 }
 0x348   : > { %13822 = vmatmul.mubr.f32.gmra.mrb[16].mxu0 %v16843_v18  ;;  %v21142_v18 = vld [vmem:[#allocation67_spill] sm:$0xff] }
 0x349   : > { %13824 = vmatprep.mubr.f32.mxu0 %v21098_v59  ;;  %v21143_v59 = vld [vmem:[#allocation69_spill] sm:$0xff] }
 0x34a   : > { %13375 = vmatmul.mubr.f32.gmra.mrb[16].mxu1 %v21137_v42 }
 0x34b   : > { %13377 = vmatprep.mubr.f32.mxu1 %v21138_v61 }
 0x34c   : > { %13825 = vmatmul.mubr.f32.gmra.mrb[18].mxu0 %v21101_v8  ;;  %v21144_v8 = vld [vmem:[#allocation77_spill] sm:$0xff] }
 0x34d   : > { %13827 = vmatprep.mubr.f32.mxu0 %v21102_v11  ;;  %v21145_v11 = vld [vmem:[#allocation78_spill] sm:$0xff] }
 0x34e   : > { %13378 = vmatmul.mubr.f32.gmra.mrb[18].mxu1 %v21139_v10 }
 0x34f   : > { %13380 = vmatprep.mubr.f32.mxu1 %v21140_v28 }
 0x350   : > { %13828 = vmatmul.mubr.f32.gmra.mrb[20].mxu0 %v21105_v35  ;;  %v21146_v35 = vld [vmem:[#allocation80_spill] sm:$0xff] }
 0x351   : > { %13830 = vmatprep.mubr.f32.mxu0 %v17012_v63  ;;  %v21147_v63 = vld [vmem:[#allocation86_spill] sm:$0xff] }
 0x352   : > { %13381 = vmatmul.mubr.f32.gmra.mrb[20].mxu1 %v21141_v22 }
 0x353   : > { %13383 = vmatprep.mubr.f32.mxu1 %v21142_v18 }
 0x354   : > { %13831 = vmatmul.mubr.f32.gmra.mrb[22].mxu0 %v21107_v33  ;;  %v21148_v33 = vld [vmem:[#allocation87_spill] sm:$0xff] }
 0x355   : > { %13833 = vmatprep.mubr.f32.mxu0 %v17087_v56  ;;  %v21149_v56 = vld [vmem:[#allocation94_spill] sm:$0xff] }
 0x356   : > { %13384 = vmatmul.mubr.f32.gmra.mrb[22].mxu1 %v21143_v59 }
 0x357   : > { %13386 = vmatprep.mubr.f32.mxu1 %v21144_v8 }
 0x358   : > { %13834 = vmatmul.mubr.f32.gmra.mrb[24].mxu0 %v17096_v0  ;;  %v21150_v0 = vld [vmem:[#allocation95_spill] sm:$0xff] }
 0x359   : > { %13836 = vmatprep.mubr.f32.mxu0 %v21110_v50  ;;  %v21151_v50 = vld [vmem:[#allocation101_spill] sm:$0xff] }
 0x35a   : > { %13387 = vmatmul.mubr.f32.gmra.mrb[24].mxu1 %v21145_v11 }
 0x35b   : > { %13389 = vmatprep.mubr.f32.mxu1 %v21146_v35 }
 0x35c   : > { %13837 = vmatmul.mubr.f32.gmra.mrb[26].mxu0 %v21113_v20 }
 0x35d   : > { %13839 = vmatprep.mubr.f32.mxu0 %v17168_v9 }
 0x35e   : > { %13390 = vmatmul.mubr.f32.gmra.mrb[26].mxu1 %v21147_v63 }
 0x35f   : > { %13392 = vmatprep.mubr.f32.mxu1 %v21148_v33 }
 0x360   : > { %13840 = vmatmul.mubr.f32.gmra.mrb[28].mxu0 %v21116_v51 }
 0x361   : > { %13842 = vmatprep.mubr.f32.mxu0 %v21117_v12 }
 0x362   : > { %13393 = vmatmul.mubr.f32.gmra.mrb[28].mxu1 %v21149_v56 }
 0x363   : > { %13395 = vmatprep.mubr.f32.mxu1 %v21150_v0 }
 0x364   : > { %13843 = vmatmul.mubr.f32.gmra.mrb[30].mxu0 %v21120_v21 }
 0x365   : > { %13845 = vmatprep.mubr.f32.mxu0 %v17288_v25 }
 0x366   : > { %13396 = vmatmul.mubr.f32.gmra.mrb[30].mxu1 %v21151_v50 }
 0x367   : > { %13398 = vmatprep.mubr.f32.mxu1 %v17280_v16 }
 0x368   : > { %13846 = vmatmul.mubr.f32.gmra.mrb[32].mxu0 %v17298_v27  ;;  %v21153_v27 = vmov 0.0  }
 0x369   : > { %13848 = vmatprep.mubr.f32.mxu0 %v17325_v3  ;;  %v21152_v3 = vand.u32 4294901760, %v21125_v36  ;;  %v21158_v36 = vand.u32 4294901760, %v21131_v23  ;;  %v21165_v23 = vand.u32 4294901760, %v21138_v61  ;;  %v21172_v61 = vand.u32 4294901760, %v21145_v11 }
 0x36a   : > { %13399 = vmatmul.mubr.f32.gmra.mrb[32].mxu1 %v17303_v46  ;;  %v21179_v11 = vand.u32 4294901760, %v17280_v16  ;;  %v21187_v16 = vld [vmem:[#allocation70_spill] sm:$0xff] }
 0x36b   : > { %13401 = vmatprep.mubr.f32.mxu1 %v17313_v31 }
 0x36c   : > { %13849 = vmatmul.mubr.f32.gmra.mrb[34].mxu0 %v17330_v1  ;;  %v21155_v1 = vand.u32 4294901760, %v21127_v49  ;;  %v21161_v49 = vand.u32 4294901760, %v21134_v40  ;;  %v21168_v40 = vand.u32 4294901760, %v21141_v22  ;;  %v21175_v22 = vand.u32 4294901760, %v21148_v33 }
 0x36d   : > { %13851 = vmatprep.mubr.f32.mxu0 %v17359_v29  ;;  %v21154_v29 = vand.u32 4294901760, %v21126_v37  ;;  %v21178_v37 = vand.u32 4294901760, %v21151_v50  ;;  %v21182_v33 = vand.u32 4294901760, %v17339_v55  ;;  %v21191_v50 = vld [vmem:[#allocation90_spill] sm:$0xff] }
 0x36e   : > { %13402 = vmatmul.mubr.f32.gmra.mrb[34].mxu1 %v17339_v55  ;;  %v21190_v55 = vld [vmem:[#allocation83_spill] sm:$0xff] }
 0x36f   : > { %13404 = vmatprep.mubr.f32.mxu1 %v17351_v2 }
 0x370   : > { %13852 = vmatmul.mubr.f32.gmra.mrb[36].mxu0 %v17380_v60 }
 0x371   : > { %13854 = vmatprep.mubr.f32.mxu0 %v17389_v38  ;;  %v21156_v38 = vand.u32 4294901760, %v21129_v41  ;;  %v21164_v41 = vand.u32 4294901760, %v21137_v42  ;;  %v21171_v42 = vand.u32 4294901760, %v21144_v8  ;;  %v21195_v8 = vld [vmem:[#allocation102_spill] sm:$0xff] }
 0x372   : > { %13405 = vmatmul.mubr.f32.gmra.mrb[36].mxu1 %v17373_v5 }
 0x373   : > { %13409 = vmatprep.mubr.f32.mxu1 %v21152_v3  ;;  %v21157_v3 = vand.u32 4294901760, %v21130_v62  ;;  %v21177_v62 = vand.u32 4294901760, %v21150_v0  ;;  %v21184_v0 = vand.u32 4294901760, %v17373_v5  ;;  %v21186_v5 = vld [vmem:[#allocation63_spill] sm:$0xff] }
 0x374   : > { %13855 = vmatmul.mubr.f32.gmra.mrb[38].mxu0 %v17405_v58 }
 0x375   : > { %13889 = vmatprep.mubr.msk.f32.mxu0 %vm16193_vm4, %v21153_v27  ;;  %v21159_v27 = vand.u32 4294901760, %v21132_v19  ;;  %v21167_v19 = vand.u32 4294901760, %v21140_v28  ;;  %v21174_v28 = vand.u32 4294901760, %v21147_v63  ;;  %v21181_v63 = vand.u32 4294901760, %v17313_v31  ;;  %v21189_v31 = vld [vmem:[#allocation74_spill] sm:$0xff] }
 0x376   : > { %13410 = vmatmul.mubr.f32.vlgmr.msra.gmra.mrb[6].mxu1 %v21154_v29  ;;  %v21160_v29 = vand.u32 4294901760, %v21133_v24  ;;  %v21192_v24 = vld [vmem:[#allocation91_spill] sm:$0xff] }
 0x377   : > { %13458 = vmatpush3.msra.mxu1 %v21128_v48  ;;  %13412 = vmatprep.mubr.f32.mxu1 %v21155_v1  ;;  %v21162_v1 = vand.u32 4294901760, %v21135_v32  ;;  %v21169_v32 = vand.u32 4294901760, %v21142_v18  ;;  %v21176_v18 = vand.u32 4294901760, %v21149_v56  ;;  %v21183_v56 = vand.u32 4294901760, %v17351_v2  ;;  %v21185_v2 = vld [vmem:[#allocation61_spill] sm:$0xff] }
 0x378   : > { %13507 = vmatprep.subr.mxu1 %v16896_v4  ;;  %v21193_v48 = vld [vmem:[#allocation97_spill] sm:$0xff] }
 0x37a   : > { %13413 = vmatmul.mubr.f32.gmra.mrb[8].mxu1 %v21156_v38  ;;  %v21163_v38 = vand.u32 4294901760, %v21136_v15  ;;  %v21170_v15 = vand.u32 4294901760, %v21143_v59  ;;  %v21194_v59 = vld [vmem:[#allocation99_spill] sm:$0xff] }
 0x37b   : > { %13415 = vmatprep.mubr.f32.mxu1 %v21157_v3  ;;  %v21196_v3 = vld [vmem:[#allocation104_spill] sm:$0xff] }
 0x37e   : > { %13416 = vmatmul.mubr.f32.gmra.mrb[10].mxu1 %v21158_v36  ;;  %v21197_v36 = vld [vmem:[#allocation106_spill] sm:$0xff] }
 0x37f   : > { %13418 = vmatprep.mubr.f32.mxu1 %v21159_v27  ;;  %v21166_v27 = vand.u32 4294901760, %v21139_v10  ;;  %v21173_v10 = vand.u32 4294901760, %v21146_v35  ;;  %v21180_v35 = vand.u32 4294901760, %v17303_v46  ;;  %v21188_v46 = vld [vmem:[#allocation72_spill] sm:$0xff] }
 0x382   : > { %13419 = vmatmul.mubr.f32.gmra.mrb[12].mxu1 %v21160_v29  ;;  %v21198_v29 = vld [vmem:[#allocation107_spill] sm:$0xff] }
 0x383   : > { %13421 = vmatprep.mubr.f32.mxu1 %v21161_v49  ;;  %v21199_v49 = vld [vmem:[#allocation112_spill] sm:$0xff] }
 0x386   : > { %13422 = vmatmul.mubr.f32.gmra.mrb[14].mxu1 %v21162_v1  ;;  %v21200_v1 = vld [vmem:[#allocation57_spill] sm:$0xff] }
 0x387   : > { %13424 = vmatprep.mubr.f32.mxu1 %v21163_v38 }
 0x38a   : > { %13425 = vmatmul.mubr.f32.gmra.mrb[16].mxu1 %v21164_v41  ;;  %v21211_v41 = vld [vmem:[#allocation33_spill] sm:$0xff] }
 0x38b   : > { %13427 = vmatprep.mubr.f32.mxu1 %v21165_v23  ;;  %v21212_v23 = vand.u32 4294901760, %v21211_v41 }
 0x38e   : > { %13428 = vmatmul.mubr.f32.gmra.mrb[18].mxu1 %v21166_v27  ;;  %v4379_v27 = vsub.f32 %v21211_v41, %v21212_v23 }
 0x38f   : > { %13430 = vmatprep.mubr.f32.mxu1 %v21167_v19 }
 0x392   : > { %13431 = vmatmul.mubr.f32.gmra.mrb[20].mxu1 %v21168_v40  ;;  %v21213_v40 = vld [vmem:[#allocation34_spill] sm:$0xff] }
 0x393   : > { %13433 = vmatprep.mubr.f32.mxu1 %v21169_v32  ;;  %v21214_v32 = vand.u32 4294901760, %v21213_v40 }
 0x396   : > { %13434 = vmatmul.mubr.f32.gmra.mrb[22].mxu1 %v21170_v15  ;;  %v4389_v15 = vsub.f32 %v21213_v40, %v21214_v32 }
 0x397   : > { %13436 = vmatprep.mubr.f32.mxu1 %v21171_v42  ;;  %v21215_v42 = vld [vmem:[#allocation48_spill] sm:$0xff] }
 0x39a   : > { %13437 = vmatmul.mubr.f32.gmra.mrb[24].mxu1 %v21172_v61  ;;  %v4380_v61 = vand.u32 4294901760, %v4379_v27 }
 0x39b   : > { %13439 = vmatprep.mubr.f32.mxu1 %v21173_v10  ;;  %v21216_v10 = vld [vmem:[#allocation36_spill] sm:$0xff] }
 0x39e   : > { %13440 = vmatmul.mubr.f32.gmra.mrb[26].mxu1 %v21174_v28  ;;  %v21217_v28 = vand.u32 4294901760, %v21216_v10 }
 0x39f   : > { %13442 = vmatprep.mubr.f32.mxu1 %v21175_v22 }
 0x3a0   : > { %v4399_v22 = vsub.f32 %v21216_v10, %v21217_v28  ;;  %v21240_v28 = vld [vmem:[#allocation88_spill] sm:$0xff] }
 0x3a2   : > { %13443 = vmatmul.mubr.f32.gmra.mrb[28].mxu1 %v21176_v18  ;;  %v4390_v18 = vand.u32 4294901760, %v4389_v15 }
 0x3a3   : > { %13445 = vmatprep.mubr.f32.mxu1 %v21177_v62  ;;  %v21218_v62 = vld [vmem:[#allocation41_spill] sm:$0xff] }
 0x3a6   : > { %13446 = vmatmul.mubr.f32.gmra.mrb[30].mxu1 %v21178_v37  ;;  %v21219_v37 = vand.u32 4294901760, %v21218_v62 }
 0x3a7   : > { %13448 = vmatprep.mubr.f32.mxu1 %v21179_v11 }
 0x3a8   : > { %v4409_v11 = vsub.f32 %v21218_v62, %v21219_v37 }
 0x3aa   : > { %13449 = vmatmul.mubr.f32.gmra.mrb[32].mxu1 %v21180_v35  ;;  %v4400_v35 = vand.u32 4294901760, %v4399_v22  ;;  %v21241_v22 = vand.u32 4294901760, %v21240_v28 }
 0x3ab   : > { %13451 = vmatprep.mubr.f32.mxu1 %v21181_v63  ;;  %v21220_v63 = vld [vmem:[#allocation43_spill] sm:$0xff] }
 0x3ae   : > { %13452 = vmatmul.mubr.f32.gmra.mrb[34].mxu1 %v21182_v33  ;;  %v21221_v33 = vand.u32 4294901760, %v21220_v63 }
 0x3af   : > { %13454 = vmatprep.mubr.f32.mxu1 %v21183_v56 }
 0x3b0   : > { %v4419_v56 = vsub.f32 %v21220_v63, %v21221_v33 }
 0x3b2   : > { %13455 = vmatmul.mubr.f32.gmra.mrb[36].mxu1 %v21184_v0  ;;  %v4410_v0 = vand.u32 4294901760, %v4409_v11  ;;  %v21242_v11 = vld [vmem:[#allocation92_spill] sm:$0xff] }
 0x3b3   : > { %13459 = vmatprep.mubr.f32.mxu1 %v16663_v7 }
 0x3b6   : > { %13460 = vmatmul.mubr.f32.vlgmr.msra.gmra.mrb[6].mxu1 %v16687_v52 }
 0x3b7   : > { %13508 = vmatpush3.msra.mxu1 %v16896_v4  ;;  %13462 = vmatprep.mubr.f32.mxu1 %v16689_v54 }
 0x3b8   : > { %13557 = vmatprep.subr.mxu1 %v16896_v4 }
 0x3ba   : > { %13463 = vmatmul.mubr.f32.gmra.mrb[8].mxu1 %v16697_v13 }
 0x3bb   : > { %13465 = vmatprep.mubr.f32.mxu1 %v16719_v34 }
 0x3be   : > { %13466 = vmatmul.mubr.f32.gmra.mrb[10].mxu1 %v16726_v47 }
 0x3bf   : > { %13468 = vmatprep.mubr.f32.mxu1 %v16769_v26 }
 0x3c2   : > { %13469 = vmatmul.mubr.f32.gmra.mrb[12].mxu1 %v16771_v30 }
 0x3c3   : > { %13471 = vmatprep.mubr.f32.mxu1 %v16777_v43 }
 0x3c6   : > { %13472 = vmatmul.mubr.f32.gmra.mrb[14].mxu1 %v16830_v17 }
 0x3c7   : > { %13474 = vmatprep.mubr.f32.mxu1 %v16848_v44 }
 0x3ca   : > { %13475 = vmatmul.mubr.f32.gmra.mrb[16].mxu1 %v21099_v6 }
 0x3cb   : > { %13477 = vmatprep.mubr.f32.mxu1 %v21100_v53 }
 0x3ce   : > { %13478 = vmatmul.mubr.f32.gmra.mrb[18].mxu1 %v21103_v57 }
 0x3cf   : > { %13480 = vmatprep.mubr.f32.mxu1 %v21104_v45 }
 0x3d2   : > { %13481 = vmatmul.mubr.f32.gmra.mrb[20].mxu1 %v21106_v14 }
 0x3d3   : > { %13483 = vmatprep.mubr.f32.mxu1 %v21185_v2 }
 0x3d6   : > { %13484 = vmatmul.mubr.f32.gmra.mrb[22].mxu1 %v21186_v5 }
 0x3d7   : > { %13486 = vmatprep.mubr.f32.mxu1 %v21187_v16 }
 0x3da   : > { %13487 = vmatmul.mubr.f32.gmra.mrb[24].mxu1 %v21188_v46 }
 0x3db   : > { %13489 = vmatprep.mubr.f32.mxu1 %v21189_v31 }
 0x3de   : > { %13490 = vmatmul.mubr.f32.gmra.mrb[26].mxu1 %v21114_v39 }
 0x3df   : > { %13492 = vmatprep.mubr.f32.mxu1 %v21190_v55 }
 0x3e2   : > { %13493 = vmatmul.mubr.f32.gmra.mrb[28].mxu1 %v21191_v50 }
 0x3e3   : > { %13495 = vmatprep.mubr.f32.mxu1 %v21192_v24 }
 0x3e6   : > { %13496 = vmatmul.mubr.f32.gmra.mrb[30].mxu1 %v21193_v48 }
 0x3e7   : > { %13498 = vmatprep.mubr.f32.mxu1 %v21194_v59 }
 0x3ea   : > { %13499 = vmatmul.mubr.f32.gmra.mrb[32].mxu1 %v21195_v8 }
 0x3eb   : > { %13501 = vmatprep.mubr.f32.mxu1 %v21196_v3 }
 0x3ee   : > { %13502 = vmatmul.mubr.f32.gmra.mrb[34].mxu1 %v21197_v36 }
 0x3ef   : > { %13504 = vmatprep.mubr.f32.mxu1 %v21198_v29 }
 0x3f2   : > { %13505 = vmatmul.mubr.f32.gmra.mrb[36].mxu1 %v21199_v49 }
 0x3f3   : > { %13509 = vmatprep.mubr.f32.mxu1 %v16663_v7  ;;  %v21201_v7 = vld [vmem:[#allocation13_spill] sm:$0xff] }
 0x3f6   : > { %13510 = vmatmul.mubr.f32.vlgmr.msra.gmra.mrb[6].mxu1 %v16687_v52  ;;  %v21202_v52 = vand.u32 4294901760, %v21201_v7 }
 0x3f7   : > { %13558 = vmatpush3.msra.mxu1 %v16896_v4  ;;  %13512 = vmatprep.mubr.f32.mxu1 %v16689_v54 }
 0x3f8   : > { %13607 = vmatprep.subr.mxu1 %v21200_v1  ;;  %v4329_v54 = vsub.f32 %v21201_v7, %v21202_v52  ;;  %v21230_v52 = vld [vmem:[#allocation68_spill] sm:$0xff] }
 0x3fa   : > { %13513 = vmatmul.mubr.f32.gmra.mrb[8].mxu1 %v16697_v13  ;;  %v21203_v13 = vld [vmem:[#allocation20_spill] sm:$0xff]  ;;  %v4330_v4 = vand.u32 4294901760, %v4329_v54  ;;  %v21231_v54 = vand.u32 4294901760, %v21230_v52 }
 0x3fb   : > { %13515 = vmatprep.mubr.f32.mxu1 %v16719_v34  ;;  %v21204_v34 = vand.u32 4294901760, %v21203_v13 }
 0x3fe   : > { %13516 = vmatmul.mubr.f32.gmra.mrb[10].mxu1 %v16726_v47  ;;  %v4339_v47 = vsub.f32 %v21203_v13, %v21204_v34  ;;  %v4469_v34 = vsub.f32 %v21230_v52, %v21231_v54 }
 0x3ff   : > { %13518 = vmatprep.mubr.f32.mxu1 %v16769_v26  ;;  %v21205_v26 = vld [vmem:[#allocation21_spill] sm:$0xff] }
 0x402   : > { %13519 = vmatmul.mubr.f32.gmra.mrb[12].mxu1 %v16771_v30  ;;  %v21206_v30 = vand.u32 4294901760, %v21205_v26 }
 0x403   : > { %13521 = vmatprep.mubr.f32.mxu1 %v16777_v43 }
 0x404   : > { %v4349_v43 = vsub.f32 %v21205_v26, %v21206_v30 }
 0x406   : > { %13522 = vmatmul.mubr.f32.gmra.mrb[14].mxu1 %v16830_v17  ;;  %v21207_v17 = vld [vmem:[#allocation23_spill] sm:$0xff] }
 0x407   : > { %13524 = vmatprep.mubr.f32.mxu1 %v16848_v44  ;;  %v4340_v44 = vand.u32 4294901760, %v4339_v47 }
 0x40a   : > { %13525 = vmatmul.mubr.f32.gmra.mrb[16].mxu1 %v21099_v6  ;;  %v21209_v6 = vld [vmem:[#allocation30_spill] sm:$0xff] }
 0x40b   : > { %13527 = vmatprep.mubr.f32.mxu1 %v21100_v53  ;;  %v21210_v53 = vand.u32 4294901760, %v21209_v6 }
 0x40e   : > { %13528 = vmatmul.mubr.f32.gmra.mrb[18].mxu1 %v21103_v57  ;;  %v4369_v57 = vsub.f32 %v21209_v6, %v21210_v53 }
 0x40f   : > { %13530 = vmatprep.mubr.f32.mxu1 %v21104_v45  ;;  %v4350_v45 = vand.u32 4294901760, %v4349_v43 }
 0x410   : > { %v4370_v19 = vand.u32 4294901760, %v4369_v57  ;;  %v21236_v57 = vld [vmem:[#allocation81_spill] sm:$0xff] }
 0x412   : > { %13531 = vmatmul.mubr.f32.gmra.mrb[20].mxu1 %v21106_v14 }
 0x413   : > { %13533 = vmatprep.mubr.f32.mxu1 %v21185_v2  ;;  %v21222_v2 = vld [vmem:[#allocation46_spill] sm:$0xff] }
 0x416   : > { %13534 = vmatmul.mubr.f32.gmra.mrb[22].mxu1 %v21186_v5  ;;  %v21223_v5 = vand.u32 4294901760, %v21222_v2 }
 0x417   : > { %13536 = vmatprep.mubr.f32.mxu1 %v21187_v16 }
 0x418   : > { %v4429_v16 = vsub.f32 %v21222_v2, %v21223_v5 }
 0x41a   : > { %13537 = vmatmul.mubr.f32.gmra.mrb[24].mxu1 %v21188_v46  ;;  %v4420_v46 = vand.u32 4294901760, %v4419_v56 }
 0x41b   : > { %13539 = vmatprep.mubr.f32.mxu1 %v21189_v31  ;;  %v21224_v31 = vld [vmem:[#allocation54_spill] sm:$0xff] }
 0x41e   : > { %13540 = vmatmul.mubr.f32.gmra.mrb[26].mxu1 %v21114_v39  ;;  %v21208_v39 = vand.u32 4294901760, %v21207_v17 }
 0x41f   : > { %13542 = vmatprep.mubr.f32.mxu1 %v21190_v55  ;;  %v21225_v55 = vand.u32 4294901760, %v21224_v31 }
 0x420   : > { %v4359_v14 = vsub.f32 %v21207_v17, %v21208_v39  ;;  %v21234_v39 = vld [vmem:[#allocation79_spill] sm:$0xff] }
 0x422   : > { %13543 = vmatmul.mubr.f32.gmra.mrb[28].mxu1 %v21191_v50  ;;  %v4360_v38 = vand.u32 4294901760, %v4359_v14  ;;  %v4439_v50 = vsub.f32 %v21224_v31, %v21225_v55  ;;  %v21235_v14 = vand.u32 4294901760, %v21234_v39  ;;  %v21246_v55 = vld [vmem:[#allocation100_spill] sm:$0xff] }
 0x423   : > { %13545 = vmatprep.mubr.f32.mxu1 %v21192_v24  ;;  %v4430_v24 = vand.u32 4294901760, %v4429_v16 }
 0x426   : > { %13546 = vmatmul.mubr.f32.gmra.mrb[30].mxu1 %v21193_v48  ;;  %v21226_v48 = vld [vmem:[#allocation56_spill] sm:$0xff] }
 0x427   : > { %13548 = vmatprep.mubr.f32.mxu1 %v21194_v59  ;;  %v21227_v59 = vand.u32 4294901760, %v21226_v48 }
 0x42a   : > { %13549 = vmatmul.mubr.f32.gmra.mrb[32].mxu1 %v21195_v8  ;;  %v4449_v8 = vsub.f32 %v21226_v48, %v21227_v59 }
 0x42b   : > { %13551 = vmatprep.mubr.f32.mxu1 %v21196_v3  ;;  %v4440_v3 = vand.u32 4294901760, %v4439_v50  ;;  %v21247_v50 = vand.u32 4294901760, %v21246_v55 }
 0x42e   : > { %13552 = vmatmul.mubr.f32.gmra.mrb[34].mxu1 %v21197_v36  ;;  %v21228_v36 = vld [vmem:[#allocation64_spill] sm:$0xff] }
 0x42f   : > { %13554 = vmatprep.mubr.f32.mxu1 %v21198_v29  ;;  %v21229_v29 = vand.u32 4294901760, %v21228_v36 }
 0x432   : > { %13555 = vmatmul.mubr.f32.gmra.mrb[36].mxu1 %v21199_v49  ;;  %v4459_v49 = vsub.f32 %v21228_v36, %v21229_v29 }
 0x433   : > { %13559 = vmatprep.mubr.f32.mxu1 %v4330_v4  ;;  %v21232_v4 = vld [vmem:[#allocation71_spill] sm:$0xff] }
 0x434   : > { %v4460_v47 = vand.u32 4294901760, %v4459_v49  ;;  %v21233_v30 = vand.u32 4294901760, %v21232_v4 }
 0x436   : > { %13560 = vmatmul.mubr.f32.vlgmr.msra.gmra.mrb[38].mxu1 %v4340_v44  ;;  %v4479_v43 = vsub.f32 %v21232_v4, %v21233_v30  ;;  %v4470_v44 = vand.u32 4294901760, %v4469_v34  ;;  %v21252_v30 = vld [vmem:[#allocation110_spill] sm:$0xff] }
 0x437   : > { %13608 = vmatpush3.msra.mxu1 %v21200_v1  ;;  %13562 = vmatprep.mubr.f32.mxu1 %v4350_v45  ;;  %v4450_v1 = vand.u32 4294901760, %v4449_v8  ;;  %v4489_v45 = vsub.f32 %v21234_v39, %v21235_v14  ;;  %v21248_v8 = vld [vmem:[#allocation103_spill] sm:$0xff] }
 0x438   : > { %13657 = vmatprep.subr.mxu1 %v21215_v42  ;;  %v4480_v53 = vand.u32 4294901760, %v4479_v43  ;;  %v21253_v43 = vand.u32 4294901760, %v21252_v30 }
 0x439   : > { %v4490_v27 = vand.u32 4294901760, %v4489_v45  ;;  %v21254_v45 = vld [vmem:[#allocation113_spill] sm:$0xff] }
 0x43a   : > { %13563 = vmatmul.mubr.f32.gmra.mrb[40].mxu1 %v4360_v38  ;;  %v21237_v38 = vand.u32 4294901760, %v21236_v57 }
 0x43b   : > { %13565 = vmatprep.mubr.f32.mxu1 %v4370_v19  ;;  %v21238_v19 = vld [vmem:[#allocation84_spill] sm:$0xff] }
 0x43c   : > { %v4499_v23 = vsub.f32 %v21236_v57, %v21237_v38  ;;  %v21239_v32 = vand.u32 4294901760, %v21238_v19 }
 0x43e   : > { %13566 = vmatmul.mubr.f32.gmra.mrb[42].mxu1 %v4380_v61  ;;  %v4509_v15 = vsub.f32 %v21238_v19, %v21239_v32  ;;  %v4500_v61 = vand.u32 4294901760, %v4499_v23 }
 0x43f   : > { %13568 = vmatprep.mubr.f32.mxu1 %v4390_v18  ;;  %v4519_v18 = vsub.f32 %v21240_v28, %v21241_v22  ;;  %v21258_v22 = vld [vmem:[#allocation116_spill] sm:$0xff] }
 0x440   : > { %v4510_v37 = vand.u32 4294901760, %v4509_v15 }
 0x441   : > { %v4520_v56 = vand.u32 4294901760, %v4519_v18  ;;  %v21259_v18 = vand.u32 4294901760, %v21258_v22 }
 0x442   : > { %13569 = vmatmul.mubr.f32.gmra.mrb[44].mxu1 %v4400_v35  ;;  %v21243_v35 = vand.u32 4294901760, %v21242_v11 }
 0x443   : > { %13571 = vmatprep.mubr.f32.mxu1 %v4410_v0  ;;  %v21244_v0 = vld [vmem:[#allocation93_spill] sm:$0xff] }
 0x444   : > { %v4529_v33 = vsub.f32 %v21242_v11, %v21243_v35  ;;  %v21245_v5 = vand.u32 4294901760, %v21244_v0 }
 0x446   : > { %13572 = vmatmul.mubr.f32.gmra.mrb[46].mxu1 %v4420_v46  ;;  %v4539_v16 = vsub.f32 %v21244_v0, %v21245_v5  ;;  %v4530_v46 = vand.u32 4294901760, %v4529_v33  ;;  %v21260_v33 = vld [vmem:[#allocation118_spill] sm:$0xff] }
 0x447   : > { %13574 = vmatprep.mubr.f32.mxu1 %v4430_v24  ;;  %v4549_v24 = vsub.f32 %v21246_v55, %v21247_v50 }
 0x448   : > { %v4540_v59 = vand.u32 4294901760, %v4539_v16 }
 0x449   : > { %v4550_v49 = vand.u32 4294901760, %v4549_v24 }
 0x44a   : > { %13575 = vmatmul.mubr.f32.gmra.mrb[48].mxu1 %v4440_v3  ;;  %v21249_v3 = vand.u32 4294901760, %v21248_v8 }
 0x44b   : > { %13577 = vmatprep.mubr.f32.mxu1 %v4450_v1  ;;  %v21250_v1 = vld [vmem:[#allocation108_spill] sm:$0xff] }
 0x44c   : > { %v4559_v29 = vsub.f32 %v21248_v8, %v21249_v3  ;;  %v21251_v54 = vand.u32 4294901760, %v21250_v1  ;;  %v21264_v3 = vld [vmem:[#allocation120_spill] sm:$0xff] }
 0x44e   : > { %13578 = vmatmul.mubr.f32.gmra.mrb[50].mxu1 %v4460_v47  ;;  %v4569_v34 = vsub.f32 %v21250_v1, %v21251_v54  ;;  %v4560_v47 = vand.u32 4294901760, %v4559_v29  ;;  %v21265_v29 = vand.u32 4294901760, %v21264_v3 }
 0x44f   : > { %13580 = vmatprep.mubr.f32.mxu1 %v4470_v44  ;;  %v4579_v44 = vsub.f32 %v21252_v30, %v21253_v43  ;;  %v21267_v43 = vld [vmem:[#allocation17_spill] sm:$0xff] }
 0x450   : > { %v4570_v14 = vand.u32 4294901760, %v4569_v34 }
 0x451   : > { %v4580_v23 = vand.u32 4294901760, %v4579_v44  ;;  %v21268_v44 = vld [vmem:[#allocation18_spill] sm:$0xff] }
 0x452   : > { %13581 = vmatmul.mubr.f32.gmra.mrb[52].mxu1 %v4480_v53  ;;  %v21255_v53 = vand.u32 4294901760, %v21254_v45 }
 0x453   : > { %13583 = vmatprep.mubr.f32.mxu1 %v4490_v27  ;;  %v21256_v27 = vld [vmem:[#allocation115_spill] sm:$0xff] }
 0x454   : > { %v4589_v38 = vsub.f32 %v21254_v45, %v21255_v53  ;;  %v21257_v32 = vand.u32 4294901760, %v21256_v27  ;;  %v21270_v53 = vld [vmem:[#allocation25_spill] sm:$0xff] }
 0x456   : > { %13584 = vmatmul.mubr.f32.gmra.mrb[54].mxu1 %v4500_v61  ;;  %v4599_v15 = vsub.f32 %v21256_v27, %v21257_v32  ;;  %v4590_v61 = vand.u32 4294901760, %v4589_v38  ;;  %v21271_v38 = vld [vmem:[#allocation26_spill] sm:$0xff]  ;;  %v21273_v32 = vld [vmem:[#allocation31_spill] sm:$0xff] }
 0x457   : > { %13586 = vmatprep.mubr.f32.mxu1 %v4510_v37  ;;  %v4609_v37 = vsub.f32 %v21258_v22, %v21259_v18  ;;  %v21276_v18 = vld [vmem:[#allocation40_spill] sm:$0xff] }
 0x458   : > { %v4600_v35 = vand.u32 4294901760, %v4599_v15  ;;  %v21274_v15 = vld [vmem:[#allocation35_spill] sm:$0xff] }
 0x459   : > { %v4610_v16 = vand.u32 4294901760, %v4609_v37  ;;  %v17818_v37 = vpop.f32.mrb[8].mxu0 }
 0x45a   : > { %13587 = vmatmul.mubr.f32.gmra.mrb[56].mxu1 %v4520_v56  ;;  %v21261_v56 = vand.u32 4294901760, %v21260_v33 }
 0x45b   : > { %13589 = vmatprep.mubr.f32.mxu1 %v4530_v46  ;;  %v21262_v46 = vld [vmem:[#allocation119_spill] sm:$0xff] }
 0x45c   : > { %v4619_v5 = vsub.f32 %v21260_v33, %v21261_v56  ;;  %v21263_v50 = vand.u32 4294901760, %v21262_v46  ;;  %v21277_v56 = vld [vmem:[#allocation49_spill] sm:$0xff] }
 0x45e   : > { %13590 = vmatmul.mubr.f32.gmra.mrb[58].mxu1 %v4540_v59  ;;  %v4629_v24 = vsub.f32 %v21262_v46, %v21263_v50  ;;  %v4620_v59 = vand.u32 4294901760, %v4619_v5 }
 0x45f   : > { %13592 = vmatprep.mubr.f32.mxu1 %v4550_v49  ;;  %v4639_v49 = vsub.f32 %v21264_v3, %v21265_v29  ;;  %v21279_v29 = vld [vmem:[#allocation58_spill] sm:$0xff] }
 0x460   : > { %v4630_v54 = vand.u32 4294901760, %v4629_v24 }
 0x461   : > { %v4640_v34 = vand.u32 4294901760, %v4639_v49 }
 0x462   : > { %13593 = vmatmul.mubr.f32.gmra.mrb[60].mxu1 %v4560_v47  ;;  %v21266_v47 = vld [vmem:[#allocation12_spill] sm:$0xff] }
 0x463   : > { %13595 = vmatprep.mubr.f32.mxu1 %v4570_v14  ;;  %v21269_v14 = vld [vmem:[#allocation19_spill] sm:$0xff] }
 0x466   : > { %13596 = vmatmul.mubr.f32.gmra.mrb[62].mxu1 %v4580_v23  ;;  %v21272_v23 = vld [vmem:[#allocation27_spill] sm:$0xff] }
 0x467   : > { %13598 = vmatprep.mubr.f32.mxu1 %v4590_v61  ;;  %v21275_v61 = vld [vmem:[#allocation37_spill] sm:$0xff] }
 0x46a   : > { %13599 = vmatmul.mubr.f32.gmra.mrb[64].mxu1 %v4600_v35 }
 0x46b   : > { %13601 = vmatprep.mubr.f32.mxu1 %v4610_v16  ;;  %v21278_v16 = vld [vmem:[#allocation51_spill] sm:$0xff] }
 0x46e   : > { %13602 = vmatmul.mubr.f32.gmra.mrb[66].mxu1 %v4620_v59 }
 0x46f   : > { %13604 = vmatprep.mubr.f32.mxu1 %v4630_v54  ;;  %v21280_v54 = vld [vmem:[#allocation62_spill] sm:$0xff] }
 0x472   : > { %13605 = vmatmul.mubr.f32.gmra.mrb[68].mxu1 %v4640_v34 }
 0x473   : > { %13609 = vmatprep.mubr.f32.mxu1 %v21266_v47 }
 0x476   : > { %13610 = vmatmul.mubr.f32.vlgmr.msra.gmra.mrb[38].mxu1 %v21267_v43 }
 0x477   : > { %13658 = vmatpush3.msra.mxu1 %v21215_v42  ;;  %13612 = vmatprep.mubr.f32.mxu1 %v21268_v44  ;;  %v17820_v42 = vpop.f32.mrb[9].mxu0  ;;  %v21281_v44 = vld [vmem:[#allocation66_spill] sm:$0xff] }
 0x478   : > { %v17822_v35 = vpop.f32.mrb[10].mxu0 }
 0x479   : > { %v17825_v5 = vpop.f32.mrb[11].mxu0 }
 0x47a   : > { %13613 = vmatmul.mubr.f32.gmra.mrb[40].mxu1 %v21269_v14  ;;  %v17828_v50 = vpop.f32.mrb[12].mxu0 }
 0x47b   : > { %13615 = vmatprep.mubr.f32.mxu1 %v21270_v53  ;;  %v17830_v24 = vpop.f32.mrb[13].mxu0  ;;  %v21282_v53 = vld [vmem:[#allocation73_spill] sm:$0xff] }
 0x47c   : > { %v17832_v59 = vpop.f32.mrb[14].mxu0 }
 0x47d   : > { %v17835_v49 = vpop.f32.mrb[15].mxu0 }
 0x47e   : > { %13616 = vmatmul.mubr.f32.gmra.mrb[42].mxu1 %v21271_v38  ;;  %v17838_v34 = vpop.f32.mrb[16].mxu0 }
 0x47f   : > { %13618 = vmatprep.mubr.f32.mxu1 %v21272_v23  ;;  %v17840_v47 = vpop.f32.mrb[17].mxu0 }
 0x480   : > { %v17842_v43 = vpop.f32.mrb[18].mxu0 }
 0x481   : > { %v17845_v14 = vpop.f32.mrb[19].mxu0 }
 0x482   : > { %13619 = vmatmul.mubr.f32.gmra.mrb[44].mxu1 %v21273_v32  ;;  %v17848_v38 = vpop.f32.mrb[20].mxu0 }
 0x483   : > { %13621 = vmatprep.mubr.f32.mxu1 %v21274_v15  ;;  %v17850_v23 = vpop.f32.mrb[21].mxu0  ;;  %v21283_v15 = vld [vmem:[#allocation75_spill] sm:$0xff] }
 0x484   : > { %v17852_v32 = vpop.f32.mrb[22].mxu0 }
 0x486   : > { %13622 = vmatmul.mubr.f32.gmra.mrb[46].mxu1 %v21275_v61  ;;  %v17855_v61 = vpop.f32.mrb[23].mxu0 }
 0x487   : > { %13624 = vmatprep.mubr.f32.mxu1 %v21276_v18  ;;  %v21284_v18 = vld [vmem:[#allocation76_spill] sm:$0xff] }
 0x48a   : > { %13625 = vmatmul.mubr.f32.gmra.mrb[48].mxu1 %v21277_v56  ;;  %v17858_v56 = vpop.f32.mrb[24].mxu0 }
 0x48b   : > { %13627 = vmatprep.mubr.f32.mxu1 %v21278_v16  ;;  %v17860_v16 = vpop.f32.mrb[25].mxu0 }
 0x48c   : > { %21285 = vst [vmem:[#allocation38_spill] sm:$0xff] %v17860_v16 }
 0x48e   : > { %13628 = vmatmul.mubr.f32.gmra.mrb[50].mxu1 %v21279_v29  ;;  %v17862_v29 = vpop.f32.mrb[26].mxu0 }
 0x48f   : > { %13630 = vmatprep.mubr.f32.mxu1 %v21280_v54  ;;  %21286 = vst [vmem:[#allocation42_spill] sm:$0xff] %v17862_v29  ;;  %v17865_v54 = vpop.f32.mrb[27].mxu0 }
 0x492   : > { %13631 = vmatmul.mubr.f32.gmra.mrb[52].mxu1 %v21281_v44  ;;  %v17868_v44 = vpop.f32.mrb[28].mxu0 }
 0x493   : > { %13633 = vmatprep.mubr.f32.mxu1 %v21282_v53  ;;  %v17870_v53 = vpop.f32.mrb[29].mxu0 }
 0x494   : > { %21287 = vst [vmem:[#allocation50_spill] sm:$0xff] %v17870_v53 }
 0x496   : > { %13634 = vmatmul.mubr.f32.gmra.mrb[54].mxu1 %v21283_v15  ;;  %v17872_v15 = vpop.f32.mrb[30].mxu0 }
 0x497   : > { %13636 = vmatprep.mubr.f32.mxu1 %v21284_v18  ;;  %21288 = vst [vmem:[#allocation53_spill] sm:$0xff] %v17872_v15  ;;  %v17875_v18 = vpop.f32.mrb[31].mxu0 }
 0x498   : > { %21289 = vst [vmem:[#allocation59_spill] sm:$0xff] %v17875_v18  ;;  %v17878_v16 = vpop.f32.mrb[32].mxu0  ;;  %v21293_v18 = vld [vmem:[#allocation105_spill] sm:$0xff] }
 0x499   : > { %21290 = vst [vmem:[#allocation85_spill] sm:$0xff] %v17878_v16  ;;  %v17880_v29 = vpop.f32.mrb[33].mxu0  ;;  %v21294_v16 = vld [vmem:[#allocation109_spill] sm:$0xff] }
 0x49a   : > { %13637 = vmatmul.mubr.f32.gmra.mrb[56].mxu1 %v21113_v20  ;;  %21291 = vst [vmem:[#allocation82_spill] sm:$0xff] %v17880_v29  ;;  %v17882_v20 = vpop.f32.mrb[34].mxu0  ;;  %v21295_v29 = vld [vmem:[#allocation111_spill] sm:$0xff] }
 0x49b   : > { %13639 = vmatprep.mubr.f32.mxu1 %v17168_v9  ;;  %21292 = vst [vmem:[#allocation89_spill] sm:$0xff] %v17882_v20  ;;  %v17885_v9 = vpop.f32.mrb[35].mxu0  ;;  %v21296_v20 = vld [vmem:[#allocation114_spill] sm:$0xff] }
 0x49c   : > { %v17888_v53 = vpop.f32.mrb[36].mxu0 }
 0x49d   : > { %v17890_v15 = vpop.f32.mrb[37].mxu0 }
 0x49e   : > { %13640 = vmatmul.mubr.f32.gmra.mrb[58].mxu1 %v21116_v51  ;;  %v17892_v51 = vpop.f32.mrb[38].mxu0 }
 0x49f   : > { %13642 = vmatprep.mubr.f32.mxu1 %v21117_v12  ;;  %v17895_v12 = vpop.f32.mrb[39].mxu0 }
 0x4a2   : > { %13643 = vmatmul.mubr.f32.gmra.mrb[60].mxu1 %v21120_v21  ;;  %v21297_v21 = vld [vmem:[#allocation117_spill] sm:$0xff] }
 0x4a3   : > { %13645 = vmatprep.mubr.f32.mxu1 %v17288_v25 }
 0x4a6   : > { %13646 = vmatmul.mubr.f32.gmra.mrb[62].mxu1 %v21293_v18 }
 0x4a7   : > { %13648 = vmatprep.mubr.f32.mxu1 %v21294_v16 }
 0x4aa   : > { %13649 = vmatmul.mubr.f32.gmra.mrb[64].mxu1 %v21295_v29 }
 0x4ab   : > { %13651 = vmatprep.mubr.f32.mxu1 %v21296_v20 }
 0x4ae   : > { %13652 = vmatmul.mubr.f32.gmra.mrb[66].mxu1 %v17380_v60 }
 0x4af   : > { %13654 = vmatprep.mubr.f32.mxu1 %v21297_v21 }
 0x4b2   : > { %13655 = vmatmul.mubr.f32.gmra.mrb[68].mxu1 %v17405_v58 }
 0x4b3   : > { %13659 = vmatprep.mubr.f32.mxu1 %v21201_v7 }
 0x4b6   : > { %13660 = vmatmul.mubr.f32.vlgmr.msra.gmra.mrb[38].mxu1 %v21203_v13 }
 0x4b7   : > { %13662 = vmatprep.mubr.f32.mxu1 %v21205_v26 }
 0x4ba   : > { %13663 = vmatmul.mubr.f32.gmra.mrb[40].mxu1 %v21207_v17 }
 0x4bb   : > { %13665 = vmatprep.mubr.f32.mxu1 %v21209_v6 }
 0x4be   : > { %13666 = vmatmul.mubr.f32.gmra.mrb[42].mxu1 %v21211_v41 }
 0x4bf   : > { %13668 = vmatprep.mubr.f32.mxu1 %v21213_v40 }
 0x4c2   : > { %13669 = vmatmul.mubr.f32.gmra.mrb[44].mxu1 %v21216_v10 }
 0x4c3   : > { %13671 = vmatprep.mubr.f32.mxu1 %v21218_v62 }
 0x4c6   : > { %13672 = vmatmul.mubr.f32.gmra.mrb[46].mxu1 %v21220_v63 }
 0x4c7   : > { %13674 = vmatprep.mubr.f32.mxu1 %v21222_v2 }
 0x4c9   : > { %v17914_v25 = vpop.f32.mrb[6].mxu1 }
 0x4ca   : > { %v17916_v60 = vpop.f32.mrb[7].mxu1  ;;  %13675 = vmatmul.mubr.f32.gmra.mrb[48].mxu1 %v21224_v31 }
 0x4cb   : > { %13677 = vmatprep.mubr.f32.mxu1 %v21226_v48 }
 0x4cd   : > { %v17920_v58 = vpop.f32.mrb[8].mxu1 }
 0x4ce   : > { %v17922_v7 = vpop.f32.mrb[9].mxu1  ;;  %13678 = vmatmul.mubr.f32.gmra.mrb[50].mxu1 %v21228_v36 }
 0x4cf   : > { %13680 = vmatprep.mubr.f32.mxu1 %v21230_v52 }
 0x4d1   : > { %v17926_v13 = vpop.f32.mrb[10].mxu1 }
 0x4d2   : > { %v17928_v26 = vpop.f32.mrb[11].mxu1  ;;  %13681 = vmatmul.mubr.f32.gmra.mrb[52].mxu1 %v21232_v4 }
 0x4d3   : > { %13683 = vmatprep.mubr.f32.mxu1 %v21234_v39 }
 0x4d5   : > { %v17932_v17 = vpop.f32.mrb[12].mxu1 }
 0x4d6   : > { %v17934_v6 = vpop.f32.mrb[13].mxu1  ;;  %13684 = vmatmul.mubr.f32.gmra.mrb[54].mxu1 %v21236_v57 }
 0x4d7   : > { %13686 = vmatprep.mubr.f32.mxu1 %v21238_v19 }
 0x4d9   : > { %v17938_v41 = vpop.f32.mrb[14].mxu1 }
 0x4da   : > { %v17940_v40 = vpop.f32.mrb[15].mxu1  ;;  %13687 = vmatmul.mubr.f32.gmra.mrb[56].mxu1 %v21240_v28 }
 0x4db   : > { %13689 = vmatprep.mubr.f32.mxu1 %v21242_v11 }
 0x4dd   : > { %v17944_v10 = vpop.f32.mrb[16].mxu1 }
 0x4de   : > { %v17946_v62 = vpop.f32.mrb[17].mxu1  ;;  %13690 = vmatmul.mubr.f32.gmra.mrb[58].mxu1 %v21244_v0 }
 0x4df   : > { %13692 = vmatprep.mubr.f32.mxu1 %v21246_v55 }
 0x4e1   : > { %v17950_v63 = vpop.f32.mrb[18].mxu1 }
 0x4e2   : > { %v17952_v2 = vpop.f32.mrb[19].mxu1  ;;  %13693 = vmatmul.mubr.f32.gmra.mrb[60].mxu1 %v21248_v8 }
 0x4e3   : > { %13695 = vmatprep.mubr.f32.mxu1 %v21250_v1 }
 0x4e5   : > { %v17956_v31 = vpop.f32.mrb[20].mxu1 }
 0x4e6   : > { %v17958_v48 = vpop.f32.mrb[21].mxu1  ;;  %13696 = vmatmul.mubr.f32.gmra.mrb[62].mxu1 %v21252_v30 }
 0x4e7   : > { %13698 = vmatprep.mubr.f32.mxu1 %v21254_v45 }
 0x4e9   : > { %v17962_v36 = vpop.f32.mrb[22].mxu1 }
 0x4ea   : > { %v17964_v52 = vpop.f32.mrb[23].mxu1  ;;  %13699 = vmatmul.mubr.f32.gmra.mrb[64].mxu1 %v21256_v27 }
 0x4eb   : > { %13701 = vmatprep.mubr.f32.mxu1 %v21258_v22 }
 0x4ed   : > { %v17968_v4 = vpop.f32.mrb[24].mxu1 }
 0x4ee   : > { %v17970_v39 = vpop.f32.mrb[25].mxu1  ;;  %13702 = vmatmul.mubr.f32.gmra.mrb[66].mxu1 %v21260_v33  ;;  %v16195_v33 = vmov 0  }
 0x4ef   : > { %13704 = vmatprep.mubr.f32.mxu1 %v21262_v46  ;;  %16144 = vset.pattern.permute.xlu0 %v16195_v33 }
 0x4f1   : > { %v17974_v57 = vpop.f32.mrb[26].mxu1 }
 0x4f2   : > { %v17976_v19 = vpop.f32.mrb[27].mxu1  ;;  %13705 = vmatmul.mubr.f32.gmra.mrb[68].mxu1 %v21264_v3 }
 0x4f5   : > { %v17979_v28 = vpop.f32.mrb[28].mxu1 }
 0x4f6   : > { %v17981_v11 = vpop.f32.mrb[29].mxu1 }
 0x4f9   : > { %v17983_v0 = vpop.f32.mrb[30].mxu1 }
 0x4fa   : > { %v17985_v55 = vpop.f32.mrb[31].mxu1 }
 0x4fd   : > { %v17987_v8 = vpop.f32.mrb[32].mxu1 }
 0x4fe   : > { %v17989_v1 = vpop.f32.mrb[33].mxu1 }
 0x501   : > { %v17991_v30 = vpop.f32.mrb[34].mxu1 }
 0x502   : > { %v17993_v45 = vpop.f32.mrb[35].mxu1 }
 0x503   : > { %21298 = vst [vmem:[#allocation96_spill] sm:$0xff] %v17993_v45 }
 0x505   : > { %v17995_v27 = vpop.f32.mrb[36].mxu1 }
 0x506   : > { %v17997_v22 = vpop.f32.mrb[37].mxu1 }
 0x507   : > { %21299 = vst [vmem:[#allocation98_spill] sm:$0xff] %v17997_v22 }
 0x589   : > { %v13661_v46 = vpop.f32.mrb[38].mxu1 }
 0x58a   : > { %v15577_v3 = vadd.f32 %v17818_v37, %v13661_v46  ;;  %v4978_v16 = vpop.f32.mrb[39].mxu1 }
 0x58b   : > { %v15578_v29 = vadd.f32 %v17820_v42, %v4978_v16 }
 0x58c   : > { %6041 = vrot.lane.b32.xlu1 %v15577_v3, %s16196_s24 }
 0x58d   : > { %v13664_v18 = vpop.f32.mrb[40].mxu1 }
 0x58e   : > { %v15579_v20 = vadd.f32 %v17822_v35, %v13664_v18  ;;  %v4992_v21 = vpop.f32.mrb[41].mxu1 }
 0x58f   : > { %v15580_v45 = vadd.f32 %v17825_v5, %v4992_v21 }
 0x590   : > { %6039 = vrot.lane.b32.xlu1 %v15578_v29, %s16196_s24 }
 0x591   : > { %v13667_v22 = vpop.f32.mrb[42].mxu1  ;;  %6043 = vrot.lane.b32.xlu0 %v15580_v45, %s16196_s24 }
 0x592   : > { %v15581_v33 = vadd.f32 %v17828_v50, %v13667_v22  ;;  %v5006_v37 = vpop.f32.mrb[43].mxu1 }
 0x593   : > { %v15582_v46 = vadd.f32 %v17830_v24, %v5006_v37 }
 0x594   : > { %6045 = vrot.lane.b32.xlu1 %v15579_v20, %s16196_s24 }
 0x595   : > { %v13670_v42 = vpop.f32.mrb[44].mxu1  ;;  %6047 = vrot.lane.b32.xlu0 %v15582_v46, %s16196_s24 }
 0x596   : > { %v15583_v35 = vadd.f32 %v17832_v59, %v13670_v42  ;;  %v5020_v3 = vpop.f32.mrb[45].mxu1 }
 0x597   : > { %v15584_v5 = vadd.f32 %v17835_v49, %v5020_v3  ;;  %v21301_v3 = vld [vmem:[#allocation42_spill] sm:$0xff] }
 0x598   : > { %6049 = vrot.lane.b32.xlu1 %v15581_v33, %s16196_s24 }
 0x599   : > { %v13673_v16 = vpop.f32.mrb[46].mxu1  ;;  %6051 = vrot.lane.b32.xlu0 %v15584_v5, %s16196_s24 }
 0x59a   : > { %v15585_v50 = vadd.f32 %v17838_v34, %v13673_v16  ;;  %v5034_v45 = vpop.f32.mrb[47].mxu1 }
 0x59b   : > { %v15586_v24 = vadd.f32 %v17840_v47, %v5034_v45 }
 0x59c   : > { %6053 = vrot.lane.b32.xlu1 %v15583_v35, %s16196_s24 }
 0x59d   : > { %v13676_v22 = vpop.f32.mrb[48].mxu1  ;;  %6055 = vrot.lane.b32.xlu0 %v15586_v24, %s16196_s24 }
 0x59e   : > { %v15587_v59 = vadd.f32 %v17842_v43, %v13676_v22  ;;  %v5048_v29 = vpop.f32.mrb[49].mxu1 }
 0x59f   : > { %v15588_v49 = vadd.f32 %v17845_v14, %v5048_v29 }
 0x5a0   : > { %6057 = vrot.lane.b32.xlu1 %v15585_v50, %s16196_s24 }
 0x5a1   : > { %v13679_v18 = vpop.f32.mrb[50].mxu1  ;;  %6059 = vrot.lane.b32.xlu0 %v15588_v49, %s16196_s24 }
 0x5a2   : > { %v15589_v34 = vadd.f32 %v17848_v38, %v13679_v18  ;;  %v5062_v20 = vpop.f32.mrb[51].mxu1  ;;  %v21300_v38 = vld [vmem:[#allocation38_spill] sm:$0xff]  ;;  %v21304_v18 = vld [vmem:[#allocation59_spill] sm:$0xff] }
 0x5a3   : > { %v15590_v47 = vadd.f32 %v17850_v23, %v5062_v20  ;;  %v21305_v20 = vld [vmem:[#allocation85_spill] sm:$0xff] }
 0x5a4   : > { %6061 = vrot.lane.b32.xlu1 %v15587_v59, %s16196_s24  ;;  %v21303_v59 = vld [vmem:[#allocation53_spill] sm:$0xff] }
 0x5a5   : > { %v13682_v21 = vpop.f32.mrb[52].mxu1  ;;  %6063 = vrot.lane.b32.xlu0 %v15590_v47, %s16196_s24 }
 0x5a6   : > { %v15591_v43 = vadd.f32 %v17852_v32, %v13682_v21  ;;  %v5076_v33 = vpop.f32.mrb[53].mxu1  ;;  %v21306_v21 = vld [vmem:[#allocation82_spill] sm:$0xff] }
 0x5a7   : > { %v15592_v14 = vadd.f32 %v17855_v61, %v5076_v33 }
 0x5a8   : > { %6065 = vrot.lane.b32.xlu1 %v15589_v34, %s16196_s24 }
 0x5a9   : > { %v13685_v37 = vpop.f32.mrb[54].mxu1 }
 0x5aa   : > { %v15593_v46 = vadd.f32 %v17858_v56, %v13685_v37  ;;  %v5090_v42 = vpop.f32.mrb[55].mxu1  ;;  %v21302_v56 = vld [vmem:[#allocation50_spill] sm:$0xff] }
 0x5ab   : > { %v15594_v35 = vadd.f32 %v21300_v38, %v5090_v42 }
 0x5ac   : > { %6073 = vrot.lane.b32.xlu0 %v15593_v46, %s16196_s24  ;;  %v21307_v46 = vld [vmem:[#allocation89_spill] sm:$0xff] }
 0x5ad   : > { %v13688_v23 = vpop.f32.mrb[56].mxu1 }
 0x5ae   : > { %v15595_v5 = vadd.f32 %v21301_v3, %v13688_v23  ;;  %v5104_v16 = vpop.f32.mrb[57].mxu1 }
 0x5af   : > { %v15596_v50 = vadd.f32 %v17865_v54, %v5104_v16 }
 0x5b0   : > { %6071 = vrot.lane.b32.xlu0 %v15594_v35, %s16196_s24  ;;  %6077 = vrot.lane.b32.xlu1 %v15595_v5, %s16196_s24 }
 0x5b1   : > { %v13691_v32 = vpop.f32.mrb[58].mxu1 }
 0x5b2   : > { %v15597_v61 = vadd.f32 %v17868_v44, %v13691_v32  ;;  %v5118_v45 = vpop.f32.mrb[59].mxu1 }
 0x5b3   : > { %v15598_v24 = vadd.f32 %v21302_v56, %v5118_v45 }
 0x5b4   : > { %6075 = vrot.lane.b32.xlu0 %v15596_v50, %s16196_s24  ;;  %6081 = vrot.lane.b32.xlu1 %v15597_v61, %s16196_s24  ;;  %v6264_v50 = vld [vmem:[%s20581_s6 + $0x8] sm:$0xff] }
 0x5b5   : > { %v13694_v22 = vpop.f32.mrb[60].mxu1  ;;  %v18059_v32 = vand.u32 4294901760, %v6264_v50 }
 0x5b6   : > { %v15599_v29 = vadd.f32 %v21303_v59, %v13694_v22  ;;  %v5132_v49 = vpop.f32.mrb[61].mxu1  ;;  %v6263_v22 = vld [vmem:[%s20581_s6] sm:$0xff]  ;;  %v6104_v59 = vld [vmem:[%s20579_s4 + $0x8] sm:$0xff] }
 0x5b7   : > { %v15600_v54 = vadd.f32 %v21304_v18, %v5132_v49  ;;  %21308 = vst [vmem:[#allocation11_spill] sm:$0xff] %v18059_v32  ;;  %v18064_v56 = vsub.f32 %v6264_v50, %v18059_v32  ;;  %v6108_v49 = vld [vmem:[%s20579_s4 + $0x28] sm:$0xff]  ;;  %v6107_v18 = vld [vmem:[%s20579_s4 + $0x20] sm:$0xff] }
 0x5b8   : > { %6079 = vrot.lane.b32.xlu0 %v15598_v24, %s16196_s24  ;;  %6085 = vrot.lane.b32.xlu1 %v15599_v29, %s16196_s24  ;;  %v6103_v29 = vld [vmem:[%s20579_s4] sm:$0xff]  ;;  %v6120_v50 = vld [vmem:[%s20579_s4 + $0x88] sm:$0xff] }
 0x5b9   : > { %v13697_v34 = vpop.f32.mrb[62].mxu1  ;;  %21309 = vst [vmem:[#allocation14_spill] sm:$0xff] %v18064_v56 }
 0x5ba   : > { %v15601_v44 = vadd.f32 %v21305_v20, %v13697_v34  ;;  %v5146_v47 = vpop.f32.mrb[63].mxu1  ;;  %v6109_v34 = vld [vmem:[%s20579_s4 + $0x30] sm:$0xff]  ;;  %v18103_v20 = vand.u32 4294901760, %v6263_v22 }
 0x5bb   : > { %v15602_v33 = vadd.f32 %v21306_v21, %v5146_v47  ;;  %v6111_v47 = vld [vmem:[%s20579_s4 + $0x40] sm:$0xff]  ;;  %v6114_v21 = vld [vmem:[%s20579_s4 + $0x58] sm:$0xff] }
 0x5bc   : > { %6083 = vrot.lane.b32.xlu0 %v15600_v54, %s16196_s24  ;;  %6089 = vrot.lane.b32.xlu1 %v15601_v44, %s16196_s24  ;;  %v6110_v54 = vld [vmem:[%s20579_s4 + $0x38] sm:$0xff]  ;;  %21310 = vst [vmem:[#allocation15_spill] sm:$0xff] %v18103_v20  ;;  %v6112_v44 = vld [vmem:[%s20579_s4 + $0x48] sm:$0xff] }
 0x5bd   : > { %v13700_v37 = vpop.f32.mrb[64].mxu1 }
 0x5be   : > { %v15603_v42 = vadd.f32 %v21307_v46, %v13700_v37  ;;  %v5160_v38 = vpop.f32.mrb[65].mxu1  ;;  %v6113_v37 = vld [vmem:[%s20579_s4 + $0x50] sm:$0xff]  ;;  %v6116_v46 = vld [vmem:[%s20579_s4 + $0x68] sm:$0xff] }
 0x5bf   : > { %v15604_v35 = vadd.f32 %v17885_v9, %v5160_v38  ;;  %v18125_v38 = vmul.f32 %v6103_v29, %v17916_v60  ;;  %v6168_v60 = vld [vmem:[%s20580_s5 + $0x8] sm:$0xff] }
 0x5c0   : > { %6087 = vrot.lane.b32.xlu0 %v15602_v33, %s16196_s24  ;;  %6093 = vrot.lane.b32.xlu1 %v15603_v42, %s16196_s24  ;;  %v6136_v33 = vmul.f32 %v17914_v25, %v6104_v59  ;;  %v6266_v42 = vld [vmem:[%s20581_s6 + $0x18] sm:$0xff] }
 0x5c1   : > { %v13703_v23 = vpop.f32.mrb[66].mxu1  ;;  %v6126_v59 = vld [vmem:[%s20579_s4 + $0xb8] sm:$0xff] }
 0x5c2   : > { %v15605_v3 = vadd.f32 %v17888_v53, %v13703_v23  ;;  %v5174_v5 = vpop.f32.mrb[67].mxu1  ;;  %v18134_v23 = vmul.f32 %v17926_v13, %v6108_v49  ;;  %v18152_v13 = vmul.f32 %v6109_v34, %v17934_v6  ;;  %v18170_v6 = vmul.f32 %v6111_v47, %v17940_v40  ;;  %v6125_v49 = vld [vmem:[%s20579_s4 + $0xb0] sm:$0xff] }
 0x5c3   : > { %v15606_v16 = vadd.f32 %v17890_v15, %v5174_v5  ;;  %v20826_v15 = vand.u32 4294901760, %v18064_v56  ;;  %v6118_v5 = vld [vmem:[%s20579_s4 + $0x78] sm:$0xff]  ;;  %v18187_v40 = vmul.f32 %v6113_v37, %v17946_v62  ;;  %v6265_v62 = vld [vmem:[%s20581_s6 + $0x10] sm:$0xff] }
 0x5c4   : > { %6091 = vrot.lane.b32.xlu0 %v15604_v35, %s16196_s24  ;;  %6097 = vrot.lane.b32.xlu1 %v15605_v3, %s16196_s24  ;;  %v6115_v3 = vld [vmem:[%s20579_s4 + $0x60] sm:$0xff] }
 0x5c5   : > { %v13706_v9 = vpop.f32.mrb[68].mxu1  ;;  %v6366_v24 = vsub.f32 %v18064_v56, %v20826_v15 }
 0x5c6   : > { %v15607_v61 = vadd.f32 %v17892_v51, %v13706_v9  ;;  %v5188_v45 = vpop.f32.mrb[69].mxu1  ;;  %v6119_v9 = vld [vmem:[%s20579_s4 + $0x80] sm:$0xff] }
 0x5c7   : > { %v15608_v53 = vadd.f32 %v17895_v12, %v5188_v45  ;;  %v6367_v51 = vand.u32 4294901760, %v6366_v24  ;;  %v1112_v12 = vld [vmem:[%s16335_s20] sm:$0xff]  ;;  %v6122_v45 = vld [vmem:[%s20579_s4 + $0x98] sm:$0xff]  ;;  %v6124_v24 = vld [vmem:[%s20579_s4 + $0xa8] sm:$0xff]  ;;  %s21440_s20 = sld [smem:[#allocation127_spill]] }
 0x5c8   : > { %6095 = vrot.lane.b32.xlu0 %v15606_v16, %s16196_s24  ;;  %6101 = vrot.lane.b32.xlu1 %v15607_v61, %s16196_s24  ;;  %v6117_v16 = vld [vmem:[%s20579_s4 + $0x70] sm:$0xff]  ;;  %v18173_v61 = vmul.f32 %v17944_v10, %v6114_v21  ;;  %v18190_v10 = vmul.f32 %v17950_v63, %v6116_v46 }
 0x5c9   : > { %6368 = vmatprep.mubr.f32.mxu1 %v6367_v51  ;;  %v18184_v51 = vand.u32 4294901760, %v6266_v42  ;;  %v18208_v63 = vmul.f32 %v6117_v16, %v17958_v48  ;;  %v18226_v48 = vmul.f32 %v17968_v4, %v6122_v45  ;;  %v18242_v4 = vmul.f32 %v17974_v57, %v6124_v24  ;;  %v6129_v21 = vld [vmem:[%s20579_s4 + $0xd0] sm:$0xff]  ;;  %v6132_v57 = vld [vmem:[%s20579_s4 + $0xe8] sm:$0xff]  ;;  %v6170_v45 = vld [vmem:[%s20580_s5 + $0x18] sm:$0xff] }
 0x5cb   : > { %21312 = vst [vmem:[#allocation16_spill] sm:$0xff] %v18184_v51  ;;  %v18251_v46 = vsub.f32 %v6266_v42, %v18184_v51 }
 0x5cc   : > { %6099 = vrot.lane.b32.xlu0 %v15608_v53, %s16196_s24  ;;  %6069 = vrot.lane.b32.xlu1 %v15591_v43, %s16196_s24  ;;  %v6106_v43 = vld [vmem:[%s20579_s4 + $0x18] sm:$0xff]  ;;  %v6121_v53 = vld [vmem:[%s20579_s4 + $0x90] sm:$0xff] }
 0x5cd   : > { %v18128_v35 = vmul.f32 %v17920_v58, %v6106_v43  ;;  %v18146_v58 = vmul.f32 %v6107_v18, %v17928_v26  ;;  %v18164_v26 = vsub.f32 %v6263_v22, %v18103_v20  ;;  %v6123_v22 = vld [vmem:[%s20579_s4 + $0xa0] sm:$0xff]  ;;  %v18205_v43 = vmul.f32 %v17956_v31, %v6118_v5  ;;  %v6128_v18 = vld [vmem:[%s20579_s4 + $0xc8] sm:$0xff]  ;;  %21313 = vst [vmem:[#allocation22_spill] sm:$0xff] %v18251_v46 }
 0x5ce   : > { %v6167_v31 = vld [vmem:[%s20580_s5] sm:$0xff]  ;;  %v18259_v5 = vmul.f32 %v6125_v49, %v17981_v11  ;;  %v20824_v49 = vand.u32 4294901760, %v18251_v46 }
 0x5cf   : > { %21311 = vst [vmem:[#allocation52_spill] sm:$0xff] %v18164_v26  ;;  %v20825_v47 = vand.u32 4294901760, %v18164_v26 }
 0x5d0   : > { %6067 = vrot.lane.b32.xlu0 %v15592_v14, %s16196_s24  ;;  %v6105_v14 = vld [vmem:[%s20579_s4 + $0x10] sm:$0xff]  ;;  %s21441_s24 = smov %s21440_s20 }
 0x5d1   : > { %v18131_v25 = vmul.f32 %v6105_v14, %v17922_v7  ;;  %v18149_v7 = vmul.f32 %v17932_v17, %v6110_v54  ;;  %v18167_v17 = vmul.f32 %v17938_v41, %v6112_v44  ;;  %v18214_v14 = vmul.f32 %v6119_v9, %v17964_v52  ;;  %v6127_v52 = vld [vmem:[%s20579_s4 + $0xc0] sm:$0xff]  ;;  %v6130_v54 = vld [vmem:[%s20579_s4 + $0xd8] sm:$0xff]  ;;  %v6169_v44 = vld [vmem:[%s20580_s5 + $0x10] sm:$0xff] }
 0x5d2   : > { %v18268_v42 = vmul.f32 %v6127_v52, %v17985_v55  ;;  %v18271_v9 = vmul.f32 %v17987_v8, %v6130_v54  ;;  %v6133_v55 = vld [vmem:[%s20579_s4 + $0xf0] sm:$0xff] }
 0x5d4   : > { %1115 = vperm.xlu0 %16144, %v1112_v12   ;;  %v18193_v12 = vmul.f32 %v6115_v3, %v17952_v2  ;;  %v18211_v2 = vmul.f32 %v17962_v36, %v6120_v50  ;;  %v18229_v36 = vmul.f32 %v6121_v53, %v17970_v39  ;;  %v18245_v39 = vmul.f32 %v6123_v22, %v17976_v19 }
 0x5d5   : > { %v18256_v3 = vmul.f32 %v17979_v28, %v6126_v59  ;;  %v18265_v50 = vmul.f32 %v17983_v0, %v6128_v18  ;;  %v6131_v28 = vld [vmem:[%s20579_s4 + $0xe0] sm:$0xff]  ;;  %v18280_v53 = vmul.f32 %v6129_v21, %v17989_v1  ;;  %v6134_v0 = vld [vmem:[%s20579_s4 + $0xf8] sm:$0xff]  ;;  %v18297_v1 = vsub.f32 %v18164_v26, %v20825_v47 }
 0x5d6   : > { %v18300_v22 = vmul.f32 %v17991_v30, %v6132_v57  ;;  %v18312_v21 = vmul.f32 %v17995_v27, %v6134_v0  ;;  %v21318_v30 = vld [vmem:[#allocation98_spill] sm:$0xff]  ;;  %v6173_v27 = vld [vmem:[%s20580_s5 + $0x30] sm:$0xff] }
 0x5fe   : > { %v6042_v41 = vpop.permute.xlu1 %6041 }
 0x5ff   : > { %v6200_v29 = vmul.f32 %v6168_v60, %v6042_v41  ;;  %v6171_v41 = vld [vmem:[%s20580_s5 + $0x20] sm:$0xff] }
 0x601   : > { %v6232_v34 = vadd.f32 %v6200_v29, %v6136_v33  ;;  %v18253_v33 = vand.u32 4294901760, %v6265_v62 }
 0x602   : > { %v6040_v37 = vpop.permute.xlu1 %6039 }
 0x603   : > { %21314 = vst [vmem:[#allocation24_spill] sm:$0xff] %v18253_v33  ;;  %v6271_v19 = vand.u32 4294901760, %v6232_v34  ;;  %v6199_v60 = vmul.f32 %v6167_v31, %v6040_v37  ;;  %v6044_v16 = vpop.permute.xlu0 %6043  ;;  %v18305_v18 = vsub.f32 %v6265_v62, %v18253_v33  ;;  %v18315_v37 = vmul.f32 %v6133_v55, %v21318_v30  ;;  %v6172_v62 = vld [vmem:[%s20580_s5 + $0x28] sm:$0xff] }
 0x604   : > { %v6201_v11 = vmul.f32 %v6169_v44, %v6044_v16 }
 0x605   : > { %v18288_v8 = vsub.f32 %v6232_v34, %v6271_v19  ;;  %v6231_v24 = vadd.f32 %v6199_v60, %v18125_v38  ;;  %21316 = vst [vmem:[#allocation29_spill] sm:$0xff] %v18305_v18  ;;  %v21317_v38 = vld [vmem:[#allocation96_spill] sm:$0xff] }
 0x606   : > { %v6233_v59 = vadd.f32 %v6201_v11, %v18131_v25  ;;  %v6046_v29 = vpop.permute.xlu1 %6045  ;;  %v18308_v31 = vmul.f32 %v6131_v28, %v21317_v38 }
 0x607   : > { %21315 = vst [vmem:[#allocation28_spill] sm:$0xff] %v18288_v8  ;;  %v6404_v52 = vand.u32 4294901760, %v18288_v8  ;;  %v6268_v54 = vand.u32 4294901760, %v6231_v24  ;;  %v6202_v34 = vmul.f32 %v6170_v45, %v6046_v29  ;;  %v6048_v44 = vpop.permute.xlu0 %6047 }
 0x608   : > { %v6274_v25 = vand.u32 4294901760, %v6233_v59  ;;  %v6203_v57 = vmul.f32 %v6171_v41, %v6048_v44 }
 0x609   : > { %v18320_v60 = vpack.c.bf16 %v6271_v19, %v6268_v54  ;;  %v18322_v16 = vsub.f32 %v6231_v24, %v6268_v54  ;;  %v6234_v28 = vadd.f32 %v6202_v34, %v18128_v35  ;;  %v18335_v19 = vsub.f32 %v18251_v46, %v20824_v49 }
 0x60a   : > { %v18329_v45 = vsub.f32 %v6233_v59, %v6274_v25  ;;  %v6235_v0 = vadd.f32 %v6203_v57, %v18146_v58  ;;  %v6050_v55 = vpop.permute.xlu1 %6049  ;;  %v6405_v35 = vsub.f32 %v18288_v8, %v6404_v52  ;;  %v6174_v58 = vld [vmem:[%s20580_s5 + $0x38] sm:$0xff] }
 0x60b   : > { %21319 = vst [vmem:[#allocation32_spill] sm:$0xff] %v18322_v16  ;;  %v6397_v41 = vand.u32 4294901760, %v18322_v16  ;;  %v6277_v29 = vand.u32 4294901760, %v6234_v28  ;;  %v6204_v38 = vmul.f32 %v6172_v62, %v6050_v55  ;;  %v6052_v54 = vpop.permute.xlu0 %6051  ;;  %v6175_v55 = vld [vmem:[%s20580_s5 + $0x40] sm:$0xff] }
 0x60c   : > { %v20831_v59 = vand.u32 4294901760, %v18329_v45  ;;  %v6280_v34 = vand.u32 4294901760, %v6235_v0  ;;  %v6205_v44 = vmul.f32 %v6173_v27, %v6052_v54 }
 0x60d   : > { %v6398_v57 = vsub.f32 %v18322_v16, %v6397_v41  ;;  %v18347_v49 = vpack.c.bf16 %v6277_v29, %v6274_v25  ;;  %v18349_v47 = vsub.f32 %v6234_v28, %v6277_v29  ;;  %v6236_v62 = vadd.f32 %v6204_v38, %v18134_v23 }
 0x60e   : > { %v6412_v27 = vsub.f32 %v18329_v45, %v20831_v59  ;;  %v18358_v54 = vsub.f32 %v6235_v0, %v6280_v34  ;;  %v6237_v15 = vadd.f32 %v6205_v44, %v18152_v13  ;;  %v6054_v30 = vpop.permute.xlu1 %6053  ;;  %v18361_v11 = vpack.c.bf16 %v6404_v52, %v6397_v41  ;;  %v6176_v0 = vld [vmem:[%s20580_s5 + $0x48] sm:$0xff] }
 0x60f   : > { %21320 = vst [vmem:[#allocation39_spill] sm:$0xff] %v18347_v49  ;;  %v20832_v25 = vand.u32 4294901760, %v18349_v47  ;;  %v6283_v28 = vand.u32 4294901760, %v6236_v62  ;;  %v6206_v29 = vmul.f32 %v6174_v58, %v6054_v30  ;;  %v6056_v23 = vpop.permute.xlu0 %6055  ;;  %v6399_v38 = vand.u32 4294901760, %v6398_v57  ;;  %v6177_v58 = vld [vmem:[%s20580_s5 + $0x50] sm:$0xff] }
 0x610   : > { %21321 = vst [vmem:[#allocation44_spill] sm:$0xff] %v18361_v11  ;;  %v6286_v46 = vand.u32 4294901760, %v6237_v15  ;;  %v6207_v26 = vmul.f32 %v6175_v55, %v6056_v23  ;;  %v6406_v59 = vand.u32 4294901760, %v6405_v35  ;;  %v6413_v23 = vand.u32 4294901760, %v6412_v27 }
 0x611   : > { %v6419_v13 = vsub.f32 %v18349_v47, %v20832_v25  ;;  %v18371_v52 = vpack.c.bf16 %v6283_v28, %v6280_v34  ;;  %v18373_v41 = vsub.f32 %v6236_v62, %v6283_v28  ;;  %v6238_v44 = vadd.f32 %v6206_v29, %v18149_v7 }
 0x612   : > { %v18379_v30 = vsub.f32 %v6237_v15, %v6286_v46  ;;  %v6239_v57 = vadd.f32 %v6207_v26, %v18170_v6  ;;  %v6058_v55 = vpop.permute.xlu1 %6057  ;;  %v18382_v35 = vpack.c.bf16 %v6406_v59, %v6399_v38  ;;  %v21323_v7 = vand.u32 4294901760, %v18358_v54  ;;  %v6178_v26 = vld [vmem:[%s20580_s5 + $0x58] sm:$0xff] }
 0x613   : > { %21322 = vst [vmem:[#allocation45_spill] sm:$0xff] %v18371_v52  ;;  %v20835_v25 = vand.u32 4294901760, %v18373_v41  ;;  %v6289_v34 = vand.u32 4294901760, %v6238_v44  ;;  %v6208_v24 = vmul.f32 %v6176_v0, %v6058_v55  ;;  %v6060_v62 = vpop.permute.xlu0 %6059  ;;  %v6420_v28 = vand.u32 4294901760, %v6419_v13  ;;  %v6179_v0 = vld [vmem:[%s20580_s5 + $0x60] sm:$0xff] }
 0x614   : > { %v6426_v29 = vsub.f32 %v18358_v54, %v21323_v7  ;;  %v20840_v11 = vand.u32 4294901760, %v18379_v30  ;;  %v6292_v15 = vand.u32 4294901760, %v6239_v57  ;;  %v6209_v56 = vmul.f32 %v6177_v58, %v6060_v62 }
 0x615   : > { %v6433_v6 = vsub.f32 %v18373_v41, %v20835_v25  ;;  %v18395_v59 = vpack.c.bf16 %v6289_v34, %v6286_v46  ;;  %v18397_v27 = vsub.f32 %v6238_v44, %v6289_v34  ;;  %v6240_v38 = vadd.f32 %v6208_v24, %v18167_v17 }
 0x616   : > { %v6440_v13 = vsub.f32 %v18379_v30, %v20840_v11  ;;  %v18406_v58 = vsub.f32 %v6239_v57, %v6292_v15  ;;  %v6241_v55 = vadd.f32 %v6209_v56, %v18187_v40  ;;  %v6062_v62 = vpop.permute.xlu1 %6061  ;;  %v18409_v7 = vpack.c.bf16 %v6420_v28, %v6413_v23  ;;  %v6180_v57 = vld [vmem:[%s20580_s5 + $0x68] sm:$0xff] }
 0x617   : > { %v20843_v46 = vand.u32 4294901760, %v18397_v27  ;;  %v6295_v44 = vand.u32 4294901760, %v6240_v38  ;;  %v6210_v34 = vmul.f32 %v6178_v26, %v6062_v62  ;;  %v6064_v17 = vpop.permute.xlu0 %6063  ;;  %v6434_v24 = vand.u32 4294901760, %v6433_v6 }
 0x618   : > { %21324 = vst [vmem:[#allocation47_spill] sm:$0xff] %v18409_v7  ;;  %v6298_v33 = vand.u32 4294901760, %v6241_v55  ;;  %v6211_v51 = vmul.f32 %v6179_v0, %v6064_v17  ;;  %v6427_v11 = vand.u32 4294901760, %v6426_v29  ;;  %v6441_v17 = vand.u32 4294901760, %v6440_v13 }
 0x619   : > { %v6447_v56 = vsub.f32 %v18397_v27, %v20843_v46  ;;  %v18419_v40 = vpack.c.bf16 %v6295_v44, %v6292_v15  ;;  %v18421_v23 = vsub.f32 %v6240_v38, %v6295_v44  ;;  %v6242_v28 = vadd.f32 %v6210_v34, %v18173_v61 }
 0x61a   : > { %v18424_v26 = vsub.f32 %v6241_v55, %v6298_v33  ;;  %v6243_v6 = vadd.f32 %v6211_v51, %v18193_v12  ;;  %v6066_v0 = vpop.permute.xlu1 %6065  ;;  %v18427_v62 = vpack.c.bf16 %v6434_v24, %v6427_v11  ;;  %v21329_v15 = vand.u32 4294901760, %v18406_v58  ;;  %v6184_v51 = vld [vmem:[%s20580_s5 + $0x88] sm:$0xff] }
 0x61b   : > { %21325 = vst [vmem:[#allocation55_spill] sm:$0xff] %v18419_v40  ;;  %21326 = vst [vmem:[#allocation60_spill] sm:$0xff] %v18421_v23  ;;  %v6460_v29 = vand.u32 4294901760, %v18421_v23  ;;  %v6301_v25 = vand.u32 4294901760, %v6242_v28  ;;  %v6212_v16 = vmul.f32 %v6180_v57, %v6066_v0  ;;  %v6448_v8 = vand.u32 4294901760, %v6447_v56 }
 0x61c   : > { %21327 = vst [vmem:[#allocation65_spill] sm:$0xff] %v18424_v26  ;;  %21328 = vst [vmem:[#allocation67_spill] sm:$0xff] %v18427_v62  ;;  %v6454_v38 = vsub.f32 %v18406_v58, %v21329_v15  ;;  %v6467_v44 = vand.u32 4294901760, %v18424_v26  ;;  %v6304_v61 = vand.u32 4294901760, %v6243_v6 }
 0x61d   : > { %v6461_v11 = vsub.f32 %v18421_v23, %v6460_v29  ;;  %v18440_v13 = vpack.c.bf16 %v6301_v25, %v6298_v33  ;;  %v18442_v55 = vsub.f32 %v6242_v28, %v6301_v25  ;;  %v6244_v34 = vadd.f32 %v6212_v16, %v18190_v10  ;;  %v6183_v10 = vld [vmem:[%s20580_s5 + $0x80] sm:$0xff]  ;;  %v6186_v16 = vld [vmem:[%s20580_s5 + $0x98] sm:$0xff] }
 0x61e   : > { %v6468_v24 = vsub.f32 %v18424_v26, %v6467_v44  ;;  %v18446_v57 = vsub.f32 %v6243_v6, %v6304_v61  ;;  %v6074_v56 = vpop.permute.xlu0 %6073  ;;  %v18448_v0 = vpack.c.bf16 %v6448_v8, %v6441_v17  ;;  %v6455_v8 = vand.u32 4294901760, %v6454_v38 }
 0x61f   : > { %21330 = vst [vmem:[#allocation69_spill] sm:$0xff] %v18440_v13  ;;  %21331 = vst [vmem:[#allocation77_spill] sm:$0xff] %v18442_v55  ;;  %v6474_v12 = vand.u32 4294901760, %v18442_v55  ;;  %v6307_v46 = vand.u32 4294901760, %v6244_v34  ;;  %v6216_v20 = vmul.f32 %v6184_v51, %v6074_v56  ;;  %v6462_v33 = vand.u32 4294901760, %v6461_v11 }
 0x620   : > { %21332 = vst [vmem:[#allocation78_spill] sm:$0xff] %v18446_v57  ;;  %21333 = vst [vmem:[#allocation80_spill] sm:$0xff] %v18448_v0  ;;  %v6481_v25 = vand.u32 4294901760, %v18446_v57  ;;  %v6469_v32 = vand.u32 4294901760, %v6468_v24  ;;  %v21335_v28 = vand.u32 4294901760, %v18329_v45  ;;  %v21336_v6 = vand.u32 4294901760, %v18349_v47 }
 0x621   : > { %v6475_v17 = vsub.f32 %v18442_v55, %v6474_v12  ;;  %v18465_v51 = vpack.c.bf16 %v6307_v46, %v6304_v61  ;;  %v18467_v11 = vsub.f32 %v6244_v34, %v6307_v46  ;;  %v6248_v56 = vadd.f32 %v6216_v20, %v18211_v2  ;;  %v6185_v2 = vld [vmem:[%s20580_s5 + $0x90] sm:$0xff]  ;;  %v6188_v24 = vld [vmem:[%s20580_s5 + $0xa8] sm:$0xff] }
 0x622   : > { %v6072_v15 = vpop.permute.xlu0 %6071  ;;  %v6078_v0 = vpop.permute.xlu1 %6077  ;;  %v18470_v62 = vpack.c.bf16 %v6462_v33, %v6455_v8  ;;  %v18478_v23 = vpack.c.bf16 %v21336_v6, %v21335_v28  ;;  %v6482_v20 = vsub.f32 %v18446_v57, %v6481_v25  ;;  %v21338_v28 = vand.u32 4294901760, %v18358_v54 }
 0x623   : > { %21334 = vst [vmem:[#allocation86_spill] sm:$0xff] %v18465_v51  ;;  %v6488_v61 = vand.u32 4294901760, %v18467_v11  ;;  %v6319_v46 = vand.u32 4294901760, %v6248_v56  ;;  %v6215_v34 = vmul.f32 %v6183_v10, %v6072_v15  ;;  %v6218_v7 = vmul.f32 %v6186_v16, %v6078_v0 }
 0x624   : > { %21337 = vst [vmem:[#allocation87_spill] sm:$0xff] %v18478_v23  ;;  %v6476_v33 = vand.u32 4294901760, %v6475_v17  ;;  %v21339_v6 = vand.u32 4294901760, %v18373_v41  ;;  %v21341_v8 = vand.u32 4294901760, %v18379_v30  ;;  %v21342_v57 = vand.u32 4294901760, %v18397_v27 }
 0x625   : > { %v6489_v0 = vsub.f32 %v18467_v11, %v6488_v61  ;;  %v18497_v10 = vsub.f32 %v6248_v56, %v6319_v46  ;;  %v6247_v16 = vadd.f32 %v6215_v34, %v18214_v14  ;;  %v6250_v38 = vadd.f32 %v6218_v7, %v18226_v48  ;;  %v6190_v7 = vld [vmem:[%s20580_s5 + $0xb8] sm:$0xff] }
 0x626   : > { %v18494_v15 = vpack.c.bf16 %v21339_v6, %v21338_v28  ;;  %v6076_v23 = vpop.permute.xlu0 %6075  ;;  %v6082_v26 = vpop.permute.xlu1 %6081  ;;  %v18501_v17 = vpack.c.bf16 %v6476_v33, %v6469_v32  ;;  %v18507_v55 = vpack.c.bf16 %v21342_v57, %v21341_v8  ;;  %v21344_v28 = vand.u32 4294901760, %v18406_v58  ;;  %v6187_v32 = vld [vmem:[%s20580_s5 + $0xa0] sm:$0xff] }
 0x627   : > { %v18513_v56 = vpack.c.bf16 %v6474_v12, %v6467_v44  ;;  %v6325_v14 = vand.u32 4294901760, %v6250_v38  ;;  %v6217_v34 = vmul.f32 %v6185_v2, %v6076_v23  ;;  %v6220_v48 = vmul.f32 %v6188_v24, %v6082_v26 }
 0x628   : > { %21340 = vst [vmem:[#allocation94_spill] sm:$0xff] %v18494_v15  ;;  %21343 = vst [vmem:[#allocation95_spill] sm:$0xff] %v18507_v55  ;;  %v18511_v6 = vpack.c.bf16 %v6460_v29, %v21344_v28  ;;  %v6316_v15 = vand.u32 4294901760, %v6247_v16  ;;  %v6516_v57 = vand.u32 4294901760, %v18497_v10  ;;  %v6483_v33 = vand.u32 4294901760, %v6482_v20 }
 0x629   : > { %21346 = vst [vmem:[#allocation61_spill] sm:$0xff] %v18513_v56  ;;  %v6490_v8 = vand.u32 4294901760, %v6489_v0  ;;  %v18522_v29 = vpack.c.bf16 %v6488_v61, %v6481_v25  ;;  %v18526_v12 = vsub.f32 %v6250_v38, %v6325_v14  ;;  %v6249_v23 = vadd.f32 %v6217_v34, %v18229_v36  ;;  %v6189_v36 = vld [vmem:[%s20580_s5 + $0xb0] sm:$0xff] }
 0x62a   : > { %21345 = vst [vmem:[#allocation101_spill] sm:$0xff] %v18511_v6  ;;  %v18524_v44 = vsub.f32 %v6247_v16, %v6316_v15  ;;  %v6252_v26 = vadd.f32 %v6220_v48, %v18242_v4  ;;  %v6080_v2 = vpop.permute.xlu0 %6079  ;;  %v6086_v24 = vpop.permute.xlu1 %6085  ;;  %v18530_v28 = vpack.c.bf16 %v6319_v46, %v6316_v15  ;;  %v21348_v20 = vand.u32 4294901760, %v18305_v18  ;;  %v6192_v4 = vld [vmem:[%s20580_s5 + $0xc8] sm:$0xff] }
 0x62b   : > { %21347 = vst [vmem:[#allocation63_spill] sm:$0xff] %v18522_v29  ;;  %v18532_v56 = vpack.c.bf16 %v6490_v8, %v6483_v33  ;;  %v6322_v61 = vand.u32 4294901760, %v6249_v23  ;;  %v6219_v0 = vmul.f32 %v6187_v32, %v6080_v2  ;;  %v6222_v16 = vmul.f32 %v6190_v7, %v6086_v24 }
 0x62c   : > { %v18538_v25 = vsub.f32 %v18305_v18, %v21348_v20  ;;  %v6331_v38 = vand.u32 4294901760, %v6252_v26  ;;  %14944 = vmatprep.subr.bf16.mxu1 %v18530_v28  ;;  %v6509_v46 = vand.u32 4294901760, %v18524_v44  ;;  %v6517_v15 = vsub.f32 %v18497_v10, %v6516_v57 }
 0x62d   : > { %v20852_v34 = vand.u32 4294901760, %v18526_v12  ;;  %v18552_v32 = vsub.f32 %v6249_v23, %v6322_v61  ;;  %v6251_v33 = vadd.f32 %v6219_v0, %v18245_v39  ;;  %v6254_v8 = vadd.f32 %v6222_v16, %v18256_v3  ;;  %14946 = vmatpush3.bf16.msra.mxu1 %v18320_v60  ;;  %v6191_v3 = vld [vmem:[%s20580_s5 + $0xc0] sm:$0xff] }
 0x62e   : > { %v18554_v7 = vsub.f32 %v6252_v26, %v6331_v38  ;;  %v6084_v2 = vpop.permute.xlu0 %6083  ;;  %v6090_v24 = vpop.permute.xlu1 %6089  ;;  %v18559_v20 = vpack.c.bf16 %v6325_v14, %v6322_v61  ;;  %v6510_v6 = vsub.f32 %v18524_v44, %v6509_v46  ;;  %v18565_v23 = vpack.c.bf16 %v6516_v57, %v6509_v46  ;;  %v6194_v14 = vld [vmem:[%s20580_s5 + $0xd8] sm:$0xff] }
 0x62f   : > { %v6531_v48 = vsub.f32 %v18526_v12, %v20852_v34  ;;  %v6328_v26 = vand.u32 4294901760, %v6251_v33  ;;  %v6337_v29 = vand.u32 4294901760, %v6254_v8  ;;  %v6221_v55 = vmul.f32 %v6189_v36, %v6084_v2 }
 0x630   : > { %21349 = vst [vmem:[#allocation70_spill] sm:$0xff] %v18559_v20  ;;  %21350 = vst [vmem:[#allocation72_spill] sm:$0xff] %v18565_v23  ;;  %v6224_v39 = vmul.f32 %v6192_v4, %v6090_v24  ;;  %14948 = vmatprep.subr.bf16.mxu1 %v18559_v20  ;;  %v6511_v61 = vand.u32 4294901760, %v6510_v6  ;;  %v6518_v0 = vand.u32 4294901760, %v6517_v15  ;;  %v20857_v16 = vand.u32 4294901760, %v18552_v32 }
 0x631   : > { %v18576_v46 = vsub.f32 %v6251_v33, %v6328_v26  ;;  %v18578_v36 = vsub.f32 %v6254_v8, %v6337_v29  ;;  %v6253_v4 = vadd.f32 %v6221_v55, %v18259_v5  ;;  %14950 = vmatpush3.bf16.msra.mxu1 %v18347_v49  ;;  %v18583_v23 = vpack.c.bf16 %v6331_v38, %v6328_v26  ;;  %v6193_v5 = vld [vmem:[%s20580_s5 + $0xd0] sm:$0xff] }
 0x632   : > { %v6256_v2 = vadd.f32 %v6224_v39, %v18265_v50  ;;  %v6088_v24 = vpop.permute.xlu0 %6087  ;;  %v6094_v34 = vpop.permute.xlu1 %6093  ;;  %v18585_v6 = vpack.c.bf16 %v6518_v0, %v6511_v61  ;;  %v6524_v15 = vsub.f32 %v18552_v32, %v20857_v16  ;;  %v6532_v33 = vand.u32 4294901760, %v6531_v48  ;;  %v6196_v50 = vld [vmem:[%s20580_s5 + $0xe8] sm:$0xff] }
 0x633   : > { %21351 = vst [vmem:[#allocation74_spill] sm:$0xff] %v18583_v23  ;;  %v6334_v57 = vand.u32 4294901760, %v6253_v4  ;;  %v6223_v18 = vmul.f32 %v6191_v3, %v6088_v24  ;;  %v6226_v20 = vmul.f32 %v6194_v14, %v6094_v34  ;;  %14952 = vmatprep.subr.bf16.mxu1 %v18583_v23  ;;  %v20859_v38 = vand.u32 4294901760, %v18576_v46 }
 0x634   : > { %v6343_v8 = vand.u32 4294901760, %v6256_v2  ;;  %v6525_v55 = vand.u32 4294901760, %v6524_v15  ;;  %v21352_v26 = vand.u32 4294901760, %v18554_v7  ;;  %v20858_v39 = vand.u32 4294901760, %v18578_v36 }
 0x635   : > { %v18602_v34 = vsub.f32 %v6253_v4, %v6334_v57  ;;  %v6255_v14 = vadd.f32 %v6223_v18, %v18268_v42  ;;  %v6258_v61 = vadd.f32 %v6226_v20, %v18271_v9  ;;  %14954 = vmatpush3.bf16.msra.mxu1 %v18371_v52  ;;  %v18609_v15 = vpack.c.bf16 %v6337_v29, %v6334_v57  ;;  %v6195_v29 = vld [vmem:[%s20580_s5 + $0xe0] sm:$0xff]  ;;  %v6198_v20 = vld [vmem:[%s20580_s5 + $0xf8] sm:$0xff] }
 0x636   : > { %v6545_v48 = vsub.f32 %v18554_v7, %v21352_v26  ;;  %v18604_v3 = vsub.f32 %v6256_v2, %v6343_v8  ;;  %v6092_v0 = vpop.permute.xlu0 %6091  ;;  %v6098_v24 = vpop.permute.xlu1 %6097  ;;  %v18611_v16 = vpack.c.bf16 %v6532_v33, %v6525_v55  ;;  %v6538_v26 = vsub.f32 %v18576_v46, %v20859_v38 }
 0x637   : > { %21353 = vst [vmem:[#allocation83_spill] sm:$0xff] %v18609_v15  ;;  %v6559_v4 = vsub.f32 %v18578_v36, %v20858_v39  ;;  %v6340_v2 = vand.u32 4294901760, %v6255_v14  ;;  %v6349_v42 = vand.u32 4294901760, %v6258_v61  ;;  %v6225_v18 = vmul.f32 %v6193_v5, %v6092_v0  ;;  %14956 = vmatprep.subr.bf16.mxu1 %v18609_v15 }
 0x638   : > { %v6228_v9 = vmul.f32 %v6196_v50, %v6098_v24  ;;  %v6539_v57 = vand.u32 4294901760, %v6538_v26  ;;  %v6546_v33 = vand.u32 4294901760, %v6545_v48  ;;  %v20868_v55 = vand.u32 4294901760, %v18602_v34 }
 0x639   : > { %v18628_v38 = vsub.f32 %v6255_v14, %v6340_v2  ;;  %v18630_v5 = vsub.f32 %v6258_v61, %v6349_v42  ;;  %v6257_v50 = vadd.f32 %v6225_v18, %v18280_v53  ;;  %14958 = vmatpush3.bf16.msra.mxu1 %v18395_v59  ;;  %v18635_v52 = vpack.c.bf16 %v6343_v8, %v6340_v2  ;;  %v6197_v53 = vld [vmem:[%s20580_s5 + $0xf0] sm:$0xff] }
 0x63a   : > { %v6260_v0 = vadd.f32 %v6228_v9, %v18300_v22  ;;  %v6096_v24 = vpop.permute.xlu0 %6095  ;;  %v6102_v15 = vpop.permute.xlu1 %6101  ;;  %v18637_v26 = vpack.c.bf16 %v6546_v33, %v6539_v57  ;;  %v6552_v48 = vsub.f32 %v18602_v34, %v20868_v55  ;;  %v6560_v14 = vand.u32 4294901760, %v6559_v4  ;;  %v6182_v22 = vld [vmem:[%s20580_s5 + $0x78] sm:$0xff] }
 0x63b   : > { %21354 = vst [vmem:[#allocation90_spill] sm:$0xff] %v18635_v52  ;;  %v6346_v39 = vand.u32 4294901760, %v6257_v50  ;;  %v6227_v23 = vmul.f32 %v6195_v29, %v6096_v24  ;;  %v6230_v49 = vmul.f32 %v6198_v20, %v6102_v15  ;;  %14960 = vmatprep.subr.bf16.mxu1 %v18635_v52  ;;  %v20869_v2 = vand.u32 4294901760, %v18628_v38 }
 0x63c   : > { %v6355_v61 = vand.u32 4294901760, %v6260_v0  ;;  %v6553_v8 = vand.u32 4294901760, %v6552_v48  ;;  %v21355_v18 = vand.u32 4294901760, %v18604_v3  ;;  %v20872_v9 = vand.u32 4294901760, %v18630_v5 }
 0x63d   : > { %v18654_v15 = vsub.f32 %v6257_v50, %v6346_v39  ;;  %v6259_v20 = vadd.f32 %v6227_v23, %v18308_v31  ;;  %v6262_v57 = vadd.f32 %v6230_v49, %v18312_v21  ;;  %14962 = vmatpush3.bf16.msra.mxu1 %v18419_v40  ;;  %v18661_v48 = vpack.c.bf16 %v6349_v42, %v6346_v39  ;;  %v6181_v21 = vld [vmem:[%s20580_s5 + $0x70] sm:$0xff] }
 0x63e   : > { %v6573_v4 = vsub.f32 %v18604_v3, %v21355_v18  ;;  %v18656_v29 = vsub.f32 %v6260_v0, %v6355_v61  ;;  %v6100_v33 = vpop.permute.xlu0 %6099  ;;  %v6070_v24 = vpop.permute.xlu1 %6069  ;;  %v18663_v55 = vpack.c.bf16 %v6560_v14, %v6553_v8  ;;  %v6566_v18 = vsub.f32 %v18628_v38, %v20869_v2 }
 0x63f   : > { %21356 = vst [vmem:[#allocation91_spill] sm:$0xff] %v18661_v48  ;;  %v6587_v50 = vsub.f32 %v18630_v5, %v20872_v9  ;;  %v6352_v0 = vand.u32 4294901760, %v6259_v20  ;;  %v6361_v31 = vand.u32 4294901760, %v6262_v57  ;;  %v6229_v23 = vmul.f32 %v6197_v53, %v6100_v33  ;;  %14964 = vmatprep.subr.bf16.mxu1 %v18661_v48 }
 0x640   : > { %v6214_v49 = vmul.f32 %v6182_v22, %v6070_v24  ;;  %v6567_v39 = vand.u32 4294901760, %v6566_v18  ;;  %v6574_v42 = vand.u32 4294901760, %v6573_v4  ;;  %v6579_v14 = vand.u32 4294901760, %v18654_v15 }
 0x641   : > { %v6600_v8 = vand.u32 4294901760, %v18656_v29  ;;  %v18677_v2 = vsub.f32 %v6259_v20, %v6352_v0  ;;  %v18679_v40 = vsub.f32 %v6262_v57, %v6361_v31  ;;  %v6261_v9 = vadd.f32 %v6229_v23, %v18315_v37  ;;  %14966 = vmatpush3.bf16.msra.mxu1 %v18440_v13 }
 0x642   : > { %v6246_v53 = vadd.f32 %v6214_v49, %v18205_v43  ;;  %v6068_v22 = vpop.permute.xlu0 %6067  ;;  %v18684_v33 = vpack.c.bf16 %v6355_v61, %v6352_v0  ;;  %v18686_v24 = vpack.c.bf16 %v6574_v42, %v6567_v39  ;;  %v6580_v4 = vsub.f32 %v18654_v15, %v6579_v14 }
 0x643   : > { %v6588_v18 = vand.u32 4294901760, %v6587_v50  ;;  %v6358_v48 = vand.u32 4294901760, %v6261_v9  ;;  %v6213_v20 = vmul.f32 %v6181_v21, %v6068_v22  ;;  %v6593_v57 = vand.u32 4294901760, %v18677_v2 }
 0x644   : > { %21357 = vst [vmem:[#allocation97_spill] sm:$0xff] %v18684_v33  ;;  %v6313_v52 = vand.u32 4294901760, %v6246_v53  ;;  %14968 = vmatprep.subr.bf16.mxu1 %v18684_v33  ;;  %v6581_v37 = vand.u32 4294901760, %v6580_v4  ;;  %v6601_v43 = vsub.f32 %v18656_v29, %v6600_v8  ;;  %v6614_v23 = vand.u32 4294901760, %v18679_v40 }
 0x645   : > { %v18695_v0 = vsub.f32 %v6261_v9, %v6358_v48  ;;  %v6245_v50 = vadd.f32 %v6213_v20, %v18208_v63  ;;  %14970 = vmatpush3.bf16.msra.mxu1 %v18465_v51  ;;  %v18701_v21 = vpack.c.bf16 %v6361_v31, %v6358_v48  ;;  %v6594_v42 = vsub.f32 %v18677_v2, %v6593_v57 }
 0x646   : > { %v18697_v49 = vsub.f32 %v6246_v53, %v6313_v52  ;;  %v14995_v39 = vpack.c.bf16 %v6588_v18, %v6581_v37  ;;  %v6615_v22 = vsub.f32 %v18679_v40, %v6614_v23  ;;  %v6602_v31 = vand.u32 4294901760, %v6601_v43 }
 0x647   : > { %21358 = vst [vmem:[#allocation99_spill] sm:$0xff] %v18701_v21  ;;  %v6310_v9 = vand.u32 4294901760, %v6245_v50  ;;  %14972 = vmatprep.subr.bf16.mxu1 %v18701_v21  ;;  %v6607_v53 = vand.u32 4294901760, %v18695_v0  ;;  %v6595_v48 = vand.u32 4294901760, %v6594_v42  ;;  %v21360_v42 = vand.u32 4294901760, %v18552_v32 }
 0x648   : > { %v6502_v61 = vand.u32 4294901760, %v18697_v49  ;;  %v6616_v21 = vand.u32 4294901760, %v6615_v22  ;;  %v21361_v18 = vand.u32 4294901760, %v18526_v12  ;;  %v21369_v20 = vand.u32 4294901760, %v18628_v38 }
 0x649   : > { %v18716_v37 = vpack.c.bf16 %v6313_v52, %v6310_v9  ;;  %v18718_v4 = vsub.f32 %v6245_v50, %v6310_v9  ;;  %v6608_v51 = vsub.f32 %v18695_v0, %v6607_v53  ;;  %v14999_v33 = vpack.c.bf16 %v6602_v31, %v6595_v48 }
 0x64a   : > { %v18729_v63 = vpack.c.bf16 %v21361_v18, %v21360_v42  ;;  %v6503_v52 = vsub.f32 %v18697_v49, %v6502_v61  ;;  %v21363_v48 = vand.u32 4294901760, %v18576_v46  ;;  %v21364_v31 = vand.u32 4294901760, %v18554_v7 }
 0x64b   : > { %21359 = vst [vmem:[#allocation102_spill] sm:$0xff] %v18716_v37  ;;  %v6495_v50 = vand.u32 4294901760, %v18718_v4  ;;  %14974 = vmatpush3.bf16.msra.mxu1 %v18716_v37  ;;  %v6609_v22 = vand.u32 4294901760, %v6608_v51  ;;  %v15037_v9 = vpack.c.bf16 %v18697_v49, %v18718_v4  ;;  %v21366_v18 = vand.u32 4294901760, %v18602_v34 }
 0x64c   : > { %21362 = vst [vmem:[#allocation104_spill] sm:$0xff] %v18729_v63  ;;  %14976 = vmatprep.subr.bf16.mxu1 %v18585_v6  ;;  %v18741_v43 = vpack.c.bf16 %v21364_v31, %v21363_v48  ;;  %v21367_v42 = vand.u32 4294901760, %v18578_v36  ;;  %v21370_v51 = vand.u32 4294901760, %v18604_v3  ;;  %v21371_v6 = vand.u32 4294901760, %v18630_v5 }
 0x64d   : > { %v6496_v37 = vsub.f32 %v18718_v4, %v6495_v50  ;;  %v15003_v48 = vpack.c.bf16 %v6616_v21, %v6609_v22  ;;  %v18760_v31 = vpack.c.bf16 %v6600_v8, %v6593_v57  ;;  %v21376_v21 = vld [vmem:[#allocation8_spill] sm:$0xff]  ;;  %v21378_v4 = vld [vmem:[#allocation67_spill] sm:$0xff] }
 0x64e   : > { %21365 = vst [vmem:[#allocation106_spill] sm:$0xff] %v18741_v43  ;;  %v18747_v13 = vpack.c.bf16 %v21367_v42, %v21366_v18  ;;  %v18753_v63 = vpack.c.bf16 %v21370_v51, %v21369_v20  ;;  %v18757_v49 = vpack.c.bf16 %v21371_v6, %v6579_v14  ;;  %v18762_v43 = vpack.c.bf16 %v6614_v23, %v6607_v53  ;;  %v21374_v23 = vld [vmem:[#allocation47_spill] sm:$0xff] }
 0x64f   : > { %v21372_v18 = vand.u32 4294901760, %v18297_v1  ;;  %v6388_v42 = vand.u32 4294901760, %v18538_v25  ;;  %v21373_v20 = vand.u32 4294901760, %v18335_v19  ;;  %v6497_v14 = vand.u32 4294901760, %v6496_v37  ;;  %v21375_v1 = vld [vmem:[#allocation11_spill] sm:$0xff]  ;;  %v21379_v19 = vld [vmem:[#allocation9_spill] sm:$0xff] }
 0x650   : > { %21368 = vst [vmem:[#allocation107_spill] sm:$0xff] %v18747_v13  ;;  %v18767_v13 = vpack.c.bf16 %v6502_v61, %v6495_v50  ;;  %v6504_v51 = vand.u32 4294901760, %v6503_v52  ;;  %v21377_v61 = vld [vmem:[#allocation121_spill] sm:$0xff]  ;;  %v21381_v52 = vld [vmem:[#allocation80_spill] sm:$0xff]  ;;  %v21382_v50 = vld [vmem:[#allocation10_spill] sm:$0xff] }
 0x651   : > { %6374 = vmatmul.mubr.f32.vlgmr.msra.gmra.mrb[70].mxu1 %v21372_v18  ;;  %v21383_v6 = vld [vmem:[#allocation123_spill] sm:$0xff] }
 0x652   : > { %14978 = vmatpush3.bf16.msra.mxu1 %v18382_v35  ;;  %6383 = vmatprep.mubr.f32.mxu1 %v21373_v20  ;;  %v15005_v8 = vpack.c.bf16 %v6504_v51, %v6497_v14  ;;  %v21389_v14 = vld [vmem:[#allocation16_spill] sm:$0xff]  ;;  %v21421_v51 = vld [vmem:[#allocation69_spill] sm:$0xff] }
 0x653   : > { %14980 = vmatprep.subr.bf16.mxu1 %v18611_v16  ;;  %v1116_v57 = vpop.permute.xlu0 %1115  ;;  %v21380_v16 = vld [vmem:[#allocation122_spill] sm:$0xff] }
 0x654   : > { %v1195_v25 = vadd.f32 %v21376_v21, %v1116_v57  ;;  %v21423_v57 = vld [vmem:[#allocation86_spill] sm:$0xff] }
 0x655   : > { %6389 = vmatmul.mubr.f32.gmra.mrb[72].mxu1 %v6388_v42  ;;  %v21387_v42 = vld [vmem:[#allocation32_spill] sm:$0xff]  ;;  %v21425_v21 = vld [vmem:[#allocation102_spill] sm:$0xff] }
 0x656   : > { %14982 = vmatpush3.bf16.msra.mxu1 %v21374_v23  ;;  %6619 = vmatprep.mubr.f32.mxu1 %v21375_v1  ;;  %v1271_v35 = vadd.f32 %v21377_v61, %v1195_v25  ;;  %v21424_v23 = vld [vmem:[#allocation99_spill] sm:$0xff]  ;;  %v21426_v25 = vld [vmem:[#allocation72_spill] sm:$0xff] }
 0x657   : > { %14984 = vmatprep.subr.bf16.mxu1 %v18637_v26  ;;  %v21385_v26 = vld [vmem:[#allocation15_spill] sm:$0xff] }
 0x658   : > { %v1345_v53 = vadd.f32 %v21379_v19, %v1271_v35  ;;  %v21428_v35 = vld [vmem:[#allocation44_spill] sm:$0xff] }
 0x659   : > { %v21430_v19 = vld [vmem:[#allocation104_spill] sm:$0xff] }
 0x65a   : > { %14986 = vmatpush3.bf16.msra.mxu1 %v21378_v4  ;;  %v1419_v37 = vadd.f32 %v21380_v16, %v1345_v53  ;;  %v21432_v16 = vld [vmem:[#allocation87_spill] sm:$0xff] }
 0x65b   : > { %14988 = vmatprep.subr.bf16.mxu1 %v18663_v55  ;;  %v21384_v55 = vpack.c.bf16 %v18497_v10, %v18524_v44  ;;  %v21393_v10 = vld [vmem:[#allocation14_spill] sm:$0xff]  ;;  %v21394_v44 = vpack.c.bf16 %v18554_v7, %v18576_v46  ;;  %v21403_v46 = vld [vmem:[#allocation65_spill] sm:$0xff] }
 0x65c   : > { %v1493_v22 = vadd.f32 %v21382_v50, %v1419_v37  ;;  %v21433_v37 = vld [vmem:[#allocation106_spill] sm:$0xff]  ;;  %v21435_v50 = vld [vmem:[#allocation107_spill] sm:$0xff] }
 0x65e   : > { %14990 = vmatpush3.bf16.msra.mxu1 %v21381_v52  ;;  %v18786_v18 = vadd.f32 %v21383_v6, %v1493_v22  ;;  %v21434_v52 = vld [vmem:[#allocation94_spill] sm:$0xff]  ;;  %v21436_v22 = vld [vmem:[#allocation95_spill] sm:$0xff]  ;;  %v21437_v6 = vld [vmem:[#allocation101_spill] sm:$0xff] }
 0x65f   : > { %14992 = vmatprep.subr.bf16.mxu1 %v18686_v24  ;;  %v21386_v24 = vld [vmem:[#allocation28_spill] sm:$0xff] }
 0x660   : > { %v21388_v20 = vpack.c.bf16 %v21386_v24, %v21387_v42  ;;  %v21439_v24 = vld [vmem:[#allocation63_spill] sm:$0xff] }
 0x662   : > { %14994 = vmatpush3.bf16.msra.mxu1 %v18470_v62  ;;  %v21390_v62 = vpack.c.bf16 %v18526_v12, %v18552_v32  ;;  %v21396_v12 = vpack.c.bf16 %v18578_v36, %v18602_v34  ;;  %v21397_v32 = vpack.c.bf16 %v18397_v27, %v18379_v30  ;;  %v21405_v30 = vpack.c.bf16 %v18656_v29, %v18677_v2  ;;  %v21406_v27 = vld [vmem:[#allocation78_spill] sm:$0xff]  ;;  %v21409_v34 = vld [vmem:[#allocation52_spill] sm:$0xff]  ;;  %v21412_v2 = vld [vmem:[#allocation29_spill] sm:$0xff] }
 0x663   : > { %14996 = vmatprep.subr.bf16.mxu1 %v14995_v39  ;;  %v21416_v29 = vld [vmem:[#allocation45_spill] sm:$0xff]  ;;  %v21418_v39 = vld [vmem:[#allocation90_spill] sm:$0xff]  ;;  %v21427_v61 = vand.u32 4294901760, %v21409_v34  ;;  %v21431_v53 = vand.u32 4294901760, %v21412_v2 }
 0x666   : > { %14998 = vmatpush3.bf16.msra.mxu1 %v18501_v17  ;;  %v21391_v17 = vld [vmem:[#allocation24_spill] sm:$0xff] }
 0x667   : > { %15000 = vmatprep.subr.bf16.mxu1 %v14999_v33  ;;  %v21395_v33 = vpack.c.bf16 %v18373_v41, %v18358_v54  ;;  %v21401_v54 = vpack.c.bf16 %v18630_v5, %v18654_v15  ;;  %v21402_v41 = vld [vmem:[#allocation77_spill] sm:$0xff]  ;;  %v21411_v5 = vld [vmem:[#allocation70_spill] sm:$0xff]  ;;  %v21413_v15 = vld [vmem:[#allocation39_spill] sm:$0xff] }
 0x668   : > { %v21404_v36 = vpack.c.bf16 %v21402_v41, %v21403_v46  ;;  %v21442_v46 = vmov 0.0|0.0  }
 0x66a   : > { %15002 = vmatpush3.bf16.msra.mxu1 %v18532_v56  ;;  %v21392_v56 = vpack.c.bf16 %v18349_v47, %v18329_v45  ;;  %v21398_v47 = vpack.c.bf16 %v18604_v3, %v18628_v38  ;;  %v21399_v45 = vld [vmem:[#allocation60_spill] sm:$0xff]  ;;  %v21407_v38 = vpack.c.bf16 %v18467_v11, %v21406_v27  ;;  %v21410_v3 = vld [vmem:[#allocation22_spill] sm:$0xff]  ;;  %v21414_v11 = vand.u32 4294901760, %v21393_v10 }
 0x66b   : > { %15004 = vmatprep.subr.bf16.mxu1 %v15003_v48  ;;  %v21400_v7 = vpack.c.bf16 %v21399_v45, %v18406_v58  ;;  %v21408_v58 = vpack.c.bf16 %v18679_v40, %v18695_v0  ;;  %v21415_v40 = vld [vmem:[#allocation74_spill] sm:$0xff]  ;;  %v21417_v0 = vld [vmem:[#allocation83_spill] sm:$0xff]  ;;  %v21429_v4 = vand.u32 4294901760, %v21410_v3 }
 0x66c   : > { %v21420_v48 = vld [vmem:[#allocation91_spill] sm:$0xff] }
 0x66d   : > { %v7207_v27 = vld [vmem:[%s21441_s24 + $0x30] sm:$0xff] }
 0x66e   : > { %15006 = vmatpush3.bf16.msra.mxu1 %v15005_v8  ;;  %v21422_v8 = vld [vmem:[#allocation97_spill] sm:$0xff] }
 0x66f   : > { %15008 = vmatprep.subr.bf16.mxu1 %v21384_v55  ;;  %v21438_v55 = vld [vmem:[#allocation61_spill] sm:$0xff] }
 0x671   : > { %6621 = vmatmul.mubr.f32.vlgmr.msra.gmra.mrb[74].mxu1 %v21385_v26 }
 0x672   : > { %15010 = vmatpush3.bf16.msra.mxu1 %v21388_v20  ;;  %6626 = vmatprep.mubr.f32.mxu1 %v21389_v14  ;;  %v7204_v20 = vld [vmem:[%s21441_s24 + $0x18] sm:$0xff] }
 0x673   : > { %15012 = vmatprep.subr.bf16.mxu1 %v21390_v62  ;;  %v7205_v62 = vld [vmem:[%s21441_s24 + $0x20] sm:$0xff] }
 0x675   : > { %6628 = vmatmul.mubr.f32.gmra.mrb[76].mxu1 %v21391_v17 }
 0x676   : > { %15014 = vmatpush3.bf16.msra.mxu1 %v21392_v56  ;;  %6763 = vmatprep.mubr.f32.mxu1 %v21393_v10  ;;  %v7227_v56 = vand.u32 4294901760, %v7204_v20  ;;  %v7230_v10 = vand.u32 4294901760, %v7205_v62 }
 0x677   : > { %15016 = vmatprep.subr.bf16.mxu1 %v21394_v44 }
 0x678   : > { %v18933_v45 = vsub.f32 %v7204_v20, %v7227_v56 }
 0x67a   : > { %15018 = vmatpush3.bf16.msra.mxu1 %v21395_v33  ;;  %v20899_v20 = vand.u32 4294901760, %v18933_v45 }
 0x67b   : > { %15020 = vmatprep.subr.bf16.mxu1 %v21396_v12 }
 0x67e   : > { %15022 = vmatpush3.bf16.msra.mxu1 %v21397_v32 }
 0x67f   : > { %15024 = vmatprep.subr.bf16.mxu1 %v21398_v47 }
 0x682   : > { %15026 = vmatpush3.bf16.msra.mxu1 %v21400_v7  ;;  %v18935_v7 = vsub.f32 %v7205_v62, %v7230_v10 }
 0x683   : > { %15028 = vmatprep.subr.bf16.mxu1 %v21401_v54 }
 0x686   : > { %15030 = vmatpush3.bf16.msra.mxu1 %v21404_v36 }
 0x687   : > { %15032 = vmatprep.subr.bf16.mxu1 %v21405_v30 }
 0x68a   : > { %15034 = vmatpush3.bf16.msra.mxu1 %v21407_v38  ;;  %v7208_v38 = vld [vmem:[%s21441_s24 + $0x38] sm:$0xff] }
 0x68b   : > { %15036 = vmatprep.subr.bf16.mxu1 %v21408_v58 }
 0x68e   : > { %15038 = vmatpush3.bf16.msra.mxu1 %v15037_v9  ;;  %v21419_v9 = vld [vmem:[#allocation55_spill] sm:$0xff] }
 0x68f   : > { %15040 = vmatprep.subr.bf16.mxu1 %v18530_v28 }
 0x691   : > { %6766 = vmatmul.mubr.f32.vlgmr.msra.gmra.mrb[78].mxu1 %v21409_v34  ;;  %v7236_v34 = vand.u32 4294901760, %v7207_v27 }
 0x692   : > { %15042 = vmatpush3.bf16.msra.mxu1 %v18320_v60  ;;  %6772 = vmatprep.mubr.f32.mxu1 %v21410_v3  ;;  %v7239_v3 = vand.u32 4294901760, %v7208_v38 }
 0x693   : > { %15044 = vmatprep.subr.bf16.mxu1 %v21411_v5 }
 0x695   : > { %6775 = vmatmul.mubr.f32.gmra.mrb[80].mxu1 %v21412_v2  ;;  %v18955_v2 = vpack.c.bf16 %v7239_v3, %v7236_v34 }
 0x696   : > { %15046 = vmatpush3.bf16.msra.mxu1 %v21413_v15  ;;  %6879 = vmatprep.mubr.f32.mxu1 %v21414_v11  ;;  %v18959_v11 = vsub.f32 %v7208_v38, %v7239_v3 }
 0x697   : > { %15048 = vmatprep.subr.bf16.mxu1 %v21415_v40 }
 0x69a   : > { %15050 = vmatpush3.bf16.msra.mxu1 %v21416_v29 }
 0x69b   : > { %15052 = vmatprep.subr.bf16.mxu1 %v21417_v0 }
 0x69e   : > { %15054 = vmatpush3.bf16.msra.mxu1 %v18395_v59 }
 0x69f   : > { %15056 = vmatprep.subr.bf16.mxu1 %v21418_v39 }
 0x6a2   : > { %15058 = vmatpush3.bf16.msra.mxu1 %v21419_v9 }
 0x6a3   : > { %15060 = vmatprep.subr.bf16.mxu1 %v21420_v48 }
 0x6a6   : > { %15062 = vmatpush3.bf16.msra.mxu1 %v21421_v51 }
 0x6a7   : > { %15064 = vmatprep.subr.bf16.mxu1 %v21422_v8 }
 0x6aa   : > { %15066 = vmatpush3.bf16.msra.mxu1 %v21423_v57 }
 0x6ab   : > { %15068 = vmatprep.subr.bf16.mxu1 %v21424_v23 }
 0x6ae   : > { %15070 = vmatpush3.bf16.msra.mxu1 %v21425_v21 }
 0x6af   : > { %15072 = vmatprep.subr.bf16.mxu1 %v21426_v25 }
 0x6b1   : > { %6883 = vmatmul.mubr.f32.vlgmr.msra.gmra.mrb[82].mxu1 %v21427_v61  ;;  %v7211_v61 = vld [vmem:[%s21441_s24 + $0x50] sm:$0xff] }
 0x6b2   : > { %15074 = vmatpush3.bf16.msra.mxu1 %v21428_v35  ;;  %6890 = vmatprep.mubr.f32.mxu1 %v21429_v4  ;;  %v7212_v35 = vld [vmem:[%s21441_s24 + $0x58] sm:$0xff]  ;;  %v7213_v4 = vld [vmem:[%s21441_s24 + $0x60] sm:$0xff] }
 0x6b3   : > { %15076 = vmatprep.subr.bf16.mxu1 %v21430_v19  ;;  %v7248_v19 = vand.u32 4294901760, %v7211_v61 }
 0x6b5   : > { %6894 = vmatmul.mubr.f32.gmra.mrb[84].mxu1 %v21431_v53  ;;  %v7251_v53 = vand.u32 4294901760, %v7212_v35 }
 0x6b6   : > { %15078 = vmatpush3.bf16.msra.mxu1 %v21432_v16  ;;  %7060 = vmatprep.mubr.f32.mxu1 %v21375_v1  ;;  %v7214_v16 = vld [vmem:[%s21441_s24 + $0x68] sm:$0xff] }
 0x6b7   : > { %15080 = vmatprep.subr.bf16.mxu1 %v21433_v37  ;;  %v7254_v37 = vand.u32 4294901760, %v7213_v4 }
 0x6ba   : > { %15082 = vmatpush3.bf16.msra.mxu1 %v21434_v52  ;;  %v7215_v52 = vld [vmem:[%s21441_s24 + $0x70] sm:$0xff] }
 0x6bb   : > { %15084 = vmatprep.subr.bf16.mxu1 %v21435_v50  ;;  %v7216_v50 = vld [vmem:[%s21441_s24 + $0x78] sm:$0xff] }
 0x6be   : > { %15086 = vmatpush3.bf16.msra.mxu1 %v21436_v22  ;;  %v7257_v22 = vand.u32 4294901760, %v7214_v16 }
 0x6bf   : > { %15088 = vmatprep.subr.bf16.mxu1 %v18753_v63 }
 0x6c2   : > { %15090 = vmatpush3.bf16.msra.mxu1 %v21437_v6  ;;  %v7260_v6 = vand.u32 4294901760, %v7215_v52 }
 0x6c3   : > { %15092 = vmatprep.subr.bf16.mxu1 %v18757_v49  ;;  %v7201_v49 = vld [vmem:[%s21440_s20] sm:$0xff] }
 0x6c6   : > { %15094 = vmatpush3.bf16.msra.mxu1 %v21438_v55  ;;  %v7263_v55 = vand.u32 4294901760, %v7216_v50 }
 0x6c7   : > { %15096 = vmatprep.subr.bf16.mxu1 %v18760_v31  ;;  %v7202_v31 = vld [vmem:[%s21441_s24 + $0x8] sm:$0xff] }
 0x6c8   : > { %v7221_v42 = vand.u32 4294901760, %v7202_v31 }
 0x6ca   : > { %15098 = vmatpush3.bf16.msra.mxu1 %v21439_v24  ;;  %v18929_v32 = vsub.f32 %v7202_v31, %v7221_v42  ;;  %v19015_v31 = vsub.f32 %v7216_v50, %v7263_v55 }
 0x6cb   : > { %15100 = vmatprep.subr.bf16.mxu1 %v18762_v43 }
 0x6ce   : > { %15102 = vmatpush3.bf16.msra.mxu1 %v18767_v13 }
 0x6cf   : > { %15104 = vmatprep.subr.bf16.mxu1 %v18530_v28 }
 0x6d1   : > { %7062 = vmatmul.mubr.f32.vlgmr.msra.gmra.mrb[86].mxu1 %v21385_v26 }
 0x6d2   : > { %15106 = vmatpush3.bf16.msra.mxu1 %v18320_v60  ;;  %7067 = vmatprep.mubr.f32.mxu1 %v21389_v14 }
 0x6d3   : > { %15108 = vmatprep.subr.bf16.mxu1 %v21411_v5 }
 0x6d5   : > { %7069 = vmatmul.mubr.f32.gmra.mrb[88].mxu1 %v21391_v17 }
 0x6d6   : > { %15110 = vmatpush3.bf16.msra.mxu1 %v21413_v15  ;;  %7171 = vmatprep.mubr.f32.mxu1 %v21375_v1  ;;  %v7203_v1 = vld [vmem:[%s21441_s24 + $0x10] sm:$0xff]  ;;  %v18957_v15 = vsub.f32 %v7207_v27, %v7236_v34 }
 0x6d7   : > { %15112 = vmatprep.subr.bf16.mxu1 %v21415_v40 }
 0x6da   : > { %15114 = vmatpush3.bf16.msra.mxu1 %v21416_v29 }
 0x6db   : > { %15116 = vmatprep.subr.bf16.mxu1 %v21417_v0 }
 0x6de   : > { %15118 = vmatpush3.bf16.msra.mxu1 %v18395_v59 }
 0x6df   : > { %15120 = vmatprep.subr.bf16.mxu1 %v21418_v39 }
 0x6e2   : > { %15122 = vmatpush3.bf16.msra.mxu1 %v21419_v9 }
 0x6e3   : > { %15124 = vmatprep.subr.bf16.mxu1 %v21420_v48  ;;  %v7209_v48 = vld [vmem:[%s21441_s24 + $0x40] sm:$0xff] }
 0x6e6   : > { %15126 = vmatpush3.bf16.msra.mxu1 %v21421_v51  ;;  %v7210_v51 = vld [vmem:[%s21441_s24 + $0x48] sm:$0xff] }
 0x6e7   : > { %15128 = vmatprep.subr.bf16.mxu1 %v21422_v8  ;;  %v7242_v8 = vand.u32 4294901760, %v7209_v48 }
 0x6ea   : > { %15130 = vmatpush3.bf16.msra.mxu1 %v21423_v57  ;;  %v7245_v57 = vand.u32 4294901760, %v7210_v51 }
 0x6eb   : > { %15132 = vmatprep.subr.bf16.mxu1 %v21424_v23 }
 0x6ec   : > { %v18973_v23 = vpack.c.bf16 %v7245_v57, %v7242_v8  ;;  %v18977_v25 = vsub.f32 %v7210_v51, %v7245_v57  ;;  %v20895_v51 = vand.u32 4294901760, %v18959_v11 }
 0x6ee   : > { %15134 = vmatpush3.bf16.msra.mxu1 %v21425_v21  ;;  %v18975_v21 = vsub.f32 %v7209_v48, %v7242_v8  ;;  %v20896_v48 = vand.u32 4294901760, %v18957_v15 }
 0x6f1   : > { %7173 = vmatmul.mubr.f32.vlgmr.msra.gmra.mrb[90].mxu1 %v21385_v26  ;;  %v7218_v26 = vand.u32 4294901760, %v7201_v49 }
 0x6f2   : > { %7178 = vmatprep.mubr.f32.mxu1 %v21389_v14  ;;  %v7224_v14 = vand.u32 4294901760, %v7203_v1 }
 0x6f3   : > { %v18925_v33 = vpack.c.bf16 %v7221_v42, %v7218_v26  ;;  %v18927_v12 = vsub.f32 %v7201_v49, %v7218_v26  ;;  %v19012_v49 = vsub.f32 %v7215_v52, %v7260_v6  ;;  %v20901_v26 = vand.u32 4294901760, %v18929_v32 }
 0x6f4   : > { %v18931_v47 = vsub.f32 %v7203_v1, %v7224_v14  ;;  %v18938_v54 = vpack.c.bf16 %v7227_v56, %v7224_v14  ;;  %v7333_v56 = vsub.f32 %v18933_v45, %v20899_v20 }
 0x6f5   : > { %7180 = vmatmul.mubr.f32.gmra.mrb[92].mxu1 %v21391_v17  ;;  %v7206_v17 = vld [vmem:[%s21441_s24 + $0x28] sm:$0xff]  ;;  %15137 = vmatpush3.bf16.msra.mxu0 %v18925_v33  ;;  %v7311_v24 = vand.u32 4294901760, %v18927_v12  ;;  %v7319_v62 = vsub.f32 %v18929_v32, %v20901_v26 }
 0x6f6   : > { %v7233_v44 = vand.u32 4294901760, %v7206_v17  ;;  %15138 = vmatprep.subr.bf16.mxu0 %v21442_v46  ;;  %v20900_v42 = vand.u32 4294901760, %v18931_v47 }
 0x6f7   : > { %v7312_v1 = vsub.f32 %v18927_v12, %v7311_v24  ;;  %v7320_v27 = vand.u32 4294901760, %v7319_v62 }
 0x6f8   : > { %v18940_v41 = vsub.f32 %v7206_v17, %v7233_v44  ;;  %v18944_v36 = vpack.c.bf16 %v7233_v44, %v7230_v10  ;;  %v7326_v17 = vsub.f32 %v18931_v47, %v20900_v42  ;;  %v20898_v10 = vand.u32 4294901760, %v18935_v7 }
 0x6f9   : > { %15140 = vmatpush3.bf16.msra.mxu0 %v18938_v54  ;;  %v7313_v14 = vand.u32 4294901760, %v7312_v1 }
 0x6fa   : > { %15141 = vmatprep.subr.bf16.mxu0 %v21442_v46  ;;  %v20897_v44 = vand.u32 4294901760, %v18940_v41  ;;  %v7327_v38 = vand.u32 4294901760, %v7326_v17  ;;  %v7340_v34 = vsub.f32 %v18935_v7, %v20898_v10 }
 0x6fc   : > { %v7347_v3 = vsub.f32 %v18940_v41, %v20897_v44 }
 0x6fd   : > { %15143 = vmatpush3.bf16.msra.mxu0 %v18944_v36 }
 0x6fe   : > { %15144 = vmatprep.subr.bf16.mxu0 %v21442_v46 }
 0x701   : > { %15146 = vmatpush3.bf16.msra.mxu0 %v18955_v2 }
 0x702   : > { %15147 = vmatprep.subr.bf16.mxu0 %v21442_v46 }
 0x705   : > { %15149 = vmatpush3.bf16.msra.mxu0 %v18973_v23 }
 0x706   : > { %15150 = vmatprep.subr.bf16.mxu0 %v21442_v46 }
 0x724   : > { %v12281_v60 = vpop.f32.mrb[70].mxu1 }
 0x725   : > { %v12282_v59 = vpop.f32.mrb[71].mxu1 }
 0x726   : > { %v12283_v13 = vadd.f32 %v12282_v59, %v12281_v60  ;;  %v19000_v60 = vpack.c.bf16 %v7251_v53, %v7248_v19  ;;  %v19002_v59 = vsub.f32 %v7211_v61, %v7248_v19  ;;  %v7354_v61 = vsub.f32 %v18957_v15, %v20896_v48 }
 0x728   : > { %v12284_v28 = vpop.f32.mrb[72].mxu1  ;;  %15152 = vmatpush3.bf16.msra.mxu0 %v19000_v60 }
 0x729   : > { %v12285_v63 = vpop.f32.mrb[73].mxu1  ;;  %15153 = vmatprep.subr.bf16.mxu0 %v21442_v46 }
 0x72a   : > { %v12286_v43 = vadd.f32 %v12285_v63, %v12284_v28  ;;  %v19006_v28 = vsub.f32 %v7213_v4, %v7254_v37  ;;  %v19008_v63 = vpack.c.bf16 %v7257_v22, %v7254_v37  ;;  %v7361_v4 = vsub.f32 %v18959_v11, %v20895_v51 }
 0x72b   : > { %v20893_v37 = vand.u32 4294901760, %v18977_v25 }
 0x72c   : > { %15155 = vmatpush3.bf16.msra.mxu0 %v19008_v63  ;;  %v7362_v52 = vand.u32 4294901760, %v7361_v4 }
 0x72d   : > { %15156 = vmatprep.subr.bf16.mxu0 %v21442_v46 }
 0x744   : > { %v12319_v30 = vpop.f32.mrb[74].mxu1 }
 0x745   : > { %v12320_v58 = vpop.f32.mrb[75].mxu1 }
 0x746   : > { %v12321_v5 = vadd.f32 %v12320_v58, %v12319_v30  ;;  %v19036_v30 = vpack.c.bf16 %v7263_v55, %v7260_v6  ;;  %v7334_v58 = vand.u32 4294901760, %v7333_v56  ;;  %v7375_v55 = vsub.f32 %v18977_v25, %v20893_v37 }
 0x748   : > { %v18961_v40 = vadd.f32 %v12321_v5, %v12283_v13  ;;  %v12322_v29 = vpop.f32.mrb[76].mxu1  ;;  %v19004_v13 = vsub.f32 %v7212_v35, %v7251_v53  ;;  %v19045_v5 = vpack.c.bf16 %v7320_v27, %v7313_v14  ;;  %15158 = vmatpush3.bf16.msra.mxu0 %v19036_v30  ;;  %v7355_v53 = vand.u32 4294901760, %v7354_v61 }
 0x749   : > { %v12323_v0 = vpop.f32.mrb[77].mxu1  ;;  %15159 = vmatprep.subr.bf16.mxu0 %v21442_v46  ;;  %v7376_v56 = vand.u32 4294901760, %v7375_v55  ;;  %v20892_v27 = vand.u32 4294901760, %v19002_v59 }
 0x74a   : > { %v12324_v39 = vadd.f32 %v12323_v0, %v12322_v29  ;;  %v19047_v29 = vpack.c.bf16 %v7334_v58, %v7327_v38  ;;  %v7341_v0 = vand.u32 4294901760, %v7340_v34  ;;  %v19070_v14 = vpack.c.bf16 %v7362_v52, %v7355_v53 }
 0x74b   : > { %v20891_v38 = vand.u32 4294901760, %v19004_v13  ;;  %v7382_v34 = vsub.f32 %v19002_v59, %v20892_v27  ;;  %v20888_v52 = vand.u32 4294901760, %v19012_v49 }
 0x74c   : > { %v18965_v9 = vadd.f32 %v12324_v39, %v12286_v43  ;;  %v19010_v43 = vsub.f32 %v7214_v16, %v7257_v22  ;;  %v7348_v39 = vand.u32 4294901760, %v7347_v3  ;;  %v20894_v16 = vand.u32 4294901760, %v18975_v21 }
 0x74d   : > { %v7389_v3 = vsub.f32 %v19004_v13, %v20891_v38  ;;  %v7410_v55 = vsub.f32 %v19012_v49, %v20888_v52 }
 0x74e   : > { %v19053_v57 = vpack.c.bf16 %v7348_v39, %v7341_v0  ;;  %v7368_v6 = vsub.f32 %v18975_v21, %v20894_v16  ;;  %v7383_v0 = vand.u32 4294901760, %v7382_v34  ;;  %v20890_v39 = vand.u32 4294901760, %v19006_v28 }
 0x74f   : > { %v7390_v61 = vand.u32 4294901760, %v7389_v3  ;;  %v15184_v34 = vpack.c.bf16 %v18929_v32, %v18927_v12  ;;  %v15187_v3 = vpack.c.bf16 %v18933_v45, %v18931_v47  ;;  %v21447_v12 = vand.u32 4294901760, %v18935_v7 }
 0x750   : > { %v7369_v17 = vand.u32 4294901760, %v7368_v6 }
 0x751   : > { %v15175_v4 = vpack.c.bf16 %v7390_v61, %v7383_v0  ;;  %v15190_v0 = vpack.c.bf16 %v18940_v41, %v18935_v7  ;;  %v15193_v61 = vpack.c.bf16 %v18959_v11, %v18957_v15  ;;  %v21453_v7 = vand.u32 4294901760, %v19002_v59 }
 0x752   : > { %v19075_v58 = vpack.c.bf16 %v7376_v56, %v7369_v17 }
 0x764   : > { %v12357_v8 = vpop.f32.mrb[78].mxu1 }
 0x765   : > { %v12358_v35 = vpop.f32.mrb[79].mxu1 }
 0x766   : > { %v12359_v19 = vadd.f32 %v12358_v35, %v12357_v8  ;;  %v20889_v8 = vand.u32 4294901760, %v19010_v43 }
 0x768   : > { %v6768_v50 = vadd.f32 %v12359_v19, %v18961_v40  ;;  %v12360_v22 = vpop.f32.mrb[80].mxu1  ;;  %v7403_v35 = vsub.f32 %v19010_v43, %v20889_v8  ;;  %v15202_v8 = vpack.c.bf16 %v19010_v43, %v19006_v28 }
 0x769   : > { %v12361_v1 = vpop.f32.mrb[81].mxu1 }
 0x76a   : > { %v12362_v62 = vadd.f32 %v12361_v1, %v12360_v22  ;;  %v7404_v53 = vand.u32 4294901760, %v7403_v35  ;;  %v20887_v22 = vand.u32 4294901760, %v19015_v31 }
 0x76c   : > { %v6777_v40 = vadd.f32 %v12362_v62, %v18965_v9  ;;  %v7396_v9 = vsub.f32 %v19006_v28, %v20890_v39  ;;  %v7417_v1 = vsub.f32 %v19015_v31, %v20887_v22  ;;  %v7411_v62 = vand.u32 4294901760, %v7410_v55 }
 0x76d   : > { %v15199_v22 = vpack.c.bf16 %v19004_v13, %v19002_v59  ;;  %v15205_v39 = vpack.c.bf16 %v19015_v31, %v19012_v49 }
 0x76e   : > { %v7397_v19 = vand.u32 4294901760, %v7396_v9  ;;  %v7418_v17 = vand.u32 4294901760, %v7417_v1 }
 0x770   : > { %v15178_v6 = vpack.c.bf16 %v7404_v53, %v7397_v19  ;;  %v15181_v56 = vpack.c.bf16 %v7418_v17, %v7411_v62  ;;  %v15196_v53 = vpack.c.bf16 %v18977_v25, %v18975_v21 }
 0x784   : > { %v12395_v9 = vpop.f32.mrb[82].mxu1 }
 0x785   : > { %v12396_v35 = vpop.f32.mrb[83].mxu1 }
 0x786   : > { %v12397_v19 = vadd.f32 %v12396_v35, %v12395_v9 }
 0x788   : > { %v6885_v55 = vadd.f32 %v12397_v19, %v6768_v50  ;;  %v12398_v1 = vpop.f32.mrb[84].mxu1 }
 0x789   : > { %v12399_v62 = vpop.f32.mrb[85].mxu1 }
 0x78a   : > { %v12400_v17 = vadd.f32 %v12399_v62, %v12398_v1 }
 0x78c   : > { %v6896_v52 = vadd.f32 %v12400_v17, %v6777_v40 }
 0x7a4   : > { %v12433_v38 = vpop.f32.mrb[86].mxu1 }
 0x7a5   : > { %v12434_v27 = vpop.f32.mrb[87].mxu1 }
 0x7a6   : > { %v12435_v9 = vadd.f32 %v12434_v27, %v12433_v38 }
 0x7a8   : > { %v7064_v35 = vadd.f32 %v12435_v9, %v6885_v55  ;;  %v12436_v37 = vpop.f32.mrb[88].mxu1 }
 0x7a9   : > { %v12437_v16 = vpop.f32.mrb[89].mxu1 }
 0x7aa   : > { %v12438_v50 = vadd.f32 %v12437_v16, %v12436_v37  ;;  %v21443_v16 = vmov 0.0  }
 0x7ac   : > { %v7071_v19 = vadd.f32 %v12438_v50, %v6896_v52 }
 0x7c4   : > { %v12471_v51 = vpop.f32.mrb[90].mxu1 }
 0x7c5   : > { %v12472_v1 = vpop.f32.mrb[91].mxu1 }
 0x7c6   : > { %v12473_v62 = vadd.f32 %v12472_v1, %v12471_v51  ;;  %v21451_v51 = vand.u32 4294901760, %v18975_v21  ;;  %v21457_v21 = vand.u32 4294901760, %v19012_v49 }
 0x7c8   : > { %v19115_v48 = vadd.f32 %v12473_v62, %v7064_v35  ;;  %v12474_v40 = vpop.f32.mrb[92].mxu1  ;;  %v19292_v62 = vld [vmem:[%s21459_s17 + $0x60] sm:$0xff] }
 0x7c9   : > { %v12475_v17 = vpop.f32.mrb[93].mxu1 }
 0x7ca   : > { %v12476_v44 = vadd.f32 %v12475_v17, %v12474_v40  ;;  %v19286_v1 = vand.u32 4294901760, %v19115_v48  ;;  %v19297_v40 = vld [vmem:[%s21459_s17 + $0x68] sm:$0xff] }
 0x7cc   : > { %v7182_v10 = vadd.f32 %v12476_v44, %v7071_v19  ;;  %v21445_v44 = vand.u32 4294901760, %v18931_v47  ;;  %v21450_v47 = vand.u32 4294901760, %v18959_v11  ;;  %v21456_v11 = vand.u32 4294901760, %v19010_v43  ;;  %v7190_v43 = vld [vmem:[%s21459_s17 + $0x28] sm:$0xff] }
 0x7ce   : > { %v19117_v20 = vand.u32 4294901760, %v7182_v10 }
 0x7d0   : > { %v7299_v42 = vsub.f32 %v7182_v10, %v19117_v20 }
 0x7d2   : > { %v7300_v26 = vand.u32 4294901760, %v7299_v42 }
 0x7d4   : > { %v7301_v27 = vsub.f32 %v7299_v42, %v7300_v26 }
 0x7d6   : > { %v7302_v38 = vand.u32 4294901760, %v7301_v27 }
 0x7d8   : > { %13890 = vmatmul.mubr.f32.vlgmr.msra.gmra.mrb[40].mxu0 %v7302_v38 }
 0x7d9   : > { %15161 = vmatpush3.bf16.msra.mxu0 %v19045_v5  ;;  %13924 = vmatprep.mubr.msk.f32.mxu0 %vm16193_vm4, %v21443_v16  ;;  %v21446_v5 = vand.u32 4294901760, %v18933_v45 }
 0x7da   : > { %15162 = vmatprep.subr.bf16.mxu0 %v21442_v46 }
 0x7dd   : > { %15164 = vmatpush3.bf16.msra.mxu0 %v19047_v29  ;;  %v15235_v29 = vpack.c.bf16 %v21446_v5, %v21445_v44  ;;  %v7895_v44 = vand.u32 4294901760, %v19292_v62  ;;  %v7898_v5 = vand.u32 4294901760, %v19297_v40 }
 0x7de   : > { %15165 = vmatprep.subr.bf16.mxu0 %v21442_v46 }
 0x7e1   : > { %15167 = vmatpush3.bf16.msra.mxu0 %v19053_v57  ;;  %v21452_v57 = vand.u32 4294901760, %v18977_v25  ;;  %v21458_v25 = vand.u32 4294901760, %v19015_v31 }
 0x7e2   : > { %15168 = vmatprep.subr.bf16.mxu0 %v21442_v46 }
 0x7e3   : > { %v15244_v37 = vpack.c.bf16 %v21452_v57, %v21451_v51  ;;  %v19336_v57 = vpack.c.bf16 %v7898_v5, %v7895_v44 }
 0x7e5   : > { %15170 = vmatpush3.bf16.msra.mxu0 %v19070_v14 }
 0x7e6   : > { %15171 = vmatprep.subr.bf16.mxu0 %v21442_v46 }
 0x7e9   : > { %15173 = vmatpush3.bf16.msra.mxu0 %v19075_v58 }
 0x7ea   : > { %15174 = vmatprep.subr.bf16.mxu0 %v21442_v46 }
 0x7ed   : > { %15176 = vmatpush3.bf16.msra.mxu0 %v15175_v4  ;;  %v7192_v4 = vld [vmem:[%s21459_s17 + $0x38] sm:$0xff] }
 0x7ee   : > { %15177 = vmatprep.subr.bf16.mxu0 %v21442_v46 }
 0x7f1   : > { %15179 = vmatpush3.bf16.msra.mxu0 %v15178_v6  ;;  %v7193_v6 = vld [vmem:[%s21459_s17 + $0x40] sm:$0xff] }
 0x7f2   : > { %15180 = vmatprep.subr.bf16.mxu0 %v21442_v46 }
 0x7f5   : > { %15182 = vmatpush3.bf16.msra.mxu0 %v15181_v56  ;;  %v7194_v56 = vld [vmem:[%s21459_s17 + $0x48] sm:$0xff] }
 0x7f6   : > { %15183 = vmatprep.subr.bf16.mxu0 %v21442_v46 }
 0x7f8   : > { %13925 = vmatmul.mubr.f32.vlgmr.msra.gmra.mrb[40].mxu0 %v19117_v20 }
 0x7f9   : > { %15185 = vmatpush3.bf16.msra.mxu0 %v15184_v34  ;;  %13959 = vmatprep.mubr.msk.f32.mxu0 %vm16193_vm4, %v21443_v16 }
 0x7fa   : > { %15186 = vmatprep.subr.bf16.mxu0 %v21442_v46 }
 0x7fd   : > { %15188 = vmatpush3.bf16.msra.mxu0 %v15187_v3  ;;  %v7883_v3 = vand.u32 4294901760, %v7193_v6 }
 0x7fe   : > { %15189 = vmatprep.subr.bf16.mxu0 %v21442_v46 }
 0x801   : > { %15191 = vmatpush3.bf16.msra.mxu0 %v15190_v0  ;;  %v7886_v0 = vand.u32 4294901760, %v7194_v56 }
 0x802   : > { %15192 = vmatprep.subr.bf16.mxu0 %v21442_v46 }
 0x803   : > { %v19283_v35 = vpack.c.bf16 %v7886_v0, %v7883_v3 }
 0x805   : > { %15194 = vmatpush3.bf16.msra.mxu0 %v15193_v61  ;;  %v7195_v61 = vld [vmem:[%s21459_s17 + $0x50] sm:$0xff] }
 0x806   : > { %15195 = vmatprep.subr.bf16.mxu0 %v21442_v46  ;;  %v7889_v50 = vand.u32 4294901760, %v7195_v61 }
 0x809   : > { %15197 = vmatpush3.bf16.msra.mxu0 %v15196_v53  ;;  %v7196_v53 = vld [vmem:[%s21459_s17 + $0x58] sm:$0xff] }
 0x80a   : > { %15198 = vmatprep.subr.bf16.mxu0 %v21442_v46  ;;  %v7892_v19 = vand.u32 4294901760, %v7196_v53 }
 0x80d   : > { %15200 = vmatpush3.bf16.msra.mxu0 %v15199_v22  ;;  %v7880_v22 = vand.u32 4294901760, %v7192_v4 }
 0x80e   : > { %15201 = vmatprep.subr.bf16.mxu0 %v21442_v46 }
 0x811   : > { %15203 = vmatpush3.bf16.msra.mxu0 %v15202_v8  ;;  %v7191_v8 = vld [vmem:[%s21459_s17 + $0x30] sm:$0xff] }
 0x812   : > { %15204 = vmatprep.subr.bf16.mxu0 %v21442_v46  ;;  %v7877_v52 = vand.u32 4294901760, %v7191_v8 }
 0x814   : > { %v19269_v34 = vpack.c.bf16 %v7880_v22, %v7877_v52 }
 0x815   : > { %15206 = vmatpush3.bf16.msra.mxu0 %v15205_v39  ;;  %v15253_v39 = vpack.c.bf16 %v21458_v25, %v21457_v21  ;;  %v19349_v25 = vsub.f32 %v7192_v4, %v7880_v22  ;;  %v19374_v4 = vsub.f32 %v7195_v61, %v7889_v50 }
 0x816   : > { %15207 = vmatprep.subr.bf16.mxu0 %v21442_v46 }
 0x818   : > { %13960 = vmatmul.mubr.f32.vlgmr.msra.gmra.mrb[40].mxu0 %v7299_v42  ;;  %v21444_v42 = vand.u32 4294901760, %v18929_v32  ;;  %v21448_v32 = vand.u32 4294901760, %v18940_v41  ;;  %v21454_v41 = vand.u32 4294901760, %v19004_v13 }
 0x819   : > { %15209 = vmatpush3.bf16.msra.mxu0 %v18925_v33  ;;  %13994 = vmatprep.mubr.msk.f32.mxu0 %vm16193_vm4, %v21443_v16 }
 0x81a   : > { %15210 = vmatprep.subr.bf16.mxu0 %v21442_v46  ;;  %v15232_v10 = vpack.c.bf16 %v21444_v42, %v7311_v24  ;;  %v15238_v24 = vpack.c.bf16 %v21448_v32, %v21447_v12  ;;  %v15247_v14 = vpack.c.bf16 %v21454_v41, %v21453_v7  ;;  %v7199_v12 = vld [vmem:[%s21459_s17 + $0x70] sm:$0xff]  ;;  %v19321_v32 = vld [vmem:[%s21459_s17 + $0x78] sm:$0xff] }
 0x81b   : > { %v7904_v7 = vand.u32 4294901760, %v19321_v32 }
 0x81d   : > { %15212 = vmatpush3.bf16.msra.mxu0 %v18938_v54 }
 0x81e   : > { %15213 = vmatprep.subr.bf16.mxu0 %v21442_v46 }
 0x821   : > { %15215 = vmatpush3.bf16.msra.mxu0 %v18944_v36 }
 0x822   : > { %15216 = vmatprep.subr.bf16.mxu0 %v21442_v46 }
 0x825   : > { %15218 = vmatpush3.bf16.msra.mxu0 %v18955_v2 }
 0x826   : > { %15219 = vmatprep.subr.bf16.mxu0 %v21442_v46 }
 0x829   : > { %15221 = vmatpush3.bf16.msra.mxu0 %v18973_v23 }
 0x82a   : > { %15222 = vmatprep.subr.bf16.mxu0 %v21442_v46 }
 0x82d   : > { %15224 = vmatpush3.bf16.msra.mxu0 %v19000_v60 }
 0x82e   : > { %15225 = vmatprep.subr.bf16.mxu0 %v21442_v46 }
 0x831   : > { %15227 = vmatpush3.bf16.msra.mxu0 %v19008_v63 }
 0x832   : > { %15228 = vmatprep.subr.bf16.mxu0 %v21442_v46 }
 0x835   : > { %15230 = vmatpush3.bf16.msra.mxu0 %v19036_v30 }
 0x836   : > { %15231 = vmatprep.subr.bf16.mxu0 %v21442_v46 }
 0x838   : > { %13995 = vmatmul.mubr.f32.vlgmr.msra.gmra.mrb[40].mxu0 %v7300_v26  ;;  %v21449_v26 = vand.u32 4294901760, %v18957_v15  ;;  %v21455_v15 = vand.u32 4294901760, %v19006_v28 }
 0x839   : > { %15233 = vmatpush3.bf16.msra.mxu0 %v15232_v10  ;;  %14029 = vmatprep.mubr.msk.f32.mxu0 %vm16193_vm4, %v21443_v16  ;;  %v19306_v10 = vpack.c.bf16 %v7892_v19, %v7889_v50 }
 0x83a   : > { %15234 = vmatprep.subr.bf16.mxu0 %v21442_v46  ;;  %v15241_v45 = vpack.c.bf16 %v21450_v47, %v21449_v26  ;;  %v15250_v58 = vpack.c.bf16 %v21456_v11, %v21455_v15 }
 0x83d   : > { %15236 = vmatpush3.bf16.msra.mxu0 %v15235_v29  ;;  %v19312_v29 = vsub.f32 %v19115_v48, %v19286_v1 }
 0x83e   : > { %15237 = vmatprep.subr.bf16.mxu0 %v21442_v46 }
 0x83f   : > { %v7941_v41 = vand.u32 4294901760, %v19312_v29 }
 0x841   : > { %15239 = vmatpush3.bf16.msra.mxu0 %v15238_v24 }
 0x842   : > { %15240 = vmatprep.subr.bf16.mxu0 %v21442_v46 }
 0x845   : > { %15242 = vmatpush3.bf16.msra.mxu0 %v15241_v45 }
 0x846   : > { %15243 = vmatprep.subr.bf16.mxu0 %v21442_v46 }
 0x849   : > { %15245 = vmatpush3.bf16.msra.mxu0 %v15244_v37  ;;  %v7901_v37 = vand.u32 4294901760, %v7199_v12 }
 0x84a   : > { %15246 = vmatprep.subr.bf16.mxu0 %v21442_v46 }
 0x84d   : > { %15248 = vmatpush3.bf16.msra.mxu0 %v15247_v14  ;;  %v19341_v14 = vsub.f32 %v7191_v8, %v7877_v52  ;;  %v19376_v52 = vsub.f32 %v7196_v53, %v7892_v19  ;;  %v19390_v53 = vsub.f32 %v19292_v62, %v7895_v44  ;;  %v19404_v44 = vsub.f32 %v7199_v12, %v7901_v37 }
 0x84e   : > { %15249 = vmatprep.subr.bf16.mxu0 %v21442_v46 }
 0x851   : > { %15251 = vmatpush3.bf16.msra.mxu0 %v15250_v58 }
 0x852   : > { %15252 = vmatprep.subr.bf16.mxu0 %v21442_v46 }
 0x855   : > { %15254 = vmatpush3.bf16.msra.mxu0 %v15253_v39  ;;  %v19352_v39 = vpack.c.bf16 %v7904_v7, %v7901_v37 }
 0x856   : > { %15255 = vmatprep.subr.bf16.mxu0 %v21442_v46 }
 0x858   : > { %14030 = vmatmul.mubr.f32.vlgmr.msra.gmra.mrb[40].mxu0 %v19117_v20 }
 0x859   : > { %15257 = vmatpush3.bf16.msra.mxu0 %v18925_v33  ;;  %14064 = vmatprep.mubr.msk.f32.mxu0 %vm16193_vm4, %v21443_v16  ;;  %v7185_v33 = vld [vmem:[%s21459_s17] sm:$0xff] }
 0x85a   : > { %15258 = vmatprep.subr.bf16.mxu0 %v21442_v46 }
 0x85d   : > { %15260 = vmatpush3.bf16.msra.mxu0 %v18938_v54  ;;  %v7186_v54 = vld [vmem:[%s21459_s17 + $0x8] sm:$0xff] }
 0x85e   : > { %15261 = vmatprep.subr.bf16.mxu0 %v21442_v46 }
 0x861   : > { %15263 = vmatpush3.bf16.msra.mxu0 %v18944_v36  ;;  %v7859_v36 = vand.u32 4294901760, %v7185_v33 }
 0x862   : > { %15264 = vmatprep.subr.bf16.mxu0 %v21442_v46 }
 0x863   : > { %v19278_v55 = vsub.f32 %v7185_v33, %v7859_v36 }
 0x865   : > { %15266 = vmatpush3.bf16.msra.mxu0 %v18955_v2  ;;  %v7862_v2 = vand.u32 4294901760, %v7186_v54  ;;  %v7952_v38 = vand.u32 4294901760, %v19278_v55 }
 0x866   : > { %15267 = vmatprep.subr.bf16.mxu0 %v21442_v46 }
 0x867   : > { %v19236_v59 = vpack.c.bf16 %v7862_v2, %v7859_v36  ;;  %v19280_v9 = vsub.f32 %v7186_v54, %v7862_v2  ;;  %v7953_v26 = vsub.f32 %v19278_v55, %v7952_v38  ;;  %v7942_v36 = vsub.f32 %v19312_v29, %v7941_v41 }
 0x868   : > { %v19360_v2 = vsub.f32 %v7193_v6, %v7883_v3 }
 0x869   : > { %15269 = vmatpush3.bf16.msra.mxu0 %v18973_v23  ;;  %v7187_v23 = vld [vmem:[%s21459_s17 + $0x10] sm:$0xff]  ;;  %v7959_v42 = vand.u32 4294901760, %v19280_v9  ;;  %v7954_v15 = vand.u32 4294901760, %v7953_v26  ;;  %v7943_v8 = vand.u32 4294901760, %v7942_v36 }
 0x86a   : > { %15270 = vmatprep.subr.bf16.mxu0 %v21442_v46  ;;  %v7865_v13 = vand.u32 4294901760, %v7187_v23  ;;  %v8008_v6 = vand.u32 4294901760, %v19360_v2 }
 0x86b   : > { %v7960_v48 = vsub.f32 %v19280_v9, %v7959_v42 }
 0x86c   : > { %v19299_v17 = vsub.f32 %v7187_v23, %v7865_v13  ;;  %v19362_v23 = vsub.f32 %v7194_v56, %v7886_v0  ;;  %v8009_v50 = vsub.f32 %v19360_v2, %v8008_v6 }
 0x86d   : > { %15272 = vmatpush3.bf16.msra.mxu0 %v19000_v60  ;;  %v7188_v60 = vld [vmem:[%s21459_s17 + $0x18] sm:$0xff]  ;;  %v7961_v11 = vand.u32 4294901760, %v7960_v48  ;;  %v8022_v48 = vand.u32 4294901760, %v19374_v4 }
 0x86e   : > { %15273 = vmatprep.subr.bf16.mxu0 %v21442_v46  ;;  %v7868_v28 = vand.u32 4294901760, %v7188_v60  ;;  %v7966_v47 = vand.u32 4294901760, %v19299_v17  ;;  %v8015_v56 = vand.u32 4294901760, %v19362_v23  ;;  %v8010_v36 = vand.u32 4294901760, %v8009_v50 }
 0x870   : > { %v19247_v49 = vpack.c.bf16 %v7868_v28, %v7865_v13  ;;  %v19301_v27 = vsub.f32 %v7188_v60, %v7868_v28  ;;  %v7967_v58 = vsub.f32 %v19299_v17, %v7966_v47  ;;  %v15304_v60 = vpack.c.bf16 %v7961_v11, %v7954_v15 }
 0x871   : > { %15275 = vmatpush3.bf16.msra.mxu0 %v19008_v63  ;;  %v7189_v63 = vld [vmem:[%s21459_s17 + $0x20] sm:$0xff]  ;;  %v8016_v19 = vsub.f32 %v19362_v23, %v8015_v56  ;;  %v8029_v15 = vand.u32 4294901760, %v19376_v52  ;;  %v19401_v11 = vsub.f32 %v19297_v40, %v7898_v5  ;;  %v19413_v40 = vsub.f32 %v19321_v32, %v7904_v7 }
 0x872   : > { %15276 = vmatprep.subr.bf16.mxu0 %v21442_v46  ;;  %v7871_v31 = vand.u32 4294901760, %v7189_v63  ;;  %v7973_v45 = vand.u32 4294901760, %v19301_v27  ;;  %v7968_v13 = vand.u32 4294901760, %v7967_v58  ;;  %v8050_v7 = vand.u32 4294901760, %v19404_v44 }
 0x873   : > { %v8043_v12 = vand.u32 4294901760, %v19401_v11 }
 0x874   : > { %v19323_v24 = vsub.f32 %v7189_v63, %v7871_v31  ;;  %v7974_v21 = vsub.f32 %v19301_v27, %v7973_v45  ;;  %v8051_v50 = vsub.f32 %v19404_v44, %v8050_v7 }
 0x875   : > { %15278 = vmatpush3.bf16.msra.mxu0 %v19036_v30  ;;  %v7874_v30 = vand.u32 4294901760, %v7190_v43  ;;  %v8044_v32 = vsub.f32 %v19401_v11, %v8043_v12 }
 0x876   : > { %15279 = vmatprep.subr.bf16.mxu0 %v21442_v46  ;;  %v7980_v33 = vand.u32 4294901760, %v19323_v24  ;;  %v7975_v28 = vand.u32 4294901760, %v7974_v21 }
 0x877   : > { %v19333_v51 = vsub.f32 %v7190_v43, %v7874_v30 }
 0x878   : > { %14065 = vmatmul.mubr.f32.vlgmr.msra.gmra.mrb[40].mxu0 %v19117_v20  ;;  %v19259_v20 = vpack.c.bf16 %v7874_v30, %v7871_v31  ;;  %v7981_v63 = vsub.f32 %v19323_v24, %v7980_v33  ;;  %v7994_v31 = vand.u32 4294901760, %v19341_v14  ;;  %v8001_v30 = vand.u32 4294901760, %v19349_v25 }
 0x879   : > { %15281 = vmatpush3.bf16.msra.mxu0 %v19236_v59  ;;  %14099 = vmatprep.mubr.msk.f32.mxu0 %vm16193_vm4, %v21443_v16  ;;  %v7987_v54 = vand.u32 4294901760, %v19333_v51  ;;  %v15307_v22 = vpack.c.bf16 %v7975_v28, %v7968_v13  ;;  %v8023_v13 = vsub.f32 %v19374_v4, %v8022_v48  ;;  %v8030_v28 = vsub.f32 %v19376_v52, %v8029_v15 }
 0x87a   : > { %15282 = vmatprep.subr.bf16.mxu0 %v21442_v46  ;;  %v7982_v3 = vand.u32 4294901760, %v7981_v63  ;;  %v7995_v26 = vsub.f32 %v19341_v14, %v7994_v31  ;;  %v8002_v61 = vsub.f32 %v19349_v25, %v8001_v30  ;;  %v8036_v63 = vand.u32 4294901760, %v19390_v53 }
 0x87b   : > { %v7988_v43 = vsub.f32 %v19333_v51, %v7987_v54 }
 0x87c   : > { %v7996_v21 = vand.u32 4294901760, %v7995_v26  ;;  %v8003_v62 = vand.u32 4294901760, %v8002_v61  ;;  %v8045_v61 = vand.u32 4294901760, %v8044_v32  ;;  %v15376_v32 = vpack.c.bf16 %v7959_v42, %v7952_v38 }
 0x87d   : > { %15284 = vmatpush3.bf16.msra.mxu0 %v19247_v49  ;;  %v7989_v0 = vand.u32 4294901760, %v7988_v43  ;;  %v8024_v43 = vand.u32 4294901760, %v8023_v13  ;;  %v15331_v13 = vpack.c.bf16 %v19301_v27, %v19299_v17  ;;  %v15388_v17 = vpack.c.bf16 %v8015_v56, %v8008_v6 }
 0x87e   : > { %15285 = vmatprep.subr.bf16.mxu0 %v21442_v46  ;;  %v15313_v5 = vpack.c.bf16 %v8003_v62, %v7996_v21  ;;  %v8052_v21 = vand.u32 4294901760, %v8051_v50  ;;  %v15391_v27 = vpack.c.bf16 %v8029_v15, %v8022_v48  ;;  %v15394_v38 = vpack.c.bf16 %v8043_v12, %v8036_v63  ;;  %v8545_v48 = vld [vmem:[%s20589_s14 + $0x28] sm:$0xff] (!%p11720_p5)  ;;  %v8546_v15 = vld [vmem:[%s20589_s14 + $0x30] sm:$0xff] (!%p11720_p5) }
 0x87f   : > { %v15310_v58 = vpack.c.bf16 %v7989_v0, %v7982_v3  ;;  %v8057_v3 = vand.u32 4294901760, %v19413_v40 }
 0x881   : > { %15287 = vmatpush3.bf16.msra.mxu0 %v19259_v20  ;;  %v15397_v42 = vpack.c.bf16 %v8057_v3, %v8050_v7 }
 0x882   : > { %15288 = vmatprep.subr.bf16.mxu0 %v21442_v46 }
 0x885   : > { %15290 = vmatpush3.bf16.msra.mxu0 %v19269_v34 }
 0x886   : > { %15291 = vmatprep.subr.bf16.mxu0 %v21442_v46 }
 0x889   : > { %15293 = vmatpush3.bf16.msra.mxu0 %v19283_v35 }
 0x88a   : > { %15294 = vmatprep.subr.bf16.mxu0 %v21442_v46 }
 0x88d   : > { %15296 = vmatpush3.bf16.msra.mxu0 %v19306_v10 }
 0x88e   : > { %15297 = vmatprep.subr.bf16.mxu0 %v21442_v46 }
 0x891   : > { %15299 = vmatpush3.bf16.msra.mxu0 %v19336_v57 }
 0x892   : > { %15300 = vmatprep.subr.bf16.mxu0 %v21442_v46 }
 0x895   : > { %15302 = vmatpush3.bf16.msra.mxu0 %v19352_v39 }
 0x896   : > { %15303 = vmatprep.subr.bf16.mxu0 %v21442_v46 }
 0x898   : > { %14100 = vmatmul.mubr.f32.vlgmr.msra.gmra.mrb[40].mxu0 %v7943_v8  ;;  %v8031_v8 = vand.u32 4294901760, %v8030_v28  ;;  %v15334_v28 = vpack.c.bf16 %v19333_v51, %v19323_v24 }
 0x899   : > { %15305 = vmatpush3.bf16.msra.mxu0 %v15304_v60  ;;  %14134 = vmatprep.mubr.msk.f32.mxu0 %vm16193_vm4, %v21443_v16  ;;  %v8017_v60 = vand.u32 4294901760, %v8016_v19  ;;  %v8058_v19 = vsub.f32 %v19413_v40, %v8057_v3 }
 0x89a   : > { %15306 = vmatprep.subr.bf16.mxu0 %v21442_v46  ;;  %v15319_v0 = vpack.c.bf16 %v8031_v8, %v8024_v43  ;;  %v15343_v43 = vpack.c.bf16 %v19376_v52, %v19374_v4  ;;  %v15346_v8 = vpack.c.bf16 %v19401_v11, %v19390_v53  ;;  %v8544_v4 = vld [vmem:[%s20589_s14 + $0x20] sm:$0xff] (!%p11720_p5) }
 0x89b   : > { %v15316_v37 = vpack.c.bf16 %v8017_v60, %v8010_v36  ;;  %v8059_v62 = vand.u32 4294901760, %v8058_v19  ;;  %v15328_v60 = vpack.c.bf16 %v19280_v9, %v19278_v55  ;;  %v15382_v55 = vpack.c.bf16 %v7987_v54, %v7980_v33  ;;  %v8541_v33 = vld [vmem:[%s20589_s14 + $0x8] sm:$0xff] (!%p11720_p5) }
 0x89c   : > { %v15385_v9 = vpack.c.bf16 %v8001_v30, %v7994_v31  ;;  %v8542_v31 = vld [vmem:[%s20589_s14 + $0x10] sm:$0xff] (!%p11720_p5)  ;;  %v8543_v30 = vld [vmem:[%s20589_s14 + $0x18] sm:$0xff] (!%p11720_p5) }
 0x89d   : > { %15308 = vmatpush3.bf16.msra.mxu0 %v15307_v22  ;;  %v8037_v22 = vsub.f32 %v19390_v53, %v8036_v63  ;;  %v15325_v36 = vpack.c.bf16 %v8059_v62, %v8052_v21  ;;  %v8565_v53 = vsel (!%p11720_p5), %vm8557_vm6, %v8542_v31, 0  ;;  %v8574_v63 = vsel (!%p11720_p5), %vm8557_vm6, %v8545_v48, 0  ;;  %v8547_v21 = vld [vmem:[%s20589_s14 + $0x38] sm:$0xff] (!%p11720_p5)  ;;  %v8548_v62 = vld [vmem:[%s20589_s14 + $0x40] sm:$0xff] (!%p11720_p5) }
 0x89e   : > { %15309 = vmatprep.subr.bf16.mxu0 %v21442_v46  ;;  %v19585_v11 = vand.u32 (!%p11720_p5), 4294901760, %v8565_v53  ;;  %v19609_v19 = vand.u32 (!%p11720_p5), 4294901760, %v8574_v63 }
 0x89f   : > { %v8038_v26 = vand.u32 4294901760, %v8037_v22  ;;  %v15349_v22 = vpack.c.bf16 %v19413_v40, %v19404_v44  ;;  %v8568_v44 = vsel (!%p11720_p5), %vm8557_vm6, %v8543_v30, 0  ;;  %v8571_v40 = vsel (!%p11720_p5), %vm8557_vm6, %v8544_v4, 0 }
 0x8a0   : > { %v19607_v50 = vand.u32 (!%p11720_p5), 4294901760, %v8571_v40 }
 0x8a1   : > { %15311 = vmatpush3.bf16.msra.mxu0 %v15310_v58  ;;  %v15322_v58 = vpack.c.bf16 %v8045_v61, %v8038_v26  ;;  %v19600_v26 = vand.u32 (!%p11720_p5), 4294901760, %v8568_v44  ;;  %v19605_v61 = vsub.f32 (!%p11720_p5), %v8565_v53, %v19585_v11 }
 0x8a2   : > { %15312 = vmatprep.subr.bf16.mxu0 %v21442_v46 }
 0x8a5   : > { %15314 = vmatpush3.bf16.msra.mxu0 %v15313_v5  ;;  %v15337_v5 = vpack.c.bf16 %v19349_v25, %v19341_v14 }
 0x8a6   : > { %15315 = vmatprep.subr.bf16.mxu0 %v21442_v46 }
 0x8a9   : > { %15317 = vmatpush3.bf16.msra.mxu0 %v15316_v37  ;;  %v15340_v37 = vpack.c.bf16 %v19362_v23, %v19360_v2  ;;  %v8562_v23 = vsel (!%p11720_p5), %vm8557_vm6, %v8541_v33, 0 }
 0x8aa   : > { %15318 = vmatprep.subr.bf16.mxu0 %v21442_v46  ;;  %v19576_v56 = vand.u32 (!%p11720_p5), 4294901760, %v8562_v23 }
 0x8ac   : > { %v19598_v3 = vsub.f32 (!%p11720_p5), %v8562_v23, %v19576_v56  ;;  %v8555_v23 = vld [vmem:[%s20589_s14 + $0x78] sm:$0xff] (!%p11720_p5) }
 0x8ad   : > { %15320 = vmatpush3.bf16.msra.mxu0 %v15319_v0  ;;  %v15379_v0 = vpack.c.bf16 %v7973_v45, %v7966_v47 }
 0x8ae   : > { %15321 = vmatprep.subr.bf16.mxu0 %v21442_v46 }
 0x8b1   : > { %15323 = vmatpush3.bf16.msra.mxu0 %v15322_v58  ;;  %v8577_v58 = vsel (!%p11720_p5), %vm8557_vm6, %v8546_v15, 0 }
 0x8b2   : > { %15324 = vmatprep.subr.bf16.mxu0 %v21442_v46 }
 0x8b5   : > { %15326 = vmatpush3.bf16.msra.mxu0 %v15325_v36 }
 0x8b6   : > { %15327 = vmatprep.subr.bf16.mxu0 %v21442_v46 }
 0x8b8   : > { %14135 = vmatmul.mubr.f32.vlgmr.msra.gmra.mrb[40].mxu0 %v19286_v1 }
 0x8b9   : > { %15329 = vmatpush3.bf16.msra.mxu0 %v15328_v60  ;;  %14169 = vmatprep.mubr.msk.f32.mxu0 %vm16193_vm4, %v21443_v16 }
 0x8ba   : > { %15330 = vmatprep.subr.bf16.mxu0 %v21442_v46 }
 0x8bd   : > { %15332 = vmatpush3.bf16.msra.mxu0 %v15331_v13  ;;  %v8688_v13 = vand.u32 (!%p11720_p5), 4294901760, %v19598_v3 }
 0x8be   : > { %15333 = vmatprep.subr.bf16.mxu0 %v21442_v46 }
 0x8c1   : > { %15335 = vmatpush3.bf16.msra.mxu0 %v15334_v28  ;;  %v19625_v28 = vsub.f32 (!%p11720_p5), %v8568_v44, %v19600_v26  ;;  %v8604_v44 = vsel (!%p11720_p5), %vm8557_vm6, %v8555_v23, 0 }
 0x8c2   : > { %15336 = vmatprep.subr.bf16.mxu0 %v21442_v46 }
 0x8c5   : > { %15338 = vmatpush3.bf16.msra.mxu0 %v15337_v5  ;;  %v8698_v5 = vand.u32 (!%p11720_p5), 4294901760, %v19605_v61 }
 0x8c6   : > { %15339 = vmatprep.subr.bf16.mxu0 %v21442_v46 }
 0x8c9   : > { %15341 = vmatpush3.bf16.msra.mxu0 %v15340_v37  ;;  %v19629_v37 = vsub.f32 (!%p11720_p5), %v8571_v40, %v19607_v50 }
 0x8ca   : > { %15342 = vmatprep.subr.bf16.mxu0 %v21442_v46 }
 0x8cd   : > { %15344 = vmatpush3.bf16.msra.mxu0 %v15343_v43  ;;  %v19631_v43 = vand.u32 (!%p11720_p5), 4294901760, %v8577_v58 }
 0x8ce   : > { %15345 = vmatprep.subr.bf16.mxu0 %v21442_v46 }
 0x8d1   : > { %15347 = vmatpush3.bf16.msra.mxu0 %v15346_v8  ;;  %v8549_v8 = vld [vmem:[%s20589_s14 + $0x48] sm:$0xff] (!%p11720_p5) }
 0x8d2   : > { %15348 = vmatprep.subr.bf16.mxu0 %v21442_v46 }
 0x8d5   : > { %15350 = vmatpush3.bf16.msra.mxu0 %v15349_v22  ;;  %v8580_v22 = vsel (!%p11720_p5), %vm8557_vm6, %v8547_v21, 0 }
 0x8d6   : > { %15351 = vmatprep.subr.bf16.mxu0 %v21442_v46 }
 0x8d8   : > { %14170 = vmatmul.mubr.f32.vlgmr.msra.gmra.mrb[40].mxu0 %v19312_v29 }
 0x8d9   : > { %15353 = vmatpush3.bf16.msra.mxu0 %v19236_v59  ;;  %14204 = vmatprep.mubr.msk.f32.mxu0 %vm16193_vm4, %v21443_v16 }
 0x8da   : > { %15354 = vmatprep.subr.bf16.mxu0 %v21442_v46 }
 0x8dd   : > { %15356 = vmatpush3.bf16.msra.mxu0 %v19247_v49 }
 0x8de   : > { %15357 = vmatprep.subr.bf16.mxu0 %v21442_v46 }
 0x8e1   : > { %15359 = vmatpush3.bf16.msra.mxu0 %v19259_v20 }
 0x8e2   : > { %15360 = vmatprep.subr.bf16.mxu0 %v21442_v46 }
 0x8e5   : > { %15362 = vmatpush3.bf16.msra.mxu0 %v19269_v34 }
 0x8e6   : > { %15363 = vmatprep.subr.bf16.mxu0 %v21442_v46 }
 0x8e9   : > { %15365 = vmatpush3.bf16.msra.mxu0 %v19283_v35 }
 0x8ea   : > { %15366 = vmatprep.subr.bf16.mxu0 %v21442_v46 }
 0x8ed   : > { %15368 = vmatpush3.bf16.msra.mxu0 %v19306_v10 }
 0x8ee   : > { %15369 = vmatprep.subr.bf16.mxu0 %v21442_v46 }
 0x8f1   : > { %15371 = vmatpush3.bf16.msra.mxu0 %v19336_v57 }
 0x8f2   : > { %15372 = vmatprep.subr.bf16.mxu0 %v21442_v46 }
 0x8f5   : > { %15374 = vmatpush3.bf16.msra.mxu0 %v19352_v39 }
 0x8f6   : > { %15375 = vmatprep.subr.bf16.mxu0 %v21442_v46 }
 0x8f8   : > { %14205 = vmatmul.mubr.f32.vlgmr.msra.gmra.mrb[40].mxu0 %v7941_v41 }
 0x8f9   : > { %15377 = vmatpush3.bf16.msra.mxu0 %v15376_v32  ;;  %14239 = vmatprep.mubr.msk.f32.mxu0 %vm16193_vm4, %v21443_v16  ;;  %v8583_v32 = vsel (!%p11720_p5), %vm8557_vm6, %v8548_v62, 0 }
 0x8fa   : > { %15378 = vmatprep.subr.bf16.mxu0 %v21442_v46 }
 0x8fd   : > { %15380 = vmatpush3.bf16.msra.mxu0 %v15379_v0  ;;  %v8550_v0 = vld [vmem:[%s20589_s14 + $0x50] sm:$0xff] (!%p11720_p5) }
 0x8fe   : > { %15381 = vmatprep.subr.bf16.mxu0 %v21442_v46 }
 0x901   : > { %15383 = vmatpush3.bf16.msra.mxu0 %v15382_v55  ;;  %v8708_v55 = vand.u32 (!%p11720_p5), 4294901760, %v19625_v28 }
 0x902   : > { %15384 = vmatprep.subr.bf16.mxu0 %v21442_v46 }
 0x905   : > { %15386 = vmatpush3.bf16.msra.mxu0 %v15385_v9  ;;  %v19648_v9 = vsub.f32 (!%p11720_p5), %v8574_v63, %v19609_v19 }
 0x906   : > { %15387 = vmatprep.subr.bf16.mxu0 %v21442_v46 }
 0x909   : > { %15389 = vmatpush3.bf16.msra.mxu0 %v15388_v17  ;;  %v19650_v17 = vand.u32 (!%p11720_p5), 4294901760, %v8580_v22 }
 0x90a   : > { %15390 = vmatprep.subr.bf16.mxu0 %v21442_v46 }
 0x90d   : > { %15392 = vmatpush3.bf16.msra.mxu0 %v15391_v27  ;;  %v8718_v27 = vand.u32 (!%p11720_p5), 4294901760, %v19629_v37 }
 0x90e   : > { %15393 = vmatprep.subr.bf16.mxu0 %v21442_v46 }
 0x911   : > { %15395 = vmatpush3.bf16.msra.mxu0 %v15394_v38  ;;  %v19657_v38 = vsub.f32 (!%p11720_p5), %v8577_v58, %v19631_v43  ;;  %v19732_v58 = vand.u32 (!%p11720_p5), 4294901760, %v8604_v44 }
 0x912   : > { %15396 = vmatprep.subr.bf16.mxu0 %v21442_v46 }
 0x915   : > { %15398 = vmatpush3.bf16.msra.mxu0 %v15397_v42  ;;  %v19659_v42 = vand.u32 (!%p11720_p5), 4294901760, %v8583_v32 }
 0x916   : > { %15399 = vmatprep.subr.bf16.mxu0 %v21442_v46 }
 0x918   : > { %14240 = vmatmul.mubr.f32.vlgmr.msra.gmra.mrb[40].mxu0 %v19286_v1 }
 0x919   : > { %15401 = vmatpush3.bf16.msra.mxu0 %v19236_v59  ;;  %14274 = vmatprep.mubr.msk.f32.mxu0 %vm16193_vm4, %v21443_v16 }
 0x91a   : > { %15402 = vmatprep.subr.bf16.mxu0 %v21442_v46 }
 0x91d   : > { %15404 = vmatpush3.bf16.msra.mxu0 %v19247_v49 }
 0x91e   : > { %15405 = vmatprep.subr.bf16.mxu0 %v21442_v46 }
 0x921   : > { %15407 = vmatpush3.bf16.msra.mxu0 %v19259_v20 }
 0x922   : > { %15408 = vmatprep.subr.bf16.mxu0 %v21442_v46 }
 0x925   : > { %15410 = vmatpush3.bf16.msra.mxu0 %v19269_v34 }
 0x926   : > { %15411 = vmatprep.subr.bf16.mxu0 %v21442_v46 }
 0x929   : > { %15413 = vmatpush3.bf16.msra.mxu0 %v19283_v35 }
 0x92a   : > { %15414 = vmatprep.subr.bf16.mxu0 %v21442_v46 }
 0x92d   : > { %15416 = vmatpush3.bf16.msra.mxu0 %v19306_v10 }
 0x92e   : > { %15417 = vmatprep.subr.bf16.mxu0 %v21442_v46 }
 0x931   : > { %15419 = vmatpush3.bf16.msra.mxu0 %v19336_v57 }
 0x932   : > { %15420 = vmatprep.subr.bf16.mxu0 %v21442_v46 }
 0x935   : > { %15422 = vmatpush3.bf16.msra.mxu0 %v19352_v39  ;;  %v8540_v39 = vld [vmem:[%s20589_s14] sm:$0xff] (!%p11720_p5) }
 0x936   : > { %v8559_v2 = vsel (!%p11720_p5), %vm8557_vm6, %v8540_v39, 0 }
 0x937   : > { %v19574_v6 = vand.u32 (!%p11720_p5), 4294901760, %v8559_v2 }
 0x938   : > { %14275 = vmatmul.mubr.f32.vlgmr.msra.gmra.mrb[40].mxu0 %v19286_v1 }
 0x939   : > { %v19592_v12 = vsub.f32 (!%p11720_p5), %v8559_v2, %v19574_v6 }
 0x93b   : > { %v8678_v36 = vand.u32 (!%p11720_p5), 4294901760, %v19592_v12 }
 0x93d   : > { %14357 = vmatprep.mubr.f32.mxu0 (!%p11720_p5), %v8678_v36 }
 0xa0b   : > { %v8495_v16 = vpop.f32.mrb[40].mxu0 }
 0xa0c   : > { %v8499_v59 = vmul.f32 0.03125, %v8495_v16  ;;  %v14276_v49 = vpop.f32.mrb[41].mxu0  ;;  %v8586_v16 = vsel (!%p11720_p5), %vm8557_vm6, %v8549_v8, 0 }
 0xa0d   : > { %v8551_v49 = vld [vmem:[%s20589_s14 + $0x58] sm:$0xff] (!%p11720_p5) }
 0xa0e   : > { %v8500_v20 = vadd.f32 %v8499_v59, %v18786_v18  ;;  %v8556_v18 = vld [vmem:[%s21460_s27] sm:$0x7] (!%p11720_p5)  ;;  %v8589_v59 = vsel (!%p11720_p5), %vm8557_vm6, %v8550_v0, 0 }
 0xa0f   : > { %v8608_v54 = vsel (!%p11720_p5), %vm8606_vm5, %v8556_v18, 0 }
 0xa10   : > { %8501 = vadd.xlane.f32.xlu1 %v8500_v20  ;;  %v19572_v52 = vand.u32 (!%p11720_p5), 4294901760, %v8608_v54 }
 0xa12   : > { %14355 = vmatprep.subr.mxu0 (!%p11720_p5), %v19572_v52  ;;  %v19595_v7 = vsub.f32 (!%p11720_p5), %v8608_v54, %v19572_v52  ;;  %14277 = vmatprep.subr.mxu1 (!%p11720_p5), %v19572_v52 }
 0xa13   : > { %14356 = vmatpush3.msra.mxu0 (!%p11720_p5), %v19572_v52  ;;  %14278 = vmatpush3.msra.mxu1 (!%p11720_p5), %v19572_v52 }
 0xa14   : > { %v19621_v60 = vand.u32 (!%p11720_p5), 4294901760, %v19595_v7  ;;  %14358 = vmatmul.mubr.f32.vlgmr.msra.gmra.mrb[0].mxu0 (!%p11720_p5), %v8688_v13 }
 0xa15   : > { %14360 = vmatprep.mubr.f32.mxu0 (!%p11720_p5), %v8698_v5 }
 0xa16   : > { %14381 = vmatprep.subr.mxu0 (!%p11720_p5), %v19621_v60  ;;  %v8840_v23 = vsub.f32 (!%p11720_p5), %v19595_v7, %v19621_v60 }
 0xa17   : > { %14382 = vmatpush3.msra.mxu0 (!%p11720_p5), %v19621_v60 }
 0xa18   : > { %14407 = vmatprep.subr.mxu0 (!%p11720_p5), %v19572_v52  ;;  %14361 = vmatmul.mubr.f32.gmra.mrb[2].mxu0 (!%p11720_p5), %v8708_v55 }
 0xa19   : > { %14363 = vmatprep.mubr.f32.mxu0 (!%p11720_p5), %v8718_v27 }
 0xa9d   : > { %v8502_v34 = vpop.xlane.xlu1 %8501 }
 0xa9e   : > { %v8504_v35 = vmul.f32 0.0078125, %v8502_v34  ;;  %v8728_v34 = vand.u32 (!%p11720_p5), 4294901760, %v19648_v9 }
 0xaa0   : > { %v8505_v29 = vsub.f32 %v8500_v20, %v8504_v35  ;;  %v8552_v20 = vld [vmem:[%s20589_s14 + $0x60] sm:$0xff] (!%p11720_p5)  ;;  %v19674_v35 = vsub.f32 (!%p11720_p5), %v8580_v22, %v19650_v17  ;;  %14364 = vmatmul.mubr.f32.gmra.mrb[4].mxu0 (!%p11720_p5), %v8728_v34  ;;  %v19740_v22 = vsub.f32 (!%p11720_p5), %v8604_v44, %v19732_v58  ;;  %v8841_v44 = vand.u32 (!%p11720_p5), 4294901760, %v8840_v23  ;;  %v8530_v23 = vld [vmem:[%s20588_s13 + $0x30] sm:$0xff] (!%p11720_p5) }
 0xaa2   : > { %v8506_v10 = vmul.f32 %v8505_v29, %v8505_v29  ;;  %v8828_v0 = vand.u32 (!%p11720_p5), 4294901760, %v19740_v22  ;;  %14303 = vmatprep.subr.mxu1 (!%p11720_p5), %v8841_v44 }
 0xaa4   : > { %8507 = vadd.xlane.f32.xlu0 %v8506_v10  ;;  %v8738_v10 = vand.u32 (!%p11720_p5), 4294901760, %v19657_v38 }
 0xaa6   : > { %14366 = vmatprep.mubr.f32.mxu0 (!%p11720_p5), %v8738_v10 }
 0xb31   : > { %v8508_v24 = vpop.xlane.xlu0 %8507 }
 0xb32   : > { %v8509_v47 = vmul.f32 0.0078125, %v8508_v24  ;;  %v19682_v24 = vsub.f32 (!%p11720_p5), %v8583_v32, %v19659_v42 }
 0xb34   : > { %v8510_v45 = vadd.f32 1e-05, %v8509_v47  ;;  %v19684_v47 = vand.u32 (!%p11720_p5), 4294901760, %v8589_v59  ;;  %v8758_v18 = vand.u32 (!%p11720_p5), 4294901760, %v19682_v24 }
 0xb36   : > { %16145 = vrsqrt.f32 %v8510_v45  ;;  %v8592_v45 = vsel (!%p11720_p5), %vm8557_vm6, %v8551_v49, 0  ;;  %v19706_v39 = vsub.f32 (!%p11720_p5), %v8589_v59, %v19684_v47  ;;  %v8679_v59 = vsub.f32 (!%p11720_p5), %v19592_v12, %v8678_v36 }
 0xb37   : > { %v8689_v49 = vsub.f32 (!%p11720_p5), %v19598_v3, %v8688_v13  ;;  %v8709_v36 = vsub.f32 (!%p11720_p5), %v19625_v28, %v8708_v55  ;;  %v8739_v55 = vsub.f32 (!%p11720_p5), %v19657_v38, %v8738_v10 }
 0xb38   : > { %v8778_v53 = vand.u32 (!%p11720_p5), 4294901760, %v19706_v39 }
 0xb39   : > { %v8710_v13 = vand.u32 (!%p11720_p5), 4294901760, %v8709_v36 }
 0xb40   : > { %v16146_v46 = vpop.eup %16145 }
 0xb41   : > { %v8512_v51 = vmul.f32 %v16146_v46, %v8505_v29  ;;  %v19676_v29 = vand.u32 (!%p11720_p5), 4294901760, %v8586_v16  ;;  %v8595_v46 = vsel (!%p11720_p5), %vm8557_vm6, %v8552_v20, 0  ;;  %v8680_v20 = vand.u32 (!%p11720_p5), 4294901760, %v8679_v59 }
 0xb42   : > { %v19708_v33 = vand.u32 (!%p11720_p5), 4294901760, %v8595_v46 }
 0xb43   : > { %v8514_v57 = vmul.f32 0.70710677, %v8512_v51  ;;  %v8513_v41 = vmul.f32 0.5, %v8512_v51  ;;  %v8553_v51 = vld [vmem:[%s20589_s14 + $0x68] sm:$0xff] (!%p11720_p5)  ;;  %14279 = vmatprep.mubr.f32.mxu1 (!%p11720_p5), %v8680_v20 }
 0xb44   : > { %v8598_v54 = vsel (!%p11720_p5), %vm8557_vm6, %v8553_v51, 0  ;;  %v19723_v48 = vsub.f32 (!%p11720_p5), %v8595_v46, %v19708_v33  ;;  %v8690_v46 = vand.u32 (!%p11720_p5), 4294901760, %v8689_v49  ;;  %v8779_v49 = vsub.f32 (!%p11720_p5), %v19706_v39, %v8778_v53 }
 0xb45   : > { %16147 = verf.f32 %v8514_v57  ;;  %v8554_v57 = vld [vmem:[%s20589_s14 + $0x70] sm:$0xff] (!%p11720_p5)  ;;  %v19719_v4 = vand.u32 (!%p11720_p5), 4294901760, %v8598_v54 }
 0xb46   : > { %v8601_v2 = vsel (!%p11720_p5), %vm8557_vm6, %v8554_v57, 0  ;;  %v8798_v21 = vand.u32 (!%p11720_p5), 4294901760, %v19723_v48  ;;  %14280 = vmatmul.mubr.f32.vlgmr.msra.gmra.mrb[0].mxu1 (!%p11720_p5), %v8690_v46  ;;  %v8780_v20 = vand.u32 (!%p11720_p5), 4294901760, %v8779_v49 }
 0xb47   : > { %v19725_v15 = vand.u32 (!%p11720_p5), 4294901760, %v8601_v2  ;;  %v19730_v63 = vsub.f32 (!%p11720_p5), %v8598_v54, %v19719_v4  ;;  %14304 = vmatpush3.msra.mxu1 (!%p11720_p5), %v8841_v44 }
 0xb48   : > { %14329 = vmatprep.subr.mxu1 (!%p11720_p5), %v19595_v7 }
 0xb49   : > { %v19736_v62 = vsub.f32 (!%p11720_p5), %v8601_v2, %v19725_v15  ;;  %v8808_v8 = vand.u32 (!%p11720_p5), 4294901760, %v19730_v63  ;;  %v8740_v2 = vand.u32 (!%p11720_p5), 4294901760, %v8739_v55 }
 0xb4b   : > { %v8818_v32 = vand.u32 (!%p11720_p5), 4294901760, %v19736_v62 }
 0xb4e   : > { %8522 = sbr.rel (%p11720_p5) target bundleno = 3775 (0xebf), region = 100 }
 0xb4f   : > { %v16148_v1 = vpop.eup %16147 }
 0xb50   : > { %v8516_v14 = vadd.f32 1.0, %v16148_v1  ;;  %v8748_v1 = vand.u32 (!%p11720_p5), 4294901760, %v19674_v35 }
 0xb52   : > { %v19547_v25 = vmul.f32 %v8516_v14, %v8513_v41  ;;  %v19698_v41 = vsub.f32 (!%p11720_p5), %v8586_v16, %v19676_v29  ;;  %v19700_v14 = vand.u32 (!%p11720_p5), 4294901760, %v8592_v45  ;;  %14367 = vmatmul.mubr.f32.gmra.mrb[6].mxu0 (!%p11720_p5), %v8748_v1  ;;  %v8749_v54 = vsub.f32 (!%p11720_p5), %v19674_v35, %v8748_v1 }
 0xb53   : > { %14369 = vmatprep.mubr.f32.mxu0 (!%p11720_p5), %v8758_v18 }
 0xb54   : > { %8518 = vst [vmem:[#allocation2] sm:$0xff] %v19547_v25  ;;  %8523 = vst [vmem:[#allocation4] sm:$0xff] (!%p11720_p5), %v19547_v25  ;;  %v8768_v31 = vand.u32 (!%p11720_p5), 4294901760, %v19698_v41  ;;  %v19717_v30 = vsub.f32 (!%p11720_p5), %v8592_v45, %v19700_v14  ;;  %v19752_v16 = vand.u32 (!%p11720_p5), 4294901760, %v19547_v25  ;;  %v8699_v45 = vsub.f32 (!%p11720_p5), %v19605_v61, %v8698_v5 }
 0xb55   : > { %v8729_v5 = vsub.f32 %v19648_v9, %v8728_v34  ;;  %v8759_v34 = vsub.f32 %v19682_v24, %v8758_v18  ;;  %v8750_v10 = vand.u32 4294901760, %v8749_v54 }
 0xb56   : > { %14370 = vmatmul.mubr.f32.gmra.mrb[8].mxu0 %v8768_v31  ;;  %v8788_v40 = vand.u32 4294901760, %v19717_v30  ;;  %v8700_v51 = vand.u32 4294901760, %v8699_v45  ;;  %v8769_v59 = vsub.f32 %v19698_v41, %v8768_v31  ;;  %v8799_v31 = vsub.f32 %v19723_v48, %v8798_v21 }
 0xb57   : > { %14372 = vmatprep.mubr.f32.mxu0 %v8778_v53  ;;  %v8760_v1 = vand.u32 4294901760, %v8759_v34  ;;  %v19797_v45 = vsub.f32 %v19547_v25, %v19752_v16  ;;  %v8529_v34 = vld [vmem:[%s20588_s13 + $0x28] sm:$0xff] }
 0xb58   : > { %14282 = vmatprep.mubr.f32.mxu1 %v8700_v51  ;;  %v8770_v18 = vand.u32 4294901760, %v8769_v59  ;;  %v8789_v60 = vsub.f32 %v19717_v30, %v8788_v40  ;;  %v8800_v46 = vand.u32 4294901760, %v8799_v31  ;;  %v8829_v51 = vsub.f32 %v19740_v22, %v8828_v0 }
 0xb59   : > { %14283 = vmatmul.mubr.f32.gmra.mrb[2].mxu1 %v8710_v13  ;;  %v19809_v25 = vand.u32 4294901760, %v19797_v45  ;;  %v9717_v59 = vsel %vm1118_vm3, %v8529_v34, 0 }
 0xb5a   : > { %14373 = vmatmul.mubr.f32.gmra.mrb[10].mxu0 %v8788_v40  ;;  %v8790_v53 = vand.u32 4294901760, %v8789_v60  ;;  %v8809_v40 = vsub.f32 %v19730_v63, %v8808_v8  ;;  %v8531_v60 = vld [vmem:[%s20588_s13 + $0x38] sm:$0xff] }
 0xb5b   : > { %14375 = vmatprep.mubr.f32.mxu0 %v8798_v21  ;;  %v8819_v21 = vsub.f32 %v19736_v62, %v8818_v32 }
 0xb5c   : > { %v8810_v36 = vand.u32 4294901760, %v8809_v40 }
 0xb5e   : > { %14376 = vmatmul.mubr.f32.gmra.mrb[12].mxu0 %v8808_v8  ;;  %v8820_v8 = vand.u32 4294901760, %v8819_v21 }
 0xb5f   : > { %14378 = vmatprep.mubr.f32.mxu0 %v8818_v32  ;;  %v8830_v32 = vand.u32 4294901760, %v8829_v51 }
 0xb62   : > { %14379 = vmatmul.mubr.f32.gmra.mrb[14].mxu0 %v8828_v0  ;;  %v8524_v0 = vld [vmem:[%s20588_s13] sm:$0xff] }
 0xb63   : > { %14383 = vmatprep.mubr.f32.mxu0 %v19574_v6 }
 0xb66   : > { %14384 = vmatmul.mubr.f32.vlgmr.msra.gmra.mrb[0].mxu0 %v19576_v56 }
 0xb67   : > { %14408 = vmatpush3.msra.mxu0 %v19572_v52  ;;  %14386 = vmatprep.mubr.f32.mxu0 %v19585_v11  ;;  %v8719_v52 = vsub.f32 %v19629_v37, %v8718_v27  ;;  %v8730_v27 = vand.u32 4294901760, %v8729_v5  ;;  %v9702_v5 = vsel %vm1118_vm3, %v8524_v0, 0  ;;  %v8534_v0 = vld [vmem:[%s20588_s13 + $0x50] sm:$0xff] }
 0xb68   : > { %14433 = vmatprep.subr.mxu0 %v19752_v16 }
 0xb69   : > { %v8720_v57 = vand.u32 4294901760, %v8719_v52  ;;  %v9979_v52 = vsub.f32 %v19797_v45, %v19809_v25 }
 0xb6a   : > { %14387 = vmatmul.mubr.f32.gmra.mrb[2].mxu0 %v19600_v26 }
 0xb6b   : > { %14389 = vmatprep.mubr.f32.mxu0 %v19607_v50  ;;  %14285 = vmatprep.mubr.f32.mxu1 %v8720_v57  ;;  %v19820_v13 = vand.u32 4294901760, %v9979_v52  ;;  %v8525_v57 = vld [vmem:[%s20588_s13 + $0x8] sm:$0xff] }
 0xb6c   : > { %14286 = vmatmul.mubr.f32.gmra.mrb[4].mxu1 %v8730_v27  ;;  %v8528_v27 = vld [vmem:[%s20588_s13 + $0x20] sm:$0xff] }
 0xb6d   : > { %14288 = vmatprep.mubr.f32.mxu1 %v8740_v2 }
 0xb6e   : > { %14390 = vmatmul.mubr.f32.gmra.mrb[4].mxu0 %v19609_v19 }
 0xb6f   : > { %14392 = vmatprep.mubr.f32.mxu0 %v19631_v43 }
 0xb70   : > { %14289 = vmatmul.mubr.f32.gmra.mrb[6].mxu1 %v8750_v10 }
 0xb71   : > { %14291 = vmatprep.mubr.f32.mxu1 %v8760_v1  ;;  %v9720_v1 = vsel %vm1118_vm3, %v8530_v23, 0 }
 0xb72   : > { %14393 = vmatmul.mubr.f32.gmra.mrb[6].mxu0 %v19650_v17  ;;  %v19900_v31 = vand.u32 4294901760, %v9720_v1 }
 0xb73   : > { %14395 = vmatprep.mubr.f32.mxu0 %v19659_v42 }
 0xb74   : > { %14292 = vmatmul.mubr.f32.gmra.mrb[8].mxu1 %v8770_v18  ;;  %v19926_v52 = vsub.f32 %v9720_v1, %v19900_v31 }
 0xb75   : > { %14294 = vmatprep.mubr.f32.mxu1 %v8780_v20  ;;  %v8532_v20 = vld [vmem:[%s20588_s13 + $0x40] sm:$0xff] }
 0xb76   : > { %14396 = vmatmul.mubr.f32.gmra.mrb[8].mxu0 %v19676_v29  ;;  %v9726_v51 = vsel %vm1118_vm3, %v8532_v20, 0  ;;  %v20903_v34 = vand.u32 4294901760, %v19926_v52 }
 0xb77   : > { %14398 = vmatprep.mubr.f32.mxu0 %v19684_v47 }
 0xb78   : > { %14295 = vmatmul.mubr.f32.gmra.mrb[10].mxu1 %v8790_v53 }
 0xb79   : > { %14297 = vmatprep.mubr.f32.mxu1 %v8800_v46  ;;  %v9723_v46 = vsel %vm1118_vm3, %v8531_v60, 0 }
 0xb7a   : > { %14399 = vmatmul.mubr.f32.gmra.mrb[10].mxu0 %v19700_v14 }
 0xb7b   : > { %14401 = vmatprep.mubr.f32.mxu0 %v19708_v33 }
 0xb7c   : > { %14298 = vmatmul.mubr.f32.gmra.mrb[12].mxu1 %v8810_v36 }
 0xb7d   : > { %14300 = vmatprep.mubr.f32.mxu1 %v8820_v8  ;;  %v8533_v8 = vld [vmem:[%s20588_s13 + $0x48] sm:$0xff] }
 0xb7e   : > { %14402 = vmatmul.mubr.f32.gmra.mrb[12].mxu0 %v19719_v4 }
 0xb7f   : > { %14404 = vmatprep.mubr.f32.mxu0 %v19725_v15 }
 0xb80   : > { %14301 = vmatmul.mubr.f32.gmra.mrb[14].mxu1 %v8830_v32  ;;  %v19928_v32 = vand.u32 4294901760, %v9723_v46 }
 0xb81   : > { %14305 = vmatprep.mubr.f32.mxu1 %v19574_v6 }
 0xb82   : > { %14405 = vmatmul.mubr.f32.gmra.mrb[14].mxu0 %v19732_v58  ;;  %v19955_v23 = vsub.f32 %v9723_v46, %v19928_v32 }
 0xb83   : > { %14409 = vmatprep.mubr.f32.mxu0 %v19574_v6  ;;  %v8526_v6 = vld [vmem:[%s20588_s13 + $0x10] sm:$0xff] }
 0xb84   : > { %14306 = vmatmul.mubr.f32.vlgmr.msra.gmra.mrb[0].mxu1 %v19576_v56  ;;  %v9708_v55 = vsel %vm1118_vm3, %v8526_v6, 0 }
 0xb85   : > { %14308 = vmatprep.mubr.f32.mxu1 %v19585_v11  ;;  %14330 = vmatpush3.msra.mxu1 %v19595_v7  ;;  %v8527_v7 = vld [vmem:[%s20588_s13 + $0x18] sm:$0xff]  ;;  %v19864_v54 = vand.u32 4294901760, %v9708_v55 }
 0xb86   : > { %14410 = vmatmul.mubr.f32.vlgmr.msra.gmra.mrb[0].mxu0 %v19576_v56  ;;  %v19845_v56 = vand.u32 4294901760, %v9702_v5  ;;  %v9711_v2 = vsel %vm1118_vm3, %v8527_v7, 0  ;;  %v9729_v7 = vsel %vm1118_vm3, %v8533_v8, 0 }
 0xb87   : > { %14434 = vmatpush3.msra.mxu0 %v19752_v16  ;;  %14412 = vmatprep.mubr.f32.mxu0 %v19585_v11  ;;  %v9705_v11 = vsel %vm1118_vm3, %v8525_v57, 0  ;;  %v19879_v10 = vand.u32 4294901760, %v9711_v2  ;;  %v19938_v57 = vand.u32 4294901760, %v9726_v51  ;;  %v19967_v60 = vand.u32 4294901760, %v9729_v7 }
 0xb88   : > { %14459 = vmatprep.subr.mxu0 %v19820_v13  ;;  %14309 = vmatmul.mubr.f32.gmra.mrb[2].mxu1 %v19600_v26 }
 0xb89   : > { %14311 = vmatprep.mubr.f32.mxu1 %v19607_v50  ;;  %v19905_v40 = vsub.f32 %v9711_v2, %v19879_v10  ;;  %v8535_v2 = vld [vmem:[%s20588_s13 + $0x58] sm:$0xff]  ;;  %v19965_v1 = vsub.f32 %v9726_v51, %v19938_v57  ;;  %v8537_v51 = vld [vmem:[%s20588_s13 + $0x68] sm:$0xff] }
 0xb8a   : > { %14413 = vmatmul.mubr.f32.gmra.mrb[2].mxu0 %v19600_v26  ;;  %v19857_v26 = vand.u32 4294901760, %v9705_v11  ;;  %v9735_v8 = vsel %vm1118_vm3, %v8535_v2, 0 }
 0xb8b   : > { %14415 = vmatprep.mubr.f32.mxu0 %v19607_v50  ;;  %v19862_v50 = vsub.f32 %v9702_v5, %v19845_v56  ;;  %v20905_v5 = vand.u32 4294901760, %v19905_v40  ;;  %v20906_v2 = vand.u32 4294901760, %v19965_v1 }
 0xb8c   : > { %14312 = vmatmul.mubr.f32.gmra.mrb[4].mxu1 %v19609_v19  ;;  %v19877_v44 = vsub.f32 %v9705_v11, %v19857_v26 }
 0xb8d   : > { %14314 = vmatprep.mubr.f32.mxu1 %v19631_v43  ;;  %v9817_v49 = vand.u32 4294901760, %v19862_v50 }
 0xb8e   : > { %14416 = vmatmul.mubr.f32.gmra.mrb[4].mxu0 %v19609_v19  ;;  %v9714_v19 = vsel %vm1118_vm3, %v8528_v27, 0  ;;  %v9827_v53 = vand.u32 4294901760, %v19877_v44  ;;  %v9732_v27 = vsel %vm1118_vm3, %v8534_v0, 0 }
 0xb8f   : > { %14418 = vmatprep.mubr.f32.mxu0 %v19631_v43  ;;  %v19887_v43 = vsub.f32 %v9708_v55, %v19864_v54  ;;  %v19889_v18 = vand.u32 4294901760, %v9714_v19 }
 0xb90   : > { %14315 = vmatmul.mubr.f32.gmra.mrb[6].mxu1 %v19650_v17 }
 0xb91   : > { %14317 = vmatprep.mubr.f32.mxu1 %v19659_v42  ;;  %v9837_v21 = vand.u32 4294901760, %v19887_v43  ;;  %v19915_v36 = vsub.f32 %v9714_v19, %v19889_v18  ;;  %v8536_v19 = vld [vmem:[%s20588_s13 + $0x60] sm:$0xff] }
 0xb92   : > { %14419 = vmatmul.mubr.f32.gmra.mrb[6].mxu0 %v19650_v17  ;;  %v19898_v17 = vand.u32 4294901760, %v9717_v59  ;;  %v9738_v0 = vsel %vm1118_vm3, %v8536_v19, 0  ;;  %v19993_v19 = vsub.f32 %v9729_v7, %v19967_v60  ;;  %v8539_v7 = vld [vmem:[%s20588_s13 + $0x78] sm:$0xff] }
 0xb93   : > { %14421 = vmatprep.mubr.f32.mxu0 %v19659_v42  ;;  %v9818_v42 = vsub.f32 %v19862_v50, %v9817_v49  ;;  %v9838_v11 = vsub.f32 %v19887_v43, %v9837_v21  ;;  %v20902_v55 = vand.u32 4294901760, %v19915_v36 }
 0xb94   : > { %14318 = vmatmul.mubr.f32.gmra.mrb[8].mxu1 %v19676_v29 }
 0xb95   : > { %14320 = vmatprep.mubr.f32.mxu1 %v19684_v47  ;;  %v9819_v6 = vand.u32 4294901760, %v9818_v42  ;;  %v9839_v20 = vand.u32 4294901760, %v9838_v11  ;;  %v9858_v46 = vsub.f32 %v19915_v36, %v20902_v55  ;;  %v19973_v42 = vand.u32 4294901760, %v9732_v27 }
 0xb96   : > { %14422 = vmatmul.mubr.f32.gmra.mrb[8].mxu0 %v19676_v29  ;;  %v19923_v29 = vsub.f32 %v9717_v59, %v19898_v17  ;;  %v9848_v59 = vsub.f32 %v19905_v40, %v20905_v5  ;;  %v19995_v55 = vand.u32 4294901760, %v9735_v8  ;;  %v20002_v5 = vand.u32 4294901760, %v9738_v0 }
 0xb97   : > { %14424 = vmatprep.mubr.f32.mxu0 %v19684_v47  ;;  %v9828_v47 = vsub.f32 %v19877_v44, %v9827_v53 }
 0xb98   : > { %14321 = vmatmul.mubr.f32.gmra.mrb[10].mxu1 %v19700_v14  ;;  %v9849_v11 = vand.u32 4294901760, %v9848_v59 }
 0xb99   : > { %14323 = vmatprep.mubr.f32.mxu1 %v19708_v33 }
 0xb9a   : > { %14425 = vmatmul.mubr.f32.gmra.mrb[10].mxu0 %v19700_v14  ;;  %v20904_v14 = vand.u32 4294901760, %v19923_v29 }
 0xb9b   : > { %14427 = vmatprep.mubr.f32.mxu0 %v19708_v33  ;;  %v9829_v33 = vand.u32 4294901760, %v9828_v47  ;;  %v9878_v47 = vsub.f32 %v19926_v52, %v20903_v34  ;;  %v9859_v34 = vand.u32 4294901760, %v9858_v46  ;;  %v9907_v46 = vand.u32 4294901760, %v19993_v19 }
 0xb9c   : > { %14324 = vmatmul.mubr.f32.gmra.mrb[12].mxu1 %v19719_v4 }
 0xb9d   : > { %14326 = vmatprep.mubr.f32.mxu1 %v19725_v15 }
 0xb9e   : > { %14428 = vmatmul.mubr.f32.gmra.mrb[12].mxu0 %v19719_v4  ;;  %v9868_v4 = vsub.f32 %v19923_v29, %v20904_v14  ;;  %v20000_v14 = vsub.f32 %v9732_v27, %v19973_v42 }
 0xb9f   : > { %14430 = vmatprep.mubr.f32.mxu0 %v19725_v15  ;;  %v8538_v15 = vld [vmem:[%s20588_s13 + $0x70] sm:$0xff] }
 0xba0   : > { %14327 = vmatmul.mubr.f32.gmra.mrb[14].mxu1 %v19732_v58  ;;  %v9744_v59 = vsel %vm1118_vm3, %v8538_v15, 0 }
 0xba1   : > { %14331 = vmatprep.mubr.f32.mxu1 %v19592_v12  ;;  %v9917_v12 = vand.u32 4294901760, %v20000_v14 }
 0xba2   : > { %14431 = vmatmul.mubr.f32.gmra.mrb[14].mxu0 %v19732_v58  ;;  %v9869_v58 = vand.u32 4294901760, %v9868_v4  ;;  %v20026_v4 = vsub.f32 %v9738_v0, %v20002_v5 }
 0xba3   : > { %14435 = vmatprep.mubr.f32.mxu0 %v9819_v6  ;;  %v20907_v6 = vand.u32 4294901760, %v19955_v23 }
 0xba4   : > { %14332 = vmatmul.mubr.f32.vlgmr.msra.gmra.mrb[0].mxu1 %v19598_v3 }
 0xba5   : > { %v9888_v27 = vsub.f32 %v19955_v23, %v20907_v6  ;;  %14334 = vmatprep.mubr.f32.mxu1 %v19605_v61  ;;  %v9918_v61 = vsub.f32 %v20000_v14, %v9917_v12 }
 0xba6   : > { %14436 = vmatmul.mubr.f32.vlgmr.msra.gmra.mrb[0].mxu0 %v9829_v33  ;;  %v9741_v33 = vsel %vm1118_vm3, %v8537_v51, 0  ;;  %v20019_v51 = vsub.f32 %v9735_v8, %v19995_v55  ;;  %v9908_v8 = vsub.f32 %v19993_v19, %v9907_v46 }
 0xba7   : > { %14460 = vmatpush3.msra.mxu0 %v19820_v13  ;;  %14438 = vmatprep.mubr.f32.mxu0 %v9839_v20  ;;  %v9879_v13 = vand.u32 4294901760, %v9878_v47  ;;  %v9898_v20 = vsub.f32 %v19965_v1, %v20906_v2  ;;  %v20021_v15 = vand.u32 4294901760, %v9741_v33  ;;  %v20028_v47 = vand.u32 4294901760, %v9744_v59 }
 0xba8   : > { %14485 = vmatprep.subr.mxu0 %v19797_v45  ;;  %v9889_v2 = vand.u32 4294901760, %v9888_v27  ;;  %v9927_v3 = vand.u32 4294901760, %v20019_v51  ;;  %14335 = vmatmul.mubr.f32.gmra.mrb[2].mxu1 %v19625_v28 }
 0xba9   : > { %v9899_v0 = vand.u32 4294901760, %v9898_v20  ;;  %14337 = vmatprep.mubr.f32.mxu1 %v19629_v37  ;;  %v9919_v20 = vand.u32 4294901760, %v9918_v61 }
 0xbaa   : > { %14439 = vmatmul.mubr.f32.gmra.mrb[2].mxu0 %v9849_v11  ;;  %v9747_v11 = vsel %vm1118_vm3, %v8539_v7, 0  ;;  %v9937_v7 = vand.u32 4294901760, %v20026_v4  ;;  %v9928_v27 = vsub.f32 %v20019_v51, %v9927_v3 }
 0xbab   : > { %14441 = vmatprep.mubr.f32.mxu0 %v9859_v34  ;;  %v20037_v34 = vsub.f32 %v9741_v33, %v20021_v15  ;;  %v20039_v6 = vand.u32 4294901760, %v9747_v11  ;;  %v9909_v33 = vand.u32 4294901760, %v9908_v8 }
 0xbac   : > { %14338 = vmatmul.mubr.f32.gmra.mrb[4].mxu1 %v19648_v9 }
 0xbad   : > { %v9947_v28 = vand.u32 4294901760, %v20037_v34  ;;  %14340 = vmatprep.mubr.f32.mxu1 %v19657_v38 }
 0xbae   : > { %14442 = vmatmul.mubr.f32.gmra.mrb[4].mxu0 %v9869_v58  ;;  %v20047_v58 = vsub.f32 %v9744_v59, %v20028_v47  ;;  %v9938_v59 = vsub.f32 %v20026_v4, %v9937_v7 }
 0xbaf   : > { %14444 = vmatprep.mubr.f32.mxu0 %v9879_v13  ;;  %v20055_v13 = vsub.f32 %v9747_v11, %v20039_v6  ;;  %v9948_v8 = vsub.f32 %v20037_v34, %v9947_v28 }
 0xbb0   : > { %v9957_v37 = vand.u32 4294901760, %v20047_v58  ;;  %14341 = vmatmul.mubr.f32.gmra.mrb[6].mxu1 %v19674_v35  ;;  %v9939_v9 = vand.u32 4294901760, %v9938_v59  ;;  %v10850_v59 = vld [vmem:[%s20590_s15 + $0x50] sm:$0xff] }
 0xbb1   : > { %v9967_v11 = vand.u32 4294901760, %v20055_v13  ;;  %14343 = vmatprep.mubr.f32.mxu1 %v19682_v24  ;;  %v9949_v38 = vand.u32 4294901760, %v9948_v8  ;;  %v10840_v24 = vld [vmem:[%s20590_s15] sm:$0xff] }
 0xbb2   : > { %14445 = vmatmul.mubr.f32.gmra.mrb[6].mxu0 %v9889_v2  ;;  %v9929_v2 = vand.u32 4294901760, %v9928_v27  ;;  %v10848_v27 = vld [vmem:[%s20590_s15 + $0x40] sm:$0xff] }
 0xbb3   : > { %14447 = vmatprep.mubr.f32.mxu0 %v9899_v0  ;;  %v9958_v0 = vsub.f32 %v20047_v58, %v9957_v37  ;;  %v9968_v61 = vsub.f32 %v20055_v13, %v9967_v11  ;;  %v10852_v8 = vld [vmem:[%s20590_s15 + $0x60] sm:$0xff] }
 0xbb4   : > { %14344 = vmatmul.mubr.f32.gmra.mrb[8].mxu1 %v19698_v41  ;;  %v10842_v41 = vld [vmem:[%s20590_s15 + $0x10] sm:$0xff] }
 0xbb5   : > { %14346 = vmatprep.mubr.f32.mxu1 %v19706_v39  ;;  %v9969_v35 = vand.u32 4294901760, %v9968_v61  ;;  %v16197_v39 = vmov 0   ;;  %v10969_v61 = vld [vmem:[#allocation3] sm:$0x1] }
 0xbb6   : > { %14448 = vmatmul.mubr.f32.gmra.mrb[8].mxu0 %v9909_v33  ;;  %v9959_v33 = vand.u32 4294901760, %v9958_v0  ;;  %16149 = vset.pattern.permute.xlu0 %v16197_v39  ;;  %v10854_v0 = vld [vmem:[%s20590_s15 + $0x70] sm:$0xff] }
 0xbb7   : > { %14450 = vmatprep.mubr.f32.mxu0 %v9919_v20  ;;  %10858 = vperm.xlu0 %16149, %v10840_v24   ;;  %v10849_v20 = vld [vmem:[%s20590_s15 + $0x48] sm:$0xff] }
 0xbb8   : > { %14347 = vmatmul.mubr.f32.gmra.mrb[10].mxu1 %v19717_v30  ;;  %16150 = vset.pattern.permute.xlu1 %v16197_v39  ;;  %v10841_v30 = vld [vmem:[%s20590_s15 + $0x8] sm:$0xff] }
 0xbb9   : > { %14349 = vmatprep.mubr.f32.mxu1 %v19723_v48  ;;  %10868 = vperm.xlu1 %16150, %v10842_v41   ;;  %v10843_v48 = vld [vmem:[%s20590_s15 + $0x18] sm:$0xff] }
 0xbba   : > { %14451 = vmatmul.mubr.f32.gmra.mrb[10].mxu0 %v9929_v2  ;;  %v10851_v2 = vld [vmem:[%s20590_s15 + $0x58] sm:$0xff] }
 0xbbb   : > { %14453 = vmatprep.mubr.f32.mxu0 %v9939_v9  ;;  %10863 = vperm.xlu0 %16149, %v10841_v30   ;;  %v10853_v9 = vld [vmem:[%s20590_s15 + $0x68] sm:$0xff] }
 0xbbc   : > { %14350 = vmatmul.mubr.f32.gmra.mrb[12].mxu1 %v19730_v63  ;;  %v10844_v63 = vld [vmem:[%s20590_s15 + $0x20] sm:$0xff] }
 0xbbd   : > { %14352 = vmatprep.mubr.f32.mxu1 %v19736_v62  ;;  %10873 = vperm.xlu1 %16150, %v10843_v48   ;;  %v10845_v62 = vld [vmem:[%s20590_s15 + $0x28] sm:$0xff] }
 0xbbe   : > { %14454 = vmatmul.mubr.f32.gmra.mrb[12].mxu0 %v9949_v38  ;;  %v10855_v38 = vld [vmem:[%s20590_s15 + $0x78] sm:$0xff] }
 0xbbf   : > { %14456 = vmatprep.mubr.f32.mxu0 %v9959_v33  ;;  %10878 = vperm.xlu0 %16149, %v10844_v63   ;;  %v21461_v33 = vand.u32 4294901760, %v19905_v40 }
 0xbc0   : > { %14353 = vmatmul.mubr.f32.gmra.mrb[14].mxu1 %v19740_v22  ;;  %v10846_v22 = vld [vmem:[%s20590_s15 + $0x30] sm:$0xff] }
 0xbc1   : > { %10883 = vperm.xlu1 %16150, %v10845_v62  }
 0xbc2   : > { %14457 = vmatmul.mubr.f32.gmra.mrb[14].mxu0 %v9969_v35  ;;  %v21462_v35 = vand.u32 4294901760, %v19915_v36 }
 0xbc3   : > { %14461 = vmatprep.mubr.f32.mxu0 %v19845_v56  ;;  %10888 = vperm.xlu0 %16149, %v10846_v22  }
 0xbc6   : > { %14462 = vmatmul.mubr.f32.vlgmr.msra.gmra.mrb[0].mxu0 %v19857_v26 }
 0xbc7   : > { %14486 = vmatpush3.msra.mxu0 %v19797_v45  ;;  %14464 = vmatprep.mubr.f32.mxu0 %v19864_v54  ;;  %v10847_v45 = vld [vmem:[%s20590_s15 + $0x38] sm:$0xff] }
 0xbc8   : > { %14511 = vmatprep.subr.mxu0 %v19752_v16  ;;  %10893 = vperm.xlu1 %16150, %v10847_v45  }
 0xbc9   : > { %10898 = vperm.xlu0 %16149, %v10848_v27  }
 0xbca   : > { %14465 = vmatmul.mubr.f32.gmra.mrb[2].mxu0 %v19879_v10 }
 0xbcb   : > { %14467 = vmatprep.mubr.f32.mxu0 %v19889_v18 }
 0xbcc   : > { %10903 = vperm.xlu1 %16150, %v10849_v20  }
 0xbcd   : > { %10908 = vperm.xlu0 %16149, %v10850_v59  }
 0xbce   : > { %14468 = vmatmul.mubr.f32.gmra.mrb[4].mxu0 %v19898_v17 }
 0xbcf   : > { %14470 = vmatprep.mubr.f32.mxu0 %v19900_v31 }
 0xbd0   : > { %10913 = vperm.xlu1 %16150, %v10851_v2  }
 0xbd1   : > { %10918 = vperm.xlu0 %16149, %v10852_v8  }
 0xbd2   : > { %14471 = vmatmul.mubr.f32.gmra.mrb[6].mxu0 %v19928_v32 }
 0xbd3   : > { %14473 = vmatprep.mubr.f32.mxu0 %v19938_v57 }
 0xbd4   : > { %10923 = vperm.xlu1 %16150, %v10853_v9  }
 0xbd5   : > { %10928 = vperm.xlu0 %16149, %v10854_v0  }
 0xbd6   : > { %14474 = vmatmul.mubr.f32.gmra.mrb[8].mxu0 %v19967_v60 }
 0xbd7   : > { %14476 = vmatprep.mubr.f32.mxu0 %v19973_v42 }
 0xbd8   : > { %10933 = vperm.xlu1 %16150, %v10855_v38  }
 0xbd9   : > { %10972 = vperm.xlu0 %16149, %v10969_v61  }
 0xbda   : > { %14477 = vmatmul.mubr.f32.gmra.mrb[10].mxu0 %v19995_v55 }
 0xbdb   : > { %14479 = vmatprep.mubr.f32.mxu0 %v20002_v5 }
 0xbde   : > { %14480 = vmatmul.mubr.f32.gmra.mrb[12].mxu0 %v20021_v15 }
 0xbdf   : > { %14482 = vmatprep.mubr.f32.mxu0 %v20028_v47 }
 0xbe2   : > { %14483 = vmatmul.mubr.f32.gmra.mrb[14].mxu0 %v20039_v6 }
 0xbe3   : > { %14487 = vmatprep.mubr.f32.mxu0 %v19862_v50  ;;  %v21463_v50 = vand.u32 4294901760, %v19923_v29 }
 0xbe6   : > { %14488 = vmatmul.mubr.f32.vlgmr.msra.gmra.mrb[0].mxu0 %v19877_v44  ;;  %v21465_v44 = vand.u32 4294901760, %v19955_v23 }
 0xbe7   : > { %14512 = vmatpush3.msra.mxu0 %v19752_v16  ;;  %14490 = vmatprep.mubr.f32.mxu0 %v19887_v43 }
 0xbe8   : > { %14537 = vmatprep.subr.mxu0 %v19809_v25 }
 0xbea   : > { %14491 = vmatmul.mubr.f32.gmra.mrb[2].mxu0 %v19905_v40 }
 0xbeb   : > { %14493 = vmatprep.mubr.f32.mxu0 %v19915_v36 }
 0xbee   : > { %14494 = vmatmul.mubr.f32.gmra.mrb[4].mxu0 %v19923_v29 }
 0xbef   : > { %14496 = vmatprep.mubr.f32.mxu0 %v19926_v52 }
 0xbf2   : > { %14497 = vmatmul.mubr.f32.gmra.mrb[6].mxu0 %v19955_v23  ;;  %v10968_v23 = vld [vmem:[%s20591_s16] sm:$0x1] }
 0xbf3   : > { %14499 = vmatprep.mubr.f32.mxu0 %v19965_v1 }
 0xbf6   : > { %14500 = vmatmul.mubr.f32.gmra.mrb[8].mxu0 %v19993_v19 }
 0xbf7   : > { %14502 = vmatprep.mubr.f32.mxu0 %v20000_v14 }
 0xbfa   : > { %14503 = vmatmul.mubr.f32.gmra.mrb[10].mxu0 %v20019_v51 }
 0xbfb   : > { %14505 = vmatprep.mubr.f32.mxu0 %v20026_v4 }
 0xbfe   : > { %14506 = vmatmul.mubr.f32.gmra.mrb[12].mxu0 %v20037_v34 }
 0xbff   : > { %14508 = vmatprep.mubr.f32.mxu0 %v20047_v58 }
 0xc02   : > { %14509 = vmatmul.mubr.f32.gmra.mrb[14].mxu0 %v20055_v13 }
 0xc03   : > { %14513 = vmatprep.mubr.f32.mxu0 %v9817_v49  ;;  %v21464_v49 = vand.u32 4294901760, %v19926_v52 }
 0xc06   : > { %14514 = vmatmul.mubr.f32.vlgmr.msra.gmra.mrb[0].mxu0 %v9827_v53 }
 0xc07   : > { %14538 = vmatpush3.msra.mxu0 %v19809_v25  ;;  %14516 = vmatprep.mubr.f32.mxu0 %v9837_v21  ;;  %v21466_v25 = vand.u32 4294901760, %v19965_v1 }
 0xc08   : > { %14563 = vmatprep.subr.mxu0 %v19752_v16 }
 0xc0a   : > { %14517 = vmatmul.mubr.f32.gmra.mrb[2].mxu0 %v21461_v33 }
 0xc0b   : > { %14519 = vmatprep.mubr.f32.mxu0 %v21462_v35 }
 0xc0e   : > { %14520 = vmatmul.mubr.f32.gmra.mrb[4].mxu0 %v21463_v50 }
 0xc0f   : > { %14522 = vmatprep.mubr.f32.mxu0 %v21464_v49 }
 0xc12   : > { %14523 = vmatmul.mubr.f32.gmra.mrb[6].mxu0 %v21465_v44 }
 0xc13   : > { %14525 = vmatprep.mubr.f32.mxu0 %v21466_v25 }
 0xc16   : > { %14526 = vmatmul.mubr.f32.gmra.mrb[8].mxu0 %v9907_v46 }
 0xc17   : > { %14528 = vmatprep.mubr.f32.mxu0 %v9917_v12 }
 0xc1a   : > { %14529 = vmatmul.mubr.f32.gmra.mrb[10].mxu0 %v9927_v3 }
 0xc1b   : > { %14531 = vmatprep.mubr.f32.mxu0 %v9937_v7 }
 0xc1e   : > { %14532 = vmatmul.mubr.f32.gmra.mrb[12].mxu0 %v9947_v28 }
 0xc1f   : > { %14534 = vmatprep.mubr.f32.mxu0 %v9957_v37 }
 0xc22   : > { %14535 = vmatmul.mubr.f32.gmra.mrb[14].mxu0 %v9967_v11 }
 0xc23   : > { %14539 = vmatprep.mubr.f32.mxu0 %v19845_v56 }
 0xc26   : > { %14540 = vmatmul.mubr.f32.vlgmr.msra.gmra.mrb[0].mxu0 %v19857_v26 }
 0xc27   : > { %14564 = vmatpush3.msra.mxu0 %v19752_v16  ;;  %14542 = vmatprep.mubr.f32.mxu0 %v19864_v54 }
 0xc2a   : > { %14543 = vmatmul.mubr.f32.gmra.mrb[2].mxu0 %v19879_v10 }
 0xc2b   : > { %14545 = vmatprep.mubr.f32.mxu0 %v19889_v18 }
 0xc2e   : > { %14546 = vmatmul.mubr.f32.gmra.mrb[4].mxu0 %v19898_v17 }
 0xc2f   : > { %14548 = vmatprep.mubr.f32.mxu0 %v19900_v31 }
 0xc32   : > { %14549 = vmatmul.mubr.f32.gmra.mrb[6].mxu0 %v19928_v32 }
 0xc33   : > { %14551 = vmatprep.mubr.f32.mxu0 %v19938_v57 }
 0xc36   : > { %14552 = vmatmul.mubr.f32.gmra.mrb[8].mxu0 %v19967_v60  ;;  %v10859_v14 = vpop.permute.xlu0 %10858 }
 0xc37   : > { %14554 = vmatprep.mubr.f32.mxu0 %v19973_v42 }
 0xc3a   : > { %14555 = vmatmul.mubr.f32.gmra.mrb[10].mxu0 %v19995_v55 }
 0xc3b   : > { %14557 = vmatprep.mubr.f32.mxu0 %v20002_v5 }
 0xc3e   : > { %14558 = vmatmul.mubr.f32.gmra.mrb[12].mxu0 %v20021_v15 }
 0xc3f   : > { %14560 = vmatprep.mubr.f32.mxu0 %v20028_v47 }
 0xc42   : > { %14561 = vmatmul.mubr.f32.gmra.mrb[14].mxu0 %v20039_v6 }
 0xc43   : > { %14565 = vmatprep.mubr.f32.mxu0 %v19845_v56 }
 0xc46   : > { %14566 = vmatmul.mubr.f32.vlgmr.msra.gmra.mrb[0].mxu0 %v19857_v26 }
 0xc47   : > { %14568 = vmatprep.mubr.f32.mxu0 %v19864_v54 }
 0xc4a   : > { %14569 = vmatmul.mubr.f32.gmra.mrb[2].mxu0 %v19879_v10 }
 0xc4b   : > { %14571 = vmatprep.mubr.f32.mxu0 %v19889_v18 }
 0xc4e   : > { %14572 = vmatmul.mubr.f32.gmra.mrb[4].mxu0 %v19898_v17 }
 0xc4f   : > { %14574 = vmatprep.mubr.f32.mxu0 %v19900_v31 }
 0xc52   : > { %14575 = vmatmul.mubr.f32.gmra.mrb[6].mxu0 %v19928_v32 }
 0xc53   : > { %14577 = vmatprep.mubr.f32.mxu0 %v19938_v57  ;;  %v20909_v57 = vmov 0.0  }
 0xc54   : > { %14621 = vmatprep.mubr.msk.f32.mxu1 %vm16199_vm7, %v20909_v57 }
 0xc56   : > { %14578 = vmatmul.mubr.f32.gmra.mrb[8].mxu0 %v19967_v60  ;;  %v20259_v60 = vand.u32 4294901760, %v10968_v23 }
 0xc57   : > { %14580 = vmatprep.mubr.f32.mxu0 %v19973_v42  ;;  %v10864_v42 = vpop.permute.xlu0 %10863 }
 0xc5a   : > { %14581 = vmatmul.mubr.f32.gmra.mrb[10].mxu0 %v19995_v55  ;;  %v10869_v55 = vpop.permute.xlu1 %10868 }
 0xc5b   : > { %14583 = vmatprep.mubr.f32.mxu0 %v20002_v5  ;;  %v16198_v5 = vmov 0.0|0.0   ;;  %v10879_v4 = vpop.permute.xlu0 %10878 }
 0xc5c   : > { %15423 = vmatprep.subr.bf16.mxu1 %v16198_v5 }
 0xc5e   : > { %14584 = vmatmul.mubr.f32.gmra.mrb[12].mxu0 %v20021_v15  ;;  %v10874_v1 = vpop.permute.xlu1 %10873 }
 0xc5f   : > { %14586 = vmatprep.mubr.f32.mxu0 %v20028_v47  ;;  %v10889_v22 = vpop.permute.xlu0 %10888 }
 0xc62   : > { %14587 = vmatmul.mubr.f32.gmra.mrb[14].mxu0 %v20039_v6  ;;  %v20262_v6 = vsub.f32 %v10968_v23, %v20259_v60  ;;  %v10884_v19 = vpop.permute.xlu1 %10883 }
 0xc64   : > { %v20908_v3 = vand.u32 4294901760, %v20262_v6 }
 0xc66   : > { %v10894_v37 = vpop.permute.xlu1 %10893  ;;  %v20268_v30 = vsub.f32 %v20262_v6, %v20908_v3 }
 0xc6a   : > { %v10904_v50 = vpop.permute.xlu1 %10903 }
 0xc77   : > { %v14333_v16 = vpop.f32.mrb[0].mxu1 }
 0xc78   : > { %v9072_v56 = vpop.f32.mrb[1].mxu1 }
 0xc7b   : > { %v14336_v26 = vpop.f32.mrb[2].mxu1 }
 0xc7c   : > { %v9086_v54 = vpop.f32.mrb[3].mxu1 }
 0xc7f   : > { %v14339_v10 = vpop.f32.mrb[4].mxu1 }
 0xc80   : > { %v9100_v43 = vpop.f32.mrb[5].mxu1 }
 0xc83   : > { %v20233_v18 = vpop.f32.mrb[6].mxu1 }
 0xc84   : > { %v20235_v17 = vpop.f32.mrb[7].mxu1 }
 0xc87   : > { %v20237_v31 = vpop.f32.mrb[8].mxu1 }
 0xc88   : > { %v20239_v53 = vpop.f32.mrb[9].mxu1 }
 0xc8b   : > { %v20241_v40 = vpop.f32.mrb[10].mxu1 }
 0xc8c   : > { %v20243_v21 = vpop.f32.mrb[11].mxu1 }
 0xc8f   : > { %v20245_v36 = vpop.f32.mrb[12].mxu1 }
 0xc90   : > { %v20247_v29 = vpop.f32.mrb[13].mxu1 }
 0xc93   : > { %v20249_v52 = vpop.f32.mrb[14].mxu1 }
 0xc94   : > { %v20251_v32 = vpop.f32.mrb[15].mxu1 }
 0xd19   : > { %v14567_v46 = vpop.f32.mrb[0].mxu0 }
 0xd1a   : > { %v15929_v51 = vadd.f32 %v14567_v46, %v14333_v16  ;;  %v10746_v15 = vpop.f32.mrb[1].mxu0 }
 0xd1b   : > { %v15930_v12 = vadd.f32 %v10746_v15, %v9072_v56 }
 0xd1c   : > { %v10937_v47 = vadd.f32 %v15929_v51, %v10864_v42 }
 0xd1d   : > { %v10936_v34 = vadd.f32 %v15930_v12, %v10859_v14  ;;  %v14570_v7 = vpop.f32.mrb[2].mxu0 }
 0xd1e   : > { %v10953_v58 = vmax.f32 %v10937_v47, 0.0  ;;  %v15931_v28 = vadd.f32 %v14570_v7, %v14336_v26  ;;  %v10758_v13 = vpop.f32.mrb[3].mxu0 }
 0xd1f   : > { %v10952_v11 = vmax.f32 %v10936_v34, 0.0  ;;  %v15932_v24 = vadd.f32 %v10758_v13, %v9086_v54 }
 0xd20   : > { %v10983_v41 = vand.u32 4294901760, %v10953_v58  ;;  %v10939_v39 = vadd.f32 %v15931_v28, %v10874_v1 }
 0xd21   : > { %v10980_v48 = vand.u32 4294901760, %v10952_v11  ;;  %v10938_v63 = vadd.f32 %v15932_v24, %v10869_v55  ;;  %v14573_v62 = vpop.f32.mrb[4].mxu0 }
 0xd22   : > { %v20270_v45 = vsub.f32 %v10953_v58, %v10983_v41  ;;  %v10955_v27 = vmax.f32 %v10939_v39, 0.0  ;;  %v15933_v20 = vadd.f32 %v14573_v62, %v14339_v10  ;;  %v10770_v59 = vpop.f32.mrb[5].mxu0 }
 0xd23   : > { %v20272_v2 = vpack.c.bf16 %v10983_v41, %v10980_v48  ;;  %v20274_v8 = vsub.f32 %v10952_v11, %v10980_v48  ;;  %v10954_v9 = vmax.f32 %v10938_v63, 0.0  ;;  %v15934_v0 = vadd.f32 %v10770_v59, %v9100_v43 }
 0xd24   : > { %v11080_v38 = vand.u32 4294901760, %v20270_v45  ;;  %v10989_v61 = vand.u32 4294901760, %v10955_v27  ;;  %v10941_v33 = vadd.f32 %v15933_v20, %v10884_v19  ;;  %v10899_v19 = vpop.permute.xlu0 %10898 }
 0xd25   : > { %v11073_v49 = vand.u32 4294901760, %v20274_v8  ;;  %v10986_v44 = vand.u32 4294901760, %v10954_v9  ;;  %v10940_v25 = vadd.f32 %v15934_v0, %v10879_v4  ;;  %v14576_v16 = vpop.f32.mrb[6].mxu0  ;;  %15425 = vmatpush3.bf16.msra.mxu1 %v20272_v2 }
 0xd26   : > { %v11081_v26 = vsub.f32 %v20270_v45, %v11080_v38  ;;  %v20285_v54 = vsub.f32 %v10955_v27, %v10989_v61  ;;  %v10957_v10 = vmax.f32 %v10941_v33, 0.0  ;;  %v15935_v43 = vadd.f32 %v14576_v16, %v20233_v18  ;;  %v10782_v55 = vpop.f32.mrb[7].mxu0  ;;  %15426 = vmatprep.subr.bf16.mxu1 %v16198_v5 }
 0xd27   : > { %v11074_v14 = vsub.f32 %v20274_v8, %v11073_v49  ;;  %v20292_v23 = vpack.c.bf16 %v10989_v61, %v10986_v44  ;;  %v20294_v1 = vsub.f32 %v10954_v9, %v10986_v44  ;;  %v10956_v42 = vmax.f32 %v10940_v25, 0.0 }
 0xd28   : > { %v11094_v46 = vand.u32 4294901760, %v20285_v54  ;;  %v10995_v51 = vand.u32 4294901760, %v10957_v10  ;;  %v10943_v15 = vadd.f32 %v15935_v43, %v10894_v37  ;;  %v15936_v12 = vadd.f32 %v10782_v55, %v20235_v17  ;;  %v10914_v17 = vpop.permute.xlu1 %10913  ;;  %v10909_v33 = vpop.permute.xlu0 %10908 }
 0xd29   : > { %v11087_v18 = vand.u32 4294901760, %v20294_v1  ;;  %v10992_v4 = vand.u32 4294901760, %v10956_v42  ;;  %v14579_v47 = vpop.f32.mrb[8].mxu0  ;;  %15428 = vmatpush3.bf16.msra.mxu1 %v20292_v23  ;;  %v11075_v34 = vand.u32 4294901760, %v11074_v14  ;;  %v11082_v7 = vand.u32 4294901760, %v11081_v26 }
 0xd2a   : > { %v20303_v58 = vsub.f32 %v20285_v54, %v11094_v46  ;;  %v20305_v28 = vsub.f32 %v10957_v10, %v10995_v51  ;;  %v10959_v13 = vmax.f32 %v10943_v15, 0.0  ;;  %v10942_v11 = vadd.f32 %v15936_v12, %v10889_v22  ;;  %v10794_v37 = vpop.f32.mrb[9].mxu0  ;;  %15429 = vmatprep.subr.bf16.mxu1 %v16198_v5 }
 0xd2b   : > { %v11088_v24 = vsub.f32 %v20294_v1, %v11087_v18  ;;  %v20311_v41 = vpack.c.bf16 %v10995_v51, %v10992_v4  ;;  %v20313_v39 = vsub.f32 %v10956_v42, %v10992_v4  ;;  %v15937_v48 = vadd.f32 %v14579_v47, %v20237_v31 }
 0xd2c   : > { %v11108_v63 = vand.u32 4294901760, %v20305_v28  ;;  %v11001_v62 = vand.u32 4294901760, %v10959_v13  ;;  %v10958_v27 = vmax.f32 %v10942_v11, 0.0  ;;  %v15938_v22 = vadd.f32 %v10794_v37, %v20239_v53  ;;  %v10924_v51 = vpop.permute.xlu1 %10923 }
 0xd2d   : > { %v11101_v20 = vand.u32 4294901760, %v20313_v39  ;;  %v10945_v59 = vadd.f32 %v15937_v48, %v10904_v50  ;;  %v14582_v9 = vpop.f32.mrb[10].mxu0  ;;  %15431 = vmatpush3.bf16.msra.mxu1 %v20311_v41  ;;  %v20320_v0 = vpack.c.bf16 %v11082_v7, %v11075_v34  ;;  %v11089_v61 = vand.u32 4294901760, %v11088_v24 }
 0xd2e   : > { %v20325_v31 = vsub.f32 %v20305_v28, %v11108_v63  ;;  %v20327_v44 = vsub.f32 %v10959_v13, %v11001_v62  ;;  %v10998_v25 = vand.u32 4294901760, %v10958_v27  ;;  %v10944_v16 = vadd.f32 %v15938_v22, %v10899_v19  ;;  %v10806_v53 = vpop.f32.mrb[11].mxu0  ;;  %15432 = vmatprep.subr.bf16.mxu1 %v16198_v5 }
 0xd2f   : > { %v20333_v50 = vsub.f32 %v20313_v39, %v11101_v20  ;;  %v10961_v26 = vmax.f32 %v10945_v59, 0.0  ;;  %v15939_v10 = vadd.f32 %v14582_v9, %v20241_v40  ;;  %v15940_v43 = vadd.f32 %v10806_v53, %v20243_v21 }
 0xd30   : > { %v11122_v55 = vand.u32 4294901760, %v20327_v44  ;;  %v20338_v14 = vpack.c.bf16 %v11001_v62, %v10998_v25  ;;  %v20340_v42 = vsub.f32 %v10958_v27, %v10998_v25  ;;  %v10960_v19 = vmax.f32 %v10944_v16, 0.0 }
 0xd31   : > { %v11007_v15 = vand.u32 4294901760, %v10961_v26  ;;  %v10947_v12 = vadd.f32 %v15939_v10, %v10914_v17  ;;  %v10946_v4 = vadd.f32 %v15940_v43, %v10909_v33  ;;  %v14585_v47 = vpop.f32.mrb[12].mxu0  ;;  %v11096_v34 = vand.u32 4294901760, %v20303_v58  ;;  %v10919_v58 = vpop.permute.xlu0 %10918 }
 0xd32   : > { %v20346_v40 = vsub.f32 %v20327_v44, %v11122_v55  ;;  %v11115_v21 = vand.u32 4294901760, %v20340_v42  ;;  %v11004_v7 = vand.u32 4294901760, %v10960_v19  ;;  %v15941_v13 = vadd.f32 %v14585_v47, %v20245_v36  ;;  %15434 = vmatpush3.bf16.msra.mxu1 %v20338_v14  ;;  %v10818_v11 = vpop.f32.mrb[13].mxu0 }
 0xd33   : > { %v20351_v37 = vsub.f32 %v10961_v26, %v11007_v15  ;;  %v10963_v17 = vmax.f32 %v10947_v12, 0.0  ;;  %v10962_v24 = vmax.f32 %v10946_v4, 0.0  ;;  %v15942_v48 = vadd.f32 %v10818_v11, %v20247_v29  ;;  %15435 = vmatprep.subr.bf16.mxu1 %v16198_v5 }
 0xd34   : > { %v11116_v62 = vsub.f32 %v20340_v42, %v11115_v21  ;;  %v20358_v27 = vpack.c.bf16 %v11007_v15, %v11004_v7  ;;  %v20360_v22 = vsub.f32 %v10960_v19, %v11004_v7  ;;  %v10949_v36 = vadd.f32 %v15941_v13, %v10924_v51  ;;  %v10934_v15 = vpop.permute.xlu1 %10933 }
 0xd35   : > { %v20911_v59 = vand.u32 4294901760, %v20351_v37  ;;  %v11013_v9 = vand.u32 4294901760, %v10963_v17  ;;  %v11010_v33 = vand.u32 4294901760, %v10962_v24  ;;  %v10948_v25 = vadd.f32 %v15942_v48, %v10919_v58  ;;  %v14588_v16 = vpop.f32.mrb[14].mxu0  ;;  %v10929_v48 = vpop.permute.xlu0 %10928 }
 0xd36   : > { %v20912_v29 = vand.u32 4294901760, %v20360_v22  ;;  %v10965_v53 = vmax.f32 %v10949_v36, 0.0  ;;  %v15943_v26 = vadd.f32 %v14588_v16, %v20249_v52  ;;  %15437 = vmatpush3.bf16.msra.mxu1 %v20358_v27  ;;  %v10830_v10 = vpop.f32.mrb[15].mxu0  ;;  %v20366_v43 = vpack.c.bf16 %v11096_v34, %v11089_v61 }
 0xd37   : > { %v11137_v19 = vsub.f32 %v20351_v37, %v20911_v59  ;;  %v20371_v51 = vsub.f32 %v10963_v17, %v11013_v9  ;;  %v20373_v12 = vpack.c.bf16 %v11013_v9, %v11010_v33  ;;  %v20375_v4 = vsub.f32 %v10962_v24, %v11010_v33  ;;  %15438 = vmatprep.subr.bf16.mxu1 %v16198_v5 }
 0xd38   : > { %v11130_v52 = vsub.f32 %v20360_v22, %v20912_v29  ;;  %v11019_v47 = vand.u32 4294901760, %v10965_v53  ;;  %v10964_v61 = vmax.f32 %v10948_v25, 0.0  ;;  %v10951_v34 = vadd.f32 %v15943_v26, %v10934_v15 }
 0xd39   : > { %v11150_v7 = vand.u32 4294901760, %v20371_v51  ;;  %v11143_v13 = vand.u32 4294901760, %v20375_v4  ;;  %v15944_v11 = vadd.f32 %v10830_v10, %v20251_v32  ;;  %v11103_v17 = vand.u32 4294901760, %v20333_v50 }
 0xd3a   : > { %v20385_v24 = vsub.f32 %v10965_v53, %v11019_v47  ;;  %v11016_v58 = vand.u32 4294901760, %v10964_v61  ;;  %v10967_v36 = vmax.f32 %v10951_v34, 0.0  ;;  %15440 = vmatpush3.bf16.msra.mxu1 %v20373_v12  ;;  %v11110_v9 = vand.u32 4294901760, %v20325_v31 }
 0xd3b   : > { %v11151_v33 = vsub.f32 %v20371_v51, %v11150_v7  ;;  %v11144_v25 = vsub.f32 %v20375_v4, %v11143_v13  ;;  %v10950_v16 = vadd.f32 %v15944_v11, %v10929_v48  ;;  %15441 = vmatprep.subr.bf16.mxu1 %v16198_v5  ;;  %v11117_v26 = vand.u32 4294901760, %v11116_v62 }
 0xd3c   : > { %v11164_v32 = vand.u32 4294901760, %v20385_v24  ;;  %v20393_v50 = vpack.c.bf16 %v11019_v47, %v11016_v58  ;;  %v20395_v53 = vsub.f32 %v10964_v61, %v11016_v58  ;;  %v11025_v10 = vand.u32 4294901760, %v10967_v36 }
 0xd3d   : > { %v10966_v15 = vmax.f32 %v10950_v16, 0.0  ;;  %v15454_v34 = vpack.c.bf16 %v11110_v9, %v11103_v17  ;;  %v11124_v3 = vand.u32 4294901760, %v20346_v40  ;;  %v11131_v31 = vand.u32 4294901760, %v11130_v52 }
 0xd3e   : > { %v11165_v56 = vsub.f32 %v20385_v24, %v11164_v32  ;;  %v11157_v57 = vand.u32 4294901760, %v20395_v53  ;;  %v20400_v11 = vsub.f32 %v10967_v36, %v11025_v10  ;;  %15443 = vmatpush3.bf16.msra.mxu1 %v20393_v50  ;;  %v11138_v62 = vand.u32 4294901760, %v11137_v19 }
 0xd3f   : > { %v11022_v48 = vand.u32 4294901760, %v10966_v15  ;;  %15444 = vmatprep.subr.bf16.mxu1 %v16198_v5  ;;  %v15457_v47 = vpack.c.bf16 %v11124_v3, %v11117_v26  ;;  %v11145_v61 = vand.u32 4294901760, %v11144_v25  ;;  %v11152_v58 = vand.u32 4294901760, %v11151_v33 }
 0xd40   : > { %v11158_v17 = vsub.f32 %v20395_v53, %v11157_v57  ;;  %v11178_v40 = vand.u32 4294901760, %v20400_v11  ;;  %v15460_v52 = vpack.c.bf16 %v11138_v62, %v11131_v31  ;;  %v11166_v9 = vand.u32 4294901760, %v11165_v56 }
 0xd41   : > { %v20406_v16 = vpack.c.bf16 %v11025_v10, %v11022_v48  ;;  %v11170_v59 = vsub.f32 %v10966_v15, %v11022_v48  ;;  %v15463_v36 = vpack.c.bf16 %v11152_v58, %v11145_v61  ;;  %v15475_v29 = vpack.c.bf16 %v20285_v54, %v20294_v1 }
 0xd42   : > { %v11179_v19 = vsub.f32 %v20400_v11, %v11178_v40  ;;  %v11159_v35 = vand.u32 4294901760, %v11158_v17  ;;  %v15478_v3 = vpack.c.bf16 %v20305_v28, %v20313_v39  ;;  %v15481_v33 = vpack.c.bf16 %v20327_v44, %v20340_v42 }
 0xd43   : > { %v11171_v25 = vand.u32 4294901760, %v11170_v59  ;;  %15446 = vmatpush3.bf16.msra.mxu1 %v20406_v16  ;;  %v15484_v56 = vpack.c.bf16 %v20351_v37, %v20360_v22  ;;  %v15487_v26 = vpack.c.bf16 %v20371_v51, %v20375_v4  ;;  %v15490_v10 = vpack.c.bf16 %v20385_v24, %v20395_v53 }
 0xd44   : > { %15447 = vmatprep.subr.bf16.mxu1 %v16198_v5  ;;  %v15466_v15 = vpack.c.bf16 %v11166_v9, %v11159_v35  ;;  %v11180_v31 = vand.u32 4294901760, %v11179_v19  ;;  %v15493_v62 = vpack.c.bf16 %v20400_v11, %v11170_v59  ;;  %v20428_v48 = vpack.c.bf16 %v11080_v38, %v11073_v49 }
 0xd45   : > { %v11172_v61 = vsub.f32 %v11170_v59, %v11171_v25  ;;  %v20434_v51 = vpack.c.bf16 %v11094_v46, %v11087_v18  ;;  %v20440_v35 = vpack.c.bf16 %v11108_v63, %v11101_v20  ;;  %v20446_v4 = vpack.c.bf16 %v11122_v55, %v11115_v21 }
 0xd46   : > { %v21467_v38 = vand.u32 4294901760, %v20268_v30  ;;  %v21468_v49 = vand.u32 4294901760, %v20360_v22  ;;  %v21469_v54 = vand.u32 4294901760, %v20351_v37  ;;  %v20456_v46 = vpack.c.bf16 %v11150_v7, %v11143_v13 }
 0xd47   : > { %v20458_v18 = vpack.c.bf16 %v11164_v32, %v11157_v57  ;;  %v20460_v28 = vpack.c.bf16 %v11178_v40, %v11171_v25  ;;  %v11173_v39 = vand.u32 4294901760, %v11172_v61  ;;  %v21470_v63 = vmov 0.0  }
 0xd48   : > { %14622 = vmatmul.mubr.f32.vlgmr.msra.gmra.mrb[16].mxu1 %v21467_v38  ;;  %v20454_v1 = vpack.c.bf16 %v21469_v54, %v21468_v49  ;;  %v21471_v57 = vpack.c.bf16 %v20270_v45, %v20274_v8  ;;  %v21472_v45 = vand.u32 4294901760, %v20262_v6 }
 0xd49   : > { %15449 = vmatpush3.bf16.msra.mxu1 %v20320_v0  ;;  %14656 = vmatprep.mubr.msk.f32.mxu1 %vm16199_vm7, %v21470_v63  ;;  %v15469_v30 = vpack.c.bf16 %v11180_v31, %v11173_v39 }
 0xd4a   : > { %15450 = vmatprep.subr.bf16.mxu1 %v16198_v5 }
 0xd4d   : > { %15452 = vmatpush3.bf16.msra.mxu1 %v20366_v43 }
 0xd4e   : > { %15453 = vmatprep.subr.bf16.mxu1 %v16198_v5 }
 0xd51   : > { %15455 = vmatpush3.bf16.msra.mxu1 %v15454_v34 }
 0xd52   : > { %15456 = vmatprep.subr.bf16.mxu1 %v16198_v5 }
 0xd55   : > { %15458 = vmatpush3.bf16.msra.mxu1 %v15457_v47 }
 0xd56   : > { %15459 = vmatprep.subr.bf16.mxu1 %v16198_v5 }
 0xd59   : > { %15461 = vmatpush3.bf16.msra.mxu1 %v15460_v52 }
 0xd5a   : > { %15462 = vmatprep.subr.bf16.mxu1 %v16198_v5 }
 0xd5d   : > { %15464 = vmatpush3.bf16.msra.mxu1 %v15463_v36 }
 0xd5e   : > { %15465 = vmatprep.subr.bf16.mxu1 %v16198_v5 }
 0xd61   : > { %15467 = vmatpush3.bf16.msra.mxu1 %v15466_v15 }
 0xd62   : > { %15468 = vmatprep.subr.bf16.mxu1 %v16198_v5 }
 0xd65   : > { %15470 = vmatpush3.bf16.msra.mxu1 %v15469_v30 }
 0xd66   : > { %15471 = vmatprep.subr.bf16.mxu1 %v16198_v5 }
 0xd68   : > { %14657 = vmatmul.mubr.f32.vlgmr.msra.gmra.mrb[16].mxu1 %v20259_v60 }
 0xd69   : > { %15473 = vmatpush3.bf16.msra.mxu1 %v21471_v57  ;;  %14691 = vmatprep.mubr.msk.f32.mxu1 %vm16199_vm7, %v21470_v63 }
 0xd6a   : > { %15474 = vmatprep.subr.bf16.mxu1 %v16198_v5 }
 0xd6d   : > { %15476 = vmatpush3.bf16.msra.mxu1 %v15475_v29 }
 0xd6e   : > { %15477 = vmatprep.subr.bf16.mxu1 %v16198_v5 }
 0xd71   : > { %15479 = vmatpush3.bf16.msra.mxu1 %v15478_v3 }
 0xd72   : > { %15480 = vmatprep.subr.bf16.mxu1 %v16198_v5 }
 0xd75   : > { %15482 = vmatpush3.bf16.msra.mxu1 %v15481_v33 }
 0xd76   : > { %15483 = vmatprep.subr.bf16.mxu1 %v16198_v5 }
 0xd79   : > { %15485 = vmatpush3.bf16.msra.mxu1 %v15484_v56 }
 0xd7a   : > { %15486 = vmatprep.subr.bf16.mxu1 %v16198_v5 }
 0xd7d   : > { %15488 = vmatpush3.bf16.msra.mxu1 %v15487_v26 }
 0xd7e   : > { %15489 = vmatprep.subr.bf16.mxu1 %v16198_v5 }
 0xd81   : > { %15491 = vmatpush3.bf16.msra.mxu1 %v15490_v10 }
 0xd82   : > { %15492 = vmatprep.subr.bf16.mxu1 %v16198_v5 }
 0xd85   : > { %15494 = vmatpush3.bf16.msra.mxu1 %v15493_v62 }
 0xd86   : > { %15495 = vmatprep.subr.bf16.mxu1 %v16198_v5 }
 0xd88   : > { %14692 = vmatmul.mubr.f32.vlgmr.msra.gmra.mrb[16].mxu1 %v20262_v6  ;;  %v10975_v6 = vlaneseq }
 0xd89   : > { %15497 = vmatpush3.bf16.msra.mxu1 %v20272_v2  ;;  %14726 = vmatprep.mubr.msk.f32.mxu1 %vm16199_vm7, %v21470_v63 }
 0xd8a   : > { %15498 = vmatprep.subr.bf16.mxu1 %v16198_v5 }
 0xd8d   : > { %15500 = vmatpush3.bf16.msra.mxu1 %v20292_v23 }
 0xd8e   : > { %15501 = vmatprep.subr.bf16.mxu1 %v16198_v5 }
 0xd91   : > { %15503 = vmatpush3.bf16.msra.mxu1 %v20311_v41 }
 0xd92   : > { %15504 = vmatprep.subr.bf16.mxu1 %v16198_v5 }
 0xd95   : > { %15506 = vmatpush3.bf16.msra.mxu1 %v20338_v14 }
 0xd96   : > { %15507 = vmatprep.subr.bf16.mxu1 %v16198_v5 }
 0xd99   : > { %15509 = vmatpush3.bf16.msra.mxu1 %v20358_v27 }
 0xd9a   : > { %15510 = vmatprep.subr.bf16.mxu1 %v16198_v5 }
 0xd9d   : > { %15512 = vmatpush3.bf16.msra.mxu1 %v20373_v12 }
 0xd9e   : > { %15513 = vmatprep.subr.bf16.mxu1 %v16198_v5 }
 0xda1   : > { %15515 = vmatpush3.bf16.msra.mxu1 %v20393_v50 }
 0xda2   : > { %15516 = vmatprep.subr.bf16.mxu1 %v16198_v5 }
 0xda5   : > { %15518 = vmatpush3.bf16.msra.mxu1 %v20406_v16 }
 0xda6   : > { %15519 = vmatprep.subr.bf16.mxu1 %v16198_v5 }
 0xda8   : > { %14727 = vmatmul.mubr.f32.vlgmr.msra.gmra.mrb[16].mxu1 %v21472_v45 }
 0xda9   : > { %15521 = vmatpush3.bf16.msra.mxu1 %v20428_v48  ;;  %14761 = vmatprep.mubr.msk.f32.mxu1 %vm16199_vm7, %v21470_v63 }
 0xdaa   : > { %15522 = vmatprep.subr.bf16.mxu1 %v16198_v5 }
 0xdad   : > { %15524 = vmatpush3.bf16.msra.mxu1 %v20434_v51 }
 0xdae   : > { %15525 = vmatprep.subr.bf16.mxu1 %v16198_v5 }
 0xdb1   : > { %15527 = vmatpush3.bf16.msra.mxu1 %v20440_v35 }
 0xdb2   : > { %15528 = vmatprep.subr.bf16.mxu1 %v16198_v5 }
 0xdb5   : > { %15530 = vmatpush3.bf16.msra.mxu1 %v20446_v4 }
 0xdb6   : > { %15531 = vmatprep.subr.bf16.mxu1 %v16198_v5 }
 0xdb9   : > { %15533 = vmatpush3.bf16.msra.mxu1 %v20454_v1 }
 0xdba   : > { %15534 = vmatprep.subr.bf16.mxu1 %v16198_v5 }
 0xdbd   : > { %15536 = vmatpush3.bf16.msra.mxu1 %v20456_v46 }
 0xdbe   : > { %15537 = vmatprep.subr.bf16.mxu1 %v16198_v5 }
 0xdc1   : > { %15539 = vmatpush3.bf16.msra.mxu1 %v20458_v18 }
 0xdc2   : > { %15540 = vmatprep.subr.bf16.mxu1 %v16198_v5 }
 0xdc5   : > { %15542 = vmatpush3.bf16.msra.mxu1 %v20460_v28 }
 0xdc6   : > { %15543 = vmatprep.subr.bf16.mxu1 %v16198_v5 }
 0xdc8   : > { %14762 = vmatmul.mubr.f32.vlgmr.msra.gmra.mrb[16].mxu1 %v20259_v60 }
 0xdc9   : > { %15545 = vmatpush3.bf16.msra.mxu1 %v20272_v2  ;;  %14796 = vmatprep.mubr.msk.f32.mxu1 %vm16199_vm7, %v21470_v63  ;;  %v10976_v2 = vshrl.u32 %v10975_v6, 7 }
 0xdca   : > { %15546 = vmatprep.subr.bf16.mxu1 %v16198_v5 }
 0xdcb   : > { %v10977_v8 = vsub.s32 0, %v10976_v2 }
 0xdcd   : > { %15548 = vmatpush3.bf16.msra.mxu1 %v20292_v23  ;;  %v10973_v23 = vpop.permute.xlu0 %10972 }
 0xdce   : > { %15549 = vmatprep.subr.bf16.mxu1 %v16198_v5 }
 0xdd1   : > { %15551 = vmatpush3.bf16.msra.mxu1 %v20311_v41  ;;  %v10978_v41 = vrot.slane %v10973_v23, %v10977_v8 }
 0xdd2   : > { %15552 = vmatprep.subr.bf16.mxu1 %v16198_v5 }
 0xdd5   : > { %15554 = vmatpush3.bf16.msra.mxu1 %v20338_v14 }
 0xdd6   : > { %15555 = vmatprep.subr.bf16.mxu1 %v16198_v5 }
 0xdd9   : > { %15557 = vmatpush3.bf16.msra.mxu1 %v20358_v27 }
 0xdda   : > { %15558 = vmatprep.subr.bf16.mxu1 %v16198_v5 }
 0xddd   : > { %15560 = vmatpush3.bf16.msra.mxu1 %v20373_v12 }
 0xdde   : > { %15561 = vmatprep.subr.bf16.mxu1 %v16198_v5 }
 0xde1   : > { %15563 = vmatpush3.bf16.msra.mxu1 %v20393_v50 }
 0xde2   : > { %15564 = vmatprep.subr.bf16.mxu1 %v16198_v5 }
 0xde5   : > { %15566 = vmatpush3.bf16.msra.mxu1 %v20406_v16 }
 0xde8   : > { %14797 = vmatmul.mubr.f32.vlgmr.msra.gmra.mrb[16].mxu1 %v20259_v60 }
 0xebb   : > { %v11616_v20 = vpop.f32.mrb[16].mxu1 }
 0xebc   : > { %v15945_v0 = vadd.f32 %v11616_v20, %v10978_v41  ;;  %v14798_v44 = vpop.f32.mrb[17].mxu1 }
 0xebe   : > { %11620 = vst [vmem:[%s20594_s19] sm:$0x1] %v15945_v0 }
 0xebf PF: > { %p16120_p6 = scmp.eq.s32.totalorder %s16311_s21, 1  ;;  %s16201_s23 = smov [#allocation4]  }
 0xec0   : > { %s11628_s1 = sshll.u32 %s16201_s23, 4  ;;  %s11629_s1 = int_to_ptr.vmem [resolvable:$true] %s11628_s1 }
 0xec1   : > { %s16151_s25 = scalar_lea.vmem %s11629_s1, 128  ;;  %p16158_p10 = scmp.lt.s32.totalorder %s11629_s1, %s11629_s1 }
 0xec2   : > { %p16152_p7 = scmp.ne.s32.totalorder %s11629_s1, %s16151_s25  ;;  %p16159_p11 = scmp.lt.s32.totalorder %s16151_s25, %s16151_s25 }
 0xec4   : > { %p16153_p8 = pnand %p16152_p7, %p16120_p6  ;;  %p16160_p12 = por %p16159_p11, %p16158_p10 }
 0xec6   : > { %p16154_p9 = pneg %p16153_p8 }
 0xec8   : > { %p16161_p13 = pnand %p16160_p12, %p16154_p9 }
 0xeca   : > { %16164 = shalt.err (!%p16161_p13)
}
 0xecb   : > { %s16165_s26 = scalar_lea.hbm %s20593_s18, 128 }
 0xecc   : > { %p16166_p0 = scmp.ne.s32.totalorder %s20593_s18, %s16165_s26  ;;  %p16171_p3 = scmp.lt.u32.totalorder %s16165_s26, %s20593_s18 }
 0xece   : > { %p16167_p1 = pnand %p16166_p0, %p16120_p6 }
 0xed0   : > { %p16168_p2 = pneg %p16167_p1 }
 0xed2   : > { %p16173_p4 = pnand %p16171_p3, %p16168_p2 }
 0xed4   : > { %16176 = shalt.err (!%p16173_p4)
}
 0xed5   : > { %16117 = dma.vmem_to_hbm [thread:$0]  (%p16120_p6), %s11629_s1, 128, %s20593_s18, [#allocation5]  }
 0xed6   : > { %16182 = dma.done.wait (%p16120_p6), [#allocation5], 128  }
 0xed7   : > { %16184 = vsyncadd (%p16120_p6), [#allocation5], 4294967168 }
 0xed8 PF: > { %s21473_s23 = sld [smem:[#allocation7_spill]] }
 0xede   : > { %s33_s20 = sadd.s32 1, %s21473_s23  }
 0xedf   : > { %p30_p5 = scmp.ge.s32.totalorder %s33_s20, 4  }
 0xee1   :  { %32 = sbr.rel (!%p30_p5) target bundleno = 6 (0x6), region = 144 }
 0xee8   :  { %11647 = vsyncpa [#allocation5], 1 }
 0xee9   :  { %11649 = vsyncpa [#allocation5 + $0x1], 1 }

</bundles_post_ra>
